<compile_context>
chip_gen: v5e
topology: v5e:2x2
jax: 0.10.0
libtpu: 0.0.40
codegen_flags: <defaults>
</compile_context>

<pallas_src>
import functools
import numpy as np

import jax
import jax.numpy as jnp
from jax.experimental import pallas as pl
from jax.experimental.pallas import tpu as pltpu


# --------------------------------- Pallas kernel -----------------------------------
def _convlstm_cell_kernel(xp_ref, hp_ref, wx_ref, wh_ref, b_ref, c_ref, out_ref, *,
                          hidden):
    """Fused ConvLSTM cell for one M-tile.

    xp_ref: (TM, Kx)  bf16 folded im2col patches of x
    hp_ref: (TM, Kh)  bf16 folded im2col patches of h
    wx_ref: (Kx, 4H)  bf16 folded conv weight (x channel range)
    wh_ref: (Kh, 4H)  bf16 folded conv weight (h channel range)
    b_ref : (1, 4H)   f32 conv bias
    c_ref : (TM, H)   f32 previous cell state
    out_ref:(TM, 2H)  f32 packed [h_new | c_new] (lane dense)
    """
    # Single large-K MXU contraction per stream, f32 accumulation.
    g = jnp.dot(xp_ref[...], wx_ref[...], preferred_element_type=jnp.float32)
    g = g + jnp.dot(hp_ref[...], wh_ref[...], preferred_element_type=jnp.float32)
    g = g + b_ref[...]

    gf = jax.nn.sigmoid(g[:, 0 * hidden:1 * hidden])
    gi = jax.nn.sigmoid(g[:, 1 * hidden:2 * hidden])
    gg = jnp.tanh(g[:, 2 * hidden:3 * hidden])
    go = jax.nn.sigmoid(g[:, 3 * hidden:4 * hidden])

    c_new = gf * c_ref[...] + gi * gg
    h_new = go * jnp.tanh(c_new)

    # Packed lane-dense store (2H = 128 lanes for H = 64).
    out_ref[...] = jnp.concatenate([h_new, c_new], axis=-1)


# ------------------------------------ helpers --------------------------------------
def _round_up(x, m):
    return (x + m - 1) // m * m


def _pick_m_tile(m):
    """Largest candidate tile that divides M and leaves >=2 grid steps (v7x megacore)."""
    for t in (1024, 512, 256, 128, 64, 32, 16, 8):
        if t < m and m % t == 0 and m // t >= 2:
            return t
    return m


def _im2col_folded(x_nhwc, kh, kw, ph, pw):
    """(N,H,W,C) -> (N*Ho*Wo, kh*kw*C) patches, tap-major / channel-minor column order.

    Pure data-movement glue left to XLA (it fuses the pad/slice/concat); the heavy
    math (the folded-K matmul) happens inside the Pallas kernel.
    """
    n, h, w, c = x_nhwc.shape
    ho = h + 2 * ph - kh + 1
    wo = w + 2 * pw - kw + 1
    xp = jnp.pad(x_nhwc, ((0, 0), (ph, ph), (pw, pw), (0, 0)))
    cols = []
    for dy in range(kh):
        for dx in range(kw):
            cols.append(xp[:, dy:dy + ho, dx:dx + wo, :].reshape(n * ho * wo, c))
    return jnp.concatenate(cols, axis=-1), (n, ho, wo)


def _fold_weight(w_oihw):
    """torch (O, I, kh, kw) conv weight -> (kh*kw*I, O) matrix matching patch columns."""
    return jnp.transpose(w_oihw, (2, 3, 1, 0)).reshape(-1, w_oihw.shape[0])


# ------------------------------------ forward --------------------------------------
def recurrent_core_forward(w, b, x, h, c, kernel_size):
    """ConvLSTM cell forward, matching RecurrentCore.forward.

    w: (4*Ch, Cx+Ch, kh, kw)  torch Conv2d weight layout
    b: (4*Ch,)
    x: (N, Cx, H, W), h/c: (N, Ch, H, W)   (NCHW, float32)
    returns (h_new, c_new) in NCHW.
    """
    kh, kw = kernel_size
    assert kh % 2 == 1 and kw % 2 == 1, "same-padding ConvLSTM expects odd kernel"
    ph, pw = (kh - 1) // 2, (kw - 1) // 2
    n, cx = x.shape[0], x.shape[1]
    ch = h.shape[1]
    assert ch % 2 == 0
    assert w.shape == (4 * ch, cx + ch, kh, kw)

    x_nhwc = jnp.transpose(x, (0, 2, 3, 1)).astype(jnp.float32)
    h_nhwc = jnp.transpose(h, (0, 2, 3, 1)).astype(jnp.float32)
    c_nhwc = jnp.transpose(c, (0, 2, 3, 1)).astype(jnp.float32)

    xp, (_, ho, wo) = _im2col_folded(x_nhwc, kh, kw, ph, pw)
    hp, _ = _im2col_folded(h_nhwc, kh, kw, ph, pw)
    m = n * ho * wo
    assert (ho, wo) == (x.shape[2], x.shape[3])

    kx = xp.shape[1]   # kh*kw*Cx
    kc = hp.shape[1]   # kh*kw*Ch

    # Split the gate-conv contraction by channel range (x-part / h-part): no torch.cat.
    wx = _fold_weight(w[:, :cx, :, :])   # (kx, 4*Ch)
    wh = _fold_weight(w[:, cx:, :, :])   # (kc, 4*Ch)

    # Pad folded K to a multiple of 128 (zero rows/cols contribute 0) and cast to bf16.
    kx_p = _round_up(kx, 128)
    kc_p = _round_up(kc, 128)
    xp = jnp.pad(xp, ((0, 0), (0, kx_p - kx))).astype(jnp.bfloat16)
    hp = jnp.pad(hp, ((0, 0), (0, kc_p - kc))).astype(jnp.bfloat16)
    wx = jnp.pad(wx, ((0, kx_p - kx), (0, 0))).astype(jnp.bfloat16)
    wh = jnp.pad(wh, ((0, kc_p - kc), (0, 0))).astype(jnp.bfloat16)
    b2 = b.reshape(1, 4 * ch).astype(jnp.float32)
    c2 = c_nhwc.reshape(m, ch)

    tm = _pick_m_tile(m)
    grid = (m // tm,)

    out = pl.pallas_call(
        functools.partial(_convlstm_cell_kernel, hidden=ch),
        out_shape=jax.ShapeDtypeStruct((m, 2 * ch), jnp.float32),
        grid_spec=pltpu.PrefetchScalarGridSpec(
            num_scalar_prefetch=0,
            grid=grid,
            in_specs=[
                pl.BlockSpec((tm, kx_p), lambda i: (i, 0)),      # x patches (M-tiled)
                pl.BlockSpec((tm, kc_p), lambda i: (i, 0)),      # h patches (M-tiled)
                pl.BlockSpec((kx_p, 4 * ch), lambda i: (0, 0)),  # Wx, VMEM resident
                pl.BlockSpec((kc_p, 4 * ch), lambda i: (0, 0)),  # Wh, VMEM resident
                pl.BlockSpec((1, 4 * ch), lambda i: (0, 0)),     # bias
                pl.BlockSpec((tm, ch), lambda i: (i, 0)),        # c (M-tiled)
            ],
            out_specs=pl.BlockSpec((tm, 2 * ch), lambda i: (i, 0)),
        ),
        compiler_params=pltpu.CompilerParams(
            dimension_semantics=("parallel",),
        ),
    )(xp, hp, wx, wh, b2, c2)

    h_new = out[:, :ch].reshape(n, ho, wo, ch)
    c_new = out[:, ch:].reshape(n, ho, wo, ch)
    return jnp.transpose(h_new, (0, 3, 1, 2)), jnp.transpose(c_new, (0, 3, 1, 2))


# --------------------------- pure-JAX reference (correctness) -----------------------
def recurrent_core_reference(w, b, x, h, c, kernel_size):
    kh, kw = kernel_size
    ph, pw = (kh - 1) // 2, (kw - 1) // 2
    inp = jnp.concatenate([x, h], axis=1)
    gates = jax.lax.conv_general_dilated(
        inp, w, window_strides=(1, 1), padding=[(ph, ph), (pw, pw)],
        dimension_numbers=("NCHW", "OIHW", "NCHW"))
    gates = gates + b.reshape(1, -1, 1, 1)
    gf, gi, gg, go = jnp.split(gates, 4, axis=1)
    gf = jax.nn.sigmoid(gf)
    gi = jax.nn.sigmoid(gi)
    gg = jnp.tanh(gg)
    go = jax.nn.sigmoid(go)
    c_new = gf * c + gi * gg
    h_new = go * jnp.tanh(c_new)
    return h_new, c_new


# --------------------------------------- main ---------------------------------------
if __name__ == "__main__":
    # Shapes consistent with the GQN usage of RecurrentCore: 16x16 latent grid,
    # hidden_channels = 64, a modest input channel count and kernel_size = (5, 5).
    N, CX, CH, H, W = 2, 32, 64, 16, 16
    KS = (5, 5)

    root = jax.random.PRNGKey(0)
    k_w, k_b, k_x, k_h, k_c = jax.random.split(root, 5)

    fan_in = KS[0] * KS[1] * (CX + CH)
    w = jax.random.normal(k_w, (4 * CH, CX + CH, KS[0], KS[1]), jnp.float32) / np.sqrt(fan_in)
    b = 0.1 * jax.random.normal(k_b, (4 * CH,), jnp.float32)
    x = jax.random.normal(k_x, (N, CX, H, W), jnp.float32)
    h = jax.random.normal(k_h, (N, CH, H, W), jnp.float32)
    c = jax.random.normal(k_c, (N, CH, H, W), jnp.float32)

    fwd = jax.jit(functools.partial(recurrent_core_forward, kernel_size=KS))
    h_new, c_new = fwd(w, b, x, h, c)
    jax.block_until_ready((h_new, c_new))

    assert h_new.shape == (N, CH, H, W), h_new.shape
    assert c_new.shape == (N, CH, H, W), c_new.shape
    assert bool(jnp.all(jnp.isfinite(h_new))) and bool(jnp.all(jnp.isfinite(c_new)))

    # Correctness vs. a pure-JAX reference (bf16 matmul inputs, f32 accumulation).
    h_ref, c_ref = recurrent_core_reference(w, b, x, h, c, KS)
    assert bool(jnp.allclose(h_new, h_ref, atol=5e-2, rtol=5e-2)), \
        float(jnp.max(jnp.abs(h_new - h_ref)))
    assert bool(jnp.allclose(c_new, c_ref, atol=5e-2, rtol=5e-2)), \
        float(jnp.max(jnp.abs(c_new - c_ref)))

    print("KERNEL_OK")
</pallas_src>

<mosaic_0001>
module attributes {stable_mosaic.version = 11 : i64} {
  func.func @_convlstm_cell_kernel(%arg0: i32, %arg1: memref<256x896xbf16, #tpu.memory_space<vmem>>, %arg2: memref<256x1664xbf16, #tpu.memory_space<vmem>>, %arg3: memref<896x256xbf16, #tpu.memory_space<vmem>>, %arg4: memref<1664x256xbf16, #tpu.memory_space<vmem>>, %arg5: memref<1x256xf32, #tpu.memory_space<vmem>>, %arg6: memref<256x64xf32, #tpu.memory_space<vmem>>, %arg7: memref<256x128xf32, #tpu.memory_space<vmem>>) attributes {dimension_semantics = [#tpu.dimension_semantics<parallel>], iteration_bounds = array<i64: 2>, scalar_prefetch = 0 : i64, scratch_operands = 0 : i64, tpu.core_type = #tpu.core_type<tc>, window_params = [{transform_indices = @transform_0, window_bounds = array<i64: 256, 896>}, {transform_indices = @transform_1, window_bounds = array<i64: 256, 1664>}, {pipeline_mode = #tpu.pipeline_mode<synchronous>, transform_indices = @transform_2, window_bounds = array<i64: 896, 256>}, {pipeline_mode = #tpu.pipeline_mode<synchronous>, transform_indices = @transform_3, window_bounds = array<i64: 1664, 256>}, {pipeline_mode = #tpu.pipeline_mode<synchronous>, transform_indices = @transform_4, window_bounds = array<i64: 1, 256>}, {transform_indices = @transform_5, window_bounds = array<i64: 256, 64>}, {transform_indices = @transform_6, window_bounds = array<i64: 256, 128>}]} {
    %c0 = arith.constant 0 : index
    %c0_0 = arith.constant 0 : index
    %0 = vector.load %arg1[%c0, %c0_0] : memref<256x896xbf16, #tpu.memory_space<vmem>>, vector<256x896xbf16>
    %c0_1 = arith.constant 0 : index
    %c0_2 = arith.constant 0 : index
    %1 = vector.load %arg3[%c0_1, %c0_2] : memref<896x256xbf16, #tpu.memory_space<vmem>>, vector<896x256xbf16>
    %cst = arith.constant dense<0.000000e+00> : vector<256x256xf32>
    %2 = tpu.matmul %0, %1, %cst {dimension_numbers = #tpu.dot_dimension_numbers<[1], [0], [0], [1], [0, 0, 1, 1], [], []>} : vector<256x896xbf16>, vector<896x256xbf16>, vector<256x256xf32> -> vector<256x256xf32>
    %c0_3 = arith.constant 0 : index
    %c0_4 = arith.constant 0 : index
    %3 = vector.load %arg2[%c0_3, %c0_4] : memref<256x1664xbf16, #tpu.memory_space<vmem>>, vector<256x1664xbf16>
    %c0_5 = arith.constant 0 : index
    %c0_6 = arith.constant 0 : index
    %4 = vector.load %arg4[%c0_5, %c0_6] : memref<1664x256xbf16, #tpu.memory_space<vmem>>, vector<1664x256xbf16>
    %cst_7 = arith.constant dense<0.000000e+00> : vector<256x256xf32>
    %5 = tpu.matmul %3, %4, %cst_7 {dimension_numbers = #tpu.dot_dimension_numbers<[1], [0], [0], [1], [0, 0, 1, 1], [], []>} : vector<256x1664xbf16>, vector<1664x256xbf16>, vector<256x256xf32> -> vector<256x256xf32>
    %6 = arith.addf %2, %5 : vector<256x256xf32>
    %c0_8 = arith.constant 0 : index
    %c0_9 = arith.constant 0 : index
    %7 = vector.load %arg5[%c0_8, %c0_9] : memref<1x256xf32, #tpu.memory_space<vmem>>, vector<1x256xf32>
    %8 = vector.broadcast %7 : vector<1x256xf32> to vector<256x256xf32>
    %9 = arith.addf %6, %8 : vector<256x256xf32>
    %10 = vector.extract_strided_slice %9 {offsets = [0, 0], sizes = [256, 64], strides = [1, 1]} : vector<256x256xf32> to vector<256x64xf32>
    %11 = arith.negf %10 : vector<256x64xf32>
    %12 = math.exp %11 : vector<256x64xf32>
    %cst_10 = arith.constant 1.000000e+00 : f32
    %13 = vector.broadcast %cst_10 : f32 to vector<256x64xf32>
    %14 = arith.addf %13, %12 : vector<256x64xf32>
    %15 = arith.divf %13, %14 : vector<256x64xf32>
    %16 = vector.extract_strided_slice %9 {offsets = [0, 64], sizes = [256, 64], strides = [1, 1]} : vector<256x256xf32> to vector<256x64xf32>
    %17 = arith.negf %16 : vector<256x64xf32>
    %18 = math.exp %17 : vector<256x64xf32>
    %cst_11 = arith.constant 1.000000e+00 : f32
    %19 = vector.broadcast %cst_11 : f32 to vector<256x64xf32>
    %20 = arith.addf %19, %18 : vector<256x64xf32>
    %21 = arith.divf %19, %20 : vector<256x64xf32>
    %22 = vector.extract_strided_slice %9 {offsets = [0, 128], sizes = [256, 64], strides = [1, 1]} : vector<256x256xf32> to vector<256x64xf32>
    %23 = math.tanh %22 : vector<256x64xf32>
    %24 = vector.extract_strided_slice %9 {offsets = [0, 192], sizes = [256, 64], strides = [1, 1]} : vector<256x256xf32> to vector<256x64xf32>
    %25 = arith.negf %24 : vector<256x64xf32>
    %26 = math.exp %25 : vector<256x64xf32>
    %cst_12 = arith.constant 1.000000e+00 : f32
    %27 = vector.broadcast %cst_12 : f32 to vector<256x64xf32>
    %28 = arith.addf %27, %26 : vector<256x64xf32>
    %29 = arith.divf %27, %28 : vector<256x64xf32>
    %c0_13 = arith.constant 0 : index
    %c0_14 = arith.constant 0 : index
    %30 = vector.load %arg6[%c0_13, %c0_14] : memref<256x64xf32, #tpu.memory_space<vmem>>, vector<256x64xf32>
    %31 = arith.mulf %15, %30 : vector<256x64xf32>
    %32 = arith.mulf %21, %23 : vector<256x64xf32>
    %33 = arith.addf %31, %32 : vector<256x64xf32>
    %34 = math.tanh %33 : vector<256x64xf32>
    %35 = arith.mulf %29, %34 : vector<256x64xf32>
    %36 = tpu.concatenate %35, %33 in 1 : vector<256x64xf32>, vector<256x64xf32> -> vector<256x128xf32>
    %c0_15 = arith.constant 0 : index
    %c0_16 = arith.constant 0 : index
    %37 = vector.load %arg7[%c0_15, %c0_16] : memref<256x128xf32, #tpu.memory_space<vmem>>, vector<256x128xf32>
    tpu.vector_store %arg7[%c0_15, %c0_16], %36 {strides = array<i32>} : memref<256x128xf32, #tpu.memory_space<vmem>>, vector<256x128xf32>,
    return
  }
  func.func @transform_0(%arg0: i32) -> (i32, i32) {
    %c0_i32 = arith.constant 0 : i32
    %c0_i32_0 = arith.constant 0 : i32
    return %arg0, %c0_i32 : i32, i32
  }
  func.func @transform_1(%arg0: i32) -> (i32, i32) {
    %c0_i32 = arith.constant 0 : i32
    %c0_i32_0 = arith.constant 0 : i32
    return %arg0, %c0_i32 : i32, i32
  }
  func.func @transform_2(%arg0: i32) -> (i32, i32) {
    %c0_i32 = arith.constant 0 : i32
    %c0_i32_0 = arith.constant 0 : i32
    %c0_i32_1 = arith.constant 0 : i32
    return %c0_i32, %c0_i32_0 : i32, i32
  }
  func.func @transform_3(%arg0: i32) -> (i32, i32) {
    %c0_i32 = arith.constant 0 : i32
    %c0_i32_0 = arith.constant 0 : i32
    %c0_i32_1 = arith.constant 0 : i32
    return %c0_i32, %c0_i32_0 : i32, i32
  }
  func.func @transform_4(%arg0: i32) -> (i32, i32) {
    %c0_i32 = arith.constant 0 : i32
    %c0_i32_0 = arith.constant 0 : i32
    %c0_i32_1 = arith.constant 0 : i32
    return %c0_i32, %c0_i32_0 : i32, i32
  }
  func.func @transform_5(%arg0: i32) -> (i32, i32) {
    %c0_i32 = arith.constant 0 : i32
    %c0_i32_0 = arith.constant 0 : i32
    return %arg0, %c0_i32 : i32, i32
  }
  func.func @transform_6(%arg0: i32) -> (i32, i32) {
    %c0_i32 = arith.constant 0 : i32
    %c0_i32_0 = arith.constant 0 : i32
    return %arg0, %c0_i32 : i32, i32
  }
}

</mosaic_0001>

<bundles_post_ra>
// kernel: recurrent_core_forward.1
= control target key start
LH: loop header
LB: loop body
LE: loop exit
PB: predicated region body
PF: predicated region fallthrough
CT: control target
= control target key end

     0   :  { %s13782_s21 = smov 0   ;;  %s20672_s0 = inlined_call_operand.vmem [shape: bf16[512,896], index: 0, kind: input, shape index: {}]   ;;  %s20673_s1 = inlined_call_operand.vmem [shape: bf16[512,1664], index: 1, kind: input, shape index: {}]   ;;  %s20674_s2 = inlined_call_operand.vmem [shape: bf16[896,256], index: 2, kind: input, shape index: {}]   ;;  %s20675_s3 = inlined_call_operand.vmem [shape: bf16[1664,256], index: 3, kind: input, shape index: {}]   ;;  %s20676_s4 = inlined_call_operand.vmem [shape: f32[1,256], index: 4, kind: input, shape index: {}]   ;;  %s20677_s5 = inlined_call_operand.vmem [shape: f32[512,64], index: 5, kind: input, shape index: {}]   ;;  %s20678_s6 = inlined_call_operand.vmem [shape: f32[512,128], index: 6, kind: output, shape index: {}]  }
   0x1 LB: > { %s10064_s22 = sadd.s32 4294967295, %s13744_s21   ;;  %p10068_p0 = scmp.ge.s32.totalorder %s13744_s21, 1  ;;  %s13744_s21 = sphi %s13782_s21, %s16_s21  }
   0x2   : > { %p237_p1 = scmp.lt.s32.totalorder %s13744_s21, 3 }
   0x4   : > { %p238_p2 = pnand %p10068_p0, %p237_p1 }
   0x6   : > { %241 = sbr.rel (%p238_p2) target bundleno = 3222 (0xc96), region = 44 }
   0xb   : > { %v10967_v0 = vld [vmem:[%s20675_s3 + $0x70] sm:$0xf]  ;;  %v13150_v1 = vld [vmem:[%s20675_s3 + $0x74] sm:$0xf0]  ;;  %v10959_v11 = vld [vmem:[%s20675_s3 + $0x60] sm:$0xf] }
   0xc   : > { %v11031_v2 = vld [vmem:[%s20675_s3 + $0xf0] sm:$0xf]  ;;  %v10968_v3 = vor.u32 %v13150_v1, %v10967_v0  ;;  %v13166_v4 = vld [vmem:[%s20675_s3 + $0xf4] sm:$0xf0]  ;;  %v13148_v13 = vld [vmem:[%s20675_s3 + $0x64] sm:$0xf0] }
   0xd   : > { %v11095_v5 = vld [vmem:[%s20675_s3 + $0x170] sm:$0xf]  ;;  %v13182_v6 = vld [vmem:[%s20675_s3 + $0x174] sm:$0xf0]  ;;  %v11032_v7 = vor.u32 %v13166_v4, %v11031_v2  ;;  %v11023_v14 = vld [vmem:[%s20675_s3 + $0xe0] sm:$0xf]  ;;  %v10960_v16 = vor.u32 %v13148_v13, %v10959_v11 }
   0xe   : > { %v11096_v8 = vor.u32 %v13182_v6, %v11095_v5  ;;  %v11159_v9 = vld [vmem:[%s20675_s3 + $0x1f0] sm:$0xf]  ;;  %v13198_v10 = vld [vmem:[%s20675_s3 + $0x1f4] sm:$0xf0]  ;;  %3073 = vmatpush.bf16.msra.mxu0 %v10968_v3  ;;  %v13164_v15 = vld [vmem:[%s20675_s3 + $0xe4] sm:$0xf0] }
   0xf   : > { %v11160_v12 = vor.u32 %v13198_v10, %v11159_v9  ;;  %3162 = vmatpush.bf16.msra.mxu1 %v11032_v7  ;;  %v11024_v17 = vor.u32 %v13164_v15, %v11023_v14  ;;  %v11087_v18 = vld [vmem:[%s20675_s3 + $0x160] sm:$0xf]  ;;  %v13180_v19 = vld [vmem:[%s20675_s3 + $0x164] sm:$0xf0]  ;;  %v10951_v23 = vld [vmem:[%s20675_s3 + $0x50] sm:$0xf] }
  0x10   : > { %3251 = vmatpush.bf16.msra.mxu2 %v11096_v8  ;;  %v11151_v20 = vld [vmem:[%s20675_s3 + $0x1e0] sm:$0xf]  ;;  %v11088_v21 = vor.u32 %v13180_v19, %v11087_v18  ;;  %v13196_v22 = vld [vmem:[%s20675_s3 + $0x1e4] sm:$0xf0]  ;;  %v13146_v24 = vld [vmem:[%s20675_s3 + $0x54] sm:$0xf0] }
  0x11   : > { %3340 = vmatpush.bf16.msra.mxu3 %v11160_v12  ;;  %v11152_v25 = vor.u32 %v13196_v22, %v11151_v20  ;;  %v11015_v26 = vld [vmem:[%s20675_s3 + $0xd0] sm:$0xf]  ;;  %v13162_v27 = vld [vmem:[%s20675_s3 + $0xd4] sm:$0xf0]  ;;  %v10952_v29 = vor.u32 %v13146_v24, %v10951_v23  ;;  %v10943_v35 = vld [vmem:[%s20675_s3 + $0x40] sm:$0xf] }
  0x12   : > { %v11079_v28 = vld [vmem:[%s20675_s3 + $0x150] sm:$0xf]  ;;  %3074 = vmatpush.bf16.msra.mxu0 %v10960_v16  ;;  %v13178_v30 = vld [vmem:[%s20675_s3 + $0x154] sm:$0xf0]  ;;  %v11016_v33 = vor.u32 %v13162_v27, %v11015_v26  ;;  %v13144_v36 = vld [vmem:[%s20675_s3 + $0x44] sm:$0xf0] }
  0x13   : > { %v11143_v31 = vld [vmem:[%s20675_s3 + $0x1d0] sm:$0xf]  ;;  %v13194_v32 = vld [vmem:[%s20675_s3 + $0x1d4] sm:$0xf0]  ;;  %3163 = vmatpush.bf16.msra.mxu1 %v11024_v17  ;;  %v11080_v34 = vor.u32 %v13178_v30, %v11079_v28  ;;  %v11007_v37 = vld [vmem:[%s20675_s3 + $0xc0] sm:$0xf]  ;;  %v10944_v44 = vor.u32 %v13144_v36, %v10943_v35 }
  0x14   : > { %3252 = vmatpush.bf16.msra.mxu2 %v11088_v21  ;;  %v11144_v38 = vor.u32 %v13194_v32, %v11143_v31  ;;  %v13160_v39 = vld [vmem:[%s20675_s3 + $0xc4] sm:$0xf0]  ;;  %v11071_v40 = vld [vmem:[%s20675_s3 + $0x140] sm:$0xf]  ;;  %v10935_v47 = vld [vmem:[%s20675_s3 + $0x30] sm:$0xf] }
  0x15   : > { %3341 = vmatpush.bf16.msra.mxu3 %v11152_v25  ;;  %v13176_v41 = vld [vmem:[%s20675_s3 + $0x144] sm:$0xf0]  ;;  %v11135_v42 = vld [vmem:[%s20675_s3 + $0x1c0] sm:$0xf]  ;;  %v11008_v45 = vor.u32 %v13160_v39, %v11007_v37  ;;  %v13142_v48 = vld [vmem:[%s20675_s3 + $0x34] sm:$0xf0] }
  0x16   : > { %v13192_v43 = vld [vmem:[%s20675_s3 + $0x1c4] sm:$0xf0]  ;;  %3075 = vmatpush.bf16.msra.mxu0 %v10952_v29  ;;  %v11072_v46 = vor.u32 %v13176_v41, %v11071_v40  ;;  %v10999_v49 = vld [vmem:[%s20675_s3 + $0xb0] sm:$0xf]  ;;  %v13158_v51 = vld [vmem:[%s20675_s3 + $0xb4] sm:$0xf0]  ;;  %v10936_v56 = vor.u32 %v13142_v48, %v10935_v47 }
  0x17   : > { %3164 = vmatpush.bf16.msra.mxu1 %v11016_v33  ;;  %v11136_v50 = vor.u32 %v13192_v43, %v11135_v42  ;;  %v11063_v52 = vld [vmem:[%s20675_s3 + $0x130] sm:$0xf]  ;;  %v13174_v53 = vld [vmem:[%s20675_s3 + $0x134] sm:$0xf0]  ;;  %v11000_v57 = vor.u32 %v13158_v51, %v10999_v49  ;;  %v10927_v59 = vld [vmem:[%s20675_s3 + $0x20] sm:$0xf] }
  0x18   : > { %3253 = vmatpush.bf16.msra.mxu2 %v11080_v34  ;;  %v11127_v54 = vld [vmem:[%s20675_s3 + $0x1b0] sm:$0xf]  ;;  %v13190_v55 = vld [vmem:[%s20675_s3 + $0x1b4] sm:$0xf0]  ;;  %v11064_v58 = vor.u32 %v13174_v53, %v11063_v52  ;;  %v13140_v60 = vld [vmem:[%s20675_s3 + $0x24] sm:$0xf0] }
  0x19   : > { %3342 = vmatpush.bf16.msra.mxu3 %v11144_v38  ;;  %v10991_v61 = vld [vmem:[%s20675_s3 + $0xa0] sm:$0xf]  ;;  %v11128_v62 = vor.u32 %v13190_v55, %v11127_v54  ;;  %v13156_v63 = vld [vmem:[%s20675_s3 + $0xa4] sm:$0xf0]  ;;  %v10928_v4 = vor.u32 %v13140_v60, %v10927_v59  ;;  %v10919_v5 = vld [vmem:[%s20675_s3 + $0x10] sm:$0xf] }
  0x1a   : > { %3076 = vmatpush.bf16.msra.mxu0 %v10944_v44  ;;  %v11055_v0 = vld [vmem:[%s20675_s3 + $0x120] sm:$0xf]  ;;  %v13172_v1 = vld [vmem:[%s20675_s3 + $0x124] sm:$0xf0]  ;;  %v10992_v6 = vor.u32 %v13156_v63, %v10991_v61  ;;  %v13138_v8 = vld [vmem:[%s20675_s3 + $0x14] sm:$0xf0] }
  0x1b   : > { %3165 = vmatpush.bf16.msra.mxu1 %v11008_v45  ;;  %v11119_v2 = vld [vmem:[%s20675_s3 + $0x1a0] sm:$0xf]  ;;  %v13188_v3 = vld [vmem:[%s20675_s3 + $0x1a4] sm:$0xf0]  ;;  %v11056_v7 = vor.u32 %v13172_v1, %v11055_v0  ;;  %v10983_v9 = vld [vmem:[%s20675_s3 + $0x90] sm:$0xf]  ;;  %v10920_v16 = vor.u32 %v13138_v8, %v10919_v5 }
  0x1c   : > { %3254 = vmatpush.bf16.msra.mxu2 %v11072_v46  ;;  %v13154_v10 = vld [vmem:[%s20675_s3 + $0x94] sm:$0xf0]  ;;  %v11120_v11 = vor.u32 %v13188_v3, %v11119_v2  ;;  %v11047_v12 = vld [vmem:[%s20675_s3 + $0x110] sm:$0xf]  ;;  %s10069_s19 = sshll.u32 %s10064_s22, 5  ;;  %s13746_s9 = smov 64  }
  0x1d   : > { %3343 = vmatpush.bf16.msra.mxu3 %v11136_v50  ;;  %v13170_v13 = vld [vmem:[%s20675_s3 + $0x114] sm:$0xf0]  ;;  %v11111_v14 = vld [vmem:[%s20675_s3 + $0x190] sm:$0xf]  ;;  %p280_p3 = scmp.lt.s32.totalorder %s10069_s19, 63  ;;  %v10984_v20 = vor.u32 %v13154_v10, %v10983_v9 }
  0x1e   : > { %3077 = vmatpush.bf16.msra.mxu0 %v10936_v56  ;;  %v13186_v15 = vld [vmem:[%s20675_s3 + $0x194] sm:$0xf0]  ;;  %v10911_v17 = vld [vmem:[%s20675_s3] sm:$0xf]  ;;  %v13136_v18 = vld [vmem:[%s20675_s3 + $0x4] sm:$0xf0]  ;;  %v11048_v21 = vor.u32 %v13170_v13, %v11047_v12 }
  0x1f   : > { %3166 = vmatpush.bf16.msra.mxu1 %v11000_v57  ;;  %v10975_v19 = vld [vmem:[%s20675_s3 + $0x80] sm:$0xf]  ;;  %v13152_v22 = vld [vmem:[%s20675_s3 + $0x84] sm:$0xf0]  ;;  %s21768_s19 = smov (!%p280_p3, %s10069_s19), 63  ;;  %v11112_v24 = vor.u32 %v13186_v15, %v11111_v14  ;;  %v10912_v30 = vor.u32 %v13136_v18, %v10911_v17 }
  0x20   : > { %3255 = vmatpush.bf16.msra.mxu2 %v11064_v58  ;;  %v11039_v23 = vld [vmem:[%s20675_s3 + $0x100] sm:$0xf]  ;;  %v13168_v25 = vld [vmem:[%s20675_s3 + $0x104] sm:$0xf0]  ;;  %s13344_s17 = smul.u32 52, %s21768_s19  ;;  %v10976_v34 = vor.u32 %v13152_v22, %v10975_v19  ;;  %s10074_s10 = sshll.u32 %s21768_s19, 3 }
  0x21   : > { %3344 = vmatpush.bf16.msra.mxu3 %v11128_v62  ;;  %v11103_v26 = vld [vmem:[%s20675_s3 + $0x180] sm:$0xf]  ;;  %v13184_v27 = vld [vmem:[%s20675_s3 + $0x184] sm:$0xf0]  ;;  %v11351_v28 = vld [vmem:[%s20675_s3 + $0x370] sm:$0xf]  ;;  %v11040_v35 = vor.u32 %v13168_v25, %v11039_v23  ;;  %s19315_s13 = scalar_lea.vmem %s20677_s5, %s10074_s10  ;;  %s20282_s16 = scalar_lea.vmem %s20678_s6, %s10074_s10 }
  0x22   : > { %3078 = vmatpush.bf16.msra.mxu0 %v10928_v4  ;;  %v13246_v29 = vld [vmem:[%s20675_s3 + $0x374] sm:$0xf0]  ;;  %v11223_v31 = vld [vmem:[%s20675_s3 + $0x270] sm:$0xf]  ;;  %s14005_s8 = scalar_lea.vmem %s20673_s1, %s13344_s17  ;;  %v11104_v39 = vor.u32 %v13184_v27, %v11103_v26  ;;  %v11343_v56 = vld [vmem:[%s20675_s3 + $0x360] sm:$0xf] }
  0x23   : > { %3167 = vmatpush.bf16.msra.mxu1 %v10992_v6  ;;  %v11415_v32 = vld [vmem:[%s20675_s3 + $0x3f0] sm:$0xf]  ;;  %v13262_v33 = vld [vmem:[%s20675_s3 + $0x3f4] sm:$0xf0]  ;;  %v10079_v40 = vld [vmem:[%s14005_s8] sm:$0xf]  ;;  %v11352_v43 = vor.u32 %v13246_v29, %v11351_v28 }
  0x24   : > { %3256 = vmatpush.bf16.msra.mxu2 %v11056_v7  ;;  %v13214_v36 = vld [vmem:[%s20675_s3 + $0x274] sm:$0xf0]  ;;  %v11287_v37 = vld [vmem:[%s20675_s3 + $0x2f0] sm:$0xf]  ;;  %v12933_v41 = vld [vmem:[%s14005_s8 + $0x30] sm:$0xf0]  ;;  %v11416_v48 = vor.u32 %v13262_v33, %v11415_v32 }
  0x25   : > { %3345 = vmatpush.bf16.msra.mxu3 %v11120_v11  ;;  %v13230_v38 = vld [vmem:[%s20675_s3 + $0x2f4] sm:$0xf0]  ;;  %v12927_v42 = vld [vmem:[%s14005_s8 + $0x4] sm:$0xf]  ;;  %v14019_v44 = vor.u32 %v12933_v41, %v10079_v40  ;;  %v10087_v46 = vld [vmem:[%s14005_s8 + $0x8] sm:$0xf]  ;;  %v11224_v54 = vor.u32 %v13214_v36, %v11223_v31 }
  0x26   : > { %3079 = vmatpush.bf16.msra.mxu0 %v10920_v16  ;;  %v10081_v45 = vld [vmem:[%s14005_s8 + $0x34] sm:$0xf0]  ;;  %v12934_v47 = vld [vmem:[%s14005_s8 + $0x38] sm:$0xf0]  ;;  %v12928_v51 = vld [vmem:[%s14005_s8 + $0xc] sm:$0xf]  ;;  %v11288_v55 = vor.u32 %v13230_v38, %v11287_v37 }
  0x27   : > { %3168 = vmatpush.bf16.msra.mxu1 %v10984_v20  ;;  %v14024_v49 = vor.u32 %v12927_v42, %v10081_v45  ;;  %v14026_v50 = vor.u32 %v12934_v47, %v10087_v46  ;;  %v10089_v52 = vld [vmem:[%s14005_s8 + $0x3c] sm:$0xf0]  ;;  %v13244_v57 = vld [vmem:[%s20675_s3 + $0x364] sm:$0xf0]  ;;  %v12946_v5 = vld [vmem:[%s14005_s8 + $0x98] sm:$0xf0] }
  0x28   : > { %3257 = vmatpush.bf16.msra.mxu2 %v11048_v21  ;;  %v14030_v53 = vor.u32 %v12928_v51, %v10089_v52  ;;  %v11215_v58 = vld [vmem:[%s20675_s3 + $0x260] sm:$0xf]  ;;  %v11344_v59 = vor.u32 %v13244_v57, %v11343_v56  ;;  %v13212_v60 = vld [vmem:[%s20675_s3 + $0x264] sm:$0xf0]  ;;  %v12940_v6 = vld [vmem:[%s14005_s8 + $0x6c] sm:$0xf] }
  0x29   : > { %3346 = vmatpush.bf16.msra.mxu3 %v11112_v24  ;;  %v11407_v61 = vld [vmem:[%s20675_s3 + $0x3e0] sm:$0xf]  ;;  %v13260_v62 = vld [vmem:[%s20675_s3 + $0x3e4] sm:$0xf0]  ;;  %v11216_v63 = vor.u32 %v13212_v60, %v11215_v58  ;;  %v10139_v8 = vld [vmem:[%s14005_s8 + $0x70] sm:$0xf] }
  0x2a   : > { %3080 = vmatpush.bf16.msra.mxu0 %v10912_v30  ;;  %20961 = vst [vmem:[#allocation2_spill] sm:$0xff] %v14030_v53  ;;  %v11408_v0 = vor.u32 %v13260_v62, %v11407_v61  ;;  %v11279_v1 = vld [vmem:[%s20675_s3 + $0x2e0] sm:$0xf]  ;;  %v13228_v2 = vld [vmem:[%s20675_s3 + $0x2e4] sm:$0xf0]  ;;  %s13343_s15 = smul.u32 28, %s21768_s19 }
  0x2b   : > { %3169 = vmatpush.bf16.msra.mxu1 %v10976_v34  ;;  %v11280_v3 = vor.u32 %v13228_v2, %v11279_v1  ;;  %v10131_v4 = vld [vmem:[%s14005_s8 + $0x68] sm:$0xf]  ;;  %v10133_v7 = vld [vmem:[%s14005_s8 + $0x9c] sm:$0xf0]  ;;  %v12947_v9 = vld [vmem:[%s14005_s8 + $0xa0] sm:$0xf0] }
  0x2c   : > { %3258 = vmatpush.bf16.msra.mxu2 %v11040_v35  ;;  %v12941_v10 = vld [vmem:[%s14005_s8 + $0x74] sm:$0xf]  ;;  %v10141_v11 = vld [vmem:[%s14005_s8 + $0xa4] sm:$0xf0]  ;;  %v14068_v12 = vor.u32 %v12946_v5, %v10131_v4  ;;  %v14070_v13 = vor.u32 %v12940_v6, %v10133_v7  ;;  %v14072_v14 = vor.u32 %v12947_v9, %v10139_v8  ;;  %v10183_v16 = vld [vmem:[%s14005_s8 + $0xd0] sm:$0xf]  ;;  %s16946_s18 = scalar_lea.vmem %s20672_s0, %s13343_s15 }
  0x2d   : > { %3347 = vmatpush.bf16.msra.mxu3 %v11104_v39  ;;  %3081 = vmatmul.bf16.vlgmr.msra.gmra.mxu0 %v14019_v44  ;;  %v14074_v15 = vor.u32 %v12941_v10, %v10141_v11  ;;  %v12959_v17 = vld [vmem:[%s14005_s8 + $0x100] sm:$0xf0]  ;;  %v12953_v18 = vld [vmem:[%s14005_s8 + $0xd4] sm:$0xf]  ;;  %v10185_v19 = vld [vmem:[%s14005_s8 + $0x104] sm:$0xf0] }
  0x2e   : > { %3170 = vmatmul.bf16.vlgmr.msra.gmra.mxu1 %v14024_v49  ;;  %3429 = vmatpush.bf16.msrb.mxu0 %v11224_v54  ;;  %v10191_v20 = vld [vmem:[%s14005_s8 + $0xd8] sm:$0xf]  ;;  %v12960_v21 = vld [vmem:[%s14005_s8 + $0x108] sm:$0xf0]  ;;  %v12954_v22 = vld [vmem:[%s14005_s8 + $0xdc] sm:$0xf]  ;;  %v14088_v24 = vor.u32 %v12959_v17, %v10183_v16  ;;  %v14090_v25 = vor.u32 %v12953_v18, %v10185_v19 }
  0x2f   : > { %3259 = vmatmul.bf16.vlgmr.msra.gmra.mxu2 %v14026_v50  ;;  %3518 = vmatpush.bf16.msrb.mxu1 %v11288_v55  ;;  %20962 = vst [vmem:[#allocation3_spill] sm:$0xff] %v14074_v15  ;;  %v10193_v23 = vld [vmem:[%s14005_s8 + $0x10c] sm:$0xf0]  ;;  %v14092_v26 = vor.u32 %v12960_v21, %v10191_v20  ;;  %v13242_v29 = vld [vmem:[%s20675_s3 + $0x354] sm:$0xf0] }
  0x30   : > { %3607 = vmatpush.bf16.msrb.mxu2 %v11352_v43  ;;  %3348 = vmatmul.bf16.vlgmr.msra.gmra.mxu3 %v14030_v53  ;;  %v14094_v27 = vor.u32 %v12954_v22, %v10193_v23  ;;  %v11335_v28 = vld [vmem:[%s20675_s3 + $0x350] sm:$0xf]  ;;  %v13210_v32 = vld [vmem:[%s20675_s3 + $0x254] sm:$0xf0]  ;;  %v12972_v41 = vld [vmem:[%s14005_s8 + $0x168] sm:$0xf0] }
  0x31   : > { %3696 = vmatpush.bf16.msrb.mxu3 %v11416_v48  ;;  %v11207_v30 = vld [vmem:[%s20675_s3 + $0x250] sm:$0xf]  ;;  %v11336_v31 = vor.u32 %v13242_v29, %v11335_v28  ;;  %v13258_v34 = vld [vmem:[%s20675_s3 + $0x3d4] sm:$0xf0]  ;;  %v12966_v42 = vld [vmem:[%s14005_s8 + $0x13c] sm:$0xf] }
  0x32   : > { %3430 = vmatpush.bf16.msrb.mxu0 %v11216_v63  ;;  %20963 = vst [vmem:[#allocation4_spill] sm:$0xff] %v14094_v27  ;;  %v11399_v33 = vld [vmem:[%s20675_s3 + $0x3d0] sm:$0xf]  ;;  %v11208_v35 = vor.u32 %v13210_v32, %v11207_v30  ;;  %v13226_v38 = vld [vmem:[%s20675_s3 + $0x2d4] sm:$0xf0] }
  0x33   : > { %3519 = vmatpush.bf16.msrb.mxu1 %v11280_v3  ;;  %v11400_v36 = vor.u32 %v13258_v34, %v11399_v33  ;;  %v11271_v37 = vld [vmem:[%s20675_s3 + $0x2d0] sm:$0xf]  ;;  %v10235_v40 = vld [vmem:[%s14005_s8 + $0x138] sm:$0xf]  ;;  %v10243_v45 = vld [vmem:[%s14005_s8 + $0x140] sm:$0xf] }
  0x34   : > { %3608 = vmatpush.bf16.msrb.mxu2 %v11344_v59  ;;  %v11272_v39 = vor.u32 %v13226_v38, %v11271_v37  ;;  %v10237_v43 = vld [vmem:[%s14005_s8 + $0x16c] sm:$0xf0]  ;;  %v12973_v46 = vld [vmem:[%s14005_s8 + $0x170] sm:$0xf0]  ;;  %v12967_v47 = vld [vmem:[%s14005_s8 + $0x144] sm:$0xf]  ;;  %v14132_v51 = vor.u32 %v12972_v41, %v10235_v40 }
  0x35   : > { %3697 = vmatpush.bf16.msrb.mxu3 %v11408_v0  ;;  %v10245_v48 = vld [vmem:[%s14005_s8 + $0x174] sm:$0xf0]  ;;  %v14134_v52 = vor.u32 %v12966_v42, %v10237_v43  ;;  %v14136_v54 = vor.u32 %v12973_v46, %v10243_v45  ;;  %v10287_v56 = vld [vmem:[%s14005_s8 + $0x1a0] sm:$0xf]  ;;  %v12985_v57 = vld [vmem:[%s14005_s8 + $0x1d0] sm:$0xf0] }
  0x36   : > { %3431 = vmatpush.bf16.msrb.mxu0 %v11208_v35  ;;  %v14138_v55 = vor.u32 %v12967_v47, %v10245_v48  ;;  %v12979_v58 = vld [vmem:[%s14005_s8 + $0x1a4] sm:$0xf]  ;;  %v10289_v59 = vld [vmem:[%s14005_s8 + $0x1d4] sm:$0xf0]  ;;  %v10295_v60 = vld [vmem:[%s14005_s8 + $0x1a8] sm:$0xf]  ;;  %v14152_v0 = vor.u32 %v12985_v57, %v10287_v56 }
  0x37   : > { %3520 = vmatpush.bf16.msrb.mxu1 %v11272_v39  ;;  %v12986_v61 = vld [vmem:[%s14005_s8 + $0x1d8] sm:$0xf0]  ;;  %v12980_v62 = vld [vmem:[%s14005_s8 + $0x1ac] sm:$0xf]  ;;  %v10297_v63 = vld [vmem:[%s14005_s8 + $0x1dc] sm:$0xf0]  ;;  %v14154_v1 = vor.u32 %v12979_v58, %v10289_v59 }
  0x38   : > { %3609 = vmatpush.bf16.msrb.mxu2 %v11336_v31  ;;  %20964 = vst [vmem:[#allocation5_spill] sm:$0xff] %v14138_v55  ;;  %v14156_v2 = vor.u32 %v12986_v61, %v10295_v60  ;;  %v14158_v3 = vor.u32 %v12980_v62, %v10297_v63  ;;  %v11327_v4 = vld [vmem:[%s20675_s3 + $0x340] sm:$0xf]  ;;  %v13240_v5 = vld [vmem:[%s20675_s3 + $0x344] sm:$0xf0] }
  0x39   : > { %3698 = vmatpush.bf16.msrb.mxu3 %v11400_v36  ;;  %20965 = vst [vmem:[#allocation6_spill] sm:$0xff] %v14152_v0  ;;  %v11199_v6 = vld [vmem:[%s20675_s3 + $0x240] sm:$0xf]  ;;  %v11328_v7 = vor.u32 %v13240_v5, %v11327_v4  ;;  %v13208_v8 = vld [vmem:[%s20675_s3 + $0x244] sm:$0xf0] }
  0x3a   : > { %20966 = vst [vmem:[#allocation7_spill] sm:$0xff] %v14154_v1  ;;  %v11391_v9 = vld [vmem:[%s20675_s3 + $0x3c0] sm:$0xf]  ;;  %v13256_v10 = vld [vmem:[%s20675_s3 + $0x3c4] sm:$0xf0]  ;;  %v11200_v11 = vor.u32 %v13208_v8, %v11199_v6 }
  0x3b   : > { %20967 = vst [vmem:[#allocation8_spill] sm:$0xff] %v14156_v2  ;;  %v11392_v16 = vor.u32 %v13256_v10, %v11391_v9  ;;  %v11263_v17 = vld [vmem:[%s20675_s3 + $0x2c0] sm:$0xf]  ;;  %v13224_v18 = vld [vmem:[%s20675_s3 + $0x2c4] sm:$0xf0] }
  0x3c   : > { %20968 = vst [vmem:[#allocation9_spill] sm:$0xff] %v14158_v3  ;;  %3610 = vmatpush.bf16.msrb.mxu2 %v11328_v7  ;;  %v11264_v19 = vor.u32 %v13224_v18, %v11263_v17  ;;  %3432 = vmatpush.bf16.msrb.mxu0 %v11200_v11  ;;  %v10339_v20 = vld [vmem:[%s14005_s8 + $0x208] sm:$0xf]  ;;  %v12998_v21 = vld [vmem:[%s14005_s8 + $0x238] sm:$0xf0] }
  0x3d   : > { %3086 = vmatmul.bf16.gmra.mxu0 %v14068_v12  ;;  %3699 = vmatpush.bf16.msrb.mxu3 %v11392_v16  ;;  %v12992_v22 = vld [vmem:[%s14005_s8 + $0x20c] sm:$0xf]  ;;  %v10341_v23 = vld [vmem:[%s14005_s8 + $0x23c] sm:$0xf0]  ;;  %v10347_v28 = vld [vmem:[%s14005_s8 + $0x210] sm:$0xf]  ;;  %v14196_v32 = vor.u32 %v12998_v21, %v10339_v20 }
  0x3e   : > { %3175 = vmatmul.bf16.gmra.mxu1 %v14070_v13  ;;  %v12999_v29 = vld [vmem:[%s14005_s8 + $0x240] sm:$0xf0]  ;;  %v12993_v30 = vld [vmem:[%s14005_s8 + $0x214] sm:$0xf]  ;;  %v10349_v31 = vld [vmem:[%s14005_s8 + $0x244] sm:$0xf0]  ;;  %v14198_v33 = vor.u32 %v12992_v22, %v10341_v23 }
  0x3f   : > { %3264 = vmatmul.bf16.gmra.mxu2 %v14072_v14  ;;  %3521 = vmatpush.bf16.msrb.mxu1 %v11264_v19  ;;  %20969 = vst [vmem:[#allocation10_spill] sm:$0xff] %v14196_v32  ;;  %v14200_v34 = vor.u32 %v12999_v29, %v10347_v28  ;;  %v14202_v35 = vor.u32 %v12993_v30, %v10349_v31  ;;  %v10391_v36 = vld [vmem:[%s14005_s8 + $0x270] sm:$0xf]  ;;  %v13011_v37 = vld [vmem:[%s14005_s8 + $0x2a0] sm:$0xf0] }
  0x40   : > { %3353 = vmatmul.bf16.gmra.mxu3 %v14074_v15  ;;  %20970 = vst [vmem:[#allocation11_spill] sm:$0xff] %v14198_v33  ;;  %v13005_v38 = vld [vmem:[%s14005_s8 + $0x274] sm:$0xf]  ;;  %v10393_v39 = vld [vmem:[%s14005_s8 + $0x2a4] sm:$0xf0]  ;;  %v14216_v45 = vor.u32 %v13011_v37, %v10391_v36 }
  0x41   : > { %20971 = vst [vmem:[#allocation12_spill] sm:$0xff] %v14200_v34  ;;  %v10399_v40 = vld [vmem:[%s14005_s8 + $0x278] sm:$0xf]  ;;  %v13012_v41 = vld [vmem:[%s14005_s8 + $0x2a8] sm:$0xf0]  ;;  %v14218_v46 = vor.u32 %v13005_v38, %v10393_v39 }
  0x42   : > { %20972 = vst [vmem:[#allocation13_spill] sm:$0xff] %v14202_v35  ;;  %v13006_v42 = vld [vmem:[%s14005_s8 + $0x27c] sm:$0xf]  ;;  %v10401_v43 = vld [vmem:[%s14005_s8 + $0x2ac] sm:$0xf0]  ;;  %v14220_v47 = vor.u32 %v13012_v41, %v10399_v40 }
  0x43   : > { %20973 = vst [vmem:[#allocation14_spill] sm:$0xff] %v14216_v45  ;;  %v14222_v48 = vor.u32 %v13006_v42, %v10401_v43  ;;  %v11319_v56 = vld [vmem:[%s20675_s3 + $0x330] sm:$0xf]  ;;  %v13238_v57 = vld [vmem:[%s20675_s3 + $0x334] sm:$0xf0] }
  0x44   : > { %20974 = vst [vmem:[#allocation15_spill] sm:$0xff] %v14218_v46  ;;  %v11191_v58 = vld [vmem:[%s20675_s3 + $0x230] sm:$0xf]  ;;  %v11320_v59 = vor.u32 %v13238_v57, %v11319_v56  ;;  %v13206_v60 = vld [vmem:[%s20675_s3 + $0x234] sm:$0xf0] }
  0x45   : > { %20975 = vst [vmem:[#allocation16_spill] sm:$0xff] %v14220_v47  ;;  %v11383_v61 = vld [vmem:[%s20675_s3 + $0x3b0] sm:$0xf]  ;;  %v13254_v62 = vld [vmem:[%s20675_s3 + $0x3b4] sm:$0xf0]  ;;  %v11192_v63 = vor.u32 %v13206_v60, %v11191_v58 }
  0x46   : > { %20976 = vst [vmem:[#allocation17_spill] sm:$0xff] %v14222_v48  ;;  %v11384_v4 = vor.u32 %v13254_v62, %v11383_v61  ;;  %3611 = vmatpush.bf16.msrb.mxu2 %v11320_v59  ;;  %v11255_v5 = vld [vmem:[%s20675_s3 + $0x2b0] sm:$0xf]  ;;  %v13222_v6 = vld [vmem:[%s20675_s3 + $0x2b4] sm:$0xf0] }
  0x47   : > { %3433 = vmatpush.bf16.msrb.mxu0 %v11192_v63  ;;  %v11256_v7 = vor.u32 %v13222_v6, %v11255_v5  ;;  %v10443_v8 = vld [vmem:[%s14005_s8 + $0x2d8] sm:$0xf]  ;;  %v13024_v9 = vld [vmem:[%s14005_s8 + $0x308] sm:$0xf0]  ;;  %v13018_v10 = vld [vmem:[%s14005_s8 + $0x2dc] sm:$0xf] }
  0x48   : > { %3700 = vmatpush.bf16.msrb.mxu3 %v11384_v4  ;;  %v10445_v11 = vld [vmem:[%s14005_s8 + $0x30c] sm:$0xf0]  ;;  %v10451_v16 = vld [vmem:[%s14005_s8 + $0x2e0] sm:$0xf]  ;;  %v13025_v17 = vld [vmem:[%s14005_s8 + $0x310] sm:$0xf0]  ;;  %v14260_v20 = vor.u32 %v13024_v9, %v10443_v8 }
  0x49   : > { %3522 = vmatpush.bf16.msrb.mxu1 %v11256_v7  ;;  %v13019_v18 = vld [vmem:[%s14005_s8 + $0x2e4] sm:$0xf]  ;;  %v10453_v19 = vld [vmem:[%s14005_s8 + $0x314] sm:$0xf0]  ;;  %v14262_v21 = vor.u32 %v13018_v10, %v10445_v11  ;;  %v14264_v22 = vor.u32 %v13025_v17, %v10451_v16  ;;  %v10495_v28 = vld [vmem:[%s14005_s8 + $0x340] sm:$0xf] }
  0x4a   : > { %20977 = vst [vmem:[#allocation18_spill] sm:$0xff] %v14260_v20  ;;  %v14266_v23 = vor.u32 %v13019_v18, %v10453_v19  ;;  %v13037_v29 = vld [vmem:[%s14005_s8 + $0x370] sm:$0xf0]  ;;  %v13031_v30 = vld [vmem:[%s14005_s8 + $0x344] sm:$0xf] }
  0x4b   : > { %20978 = vst [vmem:[#allocation19_spill] sm:$0xff] %v14262_v21  ;;  %v10497_v31 = vld [vmem:[%s14005_s8 + $0x374] sm:$0xf0]  ;;  %v10503_v36 = vld [vmem:[%s14005_s8 + $0x348] sm:$0xf]  ;;  %v14280_v40 = vor.u32 %v13037_v29, %v10495_v28 }
  0x4c   : > { %20979 = vst [vmem:[#allocation20_spill] sm:$0xff] %v14264_v22  ;;  %v13038_v37 = vld [vmem:[%s14005_s8 + $0x378] sm:$0xf0]  ;;  %v13032_v38 = vld [vmem:[%s14005_s8 + $0x34c] sm:$0xf]  ;;  %v14282_v42 = vor.u32 %v13031_v30, %v10497_v31 }
  0x4d   : > { %3091 = vmatmul.bf16.gmra.mxu0 %v14088_v24  ;;  %20980 = vst [vmem:[#allocation21_spill] sm:$0xff] %v14266_v23  ;;  %v10505_v39 = vld [vmem:[%s14005_s8 + $0x37c] sm:$0xf0]  ;;  %v14284_v43 = vor.u32 %v13038_v37, %v10503_v36  ;;  %v13236_v60 = vld [vmem:[%s20675_s3 + $0x324] sm:$0xf0] }
  0x4e   : > { %3180 = vmatmul.bf16.gmra.mxu1 %v14090_v25  ;;  %20981 = vst [vmem:[#allocation22_spill] sm:$0xff] %v14280_v40  ;;  %v14286_v57 = vor.u32 %v13032_v38, %v10505_v39  ;;  %v11311_v59 = vld [vmem:[%s20675_s3 + $0x320] sm:$0xf]  ;;  %v13204_v63 = vld [vmem:[%s20675_s3 + $0x224] sm:$0xf0] }
  0x4f   : > { %3269 = vmatmul.bf16.gmra.mxu2 %v14092_v26  ;;  %20982 = vst [vmem:[#allocation23_spill] sm:$0xff] %v14282_v42  ;;  %v11183_v61 = vld [vmem:[%s20675_s3 + $0x220] sm:$0xf]  ;;  %v11312_v62 = vor.u32 %v13236_v60, %v11311_v59  ;;  %v13252_v5 = vld [vmem:[%s20675_s3 + $0x3a4] sm:$0xf0] }
  0x50   : > { %3358 = vmatmul.bf16.gmra.mxu3 %v14094_v27  ;;  %20983 = vst [vmem:[#allocation24_spill] sm:$0xff] %v14284_v43  ;;  %v11375_v4 = vld [vmem:[%s20675_s3 + $0x3a0] sm:$0xf]  ;;  %v11184_v7 = vor.u32 %v13204_v63, %v11183_v61  ;;  %v13220_v28 = vld [vmem:[%s20675_s3 + $0x2a4] sm:$0xf0] }
  0x51   : > { %20984 = vst [vmem:[#allocation25_spill] sm:$0xff] %v14286_v57  ;;  %v11376_v8 = vor.u32 %v13252_v5, %v11375_v4  ;;  %3612 = vmatpush.bf16.msrb.mxu2 %v11312_v62  ;;  %v11247_v19 = vld [vmem:[%s20675_s3 + $0x2a0] sm:$0xf]  ;;  %v10547_v30 = vld [vmem:[%s14005_s8 + $0x3a8] sm:$0xf] }
  0x52   : > { %3434 = vmatpush.bf16.msrb.mxu0 %v11184_v7  ;;  %v11248_v29 = vor.u32 %v13220_v28, %v11247_v19  ;;  %v13050_v31 = vld [vmem:[%s14005_s8 + $0x3d8] sm:$0xf0]  ;;  %v13044_v36 = vld [vmem:[%s14005_s8 + $0x3ac] sm:$0xf]  ;;  %v10549_v37 = vld [vmem:[%s14005_s8 + $0x3dc] sm:$0xf0] }
  0x53   : > { %3701 = vmatpush.bf16.msrb.mxu3 %v11376_v8  ;;  %v10555_v38 = vld [vmem:[%s14005_s8 + $0x3b0] sm:$0xf]  ;;  %v13051_v39 = vld [vmem:[%s14005_s8 + $0x3e0] sm:$0xf0]  ;;  %v14326_v59 = vor.u32 %v13050_v31, %v10547_v30  ;;  %v14328_v63 = vor.u32 %v13044_v36, %v10549_v37  ;;  %v13057_v31 = vld [vmem:[%s14005_s8 + $0x414] sm:$0xf] }
  0x54   : > { %3523 = vmatpush.bf16.msrb.mxu1 %v11248_v29  ;;  %v14330_v4 = vor.u32 %v13051_v39, %v10555_v38  ;;  %v10599_v29 = vld [vmem:[%s14005_s8 + $0x410] sm:$0xf]  ;;  %v13063_v30 = vld [vmem:[%s14005_s8 + $0x440] sm:$0xf0]  ;;  %v10601_v36 = vld [vmem:[%s14005_s8 + $0x444] sm:$0xf0] }
  0x55   : > { %20985 = vst [vmem:[#allocation26_spill] sm:$0xff] %v14326_v59  ;;  %v10607_v37 = vld [vmem:[%s14005_s8 + $0x418] sm:$0xf]  ;;  %v13064_v38 = vld [vmem:[%s14005_s8 + $0x448] sm:$0xf0] }
  0x56   : > { %20986 = vst [vmem:[#allocation27_spill] sm:$0xff] %v14328_v63  ;;  %v13058_v39 = vld [vmem:[%s14005_s8 + $0x41c] sm:$0xf]  ;;  %v13103_v53 = vld [vmem:[%s14005_s8 + $0x580] sm:$0xf0] }
  0x57   : > { %20987 = vst [vmem:[#allocation28_spill] sm:$0xff] %v14330_v4 }
  0x5d   : > { %3096 = vmatmul.bf16.gmra.mxu0 %v14132_v51 }
  0x5e   : > { %3185 = vmatmul.bf16.gmra.mxu1 %v14134_v52 }
  0x5f   : > { %3274 = vmatmul.bf16.gmra.mxu2 %v14136_v54 }
  0x60   : > { %3363 = vmatmul.bf16.gmra.mxu3 %v14138_v55 }
  0x6d   : > { %3101 = vmatmul.bf16.gmra.mxu0 %v14152_v0 }
  0x6e   : > { %3190 = vmatmul.bf16.gmra.mxu1 %v14154_v1 }
  0x6f   : > { %3279 = vmatmul.bf16.gmra.mxu2 %v14156_v2 }
  0x70   : > { %3368 = vmatmul.bf16.gmra.mxu3 %v14158_v3 }
  0x7d   : > { %3106 = vmatmul.bf16.gmra.mxu0 %v14196_v32 }
  0x7e   : > { %3195 = vmatmul.bf16.gmra.mxu1 %v14198_v33 }
  0x7f   : > { %3284 = vmatmul.bf16.gmra.mxu2 %v14200_v34 }
  0x80   : > { %3373 = vmatmul.bf16.gmra.mxu3 %v14202_v35  ;;  %v10713_v35 = vld [vmem:[%s14005_s8 + $0x51c] sm:$0xf0] }
  0x8d   : > { %3111 = vmatmul.bf16.gmra.mxu0 %v14216_v45 }
  0x8e   : > { %3200 = vmatmul.bf16.gmra.mxu1 %v14218_v46 }
  0x8f   : > { %3289 = vmatmul.bf16.gmra.mxu2 %v14220_v47 }
  0x90   : > { %3378 = vmatmul.bf16.gmra.mxu3 %v14222_v48 }
  0x9d   : > { %3116 = vmatmul.bf16.gmra.mxu0 %v14260_v20 }
  0x9e   : > { %3205 = vmatmul.bf16.gmra.mxu1 %v14262_v21 }
  0x9f   : > { %3294 = vmatmul.bf16.gmra.mxu2 %v14264_v22 }
  0xa0   : > { %3383 = vmatmul.bf16.gmra.mxu3 %v14266_v23 }
  0xaa   : > { %v3082_v41 = vpop.f32.mrf.mxu0 }
  0xab   : > { %v3171_v56 = vpop.f32.mrf.mxu1 }
  0xac   : > { %v3172_v58 = vadd.f32 %v3171_v56, %v3082_v41  ;;  %v13045_v41 = vld [vmem:[%s14005_s8 + $0x3b4] sm:$0xf]  ;;  %v10557_v56 = vld [vmem:[%s14005_s8 + $0x3e4] sm:$0xf0] }
  0xad   : > { %3121 = vmatmul.bf16.gmra.mxu0 %v14280_v40 }
  0xae   : > { %3210 = vmatmul.bf16.gmra.mxu1 %v14282_v42 }
  0xaf   : > { %3299 = vmatmul.bf16.gmra.mxu2 %v14284_v43 }
  0xb0   : > { %3388 = vmatmul.bf16.gmra.mxu3 %v14286_v57 }
  0xb2   : > { %v3260_v6 = vpop.f32.mrf.mxu2  ;;  %v3084_v11 = vpop.f32.mrf.mxu0 }
  0xb3   : > { %v3261_v9 = vadd.f32 %v3260_v6, %v3172_v58  ;;  %v3349_v10 = vpop.f32.mrf.mxu3  ;;  %v3173_v16 = vpop.f32.mrf.mxu1  ;;  %v14332_v6 = vor.u32 %v13045_v41, %v10557_v56  ;;  %v10609_v41 = vld [vmem:[%s14005_s8 + $0x44c] sm:$0xf0] }
  0xb4   : > { %v3174_v18 = vadd.f32 %v3173_v16, %v3084_v11 }
  0xb5   : > { %v14310_v17 = vadd.f32 %v3349_v10, %v3261_v9  ;;  %20988 = vst [vmem:[#allocation29_spill] sm:$0xff] %v14332_v6 }
  0xba   : > { %v3262_v58 = vpop.f32.mrf.mxu2  ;;  %v3087_v62 = vpop.f32.mrf.mxu0 }
  0xbb   : > { %v3263_v60 = vadd.f32 %v3262_v58, %v3174_v18  ;;  %v3351_v61 = vpop.f32.mrf.mxu3  ;;  %v3176_v5 = vpop.f32.mrf.mxu1  ;;  %v14350_v58 = vor.u32 %v13063_v30, %v10599_v29  ;;  %v11175_v29 = vld [vmem:[%s20675_s3 + $0x210] sm:$0xf] }
  0xbc   : > { %v3177_v8 = vadd.f32 %v3176_v5, %v3087_v62  ;;  %v14352_v5 = vor.u32 %v13057_v31, %v10601_v36  ;;  %v13202_v31 = vld [vmem:[%s20675_s3 + $0x214] sm:$0xf0]  ;;  %v11367_v36 = vld [vmem:[%s20675_s3 + $0x390] sm:$0xf] }
  0xbd   : > { %v14334_v7 = vadd.f32 %v3351_v61, %v3263_v60  ;;  %3126 = vmatmul.bf16.gmra.mxu0 %v14326_v59  ;;  %20989 = vst [vmem:[#allocation30_spill] sm:$0xff] %v14350_v58 }
  0xbe   : > { %3215 = vmatmul.bf16.gmra.mxu1 %v14328_v63  ;;  %20990 = vst [vmem:[#allocation31_spill] sm:$0xff] %v14352_v5 }
  0xbf   : > { %3304 = vmatmul.bf16.gmra.mxu2 %v14330_v4 }
  0xc0   : > { %3393 = vmatmul.bf16.gmra.mxu3 %v14332_v6 }
  0xc2   : > { %v3265_v9 = vpop.f32.mrf.mxu2  ;;  %v3089_v16 = vpop.f32.mrf.mxu0 }
  0xc3   : > { %v3266_v10 = vadd.f32 %v3265_v9, %v3177_v8  ;;  %v3354_v11 = vpop.f32.mrf.mxu3  ;;  %v3178_v18 = vpop.f32.mrf.mxu1  ;;  %v14354_v8 = vor.u32 %v13064_v38, %v10607_v37  ;;  %v13250_v37 = vld [vmem:[%s20675_s3 + $0x394] sm:$0xf0] }
  0xc4   : > { %v3179_v28 = vadd.f32 %v3178_v18, %v3089_v16  ;;  %v11303_v18 = vld [vmem:[%s20675_s3 + $0x310] sm:$0xf] }
  0xc5   : > { %v14340_v19 = vadd.f32 %v3354_v11, %v3266_v10  ;;  %20991 = vst [vmem:[#allocation32_spill] sm:$0xff] %v14354_v8  ;;  %v14356_v10 = vor.u32 %v13058_v39, %v10609_v41  ;;  %v11176_v39 = vor.u32 %v13202_v31, %v11175_v29  ;;  %v11368_v41 = vor.u32 %v13250_v37, %v11367_v36  ;;  %v10651_v31 = vld [vmem:[%s14005_s8 + $0x478] sm:$0xf]  ;;  %v13076_v36 = vld [vmem:[%s14005_s8 + $0x4a8] sm:$0xf0] }
  0xc6   : > { %v10653_v37 = vld [vmem:[%s14005_s8 + $0x4ac] sm:$0xf0] }
  0xc7   : > { %20992 = vst [vmem:[#allocation33_spill] sm:$0xff] %v14356_v10  ;;  %3435 = vmatpush.bf16.msrb.mxu0 %v11176_v39  ;;  %3702 = vmatpush.bf16.msrb.mxu3 %v11368_v41  ;;  %v13071_v39 = vld [vmem:[%s14005_s8 + $0x484] sm:$0xf]  ;;  %v10661_v41 = vld [vmem:[%s14005_s8 + $0x4b4] sm:$0xf0] }
  0xca   : > { %v3267_v56 = vpop.f32.mrf.mxu2  ;;  %v3092_v62 = vpop.f32.mrf.mxu0 }
  0xcb   : > { %v3268_v60 = vadd.f32 %v3267_v56, %v3179_v28  ;;  %v3356_v61 = vpop.f32.mrf.mxu3  ;;  %v3181_v9 = vpop.f32.mrf.mxu1  ;;  %v13234_v28 = vld [vmem:[%s20675_s3 + $0x314] sm:$0xf0] }
  0xcc   : > { %v3182_v16 = vadd.f32 %v3181_v9, %v3092_v62  ;;  %v11304_v30 = vor.u32 %v13234_v28, %v11303_v18  ;;  %v11239_v28 = vld [vmem:[%s20675_s3 + $0x290] sm:$0xf] }
  0xcd   : > { %v14358_v11 = vadd.f32 %v3356_v61, %v3268_v60  ;;  %3131 = vmatmul.bf16.gmra.mxu0 %v14350_v58 }
  0xce   : > { %3220 = vmatmul.bf16.gmra.mxu1 %v14352_v5  ;;  %3613 = vmatpush.bf16.msrb.mxu2 %v11304_v30  ;;  %v13070_v30 = vld [vmem:[%s14005_s8 + $0x47c] sm:$0xf] }
  0xcf   : > { %3309 = vmatmul.bf16.gmra.mxu2 %v14354_v8  ;;  %v14400_v57 = vor.u32 %v13070_v30, %v10653_v37 }
  0xd0   : > { %3398 = vmatmul.bf16.gmra.mxu3 %v14356_v10  ;;  %v13077_v10 = vld [vmem:[%s14005_s8 + $0x4b0] sm:$0xf0] }
  0xd1   : > { %20994 = vst [vmem:[#allocation35_spill] sm:$0xff] %v14400_v57 }
  0xd2   : > { %v3270_v38 = vpop.f32.mrf.mxu2  ;;  %v3094_v61 = vpop.f32.mrf.mxu0 }
  0xd3   : > { %v3271_v56 = vadd.f32 %v3270_v38, %v3182_v16  ;;  %v3359_v60 = vpop.f32.mrf.mxu3  ;;  %v3183_v62 = vpop.f32.mrf.mxu1  ;;  %v13218_v16 = vld [vmem:[%s20675_s3 + $0x294] sm:$0xf0]  ;;  %v10659_v38 = vld [vmem:[%s14005_s8 + $0x480] sm:$0xf] }
  0xd4   : > { %v3184_v18 = vadd.f32 %v3183_v62, %v3094_v61  ;;  %v11240_v29 = vor.u32 %v13218_v16, %v11239_v28  ;;  %v14402_v23 = vor.u32 %v13077_v10, %v10659_v38  ;;  %v14404_v16 = vor.u32 %v13071_v39, %v10661_v41  ;;  %v10703_v38 = vld [vmem:[%s14005_s8 + $0x4e0] sm:$0xf]  ;;  %v13089_v39 = vld [vmem:[%s14005_s8 + $0x510] sm:$0xf0]  ;;  %v13083_v41 = vld [vmem:[%s14005_s8 + $0x4e4] sm:$0xf] }
  0xd5   : > { %v14382_v9 = vadd.f32 %v3359_v60, %v3271_v56  ;;  %v14398_v60 = vor.u32 %v13076_v36, %v10651_v31  ;;  %v14422_v55 = vor.u32 %v13089_v39, %v10703_v38  ;;  %v11359_v38 = vld [vmem:[%s20675_s3 + $0x380] sm:$0xf]  ;;  %v13248_v39 = vld [vmem:[%s20675_s3 + $0x384] sm:$0xf0] }
  0xd6   : > { %3524 = vmatpush.bf16.msrb.mxu1 %v11240_v29  ;;  %20995 = vst [vmem:[#allocation36_spill] sm:$0xff] %v14402_v23 }
  0xd7   : > { %20993 = vst [vmem:[#allocation34_spill] sm:$0xff] %v14398_v60 }
  0xd8   : > { %20996 = vst [vmem:[#allocation37_spill] sm:$0xff] %v14404_v16 }
  0xd9   : > { %20997 = vst [vmem:[#allocation38_spill] sm:$0xff] %v14422_v55 }
  0xda   : > { %v3272_v56 = vpop.f32.mrf.mxu2  ;;  %v3097_v6 = vpop.f32.mrf.mxu0 }
  0xdb   : > { %v3273_v61 = vadd.f32 %v3272_v56, %v3184_v18  ;;  %v3361_v62 = vpop.f32.mrf.mxu3  ;;  %v3186_v28 = vpop.f32.mrf.mxu1  ;;  %v10705_v56 = vld [vmem:[%s14005_s8 + $0x514] sm:$0xf0] }
  0xdc   : > { %v3187_v29 = vadd.f32 %v3186_v28, %v3097_v6  ;;  %v13084_v28 = vld [vmem:[%s14005_s8 + $0x4ec] sm:$0xf] }
  0xdd   : > { %v14406_v48 = vadd.f32 %v3361_v62, %v3273_v61  ;;  %3136 = vmatmul.bf16.gmra.mxu0 %v14398_v60  ;;  %v10711_v61 = vld [vmem:[%s14005_s8 + $0x4e8] sm:$0xf]  ;;  %v13090_v62 = vld [vmem:[%s14005_s8 + $0x518] sm:$0xf0] }
  0xde   : > { %3225 = vmatmul.bf16.gmra.mxu1 %v14400_v57  ;;  %v14426_v15 = vor.u32 %v13090_v62, %v10711_v61  ;;  %v11360_v61 = vor.u32 %v13248_v39, %v11359_v38  ;;  %v10755_v38 = vld [vmem:[%s14005_s8 + $0x548] sm:$0xf]  ;;  %v13102_v39 = vld [vmem:[%s14005_s8 + $0x578] sm:$0xf0] }
  0xdf   : > { %3314 = vmatmul.bf16.gmra.mxu2 %v14402_v23 }
  0xe0   : > { %3403 = vmatmul.bf16.gmra.mxu3 %v14404_v16  ;;  %20999 = vst [vmem:[#allocation40_spill] sm:$0xff] %v14426_v15 }
  0xe1   : > { %3703 = vmatpush.bf16.msrb.mxu3 %v11360_v61  ;;  %v10765_v61 = vld [vmem:[%s14005_s8 + $0x584] sm:$0xf0] }
  0xe2   : > { %v3275_v10 = vpop.f32.mrf.mxu2  ;;  %v3099_v36 = vpop.f32.mrf.mxu0 }
  0xe3   : > { %v3276_v18 = vadd.f32 %v3275_v10, %v3187_v29  ;;  %v3364_v31 = vpop.f32.mrf.mxu3  ;;  %v3188_v30 = vpop.f32.mrf.mxu1  ;;  %v14424_v10 = vor.u32 %v13083_v41, %v10705_v56 }
  0xe4   : > { %v3189_v6 = vadd.f32 %v3188_v30, %v3099_v36 }
  0xe5   : > { %v14412_v37 = vadd.f32 %v3364_v31, %v3276_v18  ;;  %20998 = vst [vmem:[#allocation39_spill] sm:$0xff] %v14424_v10  ;;  %v14428_v31 = vor.u32 %v13084_v28, %v10713_v35  ;;  %v13232_v35 = vld [vmem:[%s20675_s3 + $0x304] sm:$0xf0] }
  0xe7   : > { %21000 = vst [vmem:[#allocation41_spill] sm:$0xff] %v14428_v31 }
  0xea   : > { %v3277_v3 = vpop.f32.mrf.mxu2  ;;  %v3102_v29 = vpop.f32.mrf.mxu0 }
  0xeb   : > { %v3278_v16 = vadd.f32 %v3277_v3, %v3189_v6  ;;  %v3366_v27 = vpop.f32.mrf.mxu3  ;;  %v3191_v18 = vpop.f32.mrf.mxu1  ;;  %v11295_v3 = vld [vmem:[%s20675_s3 + $0x300] sm:$0xf]  ;;  %v13200_v6 = vld [vmem:[%s20675_s3 + $0x204] sm:$0xf0] }
  0xec   : > { %v3192_v30 = vadd.f32 %v3191_v18, %v3102_v29 }
  0xed   : > { %v14430_v36 = vadd.f32 %v3366_v27, %v3278_v16  ;;  %3141 = vmatmul.bf16.gmra.mxu0 %v14422_v55  ;;  %v11167_v27 = vld [vmem:[%s20675_s3 + $0x200] sm:$0xf]  ;;  %v11296_v16 = vor.u32 %v13232_v35, %v11295_v3 }
  0xee   : > { %3230 = vmatmul.bf16.gmra.mxu1 %v14424_v10  ;;  %v11168_v56 = vor.u32 %v13200_v6, %v11167_v27  ;;  %v11231_v27 = vld [vmem:[%s20675_s3 + $0x280] sm:$0xf] }
  0xef   : > { %3319 = vmatmul.bf16.gmra.mxu2 %v14426_v15 }
  0xf0   : > { %3408 = vmatmul.bf16.gmra.mxu3 %v14428_v31  ;;  %3614 = vmatpush.bf16.msrb.mxu2 %v11296_v16  ;;  %v13096_v16 = vld [vmem:[%s14005_s8 + $0x54c] sm:$0xf]  ;;  %v10763_v31 = vld [vmem:[%s14005_s8 + $0x550] sm:$0xf] }
  0xf1   : > { %3436 = vmatpush.bf16.msrb.mxu0 %v11168_v56  ;;  %v13097_v56 = vld [vmem:[%s14005_s8 + $0x554] sm:$0xf]  ;;  %v14474_v55 = vor.u32 %v13103_v53, %v10763_v31 }
  0xf2   : > { %v3280_v41 = vpop.f32.mrf.mxu2  ;;  %v3104_v29 = vpop.f32.mrf.mxu0 }
  0xf3   : > { %v3281_v62 = vadd.f32 %v3280_v41, %v3192_v30  ;;  %v3369_v28 = vpop.f32.mrf.mxu3  ;;  %v3193_v18 = vpop.f32.mrf.mxu1  ;;  %v13216_v30 = vld [vmem:[%s20675_s3 + $0x284] sm:$0xf0]  ;;  %v10757_v41 = vld [vmem:[%s14005_s8 + $0x57c] sm:$0xf0]  ;;  %21003 = vst [vmem:[#allocation44_spill] sm:$0xff] %v14474_v55 }
  0xf4   : > { %v3194_v35 = vadd.f32 %v3193_v18, %v3104_v29  ;;  %v11232_v6 = vor.u32 %v13216_v30, %v11231_v27  ;;  %v14472_v10 = vor.u32 %v13096_v16, %v10757_v41  ;;  %v14476_v30 = vor.u32 %v13097_v56, %v10765_v61  ;;  %v10807_v41 = vld [vmem:[%s14005_s8 + $0x5b0] sm:$0xf]  ;;  %v13115_v56 = vld [vmem:[%s14005_s8 + $0x5e0] sm:$0xf0]  ;;  %v13109_v61 = vld [vmem:[%s14005_s8 + $0x5b4] sm:$0xf] }
  0xf5   : > { %v14454_v3 = vadd.f32 %v3369_v28, %v3281_v62  ;;  %v14470_v28 = vor.u32 %v13102_v39, %v10755_v38 }
  0xf6   : > { %3525 = vmatpush.bf16.msrb.mxu1 %v11232_v6  ;;  %21002 = vst [vmem:[#allocation43_spill] sm:$0xff] %v14472_v10 }
  0xf7   : > { %21001 = vst [vmem:[#allocation42_spill] sm:$0xff] %v14470_v28 }
  0xf8   : > { %21004 = vst [vmem:[#allocation45_spill] sm:$0xff] %v14476_v30 }
  0xfa   : > { %v3282_v62 = vpop.f32.mrf.mxu2  ;;  %v3107_v15 = vpop.f32.mrf.mxu0 }
  0xfb   : > { %v3283_v29 = vadd.f32 %v3282_v62, %v3194_v35  ;;  %v3371_v18 = vpop.f32.mrf.mxu3  ;;  %v3196_v27 = vpop.f32.mrf.mxu1  ;;  %v10809_v62 = vld [vmem:[%s14005_s8 + $0x5e4] sm:$0xf0] }
  0xfc   : > { %v3197_v6 = vadd.f32 %v3196_v27, %v3107_v15  ;;  %v13110_v27 = vld [vmem:[%s14005_s8 + $0x5bc] sm:$0xf] }
  0xfd   : > { %v14478_v23 = vadd.f32 %v3371_v18, %v3283_v29  ;;  %3146 = vmatmul.bf16.gmra.mxu0 %v14470_v28  ;;  %v10815_v29 = vld [vmem:[%s14005_s8 + $0x5b8] sm:$0xf]  ;;  %v13116_v18 = vld [vmem:[%s14005_s8 + $0x5e8] sm:$0xf0]  ;;  %v14494_v28 = vor.u32 %v13115_v56, %v10807_v41  ;;  %v11671_v41 = vld [vmem:[%s20675_s3 + $0x5f0] sm:$0xf] }
  0xfe   : > { %3235 = vmatmul.bf16.gmra.mxu1 %v14472_v10  ;;  %v10817_v10 = vld [vmem:[%s14005_s8 + $0x5ec] sm:$0xf0]  ;;  %v14498_v60 = vor.u32 %v13116_v18, %v10815_v29  ;;  %v13326_v56 = vld [vmem:[%s20675_s3 + $0x5f4] sm:$0xf0] }
  0xff   : > { %3324 = vmatmul.bf16.gmra.mxu2 %v14474_v55  ;;  %21005 = vst [vmem:[#allocation46_spill] sm:$0xff] %v14494_v28  ;;  %v11672_v29 = vor.u32 %v13326_v56, %v11671_v41  ;;  %v10859_v41 = vld [vmem:[%s14005_s8 + $0x618] sm:$0xf]  ;;  %v13128_v56 = vld [vmem:[%s14005_s8 + $0x648] sm:$0xf0] }
 0x100   : > { %3413 = vmatmul.bf16.gmra.mxu3 %v14476_v30  ;;  %21007 = vst [vmem:[#allocation48_spill] sm:$0xff] %v14498_v60 }
 0x101   : > { %4052 = vmatpush.bf16.msra.mxu3 %v11672_v29  ;;  %v10869_v29 = vld [vmem:[%s14005_s8 + $0x654] sm:$0xf0] }
 0x102   : > { %v3285_v53 = vpop.f32.mrf.mxu2  ;;  %v3109_v38 = vpop.f32.mrf.mxu0 }
 0x103   : > { %v3286_v31 = vadd.f32 %v3285_v53, %v3197_v6  ;;  %v3374_v35 = vpop.f32.mrf.mxu3  ;;  %v3198_v39 = vpop.f32.mrf.mxu1  ;;  %v14496_v53 = vor.u32 %v13109_v61, %v10809_v62 }
 0x104   : > { %v3199_v15 = vadd.f32 %v3198_v39, %v3109_v38 }
 0x105   : > { %v14484_v16 = vadd.f32 %v3374_v35, %v3286_v31  ;;  %21006 = vst [vmem:[#allocation47_spill] sm:$0xff] %v14496_v53  ;;  %v14500_v35 = vor.u32 %v13110_v27, %v10817_v10  ;;  %v13310_v10 = vld [vmem:[%s20675_s3 + $0x574] sm:$0xf0] }
 0x107   : > { %21008 = vst [vmem:[#allocation49_spill] sm:$0xff] %v14500_v35 }
 0x10a   : > { %v3287_v55 = vpop.f32.mrf.mxu2  ;;  %v3112_v6 = vpop.f32.mrf.mxu0 }
 0x10b   : > { %v3288_v30 = vadd.f32 %v3287_v55, %v3199_v15  ;;  %v3376_v57 = vpop.f32.mrf.mxu3  ;;  %v3201_v31 = vpop.f32.mrf.mxu1  ;;  %v11607_v55 = vld [vmem:[%s20675_s3 + $0x570] sm:$0xf]  ;;  %v13278_v15 = vld [vmem:[%s20675_s3 + $0x474] sm:$0xf0] }
 0x10c   : > { %v3202_v39 = vadd.f32 %v3201_v31, %v3112_v6 }
 0x10d   : > { %v14502_v38 = vadd.f32 %v3376_v57, %v3288_v30  ;;  %3151 = vmatmul.bf16.gmra.mxu0 %v14494_v28  ;;  %v11479_v57 = vld [vmem:[%s20675_s3 + $0x470] sm:$0xf]  ;;  %v11608_v30 = vor.u32 %v13310_v10, %v11607_v55 }
 0x10e   : > { %3240 = vmatmul.bf16.gmra.mxu1 %v14496_v53  ;;  %v11480_v62 = vor.u32 %v13278_v15, %v11479_v57  ;;  %v11543_v57 = vld [vmem:[%s20675_s3 + $0x4f0] sm:$0xf] }
 0x10f   : > { %3329 = vmatmul.bf16.gmra.mxu2 %v14498_v60  ;;  %v13129_v60 = vld [vmem:[%s14005_s8 + $0x650] sm:$0xf0] }
 0x110   : > { %3418 = vmatmul.bf16.gmra.mxu3 %v14500_v35  ;;  %3963 = vmatpush.bf16.msra.mxu2 %v11608_v30  ;;  %v13122_v30 = vld [vmem:[%s14005_s8 + $0x61c] sm:$0xf]  ;;  %v10867_v35 = vld [vmem:[%s14005_s8 + $0x620] sm:$0xf] }
 0x111   : > { %3785 = vmatpush.bf16.msra.mxu0 %v11480_v62  ;;  %v13123_v62 = vld [vmem:[%s14005_s8 + $0x624] sm:$0xf]  ;;  %v14546_v8 = vor.u32 %v13129_v60, %v10867_v35 }
 0x112   : > { %v3290_v61 = vpop.f32.mrf.mxu2  ;;  %v3114_v6 = vpop.f32.mrf.mxu0 }
 0x113   : > { %v3291_v18 = vadd.f32 %v3290_v61, %v3202_v39  ;;  %v3379_v27 = vpop.f32.mrf.mxu3  ;;  %v3203_v31 = vpop.f32.mrf.mxu1  ;;  %v13294_v39 = vld [vmem:[%s20675_s3 + $0x4f4] sm:$0xf0]  ;;  %v10861_v61 = vld [vmem:[%s14005_s8 + $0x64c] sm:$0xf0]  ;;  %21011 = vst [vmem:[#allocation52_spill] sm:$0xff] %v14546_v8 }
 0x114   : > { %v3204_v10 = vadd.f32 %v3203_v31, %v3114_v6  ;;  %v11544_v15 = vor.u32 %v13294_v39, %v11543_v57  ;;  %v14544_v28 = vor.u32 %v13122_v30, %v10861_v61  ;;  %v14548_v39 = vor.u32 %v13123_v62, %v10869_v29  ;;  %v10095_v61 = vld [vmem:[%s14005_s8 + $0x10] sm:$0xf]  ;;  %v12935_v62 = vld [vmem:[%s14005_s8 + $0x40] sm:$0xf0]  ;;  %v12929_v29 = vld [vmem:[%s14005_s8 + $0x14] sm:$0xf] }
 0x115   : > { %v14526_v55 = vadd.f32 %v3379_v27, %v3291_v18  ;;  %v14542_v27 = vor.u32 %v13128_v56, %v10859_v41 }
 0x116   : > { %3874 = vmatpush.bf16.msra.mxu1 %v11544_v15  ;;  %21010 = vst [vmem:[#allocation51_spill] sm:$0xff] %v14544_v28 }
 0x117   : > { %21009 = vst [vmem:[#allocation50_spill] sm:$0xff] %v14542_v27 }
 0x118   : > { %21012 = vst [vmem:[#allocation53_spill] sm:$0xff] %v14548_v39 }
 0x11a   : > { %v3292_v18 = vpop.f32.mrf.mxu2  ;;  %v3117_v53 = vpop.f32.mrf.mxu0 }
 0x11b   : > { %v3293_v6 = vadd.f32 %v3292_v18, %v3204_v10  ;;  %v3381_v31 = vpop.f32.mrf.mxu3  ;;  %v3206_v57 = vpop.f32.mrf.mxu1  ;;  %v10097_v18 = vld [vmem:[%s14005_s8 + $0x44] sm:$0xf0] }
 0x11c   : > { %v3207_v15 = vadd.f32 %v3206_v57, %v3117_v53  ;;  %v12930_v57 = vld [vmem:[%s14005_s8 + $0x1c] sm:$0xf] }
 0x11d   : > { %v14550_v5 = vadd.f32 %v3381_v31, %v3293_v6  ;;  %3156 = vmatmul.bf16.gmra.mxu0 %v14542_v27  ;;  %v10103_v6 = vld [vmem:[%s14005_s8 + $0x18] sm:$0xf]  ;;  %v12936_v31 = vld [vmem:[%s14005_s8 + $0x48] sm:$0xf0]  ;;  %v14566_v27 = vor.u32 %v12935_v62, %v10095_v61  ;;  %v11663_v61 = vld [vmem:[%s20675_s3 + $0x5e0] sm:$0xf] }
 0x11e   : > { %3245 = vmatmul.bf16.gmra.mxu1 %v14544_v28  ;;  %v10105_v28 = vld [vmem:[%s14005_s8 + $0x4c] sm:$0xf0]  ;;  %v14570_v4 = vor.u32 %v12936_v31, %v10103_v6  ;;  %v13324_v62 = vld [vmem:[%s20675_s3 + $0x5e4] sm:$0xf0] }
 0x11f   : > { %3334 = vmatmul.bf16.gmra.mxu2 %v14546_v8  ;;  %21013 = vst [vmem:[#allocation54_spill] sm:$0xff] %v14566_v27  ;;  %v11664_v6 = vor.u32 %v13324_v62, %v11663_v61  ;;  %v10147_v61 = vld [vmem:[%s14005_s8 + $0x78] sm:$0xf]  ;;  %v12948_v62 = vld [vmem:[%s14005_s8 + $0xa8] sm:$0xf0] }
 0x120   : > { %3423 = vmatmul.bf16.gmra.mxu3 %v14548_v39  ;;  %21015 = vst [vmem:[#allocation56_spill] sm:$0xff] %v14570_v4 }
 0x121   : > { %4053 = vmatpush.bf16.msra.mxu3 %v11664_v6  ;;  %v10157_v6 = vld [vmem:[%s14005_s8 + $0xb4] sm:$0xf0] }
 0x122   : > { %v3295_v60 = vpop.f32.mrf.mxu2  ;;  %v3119_v41 = vpop.f32.mrf.mxu0 }
 0x123   : > { %v3296_v35 = vadd.f32 %v3295_v60, %v3207_v15  ;;  %v3384_v10 = vpop.f32.mrf.mxu3  ;;  %v3208_v56 = vpop.f32.mrf.mxu1  ;;  %v14568_v60 = vor.u32 %v12929_v29, %v10097_v18 }
 0x124   : > { %v3209_v53 = vadd.f32 %v3208_v56, %v3119_v41 }
 0x125   : > { %v14556_v30 = vadd.f32 %v3384_v10, %v3296_v35  ;;  %21014 = vst [vmem:[#allocation55_spill] sm:$0xff] %v14568_v60  ;;  %v14572_v10 = vor.u32 %v12930_v57, %v10105_v28  ;;  %v13308_v28 = vld [vmem:[%s20675_s3 + $0x564] sm:$0xf0] }
 0x127   : > { %21016 = vst [vmem:[#allocation57_spill] sm:$0xff] %v14572_v10 }
 0x12a   : > { %v3297_v8 = vpop.f32.mrf.mxu2  ;;  %v3122_v15 = vpop.f32.mrf.mxu0 }
 0x12b   : > { %v3298_v39 = vadd.f32 %v3297_v8, %v3209_v53  ;;  %v3386_v58 = vpop.f32.mrf.mxu3  ;;  %v3211_v35 = vpop.f32.mrf.mxu1  ;;  %v11599_v8 = vld [vmem:[%s20675_s3 + $0x560] sm:$0xf]  ;;  %v13276_v53 = vld [vmem:[%s20675_s3 + $0x464] sm:$0xf0] }
 0x12c   : > { %v3212_v56 = vadd.f32 %v3211_v35, %v3122_v15 }
 0x12d   : > { %v14574_v41 = vadd.f32 %v3386_v58, %v3298_v39  ;;  %3437 = vmatmul.bf16.vlgmr.msrb.gmra.mxu0 %v14566_v27  ;;  %v11471_v58 = vld [vmem:[%s20675_s3 + $0x460] sm:$0xf]  ;;  %v11600_v39 = vor.u32 %v13308_v28, %v11599_v8 }
 0x12e   : > { %3526 = vmatmul.bf16.vlgmr.msrb.gmra.mxu1 %v14568_v60  ;;  %v11472_v18 = vor.u32 %v13276_v53, %v11471_v58  ;;  %v11535_v58 = vld [vmem:[%s20675_s3 + $0x4e0] sm:$0xf] }
 0x12f   : > { %3615 = vmatmul.bf16.vlgmr.msrb.gmra.mxu2 %v14570_v4  ;;  %v12949_v4 = vld [vmem:[%s14005_s8 + $0xb0] sm:$0xf0] }
 0x130   : > { %3704 = vmatmul.bf16.vlgmr.msrb.gmra.mxu3 %v14572_v10  ;;  %3964 = vmatpush.bf16.msra.mxu2 %v11600_v39  ;;  %v12942_v39 = vld [vmem:[%s14005_s8 + $0x7c] sm:$0xf]  ;;  %v10155_v10 = vld [vmem:[%s14005_s8 + $0x80] sm:$0xf] }
 0x131   : > { %3786 = vmatpush.bf16.msra.mxu0 %v11472_v18  ;;  %v12943_v18 = vld [vmem:[%s14005_s8 + $0x84] sm:$0xf]  ;;  %v14618_v63 = vor.u32 %v12949_v4, %v10155_v10 }
 0x132   : > { %v3300_v29 = vpop.f32.mrf.mxu2  ;;  %v3124_v15 = vpop.f32.mrf.mxu0 }
 0x133   : > { %v3301_v31 = vadd.f32 %v3300_v29, %v3212_v56  ;;  %v3389_v57 = vpop.f32.mrf.mxu3  ;;  %v3213_v35 = vpop.f32.mrf.mxu1  ;;  %v13292_v56 = vld [vmem:[%s20675_s3 + $0x4e4] sm:$0xf0]  ;;  %v10149_v29 = vld [vmem:[%s14005_s8 + $0xac] sm:$0xf0]  ;;  %21019 = vst [vmem:[#allocation60_spill] sm:$0xff] %v14618_v63 }
 0x134   : > { %v3214_v28 = vadd.f32 %v3213_v35, %v3124_v15  ;;  %v11536_v53 = vor.u32 %v13292_v56, %v11535_v58  ;;  %v14616_v27 = vor.u32 %v12942_v39, %v10149_v29  ;;  %v14620_v56 = vor.u32 %v12943_v18, %v10157_v6  ;;  %v10199_v29 = vld [vmem:[%s14005_s8 + $0xe0] sm:$0xf]  ;;  %v12961_v18 = vld [vmem:[%s14005_s8 + $0x110] sm:$0xf0]  ;;  %v12955_v6 = vld [vmem:[%s14005_s8 + $0xe4] sm:$0xf] }
 0x135   : > { %v14598_v8 = vadd.f32 %v3389_v57, %v3301_v31  ;;  %v14614_v57 = vor.u32 %v12948_v62, %v10147_v61 }
 0x136   : > { %3875 = vmatpush.bf16.msra.mxu1 %v11536_v53  ;;  %21018 = vst [vmem:[#allocation59_spill] sm:$0xff] %v14616_v27 }
 0x137   : > { %21017 = vst [vmem:[#allocation58_spill] sm:$0xff] %v14614_v57 }
 0x138   : > { %21020 = vst [vmem:[#allocation61_spill] sm:$0xff] %v14620_v56 }
 0x13a   : > { %v3302_v31 = vpop.f32.mrf.mxu2  ;;  %v3127_v60 = vpop.f32.mrf.mxu0 }
 0x13b   : > { %v3303_v15 = vadd.f32 %v3302_v31, %v3214_v28  ;;  %v3391_v35 = vpop.f32.mrf.mxu3  ;;  %v3216_v58 = vpop.f32.mrf.mxu1  ;;  %v10201_v31 = vld [vmem:[%s14005_s8 + $0x114] sm:$0xf0] }
 0x13c   : > { %v3217_v53 = vadd.f32 %v3216_v58, %v3127_v60  ;;  %v12956_v58 = vld [vmem:[%s14005_s8 + $0xec] sm:$0xf] }
 0x13d   : > { %v14622_v59 = vadd.f32 %v3391_v35, %v3303_v15  ;;  %3442 = vmatmul.bf16.gmra.mxu0 %v14614_v57  ;;  %v10207_v15 = vld [vmem:[%s14005_s8 + $0xe8] sm:$0xf]  ;;  %v12962_v35 = vld [vmem:[%s14005_s8 + $0x118] sm:$0xf0]  ;;  %v14638_v57 = vor.u32 %v12961_v18, %v10199_v29  ;;  %v11655_v29 = vld [vmem:[%s20675_s3 + $0x5d0] sm:$0xf] }
 0x13e   : > { %3531 = vmatmul.bf16.gmra.mxu1 %v14616_v27  ;;  %v10209_v27 = vld [vmem:[%s14005_s8 + $0x11c] sm:$0xf0]  ;;  %v14642_v42 = vor.u32 %v12962_v35, %v10207_v15  ;;  %v13322_v18 = vld [vmem:[%s20675_s3 + $0x5d4] sm:$0xf0] }
 0x13f   : > { %3620 = vmatmul.bf16.gmra.mxu2 %v14618_v63  ;;  %21021 = vst [vmem:[#allocation62_spill] sm:$0xff] %v14638_v57  ;;  %v11656_v15 = vor.u32 %v13322_v18, %v11655_v29  ;;  %v10251_v29 = vld [vmem:[%s14005_s8 + $0x148] sm:$0xf]  ;;  %v12974_v18 = vld [vmem:[%s14005_s8 + $0x178] sm:$0xf0] }
 0x140   : > { %3709 = vmatmul.bf16.gmra.mxu3 %v14620_v56  ;;  %21023 = vst [vmem:[#allocation64_spill] sm:$0xff] %v14642_v42 }
 0x141   : > { %4054 = vmatpush.bf16.msra.mxu3 %v11656_v15  ;;  %v10261_v15 = vld [vmem:[%s14005_s8 + $0x184] sm:$0xf0] }
 0x142   : > { %v3305_v4 = vpop.f32.mrf.mxu2  ;;  %v3129_v61 = vpop.f32.mrf.mxu0 }
 0x143   : > { %v3306_v10 = vadd.f32 %v3305_v4, %v3217_v53  ;;  %v3394_v28 = vpop.f32.mrf.mxu3  ;;  %v3218_v62 = vpop.f32.mrf.mxu1  ;;  %v14640_v4 = vor.u32 %v12955_v6, %v10201_v31 }
 0x144   : > { %v3219_v60 = vadd.f32 %v3218_v62, %v3129_v61 }
 0x145   : > { %v14628_v39 = vadd.f32 %v3394_v28, %v3306_v10  ;;  %21022 = vst [vmem:[#allocation63_spill] sm:$0xff] %v14640_v4  ;;  %v14644_v28 = vor.u32 %v12956_v58, %v10209_v27  ;;  %v13306_v27 = vld [vmem:[%s20675_s3 + $0x554] sm:$0xf0] }
 0x147   : > { %21024 = vst [vmem:[#allocation65_spill] sm:$0xff] %v14644_v28 }
 0x14a   : > { %v3307_v63 = vpop.f32.mrf.mxu2  ;;  %v3132_v53 = vpop.f32.mrf.mxu0 }
 0x14b   : > { %v3308_v56 = vadd.f32 %v3307_v63, %v3219_v60  ;;  %v3396_v43 = vpop.f32.mrf.mxu3  ;;  %v3221_v10 = vpop.f32.mrf.mxu1  ;;  %v11591_v63 = vld [vmem:[%s20675_s3 + $0x550] sm:$0xf]  ;;  %v13274_v60 = vld [vmem:[%s20675_s3 + $0x454] sm:$0xf0] }
 0x14c   : > { %v3222_v62 = vadd.f32 %v3221_v10, %v3132_v53 }
 0x14d   : > { %v14646_v61 = vadd.f32 %v3396_v43, %v3308_v56  ;;  %3447 = vmatmul.bf16.gmra.mxu0 %v14638_v57  ;;  %v11463_v43 = vld [vmem:[%s20675_s3 + $0x450] sm:$0xf]  ;;  %v11592_v56 = vor.u32 %v13306_v27, %v11591_v63 }
 0x14e   : > { %3536 = vmatmul.bf16.gmra.mxu1 %v14640_v4  ;;  %v11464_v31 = vor.u32 %v13274_v60, %v11463_v43  ;;  %v11527_v43 = vld [vmem:[%s20675_s3 + $0x4d0] sm:$0xf] }
 0x14f   : > { %3625 = vmatmul.bf16.gmra.mxu2 %v14642_v42  ;;  %v12975_v42 = vld [vmem:[%s14005_s8 + $0x180] sm:$0xf0] }
 0x150   : > { %3714 = vmatmul.bf16.gmra.mxu3 %v14644_v28  ;;  %3965 = vmatpush.bf16.msra.mxu2 %v11592_v56  ;;  %v12968_v56 = vld [vmem:[%s14005_s8 + $0x14c] sm:$0xf]  ;;  %v10259_v28 = vld [vmem:[%s14005_s8 + $0x150] sm:$0xf] }
 0x151   : > { %3787 = vmatpush.bf16.msra.mxu0 %v11464_v31  ;;  %v12969_v31 = vld [vmem:[%s14005_s8 + $0x154] sm:$0xf]  ;;  %v14690_v40 = vor.u32 %v12975_v42, %v10259_v28 }
 0x152   : > { %v3310_v6 = vpop.f32.mrf.mxu2  ;;  %v3134_v53 = vpop.f32.mrf.mxu0 }
 0x153   : > { %v3311_v35 = vadd.f32 %v3310_v6, %v3222_v62  ;;  %v3399_v58 = vpop.f32.mrf.mxu3  ;;  %v3223_v10 = vpop.f32.mrf.mxu1  ;;  %v13290_v62 = vld [vmem:[%s20675_s3 + $0x4d4] sm:$0xf0]  ;;  %v10253_v6 = vld [vmem:[%s14005_s8 + $0x17c] sm:$0xf0]  ;;  %21027 = vst [vmem:[#allocation68_spill] sm:$0xff] %v14690_v40 }
 0x154   : > { %v3224_v27 = vadd.f32 %v3223_v10, %v3134_v53  ;;  %v11528_v60 = vor.u32 %v13290_v62, %v11527_v43  ;;  %v14688_v57 = vor.u32 %v12968_v56, %v10253_v6  ;;  %v14692_v62 = vor.u32 %v12969_v31, %v10261_v15  ;;  %v10303_v6 = vld [vmem:[%s14005_s8 + $0x1b0] sm:$0xf]  ;;  %v12987_v31 = vld [vmem:[%s14005_s8 + $0x1e0] sm:$0xf0]  ;;  %v12981_v15 = vld [vmem:[%s14005_s8 + $0x1b4] sm:$0xf] }
 0x155   : > { %v14670_v63 = vadd.f32 %v3399_v58, %v3311_v35  ;;  %v14686_v58 = vor.u32 %v12974_v18, %v10251_v29 }
 0x156   : > { %3876 = vmatpush.bf16.msra.mxu1 %v11528_v60  ;;  %21026 = vst [vmem:[#allocation67_spill] sm:$0xff] %v14688_v57 }
 0x157   : > { %21025 = vst [vmem:[#allocation66_spill] sm:$0xff] %v14686_v58 }
 0x158   : > { %21028 = vst [vmem:[#allocation69_spill] sm:$0xff] %v14692_v62 }
 0x15a   : > { %v3312_v35 = vpop.f32.mrf.mxu2  ;;  %v3137_v4 = vpop.f32.mrf.mxu0 }
 0x15b   : > { %v3313_v53 = vadd.f32 %v3312_v35, %v3224_v27  ;;  %v3401_v10 = vpop.f32.mrf.mxu3  ;;  %v3226_v43 = vpop.f32.mrf.mxu1  ;;  %v10305_v35 = vld [vmem:[%s14005_s8 + $0x1e4] sm:$0xf0] }
 0x15c   : > { %v3227_v60 = vadd.f32 %v3226_v43, %v3137_v4  ;;  %v12982_v43 = vld [vmem:[%s14005_s8 + $0x1bc] sm:$0xf] }
 0x15d   : > { %v14694_v22 = vadd.f32 %v3401_v10, %v3313_v53  ;;  %3452 = vmatmul.bf16.gmra.mxu0 %v14686_v58  ;;  %v10311_v53 = vld [vmem:[%s14005_s8 + $0x1b8] sm:$0xf]  ;;  %v12988_v10 = vld [vmem:[%s14005_s8 + $0x1e8] sm:$0xf0]  ;;  %v14710_v58 = vor.u32 %v12987_v31, %v10303_v6  ;;  %v11647_v6 = vld [vmem:[%s20675_s3 + $0x5c0] sm:$0xf] }
 0x15e   : > { %3541 = vmatmul.bf16.gmra.mxu1 %v14688_v57  ;;  %v10313_v57 = vld [vmem:[%s14005_s8 + $0x1ec] sm:$0xf0]  ;;  %v14714_v20 = vor.u32 %v12988_v10, %v10311_v53  ;;  %v13320_v31 = vld [vmem:[%s20675_s3 + $0x5c4] sm:$0xf0] }
 0x15f   : > { %3630 = vmatmul.bf16.gmra.mxu2 %v14690_v40  ;;  %21029 = vst [vmem:[#allocation70_spill] sm:$0xff] %v14710_v58  ;;  %v11648_v53 = vor.u32 %v13320_v31, %v11647_v6  ;;  %v10355_v6 = vld [vmem:[%s14005_s8 + $0x218] sm:$0xf]  ;;  %v13000_v31 = vld [vmem:[%s14005_s8 + $0x248] sm:$0xf0] }
 0x160   : > { %3719 = vmatmul.bf16.gmra.mxu3 %v14692_v62  ;;  %21031 = vst [vmem:[#allocation72_spill] sm:$0xff] %v14714_v20 }
 0x161   : > { %4055 = vmatpush.bf16.msra.mxu3 %v11648_v53  ;;  %v10365_v53 = vld [vmem:[%s14005_s8 + $0x254] sm:$0xf0] }
 0x162   : > { %v3315_v42 = vpop.f32.mrf.mxu2  ;;  %v3139_v29 = vpop.f32.mrf.mxu0 }
 0x163   : > { %v3316_v28 = vadd.f32 %v3315_v42, %v3227_v60  ;;  %v3404_v27 = vpop.f32.mrf.mxu3  ;;  %v3228_v18 = vpop.f32.mrf.mxu1  ;;  %v14712_v42 = vor.u32 %v12981_v15, %v10305_v35 }
 0x164   : > { %v3229_v4 = vadd.f32 %v3228_v18, %v3139_v29 }
 0x165   : > { %v14700_v56 = vadd.f32 %v3404_v27, %v3316_v28  ;;  %21030 = vst [vmem:[#allocation71_spill] sm:$0xff] %v14712_v42  ;;  %v14716_v27 = vor.u32 %v12982_v43, %v10313_v57  ;;  %v13304_v57 = vld [vmem:[%s20675_s3 + $0x544] sm:$0xf0] }
 0x167   : > { %21032 = vst [vmem:[#allocation73_spill] sm:$0xff] %v14716_v27 }
 0x16a   : > { %v3317_v40 = vpop.f32.mrf.mxu2  ;;  %v3142_v60 = vpop.f32.mrf.mxu0 }
 0x16b   : > { %v3318_v62 = vadd.f32 %v3317_v40, %v3229_v4  ;;  %v3406_v21 = vpop.f32.mrf.mxu3  ;;  %v3231_v28 = vpop.f32.mrf.mxu1  ;;  %v11583_v40 = vld [vmem:[%s20675_s3 + $0x540] sm:$0xf]  ;;  %v13272_v4 = vld [vmem:[%s20675_s3 + $0x444] sm:$0xf0] }
 0x16c   : > { %v3232_v18 = vadd.f32 %v3231_v28, %v3142_v60 }
 0x16d   : > { %v14718_v29 = vadd.f32 %v3406_v21, %v3318_v62  ;;  %3457 = vmatmul.bf16.gmra.mxu0 %v14710_v58  ;;  %v11455_v21 = vld [vmem:[%s20675_s3 + $0x440] sm:$0xf]  ;;  %v11584_v62 = vor.u32 %v13304_v57, %v11583_v40 }
 0x16e   : > { %3546 = vmatmul.bf16.gmra.mxu1 %v14712_v42  ;;  %v11456_v35 = vor.u32 %v13272_v4, %v11455_v21  ;;  %v11519_v21 = vld [vmem:[%s20675_s3 + $0x4c0] sm:$0xf] }
 0x16f   : > { %3635 = vmatmul.bf16.gmra.mxu2 %v14714_v20  ;;  %v13001_v20 = vld [vmem:[%s14005_s8 + $0x250] sm:$0xf0] }
 0x170   : > { %3724 = vmatmul.bf16.gmra.mxu3 %v14716_v27  ;;  %3966 = vmatpush.bf16.msra.mxu2 %v11584_v62  ;;  %v12994_v62 = vld [vmem:[%s14005_s8 + $0x21c] sm:$0xf]  ;;  %v10363_v27 = vld [vmem:[%s14005_s8 + $0x220] sm:$0xf] }
 0x171   : > { %3788 = vmatpush.bf16.msra.mxu0 %v11456_v35  ;;  %v12995_v35 = vld [vmem:[%s14005_s8 + $0x224] sm:$0xf]  ;;  %v14762_v47 = vor.u32 %v13001_v20, %v10363_v27 }
 0x172   : > { %v3320_v15 = vpop.f32.mrf.mxu2  ;;  %v3144_v60 = vpop.f32.mrf.mxu0 }
 0x173   : > { %v3321_v10 = vadd.f32 %v3320_v15, %v3232_v18  ;;  %v3409_v43 = vpop.f32.mrf.mxu3  ;;  %v3233_v28 = vpop.f32.mrf.mxu1  ;;  %v13288_v18 = vld [vmem:[%s20675_s3 + $0x4c4] sm:$0xf0]  ;;  %v10357_v15 = vld [vmem:[%s14005_s8 + $0x24c] sm:$0xf0]  ;;  %21035 = vst [vmem:[#allocation76_spill] sm:$0xff] %v14762_v47 }
 0x174   : > { %v3234_v57 = vadd.f32 %v3233_v28, %v3144_v60  ;;  %v11520_v4 = vor.u32 %v13288_v18, %v11519_v21  ;;  %v14760_v58 = vor.u32 %v12994_v62, %v10357_v15  ;;  %v14764_v18 = vor.u32 %v12995_v35, %v10365_v53  ;;  %v10407_v15 = vld [vmem:[%s14005_s8 + $0x280] sm:$0xf]  ;;  %v13013_v35 = vld [vmem:[%s14005_s8 + $0x2b0] sm:$0xf0]  ;;  %v13007_v53 = vld [vmem:[%s14005_s8 + $0x284] sm:$0xf] }
 0x175   : > { %v14742_v40 = vadd.f32 %v3409_v43, %v3321_v10  ;;  %v14758_v43 = vor.u32 %v13000_v31, %v10355_v6 }
 0x176   : > { %3877 = vmatpush.bf16.msra.mxu1 %v11520_v4  ;;  %21034 = vst [vmem:[#allocation75_spill] sm:$0xff] %v14760_v58 }
 0x177   : > { %21033 = vst [vmem:[#allocation74_spill] sm:$0xff] %v14758_v43 }
 0x178   : > { %21036 = vst [vmem:[#allocation77_spill] sm:$0xff] %v14764_v18 }
 0x17a   : > { %v3322_v10 = vpop.f32.mrf.mxu2  ;;  %v3147_v42 = vpop.f32.mrf.mxu0 }
 0x17b   : > { %v3323_v60 = vadd.f32 %v3322_v10, %v3234_v57  ;;  %v3411_v28 = vpop.f32.mrf.mxu3  ;;  %v3236_v21 = vpop.f32.mrf.mxu1  ;;  %v10409_v10 = vld [vmem:[%s14005_s8 + $0x2b4] sm:$0xf0] }
 0x17c   : > { %v3237_v4 = vadd.f32 %v3236_v21, %v3147_v42  ;;  %v13008_v21 = vld [vmem:[%s14005_s8 + $0x28c] sm:$0xf] }
 0x17d   : > { %v14766_v46 = vadd.f32 %v3411_v28, %v3323_v60  ;;  %3462 = vmatmul.bf16.gmra.mxu0 %v14758_v43  ;;  %v10415_v60 = vld [vmem:[%s14005_s8 + $0x288] sm:$0xf]  ;;  %v13014_v28 = vld [vmem:[%s14005_s8 + $0x2b8] sm:$0xf0]  ;;  %v14782_v43 = vor.u32 %v13013_v35, %v10407_v15  ;;  %v11639_v15 = vld [vmem:[%s20675_s3 + $0x5b0] sm:$0xf] }
 0x17e   : > { %3551 = vmatmul.bf16.gmra.mxu1 %v14760_v58  ;;  %v10417_v58 = vld [vmem:[%s14005_s8 + $0x2bc] sm:$0xf0]  ;;  %v14786_v34 = vor.u32 %v13014_v28, %v10415_v60  ;;  %v13318_v35 = vld [vmem:[%s20675_s3 + $0x5b4] sm:$0xf0] }
 0x17f   : > { %3640 = vmatmul.bf16.gmra.mxu2 %v14762_v47  ;;  %21037 = vst [vmem:[#allocation78_spill] sm:$0xff] %v14782_v43  ;;  %v11640_v60 = vor.u32 %v13318_v35, %v11639_v15  ;;  %v10459_v15 = vld [vmem:[%s14005_s8 + $0x2e8] sm:$0xf]  ;;  %v13026_v35 = vld [vmem:[%s14005_s8 + $0x318] sm:$0xf0] }
 0x180   : > { %3729 = vmatmul.bf16.gmra.mxu3 %v14764_v18  ;;  %21039 = vst [vmem:[#allocation80_spill] sm:$0xff] %v14786_v34 }
 0x181   : > { %4056 = vmatpush.bf16.msra.mxu3 %v11640_v60  ;;  %v10469_v60 = vld [vmem:[%s14005_s8 + $0x324] sm:$0xf0] }
 0x182   : > { %v3325_v20 = vpop.f32.mrf.mxu2  ;;  %v3149_v6 = vpop.f32.mrf.mxu0 }
 0x183   : > { %v3326_v27 = vadd.f32 %v3325_v20, %v3237_v4  ;;  %v3414_v57 = vpop.f32.mrf.mxu3  ;;  %v3238_v31 = vpop.f32.mrf.mxu1  ;;  %v14784_v20 = vor.u32 %v13007_v53, %v10409_v10 }
 0x184   : > { %v3239_v42 = vadd.f32 %v3238_v31, %v3149_v6 }
 0x185   : > { %v14772_v62 = vadd.f32 %v3414_v57, %v3326_v27  ;;  %21038 = vst [vmem:[#allocation79_spill] sm:$0xff] %v14784_v20  ;;  %v14788_v57 = vor.u32 %v13008_v21, %v10417_v58  ;;  %v13302_v58 = vld [vmem:[%s20675_s3 + $0x534] sm:$0xf0] }
 0x187   : > { %21040 = vst [vmem:[#allocation81_spill] sm:$0xff] %v14788_v57 }
 0x18a   : > { %v3327_v47 = vpop.f32.mrf.mxu2  ;;  %v3152_v4 = vpop.f32.mrf.mxu0 }
 0x18b   : > { %v3328_v18 = vadd.f32 %v3327_v47, %v3239_v42  ;;  %v3416_v45 = vpop.f32.mrf.mxu3  ;;  %v3241_v27 = vpop.f32.mrf.mxu1  ;;  %v11575_v47 = vld [vmem:[%s20675_s3 + $0x530] sm:$0xf]  ;;  %v13270_v42 = vld [vmem:[%s20675_s3 + $0x434] sm:$0xf0] }
 0x18c   : > { %v3242_v31 = vadd.f32 %v3241_v27, %v3152_v4 }
 0x18d   : > { %v14790_v6 = vadd.f32 %v3416_v45, %v3328_v18  ;;  %3467 = vmatmul.bf16.gmra.mxu0 %v14782_v43  ;;  %v11447_v45 = vld [vmem:[%s20675_s3 + $0x430] sm:$0xf]  ;;  %v11576_v18 = vor.u32 %v13302_v58, %v11575_v47 }
 0x18e   : > { %3556 = vmatmul.bf16.gmra.mxu1 %v14784_v20  ;;  %v11448_v10 = vor.u32 %v13270_v42, %v11447_v45  ;;  %v11511_v45 = vld [vmem:[%s20675_s3 + $0x4b0] sm:$0xf] }
 0x18f   : > { %3645 = vmatmul.bf16.gmra.mxu2 %v14786_v34  ;;  %v13027_v34 = vld [vmem:[%s14005_s8 + $0x320] sm:$0xf0] }
 0x190   : > { %3734 = vmatmul.bf16.gmra.mxu3 %v14788_v57  ;;  %3967 = vmatpush.bf16.msra.mxu2 %v11576_v18  ;;  %v13020_v18 = vld [vmem:[%s14005_s8 + $0x2ec] sm:$0xf]  ;;  %v10467_v57 = vld [vmem:[%s14005_s8 + $0x2f0] sm:$0xf] }
 0x191   : > { %3789 = vmatpush.bf16.msra.mxu0 %v11448_v10  ;;  %v13021_v10 = vld [vmem:[%s14005_s8 + $0x2f4] sm:$0xf]  ;;  %v14834_v33 = vor.u32 %v13027_v34, %v10467_v57 }
 0x192   : > { %v3330_v53 = vpop.f32.mrf.mxu2  ;;  %v3154_v4 = vpop.f32.mrf.mxu0 }
 0x193   : > { %v3331_v28 = vadd.f32 %v3330_v53, %v3242_v31  ;;  %v3419_v21 = vpop.f32.mrf.mxu3  ;;  %v3243_v27 = vpop.f32.mrf.mxu1  ;;  %v13286_v31 = vld [vmem:[%s20675_s3 + $0x4b4] sm:$0xf0]  ;;  %v10461_v53 = vld [vmem:[%s14005_s8 + $0x31c] sm:$0xf0]  ;;  %21043 = vst [vmem:[#allocation84_spill] sm:$0xff] %v14834_v33 }
 0x194   : > { %v3244_v58 = vadd.f32 %v3243_v27, %v3154_v4  ;;  %v11512_v42 = vor.u32 %v13286_v31, %v11511_v45  ;;  %v14832_v43 = vor.u32 %v13020_v18, %v10461_v53  ;;  %v14836_v31 = vor.u32 %v13021_v10, %v10469_v60  ;;  %v10511_v53 = vld [vmem:[%s14005_s8 + $0x350] sm:$0xf]  ;;  %v13039_v10 = vld [vmem:[%s14005_s8 + $0x380] sm:$0xf0]  ;;  %v13033_v60 = vld [vmem:[%s14005_s8 + $0x354] sm:$0xf] }
 0x195   : > { %v14814_v47 = vadd.f32 %v3419_v21, %v3331_v28  ;;  %v14830_v21 = vor.u32 %v13026_v35, %v10459_v15 }
 0x196   : > { %3878 = vmatpush.bf16.msra.mxu1 %v11512_v42  ;;  %21042 = vst [vmem:[#allocation83_spill] sm:$0xff] %v14832_v43 }
 0x197   : > { %21041 = vst [vmem:[#allocation82_spill] sm:$0xff] %v14830_v21 }
 0x198   : > { %21044 = vst [vmem:[#allocation85_spill] sm:$0xff] %v14836_v31 }
 0x19a   : > { %v3332_v28 = vpop.f32.mrf.mxu2  ;;  %v3157_v20 = vpop.f32.mrf.mxu0 }
 0x19b   : > { %v3333_v4 = vadd.f32 %v3332_v28, %v3244_v58  ;;  %v3421_v27 = vpop.f32.mrf.mxu3  ;;  %v3246_v45 = vpop.f32.mrf.mxu1  ;;  %v10513_v28 = vld [vmem:[%s14005_s8 + $0x384] sm:$0xf0] }
 0x19c   : > { %v3247_v42 = vadd.f32 %v3246_v45, %v3157_v20  ;;  %v13034_v45 = vld [vmem:[%s14005_s8 + $0x35c] sm:$0xf] }
 0x19d   : > { %v14838_v32 = vadd.f32 %v3421_v27, %v3333_v4  ;;  %3472 = vmatmul.bf16.gmra.mxu0 %v14830_v21  ;;  %v10519_v4 = vld [vmem:[%s14005_s8 + $0x358] sm:$0xf]  ;;  %v13040_v27 = vld [vmem:[%s14005_s8 + $0x388] sm:$0xf0]  ;;  %v14854_v21 = vor.u32 %v13039_v10, %v10511_v53  ;;  %v13316_v53 = vld [vmem:[%s20675_s3 + $0x5a4] sm:$0xf0] }
 0x19e   : > { %3561 = vmatmul.bf16.gmra.mxu1 %v14832_v43  ;;  %v10521_v43 = vld [vmem:[%s14005_s8 + $0x38c] sm:$0xf0]  ;;  %v14858_v1 = vor.u32 %v13040_v27, %v10519_v4 }
 0x19f   : > { %3650 = vmatmul.bf16.gmra.mxu2 %v14834_v33  ;;  %21045 = vst [vmem:[#allocation86_spill] sm:$0xff] %v14854_v21 }
 0x1a0   : > { %3739 = vmatmul.bf16.gmra.mxu3 %v14836_v31  ;;  %21047 = vst [vmem:[#allocation88_spill] sm:$0xff] %v14858_v1 }
 0x1a2   : > { %v3335_v34 = vpop.f32.mrf.mxu2  ;;  %v3159_v15 = vpop.f32.mrf.mxu0 }
 0x1a3   : > { %v3336_v57 = vadd.f32 %v3335_v34, %v3247_v42  ;;  %v3424_v58 = vpop.f32.mrf.mxu3  ;;  %v3248_v35 = vpop.f32.mrf.mxu1  ;;  %v14856_v34 = vor.u32 %v13033_v60, %v10513_v28 }
 0x1a4   : > { %v3249_v20 = vadd.f32 %v3248_v35, %v3159_v15  ;;  %v14861_v15 = vor.u32 %v13034_v45, %v10521_v43 }
 0x1a5   : > { %v14844_v18 = vadd.f32 %v3424_v58, %v3336_v57  ;;  %21046 = vst [vmem:[#allocation87_spill] sm:$0xff] %v14856_v34 }
 0x1a6   : > { %21048 = vst [vmem:[#allocation89_spill] sm:$0xff] %v14861_v15 }
 0x1aa   : > { %v3337_v33 = vpop.f32.mrf.mxu2  ;;  %v3438_v42 = vpop.f32.mrf.mxu0 }
 0x1ab   : > { %v3338_v31 = vadd.f32 %v3337_v33, %v3249_v20  ;;  %v3426_v2 = vpop.f32.mrf.mxu3  ;;  %v3439_v57 = vadd.f32 %v3438_v42, %v14310_v17  ;;  %v3527_v58 = vpop.f32.mrf.mxu1  ;;  %v11567_v33 = vld [vmem:[%s20675_s3 + $0x520] sm:$0xf]  ;;  %v13300_v17 = vld [vmem:[%s20675_s3 + $0x524] sm:$0xf0] }
 0x1ac   : > { %v11568_v43 = vor.u32 %v13300_v17, %v11567_v33  ;;  %v11631_v20 = vld [vmem:[%s20675_s3 + $0x5a0] sm:$0xf] }
 0x1ad   : > { %v14863_v35 = vadd.f32 %v3426_v2, %v3338_v31  ;;  %v3528_v0 = vadd.f32 %v3527_v58, %v3439_v57  ;;  %3477 = vmatmul.bf16.gmra.mxu0 %v14854_v21  ;;  %v11439_v2 = vld [vmem:[%s20675_s3 + $0x420] sm:$0xf]  ;;  %v13268_v31 = vld [vmem:[%s20675_s3 + $0x424] sm:$0xf0]  ;;  %v11632_v28 = vor.u32 %v13316_v53, %v11631_v20  ;;  %v10565_v20 = vld [vmem:[%s14005_s8 + $0x3ec] sm:$0xf0] }
 0x1ae   : > { %3566 = vmatmul.bf16.gmra.mxu1 %v14856_v34  ;;  %v11440_v60 = vor.u32 %v13268_v31, %v11439_v2  ;;  %3968 = vmatpush.bf16.msra.mxu2 %v11568_v43  ;;  %v11503_v33 = vld [vmem:[%s20675_s3 + $0x4a0] sm:$0xf]  ;;  %v10563_v43 = vld [vmem:[%s14005_s8 + $0x3b8] sm:$0xf]  ;;  %v13052_v31 = vld [vmem:[%s14005_s8 + $0x3e8] sm:$0xf0] }
 0x1af   : > { %3655 = vmatmul.bf16.gmra.mxu2 %v14858_v1  ;;  %4057 = vmatpush.bf16.msra.mxu3 %v11632_v28  ;;  %v10571_v53 = vld [vmem:[%s14005_s8 + $0x3c0] sm:$0xf]  ;;  %v10573_v28 = vld [vmem:[%s14005_s8 + $0x3f4] sm:$0xf0] }
 0x1b0   : > { %3744 = vmatmul.bf16.gmra.mxu3 %v14861_v15  ;;  %3790 = vmatpush.bf16.msra.mxu0 %v11440_v60  ;;  %v13047_v60 = vld [vmem:[%s14005_s8 + $0x3c4] sm:$0xf] }
 0x1b2   : > { %v3616_v10 = vpop.f32.mrf.mxu2  ;;  %v3440_v45 = vpop.f32.mrf.mxu0 }
 0x1b3   : > { %v3617_v4 = vadd.f32 %v3616_v10, %v3528_v0  ;;  %v3705_v27 = vpop.f32.mrf.mxu3  ;;  %v3441_v42 = vadd.f32 %v3440_v45, %v14334_v7  ;;  %v3529_v57 = vpop.f32.mrf.mxu1  ;;  %v13284_v0 = vld [vmem:[%s20675_s3 + $0x4a4] sm:$0xf0]  ;;  %v13046_v7 = vld [vmem:[%s14005_s8 + $0x3bc] sm:$0xf]  ;;  %v13053_v10 = vld [vmem:[%s14005_s8 + $0x3f0] sm:$0xf0] }
 0x1b4   : > { %v11504_v2 = vor.u32 %v13284_v0, %v11503_v33  ;;  %v14906_v34 = vor.u32 %v13046_v7, %v10565_v20  ;;  %v14908_v21 = vor.u32 %v13053_v10, %v10571_v53  ;;  %v14911_v33 = vor.u32 %v13047_v60, %v10573_v28  ;;  %v10615_v53 = vld [vmem:[%s14005_s8 + $0x420] sm:$0xf]  ;;  %v13065_v10 = vld [vmem:[%s14005_s8 + $0x450] sm:$0xf0]  ;;  %v13059_v60 = vld [vmem:[%s14005_s8 + $0x424] sm:$0xf] }
 0x1b5   : > { %v14888_v58 = vadd.f32 %v3705_v27, %v3617_v4  ;;  %v3530_v17 = vadd.f32 %v3529_v57, %v3441_v42  ;;  %v14904_v27 = vor.u32 %v13052_v31, %v10563_v43  ;;  %v10617_v28 = vld [vmem:[%s14005_s8 + $0x454] sm:$0xf0] }
 0x1b6   : > { %3879 = vmatpush.bf16.msra.mxu1 %v11504_v2  ;;  %21050 = vst [vmem:[#allocation91_spill] sm:$0xff] %v14906_v34 }
 0x1b7   : > { %21049 = vst [vmem:[#allocation90_spill] sm:$0xff] %v14904_v27 }
 0x1b8   : > { %21051 = vst [vmem:[#allocation92_spill] sm:$0xff] %v14908_v21 }
 0x1b9   : > { %21052 = vst [vmem:[#allocation93_spill] sm:$0xff] %v14911_v33 }
 0x1ba   : > { %v3618_v4 = vpop.f32.mrf.mxu2  ;;  %v3443_v1 = vpop.f32.mrf.mxu0 }
 0x1bb   : > { %v3619_v45 = vadd.f32 %v3618_v4, %v3530_v17  ;;  %v3707_v15 = vpop.f32.mrf.mxu3  ;;  %v3444_v42 = vadd.f32 %v3443_v1, %v14340_v19  ;;  %v3532_v57 = vpop.f32.mrf.mxu1  ;;  %v10623_v4 = vld [vmem:[%s14005_s8 + $0x428] sm:$0xf] }
 0x1bd   : > { %v14913_v0 = vadd.f32 %v3707_v15, %v3619_v45  ;;  %v3533_v2 = vadd.f32 %v3532_v57, %v3444_v42  ;;  %3482 = vmatmul.bf16.gmra.mxu0 %v14904_v27  ;;  %v13066_v45 = vld [vmem:[%s14005_s8 + $0x458] sm:$0xf0]  ;;  %v13060_v42 = vld [vmem:[%s14005_s8 + $0x42c] sm:$0xf]  ;;  %v10625_v57 = vld [vmem:[%s14005_s8 + $0x45c] sm:$0xf0]  ;;  %v14932_v27 = vor.u32 %v13059_v60, %v10617_v28 }
 0x1be   : > { %3571 = vmatmul.bf16.gmra.mxu1 %v14906_v34  ;;  %v13314_v60 = vld [vmem:[%s20675_s3 + $0x594] sm:$0xf0] }
 0x1bf   : > { %3660 = vmatmul.bf16.gmra.mxu2 %v14908_v21  ;;  %v14930_v21 = vor.u32 %v13065_v10, %v10615_v53  ;;  %21054 = vst [vmem:[#allocation95_spill] sm:$0xff] %v14932_v27  ;;  %v13266_v53 = vld [vmem:[%s20675_s3 + $0x414] sm:$0xf0]  ;;  %v11623_v10 = vld [vmem:[%s20675_s3 + $0x590] sm:$0xf] }
 0x1c0   : > { %3749 = vmatmul.bf16.gmra.mxu3 %v14911_v33 }
 0x1c1   : > { %21053 = vst [vmem:[#allocation94_spill] sm:$0xff] %v14930_v21 }
 0x1c2   : > { %v3621_v1 = vpop.f32.mrf.mxu2  ;;  %v3445_v15 = vpop.f32.mrf.mxu0 }
 0x1c3   : > { %v3622_v19 = vadd.f32 %v3621_v1, %v3533_v2  ;;  %v3710_v17 = vpop.f32.mrf.mxu3  ;;  %v3446_v43 = vadd.f32 %v3445_v15, %v14358_v11  ;;  %v3534_v31 = vpop.f32.mrf.mxu1  ;;  %v14934_v11 = vor.u32 %v13066_v45, %v10623_v4  ;;  %v14937_v15 = vor.u32 %v13060_v42, %v10625_v57 }
 0x1c4   : > { %v11624_v45 = vor.u32 %v13314_v60, %v11623_v10  ;;  %v10669_v10 = vld [vmem:[%s14005_s8 + $0x4bc] sm:$0xf0]  ;;  %v10675_v60 = vld [vmem:[%s14005_s8 + $0x490] sm:$0xf] }
 0x1c5   : > { %v14920_v7 = vadd.f32 %v3710_v17, %v3622_v19  ;;  %v3535_v20 = vadd.f32 %v3534_v31, %v3446_v43  ;;  %21055 = vst [vmem:[#allocation96_spill] sm:$0xff] %v14934_v11 }
 0x1c6   : > { %21056 = vst [vmem:[#allocation97_spill] sm:$0xff] %v14937_v15  ;;  %4058 = vmatpush.bf16.msra.mxu3 %v11624_v45  ;;  %v10677_v45 = vld [vmem:[%s14005_s8 + $0x4c4] sm:$0xf0] }
 0x1ca   : > { %v3623_v33 = vpop.f32.mrf.mxu2  ;;  %v3448_v34 = vpop.f32.mrf.mxu0 }
 0x1cb   : > { %v3624_v2 = vadd.f32 %v3623_v33, %v3535_v20  ;;  %v3712_v1 = vpop.f32.mrf.mxu3  ;;  %v3449_v19 = vadd.f32 %v3448_v34, %v14382_v9  ;;  %v3537_v17 = vpop.f32.mrf.mxu1  ;;  %v11559_v33 = vld [vmem:[%s20675_s3 + $0x510] sm:$0xf]  ;;  %v13298_v9 = vld [vmem:[%s20675_s3 + $0x514] sm:$0xf0] }
 0x1cc   : > { %v11431_v34 = vld [vmem:[%s20675_s3 + $0x410] sm:$0xf]  ;;  %v11560_v20 = vor.u32 %v13298_v9, %v11559_v33 }
 0x1cd   : > { %v14939_v43 = vadd.f32 %v3712_v1, %v3624_v2  ;;  %v3538_v31 = vadd.f32 %v3537_v17, %v3449_v19  ;;  %3487 = vmatmul.bf16.gmra.mxu0 %v14930_v21  ;;  %v11432_v4 = vor.u32 %v13266_v53, %v11431_v34  ;;  %v11495_v33 = vld [vmem:[%s20675_s3 + $0x490] sm:$0xf]  ;;  %v13078_v53 = vld [vmem:[%s14005_s8 + $0x4b8] sm:$0xf0] }
 0x1ce   : > { %3576 = vmatmul.bf16.gmra.mxu1 %v14932_v27  ;;  %3969 = vmatpush.bf16.msra.mxu2 %v11560_v20  ;;  %v10667_v20 = vld [vmem:[%s14005_s8 + $0x488] sm:$0xf] }
 0x1cf   : > { %3665 = vmatmul.bf16.gmra.mxu2 %v14934_v11  ;;  %3791 = vmatpush.bf16.msra.mxu0 %v11432_v4  ;;  %v13073_v4 = vld [vmem:[%s14005_s8 + $0x494] sm:$0xf] }
 0x1d0   : > { %3754 = vmatmul.bf16.gmra.mxu3 %v14937_v15 }
 0x1d2   : > { %v3626_v28 = vpop.f32.mrf.mxu2  ;;  %v3450_v2 = vpop.f32.mrf.mxu0 }
 0x1d3   : > { %v3627_v42 = vadd.f32 %v3626_v28, %v3538_v31  ;;  %v3715_v57 = vpop.f32.mrf.mxu3  ;;  %v3451_v1 = vadd.f32 %v3450_v2, %v14406_v48  ;;  %v3539_v19 = vpop.f32.mrf.mxu1  ;;  %v13282_v31 = vld [vmem:[%s20675_s3 + $0x494] sm:$0xf0]  ;;  %v13072_v48 = vld [vmem:[%s14005_s8 + $0x48c] sm:$0xf]  ;;  %v13079_v28 = vld [vmem:[%s14005_s8 + $0x4c0] sm:$0xf0] }
 0x1d4   : > { %v11496_v34 = vor.u32 %v13282_v31, %v11495_v33  ;;  %v14982_v27 = vor.u32 %v13072_v48, %v10669_v10  ;;  %v14984_v21 = vor.u32 %v13079_v28, %v10675_v60  ;;  %v14987_v33 = vor.u32 %v13073_v4, %v10677_v45  ;;  %v10719_v60 = vld [vmem:[%s14005_s8 + $0x4f0] sm:$0xf]  ;;  %v13091_v28 = vld [vmem:[%s14005_s8 + $0x520] sm:$0xf0]  ;;  %v13085_v4 = vld [vmem:[%s14005_s8 + $0x4f4] sm:$0xf] }
 0x1d5   : > { %v14964_v17 = vadd.f32 %v3715_v57, %v3627_v42  ;;  %v3540_v9 = vadd.f32 %v3539_v19, %v3451_v1  ;;  %v14980_v57 = vor.u32 %v13078_v53, %v10667_v20  ;;  %v10721_v45 = vld [vmem:[%s14005_s8 + $0x524] sm:$0xf0] }
 0x1d6   : > { %3880 = vmatpush.bf16.msra.mxu1 %v11496_v34  ;;  %21058 = vst [vmem:[#allocation99_spill] sm:$0xff] %v14982_v27 }
 0x1d7   : > { %21057 = vst [vmem:[#allocation98_spill] sm:$0xff] %v14980_v57 }
 0x1d8   : > { %21059 = vst [vmem:[#allocation100_spill] sm:$0xff] %v14984_v21 }
 0x1d9   : > { %21060 = vst [vmem:[#allocation101_spill] sm:$0xff] %v14987_v33 }
 0x1da   : > { %v3628_v42 = vpop.f32.mrf.mxu2  ;;  %v3453_v11 = vpop.f32.mrf.mxu0 }
 0x1db   : > { %v3629_v2 = vadd.f32 %v3628_v42, %v3540_v9  ;;  %v3717_v15 = vpop.f32.mrf.mxu3  ;;  %v3454_v1 = vadd.f32 %v3453_v11, %v14412_v37  ;;  %v3542_v19 = vpop.f32.mrf.mxu1  ;;  %v10727_v42 = vld [vmem:[%s14005_s8 + $0x4f8] sm:$0xf] }
 0x1dd   : > { %v14989_v31 = vadd.f32 %v3717_v15, %v3629_v2  ;;  %v3543_v34 = vadd.f32 %v3542_v19, %v3454_v1  ;;  %3492 = vmatmul.bf16.gmra.mxu0 %v14980_v57  ;;  %v13092_v2 = vld [vmem:[%s14005_s8 + $0x528] sm:$0xf0]  ;;  %v13086_v1 = vld [vmem:[%s14005_s8 + $0x4fc] sm:$0xf]  ;;  %v10729_v19 = vld [vmem:[%s14005_s8 + $0x52c] sm:$0xf0]  ;;  %v15008_v57 = vor.u32 %v13085_v4, %v10721_v45 }
 0x1de   : > { %3581 = vmatmul.bf16.gmra.mxu1 %v14982_v27  ;;  %v13312_v4 = vld [vmem:[%s20675_s3 + $0x584] sm:$0xf0] }
 0x1df   : > { %3670 = vmatmul.bf16.gmra.mxu2 %v14984_v21  ;;  %v15006_v21 = vor.u32 %v13091_v28, %v10719_v60  ;;  %21062 = vst [vmem:[#allocation103_spill] sm:$0xff] %v15008_v57  ;;  %v13264_v60 = vld [vmem:[%s20675_s3 + $0x404] sm:$0xf0]  ;;  %v11615_v28 = vld [vmem:[%s20675_s3 + $0x580] sm:$0xf] }
 0x1e0   : > { %3759 = vmatmul.bf16.gmra.mxu3 %v14987_v33 }
 0x1e1   : > { %21061 = vst [vmem:[#allocation102_spill] sm:$0xff] %v15006_v21 }
 0x1e2   : > { %v3631_v37 = vpop.f32.mrf.mxu2  ;;  %v3455_v15 = vpop.f32.mrf.mxu0 }
 0x1e3   : > { %v3632_v11 = vadd.f32 %v3631_v37, %v3543_v34  ;;  %v3720_v9 = vpop.f32.mrf.mxu3  ;;  %v3456_v20 = vadd.f32 %v3455_v15, %v14430_v36  ;;  %v3544_v53 = vpop.f32.mrf.mxu1  ;;  %v15010_v36 = vor.u32 %v13092_v2, %v10727_v42  ;;  %v15013_v15 = vor.u32 %v13086_v1, %v10729_v19 }
 0x1e4   : > { %v11616_v2 = vor.u32 %v13312_v4, %v11615_v28  ;;  %v10773_v28 = vld [vmem:[%s14005_s8 + $0x58c] sm:$0xf0]  ;;  %v10779_v4 = vld [vmem:[%s14005_s8 + $0x560] sm:$0xf] }
 0x1e5   : > { %v14996_v48 = vadd.f32 %v3720_v9, %v3632_v11  ;;  %v3545_v10 = vadd.f32 %v3544_v53, %v3456_v20  ;;  %21063 = vst [vmem:[#allocation104_spill] sm:$0xff] %v15010_v36 }
 0x1e6   : > { %21064 = vst [vmem:[#allocation105_spill] sm:$0xff] %v15013_v15  ;;  %4059 = vmatpush.bf16.msra.mxu3 %v11616_v2  ;;  %v10781_v2 = vld [vmem:[%s14005_s8 + $0x594] sm:$0xf0] }
 0x1ea   : > { %v3633_v33 = vpop.f32.mrf.mxu2  ;;  %v3458_v27 = vpop.f32.mrf.mxu0 }
 0x1eb   : > { %v3634_v34 = vadd.f32 %v3633_v33, %v3545_v10  ;;  %v3722_v37 = vpop.f32.mrf.mxu3  ;;  %v3459_v11 = vadd.f32 %v3458_v27, %v14454_v3  ;;  %v3547_v9 = vpop.f32.mrf.mxu1  ;;  %v11551_v33 = vld [vmem:[%s20675_s3 + $0x500] sm:$0xf]  ;;  %v13296_v3 = vld [vmem:[%s20675_s3 + $0x504] sm:$0xf0] }
 0x1ec   : > { %v11423_v27 = vld [vmem:[%s20675_s3 + $0x400] sm:$0xf]  ;;  %v11552_v10 = vor.u32 %v13296_v3, %v11551_v33 }
 0x1ed   : > { %v15015_v20 = vadd.f32 %v3722_v37, %v3634_v34  ;;  %v3548_v53 = vadd.f32 %v3547_v9, %v3459_v11  ;;  %3497 = vmatmul.bf16.gmra.mxu0 %v15006_v21  ;;  %v11424_v42 = vor.u32 %v13264_v60, %v11423_v27  ;;  %v11487_v33 = vld [vmem:[%s20675_s3 + $0x480] sm:$0xf]  ;;  %v13104_v60 = vld [vmem:[%s14005_s8 + $0x588] sm:$0xf0] }
 0x1ee   : > { %3586 = vmatmul.bf16.gmra.mxu1 %v15008_v57  ;;  %3970 = vmatpush.bf16.msra.mxu2 %v11552_v10  ;;  %v10771_v10 = vld [vmem:[%s14005_s8 + $0x558] sm:$0xf] }
 0x1ef   : > { %3675 = vmatmul.bf16.gmra.mxu2 %v15010_v36  ;;  %3792 = vmatpush.bf16.msra.mxu0 %v11424_v42  ;;  %v13099_v42 = vld [vmem:[%s14005_s8 + $0x564] sm:$0xf] }
 0x1f0   : > { %3764 = vmatmul.bf16.gmra.mxu3 %v15013_v15 }
 0x1f2   : > { %v3636_v45 = vpop.f32.mrf.mxu2  ;;  %v3460_v34 = vpop.f32.mrf.mxu0 }
 0x1f3   : > { %v3637_v1 = vadd.f32 %v3636_v45, %v3548_v53  ;;  %v3725_v19 = vpop.f32.mrf.mxu3  ;;  %v3461_v37 = vadd.f32 %v3460_v34, %v14478_v23  ;;  %v3549_v11 = vpop.f32.mrf.mxu1  ;;  %v13280_v53 = vld [vmem:[%s20675_s3 + $0x484] sm:$0xf0]  ;;  %v13098_v23 = vld [vmem:[%s14005_s8 + $0x55c] sm:$0xf]  ;;  %v13105_v45 = vld [vmem:[%s14005_s8 + $0x590] sm:$0xf0] }
 0x1f4   : > { %v11488_v27 = vor.u32 %v13280_v53, %v11487_v33  ;;  %v15058_v57 = vor.u32 %v13098_v23, %v10773_v28  ;;  %v15060_v21 = vor.u32 %v13105_v45, %v10779_v4  ;;  %v15063_v33 = vor.u32 %v13099_v42, %v10781_v2  ;;  %v10823_v4 = vld [vmem:[%s14005_s8 + $0x5c0] sm:$0xf]  ;;  %v13117_v45 = vld [vmem:[%s14005_s8 + $0x5f0] sm:$0xf0]  ;;  %v13111_v42 = vld [vmem:[%s14005_s8 + $0x5c4] sm:$0xf] }
 0x1f5   : > { %v15040_v9 = vadd.f32 %v3725_v19, %v3637_v1  ;;  %v3550_v3 = vadd.f32 %v3549_v11, %v3461_v37  ;;  %v15056_v19 = vor.u32 %v13104_v60, %v10771_v10  ;;  %v10825_v2 = vld [vmem:[%s14005_s8 + $0x5f4] sm:$0xf0] }
 0x1f6   : > { %3881 = vmatpush.bf16.msra.mxu1 %v11488_v27  ;;  %21066 = vst [vmem:[#allocation107_spill] sm:$0xff] %v15058_v57 }
 0x1f7   : > { %21065 = vst [vmem:[#allocation106_spill] sm:$0xff] %v15056_v19 }
 0x1f8   : > { %21067 = vst [vmem:[#allocation108_spill] sm:$0xff] %v15060_v21 }
 0x1f9   : > { %21068 = vst [vmem:[#allocation109_spill] sm:$0xff] %v15063_v33 }
 0x1fa   : > { %v3638_v1 = vpop.f32.mrf.mxu2  ;;  %v3463_v36 = vpop.f32.mrf.mxu0 }
 0x1fb   : > { %v3639_v34 = vadd.f32 %v3638_v1, %v3550_v3  ;;  %v3727_v15 = vpop.f32.mrf.mxu3  ;;  %v3464_v37 = vadd.f32 %v3463_v36, %v14484_v16  ;;  %v3552_v11 = vpop.f32.mrf.mxu1  ;;  %v10831_v1 = vld [vmem:[%s14005_s8 + $0x5c8] sm:$0xf] }
 0x1fd   : > { %v15065_v53 = vadd.f32 %v3727_v15, %v3639_v34  ;;  %v3553_v27 = vadd.f32 %v3552_v11, %v3464_v37  ;;  %3502 = vmatmul.bf16.gmra.mxu0 %v15056_v19  ;;  %v13118_v34 = vld [vmem:[%s14005_s8 + $0x5f8] sm:$0xf0]  ;;  %v13112_v37 = vld [vmem:[%s14005_s8 + $0x5cc] sm:$0xf]  ;;  %v10833_v11 = vld [vmem:[%s14005_s8 + $0x5fc] sm:$0xf0]  ;;  %v15084_v19 = vor.u32 %v13111_v42, %v10825_v2 }
 0x1fe   : > { %3591 = vmatmul.bf16.gmra.mxu1 %v15058_v57  ;;  %v11097_v42 = vld [vmem:[%s20675_s3 + $0x178] sm:$0xf0] }
 0x1ff   : > { %3680 = vmatmul.bf16.gmra.mxu2 %v15060_v21  ;;  %v15082_v21 = vor.u32 %v13117_v45, %v10823_v4  ;;  %21070 = vst [vmem:[#allocation111_spill] sm:$0xff] %v15084_v19  ;;  %v13342_v4 = vld [vmem:[%s20675_s3 + $0x674] sm:$0xf0]  ;;  %v13181_v45 = vld [vmem:[%s20675_s3 + $0x174] sm:$0xf] }
 0x200   : > { %3769 = vmatmul.bf16.gmra.mxu3 %v15063_v33 }
 0x201   : > { %21069 = vst [vmem:[#allocation110_spill] sm:$0xff] %v15082_v21 }
 0x202   : > { %v3641_v16 = vpop.f32.mrf.mxu2  ;;  %v3465_v15 = vpop.f32.mrf.mxu0 }
 0x203   : > { %v3642_v36 = vadd.f32 %v3641_v16, %v3553_v27  ;;  %v3730_v3 = vpop.f32.mrf.mxu3  ;;  %v3466_v10 = vadd.f32 %v3465_v15, %v14502_v38  ;;  %v3554_v60 = vpop.f32.mrf.mxu1  ;;  %v15086_v38 = vor.u32 %v13118_v34, %v10831_v1  ;;  %v15089_v15 = vor.u32 %v13112_v37, %v10833_v11 }
 0x204   : > { %v11100_v34 = vor.u32 %v13181_v45, %v11097_v42  ;;  %v10877_v45 = vld [vmem:[%s14005_s8 + $0x65c] sm:$0xf0]  ;;  %v10883_v42 = vld [vmem:[%s14005_s8 + $0x630] sm:$0xf] }
 0x205   : > { %v15072_v23 = vadd.f32 %v3730_v3, %v3642_v36  ;;  %v3555_v28 = vadd.f32 %v3554_v60, %v3466_v10  ;;  %21071 = vst [vmem:[#allocation112_spill] sm:$0xff] %v15086_v38 }
 0x206   : > { %21072 = vst [vmem:[#allocation113_spill] sm:$0xff] %v15089_v15  ;;  %4408 = vmatpush.bf16.msrb.mxu3 %v11100_v34  ;;  %v10885_v34 = vld [vmem:[%s14005_s8 + $0x664] sm:$0xf0] }
 0x20a   : > { %v3643_v33 = vpop.f32.mrf.mxu2  ;;  %v3468_v57 = vpop.f32.mrf.mxu0 }
 0x20b   : > { %v3644_v27 = vadd.f32 %v3643_v33, %v3555_v28  ;;  %v3732_v16 = vpop.f32.mrf.mxu3  ;;  %v3469_v36 = vadd.f32 %v3468_v57, %v14526_v55  ;;  %v3557_v3 = vpop.f32.mrf.mxu1  ;;  %v13165_v33 = vld [vmem:[%s20675_s3 + $0xf4] sm:$0xf]  ;;  %v11033_v55 = vld [vmem:[%s20675_s3 + $0xf8] sm:$0xf0]  ;;  %v11735_v57 = vld [vmem:[%s20675_s3 + $0x670] sm:$0xf] }
 0x20c   : > { %v11036_v28 = vor.u32 %v13165_v33, %v11033_v55  ;;  %v11736_v1 = vor.u32 %v13342_v4, %v11735_v57  ;;  %v13149_v33 = vld [vmem:[%s20675_s3 + $0x74] sm:$0xf]  ;;  %v13130_v4 = vld [vmem:[%s14005_s8 + $0x658] sm:$0xf0] }
 0x20d   : > { %v15091_v10 = vadd.f32 %v3732_v16, %v3644_v27  ;;  %v3558_v60 = vadd.f32 %v3557_v3, %v3469_v36  ;;  %3507 = vmatmul.bf16.gmra.mxu0 %v15082_v21 }
 0x20e   : > { %3596 = vmatmul.bf16.gmra.mxu1 %v15084_v19  ;;  %4319 = vmatpush.bf16.msrb.mxu2 %v11036_v28  ;;  %v10875_v28 = vld [vmem:[%s14005_s8 + $0x628] sm:$0xf] }
 0x20f   : > { %3685 = vmatmul.bf16.gmra.mxu2 %v15086_v38  ;;  %4141 = vmatpush.bf16.msrb.mxu0 %v11736_v1  ;;  %v13125_v1 = vld [vmem:[%s14005_s8 + $0x634] sm:$0xf] }
 0x210   : > { %3774 = vmatmul.bf16.gmra.mxu3 %v15089_v15 }
 0x212   : > { %v3646_v2 = vpop.f32.mrf.mxu2  ;;  %v3470_v27 = vpop.f32.mrf.mxu0 }
 0x213   : > { %v3647_v37 = vadd.f32 %v3646_v2, %v3558_v60  ;;  %v3735_v11 = vpop.f32.mrf.mxu3  ;;  %v3471_v16 = vadd.f32 %v3470_v27, %v14550_v5  ;;  %v3559_v36 = vpop.f32.mrf.mxu1  ;;  %v10969_v60 = vld [vmem:[%s20675_s3 + $0x78] sm:$0xf0]  ;;  %v13124_v5 = vld [vmem:[%s14005_s8 + $0x62c] sm:$0xf]  ;;  %v13131_v2 = vld [vmem:[%s14005_s8 + $0x660] sm:$0xf0] }
 0x214   : > { %v10972_v57 = vor.u32 %v13149_v33, %v10969_v60  ;;  %v15134_v19 = vor.u32 %v13124_v5, %v10877_v45  ;;  %v15136_v21 = vor.u32 %v13131_v2, %v10883_v42  ;;  %v15139_v33 = vor.u32 %v13125_v1, %v10885_v34  ;;  %v10111_v42 = vld [vmem:[%s14005_s8 + $0x20] sm:$0xf]  ;;  %v12937_v2 = vld [vmem:[%s14005_s8 + $0x50] sm:$0xf0]  ;;  %v12931_v1 = vld [vmem:[%s14005_s8 + $0x24] sm:$0xf] }
 0x215   : > { %v15116_v3 = vadd.f32 %v3735_v11, %v3647_v37  ;;  %v3560_v55 = vadd.f32 %v3559_v36, %v3471_v16  ;;  %v15132_v11 = vor.u32 %v13130_v4, %v10875_v28  ;;  %v10113_v34 = vld [vmem:[%s14005_s8 + $0x54] sm:$0xf0] }
 0x216   : > { %4230 = vmatpush.bf16.msrb.mxu1 %v10972_v57  ;;  %21074 = vst [vmem:[#allocation115_spill] sm:$0xff] %v15134_v19 }
 0x217   : > { %21073 = vst [vmem:[#allocation114_spill] sm:$0xff] %v15132_v11 }
 0x218   : > { %21075 = vst [vmem:[#allocation116_spill] sm:$0xff] %v15136_v21 }
 0x219   : > { %21076 = vst [vmem:[#allocation117_spill] sm:$0xff] %v15139_v33 }
 0x21a   : > { %v3648_v37 = vpop.f32.mrf.mxu2  ;;  %v3473_v38 = vpop.f32.mrf.mxu0 }
 0x21b   : > { %v3649_v27 = vadd.f32 %v3648_v37, %v3560_v55  ;;  %v3737_v15 = vpop.f32.mrf.mxu3  ;;  %v3474_v16 = vadd.f32 %v3473_v38, %v14556_v30  ;;  %v3562_v36 = vpop.f32.mrf.mxu1  ;;  %v10119_v37 = vld [vmem:[%s14005_s8 + $0x28] sm:$0xf] }
 0x21d   : > { %v15141_v60 = vadd.f32 %v3737_v15, %v3649_v27  ;;  %v3563_v57 = vadd.f32 %v3562_v36, %v3474_v16  ;;  %3512 = vmatmul.bf16.gmra.mxu0 %v15132_v11  ;;  %v12938_v27 = vld [vmem:[%s14005_s8 + $0x58] sm:$0xf0]  ;;  %v12932_v16 = vld [vmem:[%s14005_s8 + $0x2c] sm:$0xf]  ;;  %v10121_v36 = vld [vmem:[%s14005_s8 + $0x5c] sm:$0xf0]  ;;  %v15160_v11 = vor.u32 %v12931_v1, %v10113_v34 }
 0x21e   : > { %3601 = vmatmul.bf16.gmra.mxu1 %v15134_v19  ;;  %v11089_v1 = vld [vmem:[%s20675_s3 + $0x168] sm:$0xf0] }
 0x21f   : > { %3690 = vmatmul.bf16.gmra.mxu2 %v15136_v21  ;;  %v15158_v21 = vor.u32 %v12937_v2, %v10111_v42  ;;  %21078 = vst [vmem:[#allocation119_spill] sm:$0xff] %v15160_v11  ;;  %v13340_v42 = vld [vmem:[%s20675_s3 + $0x664] sm:$0xf0]  ;;  %v13179_v2 = vld [vmem:[%s20675_s3 + $0x164] sm:$0xf] }
 0x220   : > { %3779 = vmatmul.bf16.gmra.mxu3 %v15139_v33 }
 0x221   : > { %21077 = vst [vmem:[#allocation118_spill] sm:$0xff] %v15158_v21 }
 0x222   : > { %v3651_v30 = vpop.f32.mrf.mxu2  ;;  %v3475_v15 = vpop.f32.mrf.mxu0 }
 0x223   : > { %v3652_v38 = vadd.f32 %v3651_v30, %v3563_v57  ;;  %v3740_v55 = vpop.f32.mrf.mxu3  ;;  %v3476_v28 = vadd.f32 %v3475_v15, %v14574_v41  ;;  %v3564_v4 = vpop.f32.mrf.mxu1  ;;  %v15162_v41 = vor.u32 %v12938_v27, %v10119_v37  ;;  %v15165_v15 = vor.u32 %v12932_v16, %v10121_v36 }
 0x224   : > { %v11092_v27 = vor.u32 %v13179_v2, %v11089_v1  ;;  %v10165_v2 = vld [vmem:[%s14005_s8 + $0xbc] sm:$0xf0]  ;;  %v10171_v1 = vld [vmem:[%s14005_s8 + $0x90] sm:$0xf] }
 0x225   : > { %v15148_v5 = vadd.f32 %v3740_v55, %v3652_v38  ;;  %v3565_v45 = vadd.f32 %v3564_v4, %v3476_v28  ;;  %21079 = vst [vmem:[#allocation120_spill] sm:$0xff] %v15162_v41 }
 0x226   : > { %21080 = vst [vmem:[#allocation121_spill] sm:$0xff] %v15165_v15  ;;  %4409 = vmatpush.bf16.msrb.mxu3 %v11092_v27  ;;  %v10173_v27 = vld [vmem:[%s14005_s8 + $0xc4] sm:$0xf0] }
 0x22a   : > { %v3653_v33 = vpop.f32.mrf.mxu2  ;;  %v3478_v19 = vpop.f32.mrf.mxu0 }
 0x22b   : > { %v3654_v57 = vadd.f32 %v3653_v33, %v3565_v45  ;;  %v3742_v30 = vpop.f32.mrf.mxu3  ;;  %v3479_v38 = vadd.f32 %v3478_v19, %v14598_v8  ;;  %v3567_v55 = vpop.f32.mrf.mxu1  ;;  %v13163_v33 = vld [vmem:[%s20675_s3 + $0xe4] sm:$0xf]  ;;  %v11025_v8 = vld [vmem:[%s20675_s3 + $0xe8] sm:$0xf0]  ;;  %v11727_v19 = vld [vmem:[%s20675_s3 + $0x660] sm:$0xf] }
 0x22c   : > { %v11028_v45 = vor.u32 %v13163_v33, %v11025_v8  ;;  %v11728_v37 = vor.u32 %v13340_v42, %v11727_v19  ;;  %v13147_v33 = vld [vmem:[%s20675_s3 + $0x64] sm:$0xf]  ;;  %v12950_v42 = vld [vmem:[%s14005_s8 + $0xb8] sm:$0xf0] }
 0x22d   : > { %v15167_v28 = vadd.f32 %v3742_v30, %v3654_v57  ;;  %v3568_v4 = vadd.f32 %v3567_v55, %v3479_v38  ;;  %3793 = vmatmul.bf16.vlgmr.msra.gmra.mxu0 %v15158_v21 }
 0x22e   : > { %3882 = vmatmul.bf16.vlgmr.msra.gmra.mxu1 %v15160_v11  ;;  %4320 = vmatpush.bf16.msrb.mxu2 %v11028_v45  ;;  %v10163_v45 = vld [vmem:[%s14005_s8 + $0x88] sm:$0xf] }
 0x22f   : > { %3971 = vmatmul.bf16.vlgmr.msra.gmra.mxu2 %v15162_v41  ;;  %4142 = vmatpush.bf16.msrb.mxu0 %v11728_v37  ;;  %v12945_v37 = vld [vmem:[%s14005_s8 + $0x94] sm:$0xf] }
 0x230   : > { %4060 = vmatmul.bf16.vlgmr.msra.gmra.mxu3 %v15165_v15 }
 0x232   : > { %v3656_v34 = vpop.f32.mrf.mxu2  ;;  %v3480_v57 = vpop.f32.mrf.mxu0 }
 0x233   : > { %v3657_v16 = vadd.f32 %v3656_v34, %v3568_v4  ;;  %v3745_v36 = vpop.f32.mrf.mxu3  ;;  %v3481_v30 = vadd.f32 %v3480_v57, %v14622_v59  ;;  %v3569_v38 = vpop.f32.mrf.mxu1  ;;  %v10961_v4 = vld [vmem:[%s20675_s3 + $0x68] sm:$0xf0]  ;;  %v12951_v34 = vld [vmem:[%s14005_s8 + $0xc0] sm:$0xf0] }
 0x234   : > { %v10964_v19 = vor.u32 %v13147_v33, %v10961_v4  ;;  %v12944_v59 = vld [vmem:[%s14005_s8 + $0x8c] sm:$0xf]  ;;  %v15212_v21 = vor.u32 %v12951_v34, %v10171_v1  ;;  %v15215_v33 = vor.u32 %v12945_v37, %v10173_v27  ;;  %v10215_v1 = vld [vmem:[%s14005_s8 + $0xf0] sm:$0xf]  ;;  %v12963_v34 = vld [vmem:[%s14005_s8 + $0x120] sm:$0xf0] }
 0x235   : > { %v15192_v55 = vadd.f32 %v3745_v36, %v3657_v16  ;;  %v3570_v8 = vadd.f32 %v3569_v38, %v3481_v30  ;;  %v15208_v36 = vor.u32 %v12950_v42, %v10163_v45  ;;  %v15210_v11 = vor.u32 %v12944_v59, %v10165_v2  ;;  %v12957_v37 = vld [vmem:[%s14005_s8 + $0xf4] sm:$0xf]  ;;  %v10217_v27 = vld [vmem:[%s14005_s8 + $0x124] sm:$0xf0] }
 0x236   : > { %4231 = vmatpush.bf16.msrb.mxu1 %v10964_v19  ;;  %21083 = vst [vmem:[#allocation124_spill] sm:$0xff] %v15212_v21 }
 0x237   : > { %21081 = vst [vmem:[#allocation122_spill] sm:$0xff] %v15208_v36 }
 0x238   : > { %21082 = vst [vmem:[#allocation123_spill] sm:$0xff] %v15210_v11 }
 0x239   : > { %21084 = vst [vmem:[#allocation125_spill] sm:$0xff] %v15215_v33 }
 0x23a   : > { %v3658_v16 = vpop.f32.mrf.mxu2  ;;  %v3483_v41 = vpop.f32.mrf.mxu0 }
 0x23b   : > { %v3659_v57 = vadd.f32 %v3658_v16, %v3570_v8  ;;  %v3747_v15 = vpop.f32.mrf.mxu3  ;;  %v3484_v30 = vadd.f32 %v3483_v41, %v14628_v39  ;;  %v3572_v38 = vpop.f32.mrf.mxu1  ;;  %v10223_v16 = vld [vmem:[%s14005_s8 + $0xf8] sm:$0xf] }
 0x23d   : > { %v15217_v4 = vadd.f32 %v3747_v15, %v3659_v57  ;;  %v3573_v19 = vadd.f32 %v3572_v38, %v3484_v30  ;;  %3798 = vmatmul.bf16.gmra.mxu0 %v15208_v36  ;;  %v12964_v57 = vld [vmem:[%s14005_s8 + $0x128] sm:$0xf0]  ;;  %v12958_v30 = vld [vmem:[%s14005_s8 + $0xfc] sm:$0xf]  ;;  %v10225_v38 = vld [vmem:[%s14005_s8 + $0x12c] sm:$0xf0]  ;;  %v15236_v36 = vor.u32 %v12957_v37, %v10217_v27 }
 0x23e   : > { %3887 = vmatmul.bf16.gmra.mxu1 %v15210_v11  ;;  %v11081_v37 = vld [vmem:[%s20675_s3 + $0x158] sm:$0xf0] }
 0x23f   : > { %3976 = vmatmul.bf16.gmra.mxu2 %v15212_v21  ;;  %v15234_v21 = vor.u32 %v12963_v34, %v10215_v1  ;;  %21086 = vst [vmem:[#allocation127_spill] sm:$0xff] %v15236_v36  ;;  %v13338_v1 = vld [vmem:[%s20675_s3 + $0x654] sm:$0xf0]  ;;  %v13177_v34 = vld [vmem:[%s20675_s3 + $0x154] sm:$0xf] }
 0x240   : > { %4065 = vmatmul.bf16.gmra.mxu3 %v15215_v33 }
 0x241   : > { %21085 = vst [vmem:[#allocation126_spill] sm:$0xff] %v15234_v21 }
 0x242   : > { %v3661_v39 = vpop.f32.mrf.mxu2  ;;  %v3485_v15 = vpop.f32.mrf.mxu0 }
 0x243   : > { %v3662_v41 = vadd.f32 %v3661_v39, %v3573_v19  ;;  %v3750_v8 = vpop.f32.mrf.mxu3  ;;  %v3486_v45 = vadd.f32 %v3485_v15, %v14646_v61  ;;  %v3574_v42 = vpop.f32.mrf.mxu1  ;;  %v15238_v61 = vor.u32 %v12964_v57, %v10223_v16  ;;  %v15241_v15 = vor.u32 %v12958_v30, %v10225_v38 }
 0x244   : > { %v11084_v57 = vor.u32 %v13177_v34, %v11081_v37  ;;  %v10269_v34 = vld [vmem:[%s14005_s8 + $0x18c] sm:$0xf0]  ;;  %v10275_v37 = vld [vmem:[%s14005_s8 + $0x160] sm:$0xf] }
 0x245   : > { %v15224_v59 = vadd.f32 %v3750_v8, %v3662_v41  ;;  %v3575_v2 = vadd.f32 %v3574_v42, %v3486_v45  ;;  %21087 = vst [vmem:[#allocation128_spill] sm:$0xff] %v15238_v61 }
 0x246   : > { %21088 = vst [vmem:[#allocation129_spill] sm:$0xff] %v15241_v15  ;;  %4410 = vmatpush.bf16.msrb.mxu3 %v11084_v57  ;;  %v10277_v57 = vld [vmem:[%s14005_s8 + $0x194] sm:$0xf0] }
 0x24a   : > { %v3663_v33 = vpop.f32.mrf.mxu2  ;;  %v3488_v11 = vpop.f32.mrf.mxu0 }
 0x24b   : > { %v3664_v19 = vadd.f32 %v3663_v33, %v3575_v2  ;;  %v3752_v39 = vpop.f32.mrf.mxu3  ;;  %v3489_v41 = vadd.f32 %v3488_v11, %v14670_v63  ;;  %v3577_v8 = vpop.f32.mrf.mxu1  ;;  %v13161_v33 = vld [vmem:[%s20675_s3 + $0xd4] sm:$0xf]  ;;  %v11017_v63 = vld [vmem:[%s20675_s3 + $0xd8] sm:$0xf0]  ;;  %v11719_v11 = vld [vmem:[%s20675_s3 + $0x650] sm:$0xf] }
 0x24c   : > { %v11020_v2 = vor.u32 %v13161_v33, %v11017_v63  ;;  %v11720_v16 = vor.u32 %v13338_v1, %v11719_v11  ;;  %v13145_v33 = vld [vmem:[%s20675_s3 + $0x54] sm:$0xf]  ;;  %v12976_v1 = vld [vmem:[%s14005_s8 + $0x188] sm:$0xf0] }
 0x24d   : > { %v15243_v45 = vadd.f32 %v3752_v39, %v3664_v19  ;;  %v3578_v42 = vadd.f32 %v3577_v8, %v3489_v41  ;;  %3803 = vmatmul.bf16.gmra.mxu0 %v15234_v21 }
 0x24e   : > { %3892 = vmatmul.bf16.gmra.mxu1 %v15236_v36  ;;  %4321 = vmatpush.bf16.msrb.mxu2 %v11020_v2  ;;  %v10267_v2 = vld [vmem:[%s14005_s8 + $0x158] sm:$0xf] }
 0x24f   : > { %3981 = vmatmul.bf16.gmra.mxu2 %v15238_v61  ;;  %4143 = vmatpush.bf16.msrb.mxu0 %v11720_v16  ;;  %v12971_v16 = vld [vmem:[%s14005_s8 + $0x164] sm:$0xf] }
 0x250   : > { %4070 = vmatmul.bf16.gmra.mxu3 %v15241_v15 }
 0x252   : > { %v3666_v27 = vpop.f32.mrf.mxu2  ;;  %v3490_v19 = vpop.f32.mrf.mxu0 }
 0x253   : > { %v3667_v30 = vadd.f32 %v3666_v27, %v3578_v42  ;;  %v3755_v38 = vpop.f32.mrf.mxu3  ;;  %v3491_v39 = vadd.f32 %v3490_v19, %v14694_v22  ;;  %v3579_v41 = vpop.f32.mrf.mxu1  ;;  %v10953_v42 = vld [vmem:[%s20675_s3 + $0x58] sm:$0xf0]  ;;  %v12977_v27 = vld [vmem:[%s14005_s8 + $0x190] sm:$0xf0] }
 0x254   : > { %v10956_v11 = vor.u32 %v13145_v33, %v10953_v42  ;;  %v12970_v22 = vld [vmem:[%s14005_s8 + $0x15c] sm:$0xf]  ;;  %v15288_v21 = vor.u32 %v12977_v27, %v10275_v37  ;;  %v15291_v33 = vor.u32 %v12971_v16, %v10277_v57  ;;  %v10319_v37 = vld [vmem:[%s14005_s8 + $0x1c0] sm:$0xf]  ;;  %v12989_v27 = vld [vmem:[%s14005_s8 + $0x1f0] sm:$0xf0] }
 0x255   : > { %v15268_v8 = vadd.f32 %v3755_v38, %v3667_v30  ;;  %v3580_v63 = vadd.f32 %v3579_v41, %v3491_v39  ;;  %v15284_v38 = vor.u32 %v12976_v1, %v10267_v2  ;;  %v15286_v36 = vor.u32 %v12970_v22, %v10269_v34  ;;  %v12983_v16 = vld [vmem:[%s14005_s8 + $0x1c4] sm:$0xf]  ;;  %v10321_v57 = vld [vmem:[%s14005_s8 + $0x1f4] sm:$0xf0] }
 0x256   : > { %4232 = vmatpush.bf16.msrb.mxu1 %v10956_v11  ;;  %21091 = vst [vmem:[#allocation132_spill] sm:$0xff] %v15288_v21 }
 0x257   : > { %21089 = vst [vmem:[#allocation130_spill] sm:$0xff] %v15284_v38 }
 0x258   : > { %21090 = vst [vmem:[#allocation131_spill] sm:$0xff] %v15286_v36 }
 0x259   : > { %21092 = vst [vmem:[#allocation133_spill] sm:$0xff] %v15291_v33 }
 0x25a   : > { %v3668_v30 = vpop.f32.mrf.mxu2  ;;  %v3493_v61 = vpop.f32.mrf.mxu0 }
 0x25b   : > { %v3669_v19 = vadd.f32 %v3668_v30, %v3580_v63  ;;  %v3757_v15 = vpop.f32.mrf.mxu3  ;;  %v3494_v39 = vadd.f32 %v3493_v61, %v14700_v56  ;;  %v3582_v41 = vpop.f32.mrf.mxu1  ;;  %v10327_v30 = vld [vmem:[%s14005_s8 + $0x1c8] sm:$0xf] }
 0x25d   : > { %v15293_v42 = vadd.f32 %v3757_v15, %v3669_v19  ;;  %v3583_v11 = vadd.f32 %v3582_v41, %v3494_v39  ;;  %3808 = vmatmul.bf16.gmra.mxu0 %v15284_v38  ;;  %v12990_v19 = vld [vmem:[%s14005_s8 + $0x1f8] sm:$0xf0]  ;;  %v12984_v39 = vld [vmem:[%s14005_s8 + $0x1cc] sm:$0xf]  ;;  %v10329_v41 = vld [vmem:[%s14005_s8 + $0x1fc] sm:$0xf0]  ;;  %v15312_v38 = vor.u32 %v12983_v16, %v10321_v57 }
 0x25e   : > { %3897 = vmatmul.bf16.gmra.mxu1 %v15286_v36  ;;  %v11073_v16 = vld [vmem:[%s20675_s3 + $0x148] sm:$0xf0] }
 0x25f   : > { %3986 = vmatmul.bf16.gmra.mxu2 %v15288_v21  ;;  %v15310_v21 = vor.u32 %v12989_v27, %v10319_v37  ;;  %21094 = vst [vmem:[#allocation135_spill] sm:$0xff] %v15312_v38  ;;  %v13336_v37 = vld [vmem:[%s20675_s3 + $0x644] sm:$0xf0]  ;;  %v13175_v27 = vld [vmem:[%s20675_s3 + $0x144] sm:$0xf] }
 0x260   : > { %4075 = vmatmul.bf16.gmra.mxu3 %v15291_v33 }
 0x261   : > { %21093 = vst [vmem:[#allocation134_spill] sm:$0xff] %v15310_v21 }
 0x262   : > { %v3671_v56 = vpop.f32.mrf.mxu2  ;;  %v3495_v15 = vpop.f32.mrf.mxu0 }
 0x263   : > { %v3672_v61 = vadd.f32 %v3671_v56, %v3583_v11  ;;  %v3760_v63 = vpop.f32.mrf.mxu3  ;;  %v3496_v2 = vadd.f32 %v3495_v15, %v14718_v29  ;;  %v3584_v1 = vpop.f32.mrf.mxu1  ;;  %v15314_v29 = vor.u32 %v12990_v19, %v10327_v30  ;;  %v15317_v15 = vor.u32 %v12984_v39, %v10329_v41 }
 0x264   : > { %v11076_v19 = vor.u32 %v13175_v27, %v11073_v16  ;;  %v10373_v27 = vld [vmem:[%s14005_s8 + $0x25c] sm:$0xf0]  ;;  %v10379_v16 = vld [vmem:[%s14005_s8 + $0x230] sm:$0xf] }
 0x265   : > { %v15300_v22 = vadd.f32 %v3760_v63, %v3672_v61  ;;  %v3585_v34 = vadd.f32 %v3584_v1, %v3496_v2  ;;  %21095 = vst [vmem:[#allocation136_spill] sm:$0xff] %v15314_v29 }
 0x266   : > { %21096 = vst [vmem:[#allocation137_spill] sm:$0xff] %v15317_v15  ;;  %4411 = vmatpush.bf16.msrb.mxu3 %v11076_v19  ;;  %v10381_v19 = vld [vmem:[%s14005_s8 + $0x264] sm:$0xf0] }
 0x26a   : > { %v3673_v33 = vpop.f32.mrf.mxu2  ;;  %v3498_v36 = vpop.f32.mrf.mxu0 }
 0x26b   : > { %v3674_v11 = vadd.f32 %v3673_v33, %v3585_v34  ;;  %v3762_v56 = vpop.f32.mrf.mxu3  ;;  %v3499_v61 = vadd.f32 %v3498_v36, %v14742_v40  ;;  %v3587_v63 = vpop.f32.mrf.mxu1  ;;  %v13159_v33 = vld [vmem:[%s20675_s3 + $0xc4] sm:$0xf]  ;;  %v11009_v40 = vld [vmem:[%s20675_s3 + $0xc8] sm:$0xf0]  ;;  %v11711_v36 = vld [vmem:[%s20675_s3 + $0x640] sm:$0xf] }
 0x26c   : > { %v11012_v34 = vor.u32 %v13159_v33, %v11009_v40  ;;  %v11712_v30 = vor.u32 %v13336_v37, %v11711_v36  ;;  %v13143_v33 = vld [vmem:[%s20675_s3 + $0x44] sm:$0xf]  ;;  %v13002_v37 = vld [vmem:[%s14005_s8 + $0x258] sm:$0xf0] }
 0x26d   : > { %v15319_v2 = vadd.f32 %v3762_v56, %v3674_v11  ;;  %v3588_v1 = vadd.f32 %v3587_v63, %v3499_v61  ;;  %3813 = vmatmul.bf16.gmra.mxu0 %v15310_v21 }
 0x26e   : > { %3902 = vmatmul.bf16.gmra.mxu1 %v15312_v38  ;;  %4322 = vmatpush.bf16.msrb.mxu2 %v11012_v34  ;;  %v10371_v34 = vld [vmem:[%s14005_s8 + $0x228] sm:$0xf] }
 0x26f   : > { %3991 = vmatmul.bf16.gmra.mxu2 %v15314_v29  ;;  %4144 = vmatpush.bf16.msrb.mxu0 %v11712_v30  ;;  %v12997_v30 = vld [vmem:[%s14005_s8 + $0x234] sm:$0xf] }
 0x270   : > { %4080 = vmatmul.bf16.gmra.mxu3 %v15317_v15 }
 0x272   : > { %v3676_v57 = vpop.f32.mrf.mxu2  ;;  %v3500_v11 = vpop.f32.mrf.mxu0 }
 0x273   : > { %v3677_v39 = vadd.f32 %v3676_v57, %v3588_v1  ;;  %v3765_v41 = vpop.f32.mrf.mxu3  ;;  %v3501_v56 = vadd.f32 %v3500_v11, %v14766_v46  ;;  %v3589_v61 = vpop.f32.mrf.mxu1  ;;  %v10945_v1 = vld [vmem:[%s20675_s3 + $0x48] sm:$0xf0]  ;;  %v13003_v57 = vld [vmem:[%s14005_s8 + $0x260] sm:$0xf0] }
 0x274   : > { %v10948_v36 = vor.u32 %v13143_v33, %v10945_v1  ;;  %v12996_v46 = vld [vmem:[%s14005_s8 + $0x22c] sm:$0xf]  ;;  %v15364_v21 = vor.u32 %v13003_v57, %v10379_v16  ;;  %v15367_v33 = vor.u32 %v12997_v30, %v10381_v19  ;;  %v10423_v16 = vld [vmem:[%s14005_s8 + $0x290] sm:$0xf]  ;;  %v13015_v57 = vld [vmem:[%s14005_s8 + $0x2c0] sm:$0xf0] }
 0x275   : > { %v15344_v63 = vadd.f32 %v3765_v41, %v3677_v39  ;;  %v3590_v40 = vadd.f32 %v3589_v61, %v3501_v56  ;;  %v15360_v41 = vor.u32 %v13002_v37, %v10371_v34  ;;  %v15362_v38 = vor.u32 %v12996_v46, %v10373_v27  ;;  %v13009_v30 = vld [vmem:[%s14005_s8 + $0x294] sm:$0xf]  ;;  %v10425_v19 = vld [vmem:[%s14005_s8 + $0x2c4] sm:$0xf0] }
 0x276   : > { %4233 = vmatpush.bf16.msrb.mxu1 %v10948_v36  ;;  %21099 = vst [vmem:[#allocation140_spill] sm:$0xff] %v15364_v21 }
 0x277   : > { %21097 = vst [vmem:[#allocation138_spill] sm:$0xff] %v15360_v41 }
 0x278   : > { %21098 = vst [vmem:[#allocation139_spill] sm:$0xff] %v15362_v38 }
 0x279   : > { %21100 = vst [vmem:[#allocation141_spill] sm:$0xff] %v15367_v33 }
 0x27a   : > { %v3678_v39 = vpop.f32.mrf.mxu2  ;;  %v3503_v29 = vpop.f32.mrf.mxu0 }
 0x27b   : > { %v3679_v11 = vadd.f32 %v3678_v39, %v3590_v40  ;;  %v3767_v15 = vpop.f32.mrf.mxu3  ;;  %v3504_v56 = vadd.f32 %v3503_v29, %v14772_v62  ;;  %v3592_v61 = vpop.f32.mrf.mxu1  ;;  %v10431_v39 = vld [vmem:[%s14005_s8 + $0x298] sm:$0xf] }
 0x27d   : > { %v15369_v1 = vadd.f32 %v3767_v15, %v3679_v11  ;;  %v3593_v36 = vadd.f32 %v3592_v61, %v3504_v56  ;;  %3818 = vmatmul.bf16.gmra.mxu0 %v15360_v41  ;;  %v13016_v11 = vld [vmem:[%s14005_s8 + $0x2c8] sm:$0xf0]  ;;  %v13010_v56 = vld [vmem:[%s14005_s8 + $0x29c] sm:$0xf]  ;;  %v10433_v61 = vld [vmem:[%s14005_s8 + $0x2cc] sm:$0xf0]  ;;  %v15388_v41 = vor.u32 %v13009_v30, %v10425_v19 }
 0x27e   : > { %3907 = vmatmul.bf16.gmra.mxu1 %v15362_v38  ;;  %v11065_v30 = vld [vmem:[%s20675_s3 + $0x138] sm:$0xf0] }
 0x27f   : > { %3996 = vmatmul.bf16.gmra.mxu2 %v15364_v21  ;;  %v15386_v21 = vor.u32 %v13015_v57, %v10423_v16  ;;  %21102 = vst [vmem:[#allocation143_spill] sm:$0xff] %v15388_v41  ;;  %v13334_v16 = vld [vmem:[%s20675_s3 + $0x634] sm:$0xf0]  ;;  %v13173_v57 = vld [vmem:[%s20675_s3 + $0x134] sm:$0xf] }
 0x280   : > { %4085 = vmatmul.bf16.gmra.mxu3 %v15367_v33 }
 0x281   : > { %21101 = vst [vmem:[#allocation142_spill] sm:$0xff] %v15386_v21 }
 0x282   : > { %v3681_v62 = vpop.f32.mrf.mxu2  ;;  %v3505_v15 = vpop.f32.mrf.mxu0 }
 0x283   : > { %v3682_v29 = vadd.f32 %v3681_v62, %v3593_v36  ;;  %v3770_v40 = vpop.f32.mrf.mxu3  ;;  %v3506_v34 = vadd.f32 %v3505_v15, %v14790_v6  ;;  %v3594_v37 = vpop.f32.mrf.mxu1  ;;  %v15390_v6 = vor.u32 %v13016_v11, %v10431_v39  ;;  %v15393_v15 = vor.u32 %v13010_v56, %v10433_v61 }
 0x284   : > { %v11068_v11 = vor.u32 %v13173_v57, %v11065_v30  ;;  %v10477_v57 = vld [vmem:[%s14005_s8 + $0x32c] sm:$0xf0]  ;;  %v10483_v30 = vld [vmem:[%s14005_s8 + $0x300] sm:$0xf] }
 0x285   : > { %v15376_v46 = vadd.f32 %v3770_v40, %v3682_v29  ;;  %v3595_v27 = vadd.f32 %v3594_v37, %v3506_v34  ;;  %21103 = vst [vmem:[#allocation144_spill] sm:$0xff] %v15390_v6 }
 0x286   : > { %21104 = vst [vmem:[#allocation145_spill] sm:$0xff] %v15393_v15  ;;  %4412 = vmatpush.bf16.msrb.mxu3 %v11068_v11  ;;  %v10485_v11 = vld [vmem:[%s14005_s8 + $0x334] sm:$0xf0] }
 0x28a   : > { %v3683_v33 = vpop.f32.mrf.mxu2  ;;  %v3508_v38 = vpop.f32.mrf.mxu0 }
 0x28b   : > { %v3684_v36 = vadd.f32 %v3683_v33, %v3595_v27  ;;  %v3772_v62 = vpop.f32.mrf.mxu3  ;;  %v3509_v29 = vadd.f32 %v3508_v38, %v14814_v47  ;;  %v3597_v40 = vpop.f32.mrf.mxu1  ;;  %v13157_v33 = vld [vmem:[%s20675_s3 + $0xb4] sm:$0xf]  ;;  %v11001_v47 = vld [vmem:[%s20675_s3 + $0xb8] sm:$0xf0]  ;;  %v11703_v38 = vld [vmem:[%s20675_s3 + $0x630] sm:$0xf] }
 0x28c   : > { %v11004_v27 = vor.u32 %v13157_v33, %v11001_v47  ;;  %v11704_v39 = vor.u32 %v13334_v16, %v11703_v38  ;;  %v13141_v33 = vld [vmem:[%s20675_s3 + $0x34] sm:$0xf]  ;;  %v13028_v16 = vld [vmem:[%s14005_s8 + $0x328] sm:$0xf0] }
 0x28d   : > { %v15395_v34 = vadd.f32 %v3772_v62, %v3684_v36  ;;  %v3598_v37 = vadd.f32 %v3597_v40, %v3509_v29  ;;  %3823 = vmatmul.bf16.gmra.mxu0 %v15386_v21 }
 0x28e   : > { %3912 = vmatmul.bf16.gmra.mxu1 %v15388_v41  ;;  %4323 = vmatpush.bf16.msrb.mxu2 %v11004_v27  ;;  %v10475_v27 = vld [vmem:[%s14005_s8 + $0x2f8] sm:$0xf] }
 0x28f   : > { %4001 = vmatmul.bf16.gmra.mxu2 %v15390_v6  ;;  %4145 = vmatpush.bf16.msrb.mxu0 %v11704_v39  ;;  %v13023_v39 = vld [vmem:[%s14005_s8 + $0x304] sm:$0xf] }
 0x290   : > { %4090 = vmatmul.bf16.gmra.mxu3 %v15393_v15 }
 0x292   : > { %v3686_v19 = vpop.f32.mrf.mxu2  ;;  %v3510_v36 = vpop.f32.mrf.mxu0 }
 0x293   : > { %v3687_v56 = vadd.f32 %v3686_v19, %v3598_v37  ;;  %v3775_v61 = vpop.f32.mrf.mxu3  ;;  %v3511_v62 = vadd.f32 %v3510_v36, %v14838_v32  ;;  %v3599_v29 = vpop.f32.mrf.mxu1  ;;  %v10937_v37 = vld [vmem:[%s20675_s3 + $0x38] sm:$0xf0]  ;;  %v13029_v19 = vld [vmem:[%s14005_s8 + $0x330] sm:$0xf0] }
 0x294   : > { %v10940_v38 = vor.u32 %v13141_v33, %v10937_v37  ;;  %v13022_v32 = vld [vmem:[%s14005_s8 + $0x2fc] sm:$0xf]  ;;  %v15440_v21 = vor.u32 %v13029_v19, %v10483_v30  ;;  %v15443_v33 = vor.u32 %v13023_v39, %v10485_v11  ;;  %v10527_v30 = vld [vmem:[%s14005_s8 + $0x360] sm:$0xf]  ;;  %v13041_v19 = vld [vmem:[%s14005_s8 + $0x390] sm:$0xf0] }
 0x295   : > { %v15420_v40 = vadd.f32 %v3775_v61, %v3687_v56  ;;  %v3600_v47 = vadd.f32 %v3599_v29, %v3511_v62  ;;  %v15436_v61 = vor.u32 %v13028_v16, %v10475_v27  ;;  %v15438_v41 = vor.u32 %v13022_v32, %v10477_v57  ;;  %v13035_v39 = vld [vmem:[%s14005_s8 + $0x364] sm:$0xf]  ;;  %v10529_v11 = vld [vmem:[%s14005_s8 + $0x394] sm:$0xf0] }
 0x296   : > { %4234 = vmatpush.bf16.msrb.mxu1 %v10940_v38  ;;  %21107 = vst [vmem:[#allocation148_spill] sm:$0xff] %v15440_v21 }
 0x297   : > { %21105 = vst [vmem:[#allocation146_spill] sm:$0xff] %v15436_v61 }
 0x298   : > { %21106 = vst [vmem:[#allocation147_spill] sm:$0xff] %v15438_v41 }
 0x299   : > { %21108 = vst [vmem:[#allocation149_spill] sm:$0xff] %v15443_v33 }
 0x29a   : > { %v3688_v56 = vpop.f32.mrf.mxu2  ;;  %v3513_v6 = vpop.f32.mrf.mxu0 }
 0x29b   : > { %v3689_v36 = vadd.f32 %v3688_v56, %v3600_v47  ;;  %v3777_v15 = vpop.f32.mrf.mxu3  ;;  %v3514_v62 = vadd.f32 %v3513_v6, %v14844_v18  ;;  %v3602_v29 = vpop.f32.mrf.mxu1  ;;  %v10535_v56 = vld [vmem:[%s14005_s8 + $0x368] sm:$0xf] }
 0x29d   : > { %v15445_v37 = vadd.f32 %v3777_v15, %v3689_v36  ;;  %v3603_v38 = vadd.f32 %v3602_v29, %v3514_v62  ;;  %3828 = vmatmul.bf16.gmra.mxu0 %v15436_v61  ;;  %v13042_v36 = vld [vmem:[%s14005_s8 + $0x398] sm:$0xf0]  ;;  %v13036_v62 = vld [vmem:[%s14005_s8 + $0x36c] sm:$0xf]  ;;  %v10537_v29 = vld [vmem:[%s14005_s8 + $0x39c] sm:$0xf0]  ;;  %v15464_v61 = vor.u32 %v13035_v39, %v10529_v11 }
 0x29e   : > { %3917 = vmatmul.bf16.gmra.mxu1 %v15438_v41  ;;  %v11057_v39 = vld [vmem:[%s20675_s3 + $0x128] sm:$0xf0] }
 0x29f   : > { %4006 = vmatmul.bf16.gmra.mxu2 %v15440_v21  ;;  %v15462_v21 = vor.u32 %v13041_v19, %v10527_v30  ;;  %21110 = vst [vmem:[#allocation151_spill] sm:$0xff] %v15464_v61  ;;  %v13332_v30 = vld [vmem:[%s20675_s3 + $0x624] sm:$0xf0]  ;;  %v13171_v19 = vld [vmem:[%s20675_s3 + $0x124] sm:$0xf] }
 0x2a0   : > { %4095 = vmatmul.bf16.gmra.mxu3 %v15443_v33 }
 0x2a1   : > { %21109 = vst [vmem:[#allocation150_spill] sm:$0xff] %v15462_v21 }
 0x2a2   : > { %v3691_v18 = vpop.f32.mrf.mxu2  ;;  %v3515_v15 = vpop.f32.mrf.mxu0 }
 0x2a3   : > { %v3692_v6 = vadd.f32 %v3691_v18, %v3603_v38  ;;  %v3780_v47 = vpop.f32.mrf.mxu3  ;;  %v3516_v27 = vadd.f32 %v3515_v15, %v14863_v35  ;;  %v3604_v16 = vpop.f32.mrf.mxu1  ;;  %v15466_v35 = vor.u32 %v13042_v36, %v10535_v56  ;;  %v15469_v15 = vor.u32 %v13036_v62, %v10537_v29 }
 0x2a4   : > { %v11060_v36 = vor.u32 %v13171_v19, %v11057_v39  ;;  %v10581_v19 = vld [vmem:[%s14005_s8 + $0x3fc] sm:$0xf0]  ;;  %v10587_v39 = vld [vmem:[%s14005_s8 + $0x3d0] sm:$0xf] }
 0x2a5   : > { %v15452_v32 = vadd.f32 %v3780_v47, %v3692_v6  ;;  %v3605_v57 = vadd.f32 %v3604_v16, %v3516_v27  ;;  %21111 = vst [vmem:[#allocation152_spill] sm:$0xff] %v15466_v35 }
 0x2a6   : > { %21112 = vst [vmem:[#allocation153_spill] sm:$0xff] %v15469_v15  ;;  %4413 = vmatpush.bf16.msrb.mxu3 %v11060_v36  ;;  %v10589_v36 = vld [vmem:[%s14005_s8 + $0x404] sm:$0xf0] }
 0x2aa   : > { %v3693_v33 = vpop.f32.mrf.mxu2  ;;  %v3794_v41 = vpop.f32.mrf.mxu0 }
 0x2ab   : > { %v3694_v38 = vadd.f32 %v3693_v33, %v3605_v57  ;;  %v3782_v18 = vpop.f32.mrf.mxu3  ;;  %v3795_v6 = vadd.f32 %v3794_v41, %v14888_v58  ;;  %v3883_v47 = vpop.f32.mrf.mxu1  ;;  %v13155_v33 = vld [vmem:[%s20675_s3 + $0xa4] sm:$0xf]  ;;  %v10993_v58 = vld [vmem:[%s20675_s3 + $0xa8] sm:$0xf0]  ;;  %v11695_v41 = vld [vmem:[%s20675_s3 + $0x620] sm:$0xf] }
 0x2ac   : > { %v10996_v57 = vor.u32 %v13155_v33, %v10993_v58  ;;  %v11696_v56 = vor.u32 %v13332_v30, %v11695_v41  ;;  %v13139_v33 = vld [vmem:[%s20675_s3 + $0x24] sm:$0xf]  ;;  %v13054_v30 = vld [vmem:[%s14005_s8 + $0x3f8] sm:$0xf0] }
 0x2ad   : > { %v15471_v27 = vadd.f32 %v3782_v18, %v3694_v38  ;;  %v3884_v16 = vadd.f32 %v3883_v47, %v3795_v6  ;;  %3833 = vmatmul.bf16.gmra.mxu0 %v15462_v21 }
 0x2ae   : > { %3922 = vmatmul.bf16.gmra.mxu1 %v15464_v61  ;;  %4324 = vmatpush.bf16.msrb.mxu2 %v10996_v57  ;;  %v10579_v57 = vld [vmem:[%s14005_s8 + $0x3c8] sm:$0xf] }
 0x2af   : > { %4011 = vmatmul.bf16.gmra.mxu2 %v15466_v35  ;;  %4146 = vmatpush.bf16.msrb.mxu0 %v11696_v56  ;;  %v13049_v56 = vld [vmem:[%s14005_s8 + $0x3d4] sm:$0xf] }
 0x2b0   : > { %4100 = vmatmul.bf16.gmra.mxu3 %v15469_v15 }
 0x2b2   : > { %v3972_v11 = vpop.f32.mrf.mxu2  ;;  %v3796_v38 = vpop.f32.mrf.mxu0 }
 0x2b3   : > { %v3973_v62 = vadd.f32 %v3972_v11, %v3884_v16  ;;  %v4061_v29 = vpop.f32.mrf.mxu3  ;;  %v3797_v18 = vadd.f32 %v3796_v38, %v14913_v0  ;;  %v3885_v6 = vpop.f32.mrf.mxu1  ;;  %v10929_v16 = vld [vmem:[%s20675_s3 + $0x28] sm:$0xf0]  ;;  %v13055_v11 = vld [vmem:[%s14005_s8 + $0x400] sm:$0xf0] }
 0x2b4   : > { %v10932_v41 = vor.u32 %v13139_v33, %v10929_v16  ;;  %v13048_v0 = vld [vmem:[%s14005_s8 + $0x3cc] sm:$0xf]  ;;  %v15516_v21 = vor.u32 %v13055_v11, %v10587_v39  ;;  %v15519_v33 = vor.u32 %v13049_v56, %v10589_v36  ;;  %v10631_v39 = vld [vmem:[%s14005_s8 + $0x430] sm:$0xf]  ;;  %v13067_v11 = vld [vmem:[%s14005_s8 + $0x460] sm:$0xf0] }
 0x2b5   : > { %v15496_v47 = vadd.f32 %v4061_v29, %v3973_v62  ;;  %v3886_v58 = vadd.f32 %v3885_v6, %v3797_v18  ;;  %v15512_v29 = vor.u32 %v13054_v30, %v10579_v57  ;;  %v15514_v61 = vor.u32 %v13048_v0, %v10581_v19  ;;  %v13061_v56 = vld [vmem:[%s14005_s8 + $0x434] sm:$0xf]  ;;  %v10633_v36 = vld [vmem:[%s14005_s8 + $0x464] sm:$0xf0] }
 0x2b6   : > { %4235 = vmatpush.bf16.msrb.mxu1 %v10932_v41  ;;  %21115 = vst [vmem:[#allocation156_spill] sm:$0xff] %v15516_v21 }
 0x2b7   : > { %21113 = vst [vmem:[#allocation154_spill] sm:$0xff] %v15512_v29 }
 0x2b8   : > { %21114 = vst [vmem:[#allocation155_spill] sm:$0xff] %v15514_v61 }
 0x2b9   : > { %21116 = vst [vmem:[#allocation157_spill] sm:$0xff] %v15519_v33 }
 0x2ba   : > { %v3974_v62 = vpop.f32.mrf.mxu2  ;;  %v3799_v35 = vpop.f32.mrf.mxu0 }
 0x2bb   : > { %v3975_v38 = vadd.f32 %v3974_v62, %v3886_v58  ;;  %v4063_v15 = vpop.f32.mrf.mxu3  ;;  %v3800_v18 = vadd.f32 %v3799_v35, %v14920_v7  ;;  %v3888_v6 = vpop.f32.mrf.mxu1  ;;  %v10639_v62 = vld [vmem:[%s14005_s8 + $0x438] sm:$0xf] }
 0x2bd   : > { %v15521_v16 = vadd.f32 %v4063_v15, %v3975_v38  ;;  %v3889_v41 = vadd.f32 %v3888_v6, %v3800_v18  ;;  %3838 = vmatmul.bf16.gmra.mxu0 %v15512_v29  ;;  %v13068_v38 = vld [vmem:[%s14005_s8 + $0x468] sm:$0xf0]  ;;  %v13062_v18 = vld [vmem:[%s14005_s8 + $0x43c] sm:$0xf]  ;;  %v10641_v6 = vld [vmem:[%s14005_s8 + $0x46c] sm:$0xf0]  ;;  %v15540_v29 = vor.u32 %v13061_v56, %v10633_v36 }
 0x2be   : > { %3927 = vmatmul.bf16.gmra.mxu1 %v15514_v61  ;;  %v11049_v56 = vld [vmem:[%s20675_s3 + $0x118] sm:$0xf0] }
 0x2bf   : > { %4016 = vmatmul.bf16.gmra.mxu2 %v15516_v21  ;;  %v15538_v21 = vor.u32 %v13067_v11, %v10631_v39  ;;  %21118 = vst [vmem:[#allocation159_spill] sm:$0xff] %v15540_v29  ;;  %v13330_v39 = vld [vmem:[%s20675_s3 + $0x614] sm:$0xf0]  ;;  %v13169_v11 = vld [vmem:[%s20675_s3 + $0x114] sm:$0xf] }
 0x2c0   : > { %4105 = vmatmul.bf16.gmra.mxu3 %v15519_v33 }
 0x2c1   : > { %21117 = vst [vmem:[#allocation158_spill] sm:$0xff] %v15538_v21 }
 0x2c2   : > { %v3977_v7 = vpop.f32.mrf.mxu2  ;;  %v3801_v15 = vpop.f32.mrf.mxu0 }
 0x2c3   : > { %v3978_v35 = vadd.f32 %v3977_v7, %v3889_v41  ;;  %v4066_v58 = vpop.f32.mrf.mxu3  ;;  %v3802_v57 = vadd.f32 %v3801_v15, %v14939_v43  ;;  %v3890_v30 = vpop.f32.mrf.mxu1  ;;  %v15542_v43 = vor.u32 %v13068_v38, %v10639_v62  ;;  %v15545_v15 = vor.u32 %v13062_v18, %v10641_v6 }
 0x2c4   : > { %v11052_v38 = vor.u32 %v13169_v11, %v11049_v56  ;;  %v10685_v11 = vld [vmem:[%s14005_s8 + $0x4cc] sm:$0xf0]  ;;  %v10691_v56 = vld [vmem:[%s14005_s8 + $0x4a0] sm:$0xf] }
 0x2c5   : > { %v15528_v0 = vadd.f32 %v4066_v58, %v3978_v35  ;;  %v3891_v19 = vadd.f32 %v3890_v30, %v3802_v57  ;;  %21119 = vst [vmem:[#allocation160_spill] sm:$0xff] %v15542_v43 }
 0x2c6   : > { %21120 = vst [vmem:[#allocation161_spill] sm:$0xff] %v15545_v15  ;;  %4414 = vmatpush.bf16.msrb.mxu3 %v11052_v38  ;;  %v10693_v38 = vld [vmem:[%s14005_s8 + $0x4d4] sm:$0xf0] }
 0x2ca   : > { %v3979_v33 = vpop.f32.mrf.mxu2  ;;  %v3804_v61 = vpop.f32.mrf.mxu0 }
 0x2cb   : > { %v3980_v41 = vadd.f32 %v3979_v33, %v3891_v19  ;;  %v4068_v7 = vpop.f32.mrf.mxu3  ;;  %v3805_v35 = vadd.f32 %v3804_v61, %v14964_v17  ;;  %v3893_v58 = vpop.f32.mrf.mxu1  ;;  %v13153_v33 = vld [vmem:[%s20675_s3 + $0x94] sm:$0xf]  ;;  %v10985_v17 = vld [vmem:[%s20675_s3 + $0x98] sm:$0xf0]  ;;  %v11687_v61 = vld [vmem:[%s20675_s3 + $0x610] sm:$0xf] }
 0x2cc   : > { %v10988_v19 = vor.u32 %v13153_v33, %v10985_v17  ;;  %v11688_v62 = vor.u32 %v13330_v39, %v11687_v61  ;;  %v13137_v33 = vld [vmem:[%s20675_s3 + $0x14] sm:$0xf]  ;;  %v13080_v39 = vld [vmem:[%s14005_s8 + $0x4c8] sm:$0xf0] }
 0x2cd   : > { %v15547_v57 = vadd.f32 %v4068_v7, %v3980_v41  ;;  %v3894_v30 = vadd.f32 %v3893_v58, %v3805_v35  ;;  %3843 = vmatmul.bf16.gmra.mxu0 %v15538_v21 }
 0x2ce   : > { %3932 = vmatmul.bf16.gmra.mxu1 %v15540_v29  ;;  %4325 = vmatpush.bf16.msrb.mxu2 %v10988_v19  ;;  %v10683_v19 = vld [vmem:[%s14005_s8 + $0x498] sm:$0xf] }
 0x2cf   : > { %4021 = vmatmul.bf16.gmra.mxu2 %v15542_v43  ;;  %4147 = vmatpush.bf16.msrb.mxu0 %v11688_v62  ;;  %v13075_v62 = vld [vmem:[%s14005_s8 + $0x4a4] sm:$0xf] }
 0x2d0   : > { %4110 = vmatmul.bf16.gmra.mxu3 %v15545_v15 }
 0x2d2   : > { %v3982_v36 = vpop.f32.mrf.mxu2  ;;  %v3806_v41 = vpop.f32.mrf.mxu0 }
 0x2d3   : > { %v3983_v18 = vadd.f32 %v3982_v36, %v3894_v30  ;;  %v4071_v6 = vpop.f32.mrf.mxu3  ;;  %v3807_v7 = vadd.f32 %v3806_v41, %v14989_v31  ;;  %v3895_v35 = vpop.f32.mrf.mxu1  ;;  %v10921_v30 = vld [vmem:[%s20675_s3 + $0x18] sm:$0xf0]  ;;  %v13081_v36 = vld [vmem:[%s14005_s8 + $0x4d0] sm:$0xf0] }
 0x2d4   : > { %v10924_v61 = vor.u32 %v13137_v33, %v10921_v30  ;;  %v13074_v31 = vld [vmem:[%s14005_s8 + $0x49c] sm:$0xf]  ;;  %v15592_v21 = vor.u32 %v13081_v36, %v10691_v56  ;;  %v15595_v33 = vor.u32 %v13075_v62, %v10693_v38  ;;  %v10735_v56 = vld [vmem:[%s14005_s8 + $0x500] sm:$0xf]  ;;  %v13093_v36 = vld [vmem:[%s14005_s8 + $0x530] sm:$0xf0] }
 0x2d5   : > { %v15572_v58 = vadd.f32 %v4071_v6, %v3983_v18  ;;  %v3896_v17 = vadd.f32 %v3895_v35, %v3807_v7  ;;  %v15588_v6 = vor.u32 %v13080_v39, %v10683_v19  ;;  %v15590_v29 = vor.u32 %v13074_v31, %v10685_v11  ;;  %v13087_v62 = vld [vmem:[%s14005_s8 + $0x504] sm:$0xf]  ;;  %v10737_v38 = vld [vmem:[%s14005_s8 + $0x534] sm:$0xf0] }
 0x2d6   : > { %4236 = vmatpush.bf16.msrb.mxu1 %v10924_v61  ;;  %21123 = vst [vmem:[#allocation164_spill] sm:$0xff] %v15592_v21 }
 0x2d7   : > { %21121 = vst [vmem:[#allocation162_spill] sm:$0xff] %v15588_v6 }
 0x2d8   : > { %21122 = vst [vmem:[#allocation163_spill] sm:$0xff] %v15590_v29 }
 0x2d9   : > { %21124 = vst [vmem:[#allocation165_spill] sm:$0xff] %v15595_v33 }
 0x2da   : > { %v3984_v18 = vpop.f32.mrf.mxu2  ;;  %v3809_v43 = vpop.f32.mrf.mxu0 }
 0x2db   : > { %v3985_v41 = vadd.f32 %v3984_v18, %v3896_v17  ;;  %v4073_v15 = vpop.f32.mrf.mxu3  ;;  %v3810_v7 = vadd.f32 %v3809_v43, %v14996_v48  ;;  %v3898_v35 = vpop.f32.mrf.mxu1  ;;  %v10743_v18 = vld [vmem:[%s14005_s8 + $0x508] sm:$0xf] }
 0x2dd   : > { %v15597_v30 = vadd.f32 %v4073_v15, %v3985_v41  ;;  %v3899_v61 = vadd.f32 %v3898_v35, %v3810_v7  ;;  %3848 = vmatmul.bf16.gmra.mxu0 %v15588_v6  ;;  %v13094_v41 = vld [vmem:[%s14005_s8 + $0x538] sm:$0xf0]  ;;  %v13088_v7 = vld [vmem:[%s14005_s8 + $0x50c] sm:$0xf]  ;;  %v10745_v35 = vld [vmem:[%s14005_s8 + $0x53c] sm:$0xf0]  ;;  %v15616_v6 = vor.u32 %v13087_v62, %v10737_v38 }
 0x2de   : > { %3937 = vmatmul.bf16.gmra.mxu1 %v15590_v29  ;;  %v11041_v62 = vld [vmem:[%s20675_s3 + $0x108] sm:$0xf0] }
 0x2df   : > { %4026 = vmatmul.bf16.gmra.mxu2 %v15592_v21  ;;  %v15614_v21 = vor.u32 %v13093_v36, %v10735_v56  ;;  %21126 = vst [vmem:[#allocation167_spill] sm:$0xff] %v15616_v6  ;;  %v13328_v56 = vld [vmem:[%s20675_s3 + $0x604] sm:$0xf0]  ;;  %v13167_v36 = vld [vmem:[%s20675_s3 + $0x104] sm:$0xf] }
 0x2e0   : > { %4115 = vmatmul.bf16.gmra.mxu3 %v15595_v33 }
 0x2e1   : > { %21125 = vst [vmem:[#allocation166_spill] sm:$0xff] %v15614_v21 }
 0x2e2   : > { %v3987_v48 = vpop.f32.mrf.mxu2  ;;  %v3811_v15 = vpop.f32.mrf.mxu0 }
 0x2e3   : > { %v3988_v43 = vadd.f32 %v3987_v48, %v3899_v61  ;;  %v4076_v17 = vpop.f32.mrf.mxu3  ;;  %v3812_v19 = vadd.f32 %v3811_v15, %v15015_v20  ;;  %v3900_v39 = vpop.f32.mrf.mxu1  ;;  %v15618_v20 = vor.u32 %v13094_v41, %v10743_v18  ;;  %v15621_v15 = vor.u32 %v13088_v7, %v10745_v35 }
 0x2e4   : > { %v11044_v41 = vor.u32 %v13167_v36, %v11041_v62  ;;  %v10789_v36 = vld [vmem:[%s14005_s8 + $0x59c] sm:$0xf0]  ;;  %v10795_v62 = vld [vmem:[%s14005_s8 + $0x570] sm:$0xf] }
 0x2e5   : > { %v15604_v31 = vadd.f32 %v4076_v17, %v3988_v43  ;;  %v3901_v11 = vadd.f32 %v3900_v39, %v3812_v19  ;;  %21127 = vst [vmem:[#allocation168_spill] sm:$0xff] %v15618_v20 }
 0x2e6   : > { %21128 = vst [vmem:[#allocation169_spill] sm:$0xff] %v15621_v15  ;;  %4415 = vmatpush.bf16.msrb.mxu3 %v11044_v41  ;;  %v10797_v41 = vld [vmem:[%s14005_s8 + $0x5a4] sm:$0xf0] }
 0x2ea   : > { %v3989_v33 = vpop.f32.mrf.mxu2  ;;  %v3814_v29 = vpop.f32.mrf.mxu0 }
 0x2eb   : > { %v3990_v61 = vadd.f32 %v3989_v33, %v3901_v11  ;;  %v4078_v48 = vpop.f32.mrf.mxu3  ;;  %v3815_v43 = vadd.f32 %v3814_v29, %v15040_v9  ;;  %v3903_v17 = vpop.f32.mrf.mxu1  ;;  %v13151_v33 = vld [vmem:[%s20675_s3 + $0x84] sm:$0xf]  ;;  %v10977_v9 = vld [vmem:[%s20675_s3 + $0x88] sm:$0xf0]  ;;  %v11679_v29 = vld [vmem:[%s20675_s3 + $0x600] sm:$0xf] }
 0x2ec   : > { %v10980_v11 = vor.u32 %v13151_v33, %v10977_v9  ;;  %v11680_v18 = vor.u32 %v13328_v56, %v11679_v29  ;;  %v13135_v33 = vld [vmem:[%s20675_s3 + $0x4] sm:$0xf]  ;;  %v13106_v56 = vld [vmem:[%s14005_s8 + $0x598] sm:$0xf0] }
 0x2ed   : > { %v15623_v19 = vadd.f32 %v4078_v48, %v3990_v61  ;;  %v3904_v39 = vadd.f32 %v3903_v17, %v3815_v43  ;;  %3853 = vmatmul.bf16.gmra.mxu0 %v15614_v21 }
 0x2ee   : > { %3942 = vmatmul.bf16.gmra.mxu1 %v15616_v6  ;;  %4326 = vmatpush.bf16.msrb.mxu2 %v10980_v11  ;;  %v10787_v11 = vld [vmem:[%s14005_s8 + $0x568] sm:$0xf] }
 0x2ef   : > { %4031 = vmatmul.bf16.gmra.mxu2 %v15618_v20  ;;  %4148 = vmatpush.bf16.msrb.mxu0 %v11680_v18  ;;  %v13101_v18 = vld [vmem:[%s14005_s8 + $0x574] sm:$0xf] }
 0x2f0   : > { %4120 = vmatmul.bf16.gmra.mxu3 %v15621_v15 }
 0x2f2   : > { %v3992_v38 = vpop.f32.mrf.mxu2  ;;  %v3816_v61 = vpop.f32.mrf.mxu0 }
 0x2f3   : > { %v3993_v7 = vadd.f32 %v3992_v38, %v3904_v39  ;;  %v4081_v35 = vpop.f32.mrf.mxu3  ;;  %v3817_v48 = vadd.f32 %v3816_v61, %v15065_v53  ;;  %v3905_v43 = vpop.f32.mrf.mxu1  ;;  %v10913_v39 = vld [vmem:[%s20675_s3 + $0x8] sm:$0xf0]  ;;  %v13107_v38 = vld [vmem:[%s14005_s8 + $0x5a0] sm:$0xf0] }
 0x2f4   : > { %v10916_v29 = vor.u32 %v13135_v33, %v10913_v39  ;;  %v13100_v53 = vld [vmem:[%s14005_s8 + $0x56c] sm:$0xf]  ;;  %v15668_v21 = vor.u32 %v13107_v38, %v10795_v62  ;;  %v15671_v33 = vor.u32 %v13101_v18, %v10797_v41  ;;  %v10839_v62 = vld [vmem:[%s14005_s8 + $0x5d0] sm:$0xf]  ;;  %v13119_v38 = vld [vmem:[%s14005_s8 + $0x600] sm:$0xf0] }
 0x2f5   : > { %v15648_v17 = vadd.f32 %v4081_v35, %v3993_v7  ;;  %v3906_v9 = vadd.f32 %v3905_v43, %v3817_v48  ;;  %v15664_v35 = vor.u32 %v13106_v56, %v10787_v11  ;;  %v15666_v6 = vor.u32 %v13100_v53, %v10789_v36  ;;  %v13113_v18 = vld [vmem:[%s14005_s8 + $0x5d4] sm:$0xf]  ;;  %v10841_v41 = vld [vmem:[%s14005_s8 + $0x604] sm:$0xf0] }
 0x2f6   : > { %4237 = vmatpush.bf16.msrb.mxu1 %v10916_v29  ;;  %21131 = vst [vmem:[#allocation172_spill] sm:$0xff] %v15668_v21 }
 0x2f7   : > { %21129 = vst [vmem:[#allocation170_spill] sm:$0xff] %v15664_v35 }
 0x2f8   : > { %21130 = vst [vmem:[#allocation171_spill] sm:$0xff] %v15666_v6 }
 0x2f9   : > { %21132 = vst [vmem:[#allocation173_spill] sm:$0xff] %v15671_v33 }
 0x2fa   : > { %v3994_v7 = vpop.f32.mrf.mxu2  ;;  %v3819_v20 = vpop.f32.mrf.mxu0 }
 0x2fb   : > { %v3995_v61 = vadd.f32 %v3994_v7, %v3906_v9  ;;  %v4083_v15 = vpop.f32.mrf.mxu3  ;;  %v3820_v48 = vadd.f32 %v3819_v20, %v15072_v23  ;;  %v3908_v43 = vpop.f32.mrf.mxu1  ;;  %v10847_v7 = vld [vmem:[%s14005_s8 + $0x5d8] sm:$0xf] }
 0x2fd   : > { %v15673_v39 = vadd.f32 %v4083_v15, %v3995_v61  ;;  %v3909_v29 = vadd.f32 %v3908_v43, %v3820_v48  ;;  %3858 = vmatmul.bf16.gmra.mxu0 %v15664_v35  ;;  %v13120_v61 = vld [vmem:[%s14005_s8 + $0x608] sm:$0xf0]  ;;  %v13114_v48 = vld [vmem:[%s14005_s8 + $0x5dc] sm:$0xf]  ;;  %v10849_v43 = vld [vmem:[%s14005_s8 + $0x60c] sm:$0xf0]  ;;  %v15692_v35 = vor.u32 %v13113_v18, %v10841_v41 }
 0x2fe   : > { %3947 = vmatmul.bf16.gmra.mxu1 %v15666_v6  ;;  %v11353_v18 = vld [vmem:[%s20675_s3 + $0x378] sm:$0xf0] }
 0x2ff   : > { %4036 = vmatmul.bf16.gmra.mxu2 %v15668_v21  ;;  %v15690_v21 = vor.u32 %v13119_v38, %v10839_v62  ;;  %21134 = vst [vmem:[#allocation175_spill] sm:$0xff] %v15692_v35  ;;  %v11161_v62 = vld [vmem:[%s20675_s3 + $0x1f8] sm:$0xf0]  ;;  %v13245_v38 = vld [vmem:[%s20675_s3 + $0x374] sm:$0xf] }
 0x300   : > { %4125 = vmatmul.bf16.gmra.mxu3 %v15671_v33 }
 0x301   : > { %21133 = vst [vmem:[#allocation174_spill] sm:$0xff] %v15690_v21 }
 0x302   : > { %v3997_v23 = vpop.f32.mrf.mxu2  ;;  %v3821_v15 = vpop.f32.mrf.mxu0 }
 0x303   : > { %v3998_v20 = vadd.f32 %v3997_v23, %v3909_v29  ;;  %v4086_v9 = vpop.f32.mrf.mxu3  ;;  %v3822_v11 = vadd.f32 %v3821_v15, %v15091_v10  ;;  %v3910_v56 = vpop.f32.mrf.mxu1  ;;  %v15694_v10 = vor.u32 %v13120_v61, %v10847_v7  ;;  %v15697_v15 = vor.u32 %v13114_v48, %v10849_v43 }
 0x304   : > { %v11356_v61 = vor.u32 %v13245_v38, %v11353_v18  ;;  %v10893_v38 = vld [vmem:[%s14005_s8 + $0x66c] sm:$0xf0]  ;;  %v10899_v18 = vld [vmem:[%s14005_s8 + $0x640] sm:$0xf] }
 0x305   : > { %v15680_v53 = vadd.f32 %v4086_v9, %v3998_v20  ;;  %v3911_v36 = vadd.f32 %v3910_v56, %v3822_v11  ;;  %21135 = vst [vmem:[#allocation176_spill] sm:$0xff] %v15694_v10 }
 0x306   : > { %21136 = vst [vmem:[#allocation177_spill] sm:$0xff] %v15697_v15  ;;  %4764 = vmatpush.bf16.msra.mxu3 %v11356_v61  ;;  %v10901_v61 = vld [vmem:[%s14005_s8 + $0x674] sm:$0xf0] }
 0x30a   : > { %v3999_v33 = vpop.f32.mrf.mxu2  ;;  %v3824_v6 = vpop.f32.mrf.mxu0 }
 0x30b   : > { %v4000_v29 = vadd.f32 %v3999_v33, %v3911_v36  ;;  %v4088_v23 = vpop.f32.mrf.mxu3  ;;  %v3825_v20 = vadd.f32 %v3824_v6, %v15116_v3  ;;  %v3913_v9 = vpop.f32.mrf.mxu1  ;;  %v13229_v33 = vld [vmem:[%s20675_s3 + $0x2f4] sm:$0xf]  ;;  %v11289_v3 = vld [vmem:[%s20675_s3 + $0x2f8] sm:$0xf0] }
 0x30c   : > { %v13197_v6 = vld [vmem:[%s20675_s3 + $0x1f4] sm:$0xf]  ;;  %v11292_v36 = vor.u32 %v13229_v33, %v11289_v3 }
 0x30d   : > { %v15699_v11 = vadd.f32 %v4088_v23, %v4000_v29  ;;  %v3914_v56 = vadd.f32 %v3913_v9, %v3825_v20  ;;  %3863 = vmatmul.bf16.gmra.mxu0 %v15690_v21  ;;  %v11164_v7 = vor.u32 %v13197_v6, %v11161_v62  ;;  %v13213_v33 = vld [vmem:[%s20675_s3 + $0x274] sm:$0xf]  ;;  %v13132_v62 = vld [vmem:[%s14005_s8 + $0x668] sm:$0xf0] }
 0x30e   : > { %3952 = vmatmul.bf16.gmra.mxu1 %v15692_v35  ;;  %4675 = vmatpush.bf16.msra.mxu2 %v11292_v36  ;;  %v10891_v36 = vld [vmem:[%s14005_s8 + $0x638] sm:$0xf] }
 0x30f   : > { %4041 = vmatmul.bf16.gmra.mxu2 %v15694_v10  ;;  %4497 = vmatpush.bf16.msra.mxu0 %v11164_v7  ;;  %v13127_v7 = vld [vmem:[%s14005_s8 + $0x644] sm:$0xf] }
 0x310   : > { %4130 = vmatmul.bf16.gmra.mxu3 %v15697_v15 }
 0x312   : > { %v4002_v41 = vpop.f32.mrf.mxu2  ;;  %v3826_v29 = vpop.f32.mrf.mxu0 }
 0x313   : > { %v4003_v48 = vadd.f32 %v4002_v41, %v3914_v56  ;;  %v4091_v43 = vpop.f32.mrf.mxu3  ;;  %v3827_v23 = vadd.f32 %v3826_v29, %v15141_v60  ;;  %v3915_v20 = vpop.f32.mrf.mxu1  ;;  %v11225_v56 = vld [vmem:[%s20675_s3 + $0x278] sm:$0xf0]  ;;  %v13133_v41 = vld [vmem:[%s14005_s8 + $0x670] sm:$0xf0] }
 0x314   : > { %v11228_v6 = vor.u32 %v13213_v33, %v11225_v56  ;;  %v13126_v60 = vld [vmem:[%s14005_s8 + $0x63c] sm:$0xf]  ;;  %v15744_v21 = vor.u32 %v13133_v41, %v10899_v18  ;;  %v15747_v33 = vor.u32 %v13127_v7, %v10901_v61  ;;  %v10127_v18 = vld [vmem:[%s14005_s8 + $0x30] sm:$0xf]  ;;  %v12939_v41 = vld [vmem:[%s14005_s8 + $0x60] sm:$0xf0] }
 0x315   : > { %v15724_v9 = vadd.f32 %v4091_v43, %v4003_v48  ;;  %v3916_v3 = vadd.f32 %v3915_v20, %v3827_v23  ;;  %v15740_v43 = vor.u32 %v13132_v62, %v10891_v36  ;;  %v15742_v35 = vor.u32 %v13126_v60, %v10893_v38 }
 0x316   : > { %4586 = vmatpush.bf16.msra.mxu1 %v11228_v6  ;;  %21137 = vst [vmem:[#allocation178_spill] sm:$0xff] %v15747_v33  ;;  %v15760_v61 = vor.u32 %v12939_v41, %v10127_v18 }
 0x31a   : > { %v4004_v48 = vpop.f32.mrf.mxu2  ;;  %v3829_v10 = vpop.f32.mrf.mxu0 }
 0x31b   : > { %v4005_v29 = vadd.f32 %v4004_v48, %v3916_v3  ;;  %v4093_v15 = vpop.f32.mrf.mxu3  ;;  %v3830_v23 = vadd.f32 %v3829_v10, %v15148_v5  ;;  %v3918_v20 = vpop.f32.mrf.mxu1 }
 0x31d   : > { %v15749_v56 = vadd.f32 %v4093_v15, %v4005_v29  ;;  %v3919_v6 = vadd.f32 %v3918_v20, %v3830_v23  ;;  %3868 = vmatmul.bf16.gmra.mxu0 %v15740_v43 }
 0x31e   : > { %3957 = vmatmul.bf16.gmra.mxu1 %v15742_v35 }
 0x31f   : > { %4046 = vmatmul.bf16.gmra.mxu2 %v15744_v21 }
 0x320   : > { %4135 = vmatmul.bf16.gmra.mxu3 %v15747_v33 }
 0x322   : > { %v4007_v3 = vpop.f32.mrf.mxu2  ;;  %v3831_v5 = vpop.f32.mrf.mxu0 }
 0x323   : > { %v4008_v36 = vadd.f32 %v4007_v3, %v3919_v6  ;;  %v4096_v62 = vpop.f32.mrf.mxu3  ;;  %v3832_v10 = vadd.f32 %v3831_v5, %v15167_v28  ;;  %v3920_v60 = vpop.f32.mrf.mxu1  ;;  %v13227_v28 = vld [vmem:[%s20675_s3 + $0x2e4] sm:$0xf] }
 0x325   : > { %v15756_v38 = vadd.f32 %v4096_v62, %v4008_v36  ;;  %v3921_v15 = vadd.f32 %v3920_v60, %v3832_v10 }
 0x32a   : > { %v4009_v7 = vpop.f32.mrf.mxu2  ;;  %v3834_v23 = vpop.f32.mrf.mxu0 }
 0x32b   : > { %v4010_v48 = vadd.f32 %v4009_v7, %v3921_v15  ;;  %v4098_v29 = vpop.f32.mrf.mxu3  ;;  %v3835_v20 = vadd.f32 %v3834_v23, %v15192_v55  ;;  %v3923_v33 = vpop.f32.mrf.mxu1  ;;  %v11281_v55 = vld [vmem:[%s20675_s3 + $0x2e8] sm:$0xf0] }
 0x32c   : > { %v11284_v36 = vor.u32 %v13227_v28, %v11281_v55  ;;  %v11217_v23 = vld [vmem:[%s20675_s3 + $0x268] sm:$0xf0]  ;;  %v10179_v28 = vld [vmem:[%s14005_s8 + $0x98] sm:$0xf] }
 0x32d   : > { %v15763_v6 = vadd.f32 %v4098_v29, %v4010_v48  ;;  %v3924_v3 = vadd.f32 %v3923_v33, %v3835_v20  ;;  %4149 = vmatmul.bf16.vlgmr.msrb.gmra.mxu0 %v15760_v61  ;;  %v13195_v33 = vld [vmem:[%s20675_s3 + $0x1e4] sm:$0xf]  ;;  %v12952_v55 = vld [vmem:[%s14005_s8 + $0xc8] sm:$0xf0] }
 0x32e   : > { %4238 = vmatmul.bf16.vlgmr.msrb.gmra.mxu1 %v14019_v44  ;;  %v11153_v44 = vld [vmem:[%s20675_s3 + $0x1e8] sm:$0xf0]  ;;  %4676 = vmatpush.bf16.msra.mxu2 %v11284_v36  ;;  %v13211_v29 = vld [vmem:[%s20675_s3 + $0x264] sm:$0xf] }
 0x32f   : > { %4327 = vmatmul.bf16.vlgmr.msrb.gmra.mxu2 %v14024_v49  ;;  %v13243_v49 = vld [vmem:[%s20675_s3 + $0x364] sm:$0xf]  ;;  %v11156_v5 = vor.u32 %v13195_v33, %v11153_v44 }
 0x330   : > { %4416 = vmatmul.bf16.vlgmr.msrb.gmra.mxu3 %v14026_v50  ;;  %v11345_v50 = vld [vmem:[%s20675_s3 + $0x368] sm:$0xf0] }
 0x331   : > { %v11348_v10 = vor.u32 %v13243_v49, %v11345_v50  ;;  %4498 = vmatpush.bf16.msra.mxu0 %v11156_v5 }
 0x332   : > { %v4012_v62 = vpop.f32.mrf.mxu2  ;;  %v3836_v18 = vpop.f32.mrf.mxu0 }
 0x333   : > { %v4013_v60 = vadd.f32 %v4012_v62, %v3924_v3  ;;  %v4101_v15 = vpop.f32.mrf.mxu3  ;;  %v3837_v41 = vadd.f32 %v3836_v18, %v15217_v4  ;;  %v3925_v7 = vpop.f32.mrf.mxu1  ;;  %4765 = vmatpush.bf16.msra.mxu3 %v11348_v10  ;;  %v11220_v3 = vor.u32 %v13211_v29, %v11217_v23  ;;  %v15798_v4 = vor.u32 %v12952_v55, %v10179_v28 }
 0x335   : > { %v15788_v48 = vadd.f32 %v4101_v15, %v4013_v60  ;;  %v3926_v20 = vadd.f32 %v3925_v7, %v3837_v41  ;;  %4587 = vmatpush.bf16.msra.mxu1 %v11220_v3  ;;  %v12965_v3 = vld [vmem:[%s14005_s8 + $0x130] sm:$0xf0] }
 0x33a   : > { %v4014_v33 = vpop.f32.mrf.mxu2  ;;  %v3839_v49 = vpop.f32.mrf.mxu0 }
 0x33b   : > { %v4015_v36 = vadd.f32 %v4014_v33, %v3926_v20  ;;  %v4103_v44 = vpop.f32.mrf.mxu3  ;;  %v3840_v50 = vadd.f32 %v3839_v49, %v15224_v59  ;;  %v3928_v62 = vpop.f32.mrf.mxu1  ;;  %v10231_v20 = vld [vmem:[%s14005_s8 + $0x100] sm:$0xf] }
 0x33c   : > { %v15812_v55 = vor.u32 %v12965_v3, %v10231_v20  ;;  %v13209_v3 = vld [vmem:[%s20675_s3 + $0x254] sm:$0xf] }
 0x33d   : > { %v15801_v5 = vadd.f32 %v4103_v44, %v4015_v36  ;;  %v3929_v10 = vadd.f32 %v3928_v62, %v3840_v50  ;;  %4154 = vmatmul.bf16.gmra.mxu0 %v15798_v4  ;;  %v13193_v50 = vld [vmem:[%s20675_s3 + $0x1d4] sm:$0xf] }
 0x33e   : > { %4243 = vmatmul.bf16.gmra.mxu1 %v14068_v12 }
 0x33f   : > { %4332 = vmatmul.bf16.gmra.mxu2 %v14070_v13 }
 0x340   : > { %4421 = vmatmul.bf16.gmra.mxu3 %v14072_v14 }
 0x342   : > { %v4017_v60 = vpop.f32.mrf.mxu2  ;;  %v3841_v41 = vpop.f32.mrf.mxu0 }
 0x343   : > { %v4018_v15 = vadd.f32 %v4017_v60, %v3929_v10  ;;  %v4106_v18 = vpop.f32.mrf.mxu3  ;;  %v3842_v59 = vadd.f32 %v3841_v41, %v15243_v45  ;;  %v3930_v7 = vpop.f32.mrf.mxu1  ;;  %v13225_v45 = vld [vmem:[%s20675_s3 + $0x2d4] sm:$0xf] }
 0x345   : > { %v15808_v29 = vadd.f32 %v4106_v18, %v4018_v15  ;;  %v3931_v23 = vadd.f32 %v3930_v7, %v3842_v59 }
 0x34a   : > { %v4019_v28 = vpop.f32.mrf.mxu2  ;;  %v3844_v13 = vpop.f32.mrf.mxu0 }
 0x34b   : > { %v4020_v12 = vadd.f32 %v4019_v28, %v3931_v23  ;;  %v4108_v33 = vpop.f32.mrf.mxu3  ;;  %v3845_v14 = vadd.f32 %v3844_v13, %v15268_v8  ;;  %v3933_v36 = vpop.f32.mrf.mxu1  ;;  %v11273_v8 = vld [vmem:[%s20675_s3 + $0x2d8] sm:$0xf0]  ;;  %v10283_v13 = vld [vmem:[%s14005_s8 + $0x168] sm:$0xf] }
 0x34c   : > { %v11276_v62 = vor.u32 %v13225_v45, %v11273_v8  ;;  %v11209_v28 = vld [vmem:[%s20675_s3 + $0x258] sm:$0xf0] }
 0x34d   : > { %v15815_v44 = vadd.f32 %v4108_v33, %v4020_v12  ;;  %v3934_v49 = vadd.f32 %v3933_v36, %v3845_v14  ;;  %4159 = vmatmul.bf16.gmra.mxu0 %v15812_v55  ;;  %v11212_v33 = vor.u32 %v13209_v3, %v11209_v28  ;;  %v12978_v14 = vld [vmem:[%s14005_s8 + $0x198] sm:$0xf0] }
 0x34e   : > { %4248 = vmatmul.bf16.gmra.mxu1 %v14088_v24  ;;  %v11145_v24 = vld [vmem:[%s20675_s3 + $0x1d8] sm:$0xf0]  ;;  %4677 = vmatpush.bf16.msra.mxu2 %v11276_v62 }
 0x34f   : > { %4337 = vmatmul.bf16.gmra.mxu2 %v14090_v25  ;;  %v13241_v25 = vld [vmem:[%s20675_s3 + $0x354] sm:$0xf]  ;;  %v11148_v60 = vor.u32 %v13193_v50, %v11145_v24  ;;  %4588 = vmatpush.bf16.msra.mxu1 %v11212_v33 }
 0x350   : > { %4426 = vmatmul.bf16.gmra.mxu3 %v14092_v26  ;;  %v11337_v26 = vld [vmem:[%s20675_s3 + $0x358] sm:$0xf0] }
 0x351   : > { %v11340_v15 = vor.u32 %v13241_v25, %v11337_v26  ;;  %4499 = vmatpush.bf16.msra.mxu0 %v11148_v60 }
 0x352   : > { %v4022_v10 = vpop.f32.mrf.mxu2  ;;  %v3846_v59 = vpop.f32.mrf.mxu0 }
 0x353   : > { %v4023_v18 = vadd.f32 %v4022_v10, %v3934_v49  ;;  %v4111_v41 = vpop.f32.mrf.mxu3  ;;  %v3847_v7 = vadd.f32 %v3846_v59, %v15293_v42  ;;  %v3935_v23 = vpop.f32.mrf.mxu1  ;;  %4766 = vmatpush.bf16.msra.mxu3 %v11340_v15  ;;  %v15850_v42 = vor.u32 %v12978_v14, %v10283_v13 }
 0x355   : > { %v15840_v20 = vadd.f32 %v4111_v41, %v4023_v18  ;;  %v3936_v12 = vadd.f32 %v3935_v23, %v3847_v7  ;;  %v10335_v7 = vld [vmem:[%s14005_s8 + $0x1d0] sm:$0xf]  ;;  %v12991_v23 = vld [vmem:[%s14005_s8 + $0x200] sm:$0xf0] }
 0x356   : > { %v15864_v28 = vor.u32 %v12991_v23, %v10335_v7 }
 0x35a   : > { %v4024_v36 = vpop.f32.mrf.mxu2  ;;  %v3849_v8 = vpop.f32.mrf.mxu0 }
 0x35b   : > { %v4025_v49 = vadd.f32 %v4024_v36, %v3936_v12  ;;  %v4113_v45 = vpop.f32.mrf.mxu3  ;;  %v3850_v50 = vadd.f32 %v3849_v8, %v15300_v22  ;;  %v3938_v62 = vpop.f32.mrf.mxu1  ;;  %v21139_v36 = vld [vmem:[#allocation7_spill] sm:$0xff]  ;;  %v13191_v8 = vld [vmem:[%s20675_s3 + $0x1c4] sm:$0xf] }
 0x35d   : > { %v15853_v24 = vadd.f32 %v4113_v45, %v4025_v49  ;;  %v3939_v25 = vadd.f32 %v3938_v62, %v3850_v50  ;;  %4164 = vmatmul.bf16.gmra.mxu0 %v15850_v42  ;;  %v21140_v49 = vld [vmem:[#allocation8_spill] sm:$0xff]  ;;  %v13223_v45 = vld [vmem:[%s20675_s3 + $0x2c4] sm:$0xf]  ;;  %v11137_v62 = vld [vmem:[%s20675_s3 + $0x1c8] sm:$0xf0] }
 0x35e   : > { %4253 = vmatmul.bf16.gmra.mxu1 %v14132_v51 }
 0x35f   : > { %4342 = vmatmul.bf16.gmra.mxu2 %v14134_v52 }
 0x360   : > { %4431 = vmatmul.bf16.gmra.mxu3 %v14136_v54 }
 0x362   : > { %v4027_v26 = vpop.f32.mrf.mxu2  ;;  %v3851_v15 = vpop.f32.mrf.mxu0 }
 0x363   : > { %v4028_v10 = vadd.f32 %v4027_v26, %v3939_v25  ;;  %v4116_v60 = vpop.f32.mrf.mxu3  ;;  %v3852_v22 = vadd.f32 %v3851_v15, %v15319_v2  ;;  %v3940_v18 = vpop.f32.mrf.mxu1  ;;  %v21138_v2 = vld [vmem:[#allocation6_spill] sm:$0xff]  ;;  %v11329_v26 = vld [vmem:[%s20675_s3 + $0x348] sm:$0xf0] }
 0x364   : > { %v13239_v25 = vld [vmem:[%s20675_s3 + $0x344] sm:$0xf] }
 0x365   : > { %v15860_v41 = vadd.f32 %v4116_v60, %v4028_v10  ;;  %v3941_v59 = vadd.f32 %v3940_v18, %v3852_v22  ;;  %v11140_v60 = vor.u32 %v13191_v8, %v11137_v62  ;;  %v11332_v15 = vor.u32 %v13239_v25, %v11329_v26  ;;  %v21141_v25 = vld [vmem:[#allocation10_spill] sm:$0xff]  ;;  %v21142_v26 = vld [vmem:[#allocation11_spill] sm:$0xff] }
 0x367   : > { %4500 = vmatpush.bf16.msra.mxu0 %v11140_v60  ;;  %4767 = vmatpush.bf16.msra.mxu3 %v11332_v15 }
 0x36a   : > { %v4029_v3 = vpop.f32.mrf.mxu2  ;;  %v3854_v52 = vpop.f32.mrf.mxu0 }
 0x36b   : > { %v4030_v51 = vadd.f32 %v4029_v3, %v3941_v59  ;;  %v4118_v12 = vpop.f32.mrf.mxu3  ;;  %v3855_v54 = vadd.f32 %v3854_v52, %v15344_v63  ;;  %v3943_v33 = vpop.f32.mrf.mxu1  ;;  %v11265_v63 = vld [vmem:[%s20675_s3 + $0x2c8] sm:$0xf0] }
 0x36c   : > { %v11268_v50 = vor.u32 %v13223_v45, %v11265_v63 }
 0x36d   : > { %v15867_v13 = vadd.f32 %v4118_v12, %v4030_v51  ;;  %v3944_v14 = vadd.f32 %v3943_v33, %v3855_v54  ;;  %4169 = vmatmul.bf16.gmra.mxu0 %v15864_v28  ;;  %v13207_v51 = vld [vmem:[%s20675_s3 + $0x244] sm:$0xf]  ;;  %v11201_v12 = vld [vmem:[%s20675_s3 + $0x248] sm:$0xf0]  ;;  %v10387_v33 = vld [vmem:[%s14005_s8 + $0x238] sm:$0xf] }
 0x36e   : > { %4258 = vmatmul.bf16.gmra.mxu1 %v21138_v2  ;;  %4678 = vmatpush.bf16.msra.mxu2 %v11268_v50  ;;  %v11204_v54 = vor.u32 %v13207_v51, %v11201_v12  ;;  %v10439_v51 = vld [vmem:[%s14005_s8 + $0x2a0] sm:$0xf]  ;;  %v13017_v12 = vld [vmem:[%s14005_s8 + $0x2d0] sm:$0xf0] }
 0x36f   : > { %4347 = vmatmul.bf16.gmra.mxu2 %v21139_v36 }
 0x370   : > { %4436 = vmatmul.bf16.gmra.mxu3 %v21140_v49  ;;  %4589 = vmatpush.bf16.msra.mxu1 %v11204_v54  ;;  %v15916_v54 = vor.u32 %v13017_v12, %v10439_v51 }
 0x372   : > { %v4032_v10 = vpop.f32.mrf.mxu2  ;;  %v3856_v59 = vpop.f32.mrf.mxu0 }
 0x373   : > { %v4033_v22 = vadd.f32 %v4032_v10, %v3944_v14  ;;  %v4121_v18 = vpop.f32.mrf.mxu3  ;;  %v3857_v7 = vadd.f32 %v3856_v59, %v15369_v1  ;;  %v3945_v23 = vpop.f32.mrf.mxu1  ;;  %v13004_v14 = vld [vmem:[%s14005_s8 + $0x268] sm:$0xf0]  ;;  %v21143_v10 = vld [vmem:[#allocation12_spill] sm:$0xff] }
 0x374   : > { %v15902_v1 = vor.u32 %v13004_v14, %v10387_v33 }
 0x375   : > { %v15892_v3 = vadd.f32 %v4121_v18, %v4033_v22  ;;  %v3946_v52 = vadd.f32 %v3945_v23, %v3857_v7 }
 0x37a   : > { %v4034_v2 = vpop.f32.mrf.mxu2  ;;  %v3859_v45 = vpop.f32.mrf.mxu0 }
 0x37b   : > { %v4035_v36 = vadd.f32 %v4034_v2, %v3946_v52  ;;  %v4123_v49 = vpop.f32.mrf.mxu3  ;;  %v3860_v63 = vadd.f32 %v3859_v45, %v15376_v46  ;;  %v3948_v8 = vpop.f32.mrf.mxu1 }
 0x37d   : > { %v15905_v50 = vadd.f32 %v4123_v49, %v4035_v36  ;;  %v3949_v62 = vadd.f32 %v3948_v8, %v3860_v63  ;;  %4174 = vmatmul.bf16.gmra.mxu0 %v15902_v1  ;;  %v21145_v8 = vld [vmem:[#allocation15_spill] sm:$0xff] }
 0x37e   : > { %4263 = vmatmul.bf16.gmra.mxu1 %v21141_v25  ;;  %v13221_v25 = vld [vmem:[%s20675_s3 + $0x2b4] sm:$0xf] }
 0x37f   : > { %4352 = vmatmul.bf16.gmra.mxu2 %v21142_v26  ;;  %v13189_v26 = vld [vmem:[%s20675_s3 + $0x1b4] sm:$0xf] }
 0x380   : > { %4441 = vmatmul.bf16.gmra.mxu3 %v21143_v10 }
 0x382   : > { %v4037_v60 = vpop.f32.mrf.mxu2  ;;  %v3861_v18 = vpop.f32.mrf.mxu0 }
 0x383   : > { %v4038_v15 = vadd.f32 %v4037_v60, %v3949_v62  ;;  %v4126_v22 = vpop.f32.mrf.mxu3  ;;  %v3862_v46 = vadd.f32 %v3861_v18, %v15395_v34  ;;  %v3950_v59 = vpop.f32.mrf.mxu1  ;;  %v21144_v34 = vld [vmem:[#allocation14_spill] sm:$0xff]  ;;  %v21146_v62 = vld [vmem:[#allocation16_spill] sm:$0xff]  ;;  %v11129_v60 = vld [vmem:[%s20675_s3 + $0x1b8] sm:$0xf0] }
 0x385   : > { %v15912_v7 = vadd.f32 %v4126_v22, %v4038_v15  ;;  %v3951_v23 = vadd.f32 %v3950_v59, %v3862_v46  ;;  %v13237_v15 = vld [vmem:[%s20675_s3 + $0x334] sm:$0xf]  ;;  %v11321_v22 = vld [vmem:[%s20675_s3 + $0x338] sm:$0xf0]  ;;  %v11132_v46 = vor.u32 %v13189_v26, %v11129_v60 }
 0x386   : > { %v11324_v59 = vor.u32 %v13237_v15, %v11321_v22 }
 0x387   : > { %4501 = vmatpush.bf16.msra.mxu0 %v11132_v46  ;;  %v21148_v46 = vld [vmem:[#allocation19_spill] sm:$0xff] }
 0x388   : > { %4768 = vmatpush.bf16.msra.mxu3 %v11324_v59  ;;  %v21149_v59 = vld [vmem:[#allocation20_spill] sm:$0xff] }
 0x38a   : > { %v4039_v52 = vpop.f32.mrf.mxu2  ;;  %v3864_v2 = vpop.f32.mrf.mxu0 }
 0x38b   : > { %v4040_v33 = vadd.f32 %v4039_v52, %v3951_v23  ;;  %v4128_v14 = vpop.f32.mrf.mxu3  ;;  %v3865_v36 = vadd.f32 %v3864_v2, %v15420_v40  ;;  %v3953_v49 = vpop.f32.mrf.mxu1  ;;  %v11257_v40 = vld [vmem:[%s20675_s3 + $0x2b8] sm:$0xf0]  ;;  %v13205_v2 = vld [vmem:[%s20675_s3 + $0x234] sm:$0xf] }
 0x38c   : > { %v11260_v10 = vor.u32 %v13221_v25, %v11257_v40 }
 0x38d   : > { %v15919_v45 = vadd.f32 %v4128_v14, %v4040_v33  ;;  %v3954_v63 = vadd.f32 %v3953_v49, %v3865_v36  ;;  %4179 = vmatmul.bf16.gmra.mxu0 %v15916_v54  ;;  %v11193_v36 = vld [vmem:[%s20675_s3 + $0x238] sm:$0xf0] }
 0x38e   : > { %4268 = vmatmul.bf16.gmra.mxu1 %v21144_v34  ;;  %4679 = vmatpush.bf16.msra.mxu2 %v11260_v10  ;;  %v10491_v34 = vld [vmem:[%s14005_s8 + $0x308] sm:$0xf] }
 0x38f   : > { %4357 = vmatmul.bf16.gmra.mxu2 %v21145_v8  ;;  %v13030_v8 = vld [vmem:[%s14005_s8 + $0x338] sm:$0xf0] }
 0x390   : > { %4446 = vmatmul.bf16.gmra.mxu3 %v21146_v62 }
 0x392   : > { %v4042_v18 = vpop.f32.mrf.mxu2  ;;  %v3866_v12 = vpop.f32.mrf.mxu0 }
 0x393   : > { %v4043_v23 = vadd.f32 %v4042_v18, %v3954_v63  ;;  %v4131_v51 = vpop.f32.mrf.mxu3  ;;  %v3867_v52 = vadd.f32 %v3866_v12, %v15445_v37  ;;  %v3955_v33 = vpop.f32.mrf.mxu1  ;;  %v11196_v63 = vor.u32 %v13205_v2, %v11193_v36  ;;  %v15954_v37 = vor.u32 %v13030_v8, %v10491_v34  ;;  %v21147_v18 = vld [vmem:[#allocation18_spill] sm:$0xff] }
 0x395   : > { %v15944_v14 = vadd.f32 %v4131_v51, %v4043_v23  ;;  %v3956_v49 = vadd.f32 %v3955_v33, %v3867_v52  ;;  %4590 = vmatpush.bf16.msra.mxu1 %v11196_v63  ;;  %v13043_v63 = vld [vmem:[%s14005_s8 + $0x3a0] sm:$0xf0] }
 0x39a   : > { %v4044_v62 = vpop.f32.mrf.mxu2  ;;  %v3869_v26 = vpop.f32.mrf.mxu0 }
 0x39b   : > { %v4045_v25 = vadd.f32 %v4044_v62, %v3956_v49  ;;  %v4133_v40 = vpop.f32.mrf.mxu3  ;;  %v3870_v10 = vadd.f32 %v3869_v26, %v15452_v32  ;;  %v3958_v60 = vpop.f32.mrf.mxu1  ;;  %v10543_v49 = vld [vmem:[%s14005_s8 + $0x370] sm:$0xf] }
 0x39c   : > { %v15968_v8 = vor.u32 %v13043_v63, %v10543_v49 }
 0x39d   : > { %v15957_v15 = vadd.f32 %v4133_v40, %v4045_v25  ;;  %v3959_v22 = vadd.f32 %v3958_v60, %v3870_v10  ;;  %4184 = vmatmul.bf16.gmra.mxu0 %v15954_v37 }
 0x39e   : > { %4273 = vmatmul.bf16.gmra.mxu1 %v21147_v18  ;;  %v21152_v18 = vld [vmem:[#allocation24_spill] sm:$0xff] }
 0x39f   : > { %4362 = vmatmul.bf16.gmra.mxu2 %v21148_v46  ;;  %v13219_v46 = vld [vmem:[%s20675_s3 + $0x2a4] sm:$0xf] }
 0x3a0   : > { %4451 = vmatmul.bf16.gmra.mxu3 %v21149_v59  ;;  %v13187_v59 = vld [vmem:[%s20675_s3 + $0x1a4] sm:$0xf] }
 0x3a2   : > { %v4047_v23 = vpop.f32.mrf.mxu2  ;;  %v3871_v52 = vpop.f32.mrf.mxu0 }
 0x3a3   : > { %v4048_v51 = vadd.f32 %v4047_v23, %v3959_v22  ;;  %v4136_v12 = vpop.f32.mrf.mxu3  ;;  %v3872_v32 = vadd.f32 %v3871_v52, %v15471_v27  ;;  %v3960_v33 = vpop.f32.mrf.mxu1  ;;  %v21150_v27 = vld [vmem:[#allocation22_spill] sm:$0xff]  ;;  %v21151_v22 = vld [vmem:[#allocation23_spill] sm:$0xff] }
 0x3a4   : > { %v11313_v52 = vld [vmem:[%s20675_s3 + $0x328] sm:$0xf0] }
 0x3a5   : > { %v15964_v2 = vadd.f32 %v4136_v12, %v4048_v51  ;;  %v3961_v36 = vadd.f32 %v3960_v33, %v3872_v32  ;;  %v11121_v51 = vld [vmem:[%s20675_s3 + $0x1a8] sm:$0xf0]  ;;  %v13235_v12 = vld [vmem:[%s20675_s3 + $0x324] sm:$0xf] }
 0x3a6   : > { %v11124_v33 = vor.u32 %v13187_v59, %v11121_v51 }
 0x3a8   : > { %4502 = vmatpush.bf16.msra.mxu0 %v11124_v33  ;;  %v21154_v33 = vld [vmem:[#allocation26_spill] sm:$0xff] }
 0x3aa   : > { %v4049_v34 = vpop.f32.mrf.mxu2  ;;  %v4150_v40 = vpop.f32.mrf.mxu0 }
 0x3ab   : > { %v4050_v62 = vadd.f32 %v4049_v34, %v3961_v36  ;;  %v4138_v25 = vpop.f32.mrf.mxu3  ;;  %v15971_v26 = vadd.f32 %v4150_v40, %v15496_v47  ;;  %v4239_v10 = vpop.f32.mrf.mxu1  ;;  %v11249_v47 = vld [vmem:[%s20675_s3 + $0x2a8] sm:$0xf0]  ;;  %v11316_v36 = vor.u32 %v13235_v12, %v11313_v52 }
 0x3ac   : > { %v11252_v23 = vor.u32 %v13219_v46, %v11249_v47  ;;  %v13056_v46 = vld [vmem:[%s14005_s8 + $0x408] sm:$0xf0] }
 0x3ad   : > { %v15973_v60 = vadd.f32 %v4138_v25, %v4050_v62  ;;  %4189 = vmatmul.bf16.gmra.mxu0 %v15968_v8  ;;  %4769 = vmatpush.bf16.msra.mxu3 %v11316_v36  ;;  %v21155_v36 = vld [vmem:[#allocation27_spill] sm:$0xff] }
 0x3ae   : > { %4278 = vmatmul.bf16.gmra.mxu1 %v21150_v27  ;;  %4680 = vmatpush.bf16.msra.mxu2 %v11252_v23  ;;  %v13203_v27 = vld [vmem:[%s20675_s3 + $0x224] sm:$0xf] }
 0x3af   : > { %4367 = vmatmul.bf16.gmra.mxu2 %v21151_v22  ;;  %v11185_v22 = vld [vmem:[%s20675_s3 + $0x228] sm:$0xf0] }
 0x3b0   : > { %4456 = vmatmul.bf16.gmra.mxu3 %v21152_v18  ;;  %v10595_v18 = vld [vmem:[%s14005_s8 + $0x3d8] sm:$0xf] }
 0x3b2   : > { %v4328_v32 = vpop.f32.mrf.mxu2  ;;  %v4152_v34 = vpop.f32.mrf.mxu0 }
 0x3b3   : > { %v4329_v49 = vadd.f32 %v4328_v32, %v4239_v10  ;;  %v4417_v63 = vpop.f32.mrf.mxu3  ;;  %v15998_v62 = vadd.f32 %v4152_v34, %v15521_v16  ;;  %v4241_v25 = vpop.f32.mrf.mxu1  ;;  %v11188_v10 = vor.u32 %v13203_v27, %v11185_v22  ;;  %v16010_v16 = vor.u32 %v13056_v46, %v10595_v18  ;;  %v10647_v18 = vld [vmem:[%s14005_s8 + $0x440] sm:$0xf]  ;;  %v13069_v46 = vld [vmem:[%s14005_s8 + $0x470] sm:$0xf0] }
 0x3b5   : > { %v16000_v40 = vadd.f32 %v4417_v63, %v4329_v49  ;;  %4591 = vmatpush.bf16.msra.mxu1 %v11188_v10  ;;  %v21156_v49 = vld [vmem:[#allocation28_spill] sm:$0xff] }
 0x3ba   : > { %v4330_v47 = vpop.f32.mrf.mxu2  ;;  %v4155_v51 = vpop.f32.mrf.mxu0 }
 0x3bb   : > { %v4331_v59 = vadd.f32 %v4330_v47, %v4241_v25  ;;  %v4419_v23 = vpop.f32.mrf.mxu3  ;;  %v16013_v12 = vadd.f32 %v4155_v51, %v15528_v0  ;;  %v4244_v52 = vpop.f32.mrf.mxu1 }
 0x3bd   : > { %21153 = vst [vmem:[#allocation6_spill] sm:$0xff] %v16013_v12  ;;  %v16015_v32 = vadd.f32 %v4419_v23, %v4331_v59  ;;  %4194 = vmatmul.bf16.gmra.mxu0 %v16010_v16  ;;  %v16028_v59 = vor.u32 %v13069_v46, %v10647_v18  ;;  %v11113_v18 = vld [vmem:[%s20675_s3 + $0x198] sm:$0xf0]  ;;  %v13233_v46 = vld [vmem:[%s20675_s3 + $0x314] sm:$0xf] }
 0x3be   : > { %4283 = vmatmul.bf16.gmra.mxu1 %v21154_v33  ;;  %v21249_v12 = vld [vmem:[#allocation92_spill] sm:$0xff] }
 0x3bf   : > { %4372 = vmatmul.bf16.gmra.mxu2 %v21155_v36  ;;  %21158 = vst [vmem:[#allocation8_spill] sm:$0xff] %v16028_v59 }
 0x3c0   : > { %4461 = vmatmul.bf16.gmra.mxu3 %v21156_v49 }
 0x3c2   : > { %v4333_v63 = vpop.f32.mrf.mxu2  ;;  %v4157_v27 = vpop.f32.mrf.mxu0 }
 0x3c3   : > { %v4334_v34 = vadd.f32 %v4333_v63, %v4244_v52  ;;  %v4422_v25 = vpop.f32.mrf.mxu3  ;;  %v16022_v22 = vadd.f32 %v4157_v27, %v15547_v57  ;;  %v4246_v0 = vpop.f32.mrf.mxu1  ;;  %v21160_v57 = vld [vmem:[#allocation30_spill] sm:$0xff]  ;;  %v21161_v63 = vld [vmem:[#allocation31_spill] sm:$0xff]  ;;  %v13185_v27 = vld [vmem:[%s20675_s3 + $0x194] sm:$0xf] }
 0x3c5   : > { %21157 = vst [vmem:[#allocation7_spill] sm:$0xff] %v16022_v22  ;;  %v16024_v10 = vadd.f32 %v4422_v25, %v4334_v34  ;;  %v21162_v34 = vld [vmem:[#allocation32_spill] sm:$0xff]  ;;  %v21242_v22 = vld [vmem:[#allocation25_spill] sm:$0xff] }
 0x3c6   : > { %v13217_v25 = vld [vmem:[%s20675_s3 + $0x294] sm:$0xf] }
 0x3ca   : > { %v4335_v47 = vpop.f32.mrf.mxu2  ;;  %v4160_v33 = vpop.f32.mrf.mxu0 }
 0x3cb   : > { %v4336_v23 = vadd.f32 %v4335_v47, %v4246_v0  ;;  %v4424_v51 = vpop.f32.mrf.mxu3  ;;  %v16031_v36 = vadd.f32 %v4160_v33, %v15572_v58  ;;  %v4249_v52 = vpop.f32.mrf.mxu1  ;;  %v11241_v58 = vld [vmem:[%s20675_s3 + $0x298] sm:$0xf0] }
 0x3cc   : > { %v11244_v0 = vor.u32 %v13217_v25, %v11241_v58  ;;  %v11305_v47 = vld [vmem:[%s20675_s3 + $0x318] sm:$0xf0] }
 0x3cd   : > { %21159 = vst [vmem:[#allocation10_spill] sm:$0xff] %v16031_v36  ;;  %v16033_v49 = vadd.f32 %v4424_v51, %v4336_v23  ;;  %4199 = vmatmul.bf16.gmra.mxu0 %v16028_v59  ;;  %v11116_v51 = vor.u32 %v13185_v27, %v11113_v18  ;;  %v11308_v33 = vor.u32 %v13233_v46, %v11305_v47  ;;  %v13201_v59 = vld [vmem:[%s20675_s3 + $0x214] sm:$0xf]  ;;  %v11177_v27 = vld [vmem:[%s20675_s3 + $0x218] sm:$0xf0] }
 0x3ce   : > { %4288 = vmatmul.bf16.gmra.mxu1 %v21160_v57  ;;  %4681 = vmatpush.bf16.msra.mxu2 %v11244_v0  ;;  %v10699_v18 = vld [vmem:[%s14005_s8 + $0x4a8] sm:$0xf]  ;;  %v13082_v46 = vld [vmem:[%s14005_s8 + $0x4d8] sm:$0xf0] }
 0x3cf   : > { %4377 = vmatmul.bf16.gmra.mxu2 %v21161_v63  ;;  %4503 = vmatpush.bf16.msra.mxu0 %v11116_v51 }
 0x3d0   : > { %4466 = vmatmul.bf16.gmra.mxu3 %v21162_v34 }
 0x3d1   : > { %4770 = vmatpush.bf16.msra.mxu3 %v11308_v33 }
 0x3d2   : > { %v4338_v23 = vpop.f32.mrf.mxu2  ;;  %v4162_v34 = vpop.f32.mrf.mxu0 }
 0x3d3   : > { %v4339_v57 = vadd.f32 %v4338_v23, %v4249_v52  ;;  %v4427_v63 = vpop.f32.mrf.mxu3  ;;  %v16058_v25 = vadd.f32 %v4162_v34, %v15597_v30  ;;  %v4251_v58 = vpop.f32.mrf.mxu1  ;;  %v11180_v52 = vor.u32 %v13201_v59, %v11177_v27  ;;  %v16070_v30 = vor.u32 %v13082_v46, %v10699_v18  ;;  %v21166_v59 = vld [vmem:[#allocation34_spill] sm:$0xff]  ;;  %v21167_v34 = vld [vmem:[#allocation35_spill] sm:$0xff]  ;;  %v21168_v27 = vld [vmem:[#allocation36_spill] sm:$0xff] }
 0x3d5   : > { %21163 = vst [vmem:[#allocation11_spill] sm:$0xff] %v16058_v25  ;;  %v16060_v36 = vadd.f32 %v4427_v63, %v4339_v57  ;;  %4592 = vmatpush.bf16.msra.mxu1 %v11180_v52 }
 0x3d6   : > { %21164 = vst [vmem:[#allocation12_spill] sm:$0xff] %v16070_v30 }
 0x3da   : > { %v4340_v0 = vpop.f32.mrf.mxu2  ;;  %v4165_v51 = vpop.f32.mrf.mxu0 }
 0x3db   : > { %v4341_v47 = vadd.f32 %v4340_v0, %v4251_v58  ;;  %v4429_v23 = vpop.f32.mrf.mxu3  ;;  %v16073_v33 = vadd.f32 %v4165_v51, %v15604_v31  ;;  %v4254_v57 = vpop.f32.mrf.mxu1 }
 0x3dd   : > { %21165 = vst [vmem:[#allocation14_spill] sm:$0xff] %v16073_v33  ;;  %v16075_v63 = vadd.f32 %v4429_v23, %v4341_v47  ;;  %4204 = vmatmul.bf16.gmra.mxu0 %v16070_v30  ;;  %v10751_v47 = vld [vmem:[%s14005_s8 + $0x510] sm:$0xf]  ;;  %v13095_v23 = vld [vmem:[%s14005_s8 + $0x540] sm:$0xf0] }
 0x3de   : > { %4293 = vmatmul.bf16.gmra.mxu1 %v21166_v59  ;;  %v16088_v30 = vor.u32 %v13095_v23, %v10751_v47  ;;  %v13231_v47 = vld [vmem:[%s20675_s3 + $0x304] sm:$0xf]  ;;  %v11297_v23 = vld [vmem:[%s20675_s3 + $0x308] sm:$0xf0] }
 0x3df   : > { %4382 = vmatmul.bf16.gmra.mxu2 %v21167_v34 }
 0x3e0   : > { %4471 = vmatmul.bf16.gmra.mxu3 %v21168_v27  ;;  %21170 = vst [vmem:[#allocation16_spill] sm:$0xff] %v16088_v30 }
 0x3e2   : > { %v4343_v52 = vpop.f32.mrf.mxu2  ;;  %v4167_v46 = vpop.f32.mrf.mxu0 }
 0x3e3   : > { %v4344_v58 = vadd.f32 %v4343_v52, %v4254_v57  ;;  %v4432_v18 = vpop.f32.mrf.mxu3  ;;  %v16082_v0 = vadd.f32 %v4167_v46, %v15623_v19  ;;  %v4256_v31 = vpop.f32.mrf.mxu1  ;;  %v21172_v19 = vld [vmem:[#allocation38_spill] sm:$0xff] }
 0x3e5   : > { %21169 = vst [vmem:[#allocation15_spill] sm:$0xff] %v16082_v0  ;;  %v16084_v51 = vadd.f32 %v4432_v18, %v4344_v58  ;;  %v21173_v58 = vld [vmem:[#allocation39_spill] sm:$0xff]  ;;  %v21174_v18 = vld [vmem:[#allocation40_spill] sm:$0xff]  ;;  %v13199_v0 = vld [vmem:[%s20675_s3 + $0x204] sm:$0xf] }
 0x3ea   : > { %v4345_v33 = vpop.f32.mrf.mxu2  ;;  %v4170_v34 = vpop.f32.mrf.mxu0 }
 0x3eb   : > { %v4346_v59 = vadd.f32 %v4345_v33, %v4256_v31  ;;  %v4434_v25 = vpop.f32.mrf.mxu3  ;;  %v16091_v27 = vadd.f32 %v4170_v34, %v15648_v17  ;;  %v4259_v57 = vpop.f32.mrf.mxu1  ;;  %v13215_v33 = vld [vmem:[%s20675_s3 + $0x284] sm:$0xf]  ;;  %v11233_v17 = vld [vmem:[%s20675_s3 + $0x288] sm:$0xf0] }
 0x3ec   : > { %v11236_v46 = vor.u32 %v13215_v33, %v11233_v17  ;;  %v11105_v31 = vld [vmem:[%s20675_s3 + $0x188] sm:$0xf0] }
 0x3ed   : > { %21171 = vst [vmem:[#allocation18_spill] sm:$0xff] %v16091_v27  ;;  %v16093_v52 = vadd.f32 %v4434_v25, %v4346_v59  ;;  %4209 = vmatmul.bf16.gmra.mxu0 %v16088_v30  ;;  %v13183_v25 = vld [vmem:[%s20675_s3 + $0x184] sm:$0xf] }
 0x3ee   : > { %4298 = vmatmul.bf16.gmra.mxu1 %v21172_v19  ;;  %v11108_v34 = vor.u32 %v13183_v25, %v11105_v31  ;;  %v11300_v19 = vor.u32 %v13231_v47, %v11297_v23  ;;  %4682 = vmatpush.bf16.msra.mxu2 %v11236_v46  ;;  %v11169_v25 = vld [vmem:[%s20675_s3 + $0x208] sm:$0xf0]  ;;  %v10803_v31 = vld [vmem:[%s14005_s8 + $0x578] sm:$0xf] }
 0x3ef   : > { %4387 = vmatmul.bf16.gmra.mxu2 %v21173_v58  ;;  %v13108_v47 = vld [vmem:[%s14005_s8 + $0x5a8] sm:$0xf0] }
 0x3f0   : > { %4476 = vmatmul.bf16.gmra.mxu3 %v21174_v18  ;;  %4504 = vmatpush.bf16.msra.mxu0 %v11108_v34 }
 0x3f1   : > { %4771 = vmatpush.bf16.msra.mxu3 %v11300_v19 }
 0x3f2   : > { %v4348_v59 = vpop.f32.mrf.mxu2  ;;  %v4172_v33 = vpop.f32.mrf.mxu0 }
 0x3f3   : > { %v4349_v58 = vadd.f32 %v4348_v59, %v4259_v57  ;;  %v4437_v18 = vpop.f32.mrf.mxu3  ;;  %v16118_v17 = vadd.f32 %v4172_v33, %v15673_v39  ;;  %v4261_v27 = vpop.f32.mrf.mxu1  ;;  %v11172_v57 = vor.u32 %v13199_v0, %v11169_v25  ;;  %v16130_v39 = vor.u32 %v13108_v47, %v10803_v31  ;;  %v21178_v0 = vld [vmem:[#allocation42_spill] sm:$0xff]  ;;  %v21179_v33 = vld [vmem:[#allocation43_spill] sm:$0xff]  ;;  %v21180_v25 = vld [vmem:[#allocation44_spill] sm:$0xff] }
 0x3f5   : > { %21175 = vst [vmem:[#allocation19_spill] sm:$0xff] %v16118_v17  ;;  %v16120_v30 = vadd.f32 %v4437_v18, %v4349_v58  ;;  %4593 = vmatpush.bf16.msra.mxu1 %v11172_v57 }
 0x3f6   : > { %21176 = vst [vmem:[#allocation20_spill] sm:$0xff] %v16130_v39 }
 0x3fa   : > { %v4350_v46 = vpop.f32.mrf.mxu2  ;;  %v4175_v34 = vpop.f32.mrf.mxu0 }
 0x3fb   : > { %v4351_v23 = vadd.f32 %v4350_v46, %v4261_v27  ;;  %v4439_v59 = vpop.f32.mrf.mxu3  ;;  %v16133_v19 = vadd.f32 %v4175_v34, %v15680_v53  ;;  %v4264_v58 = vpop.f32.mrf.mxu1 }
 0x3fd   : > { %21177 = vst [vmem:[#allocation22_spill] sm:$0xff] %v16133_v19  ;;  %v16135_v18 = vadd.f32 %v4439_v59, %v4351_v23  ;;  %4214 = vmatmul.bf16.gmra.mxu0 %v16130_v39  ;;  %v10855_v23 = vld [vmem:[%s14005_s8 + $0x5e0] sm:$0xf]  ;;  %v13121_v59 = vld [vmem:[%s14005_s8 + $0x610] sm:$0xf0] }
 0x3fe   : > { %4303 = vmatmul.bf16.gmra.mxu1 %v21178_v0  ;;  %v16148_v39 = vor.u32 %v13121_v59, %v10855_v23  ;;  %v13309_v23 = vld [vmem:[%s20675_s3 + $0x574] sm:$0xf]  ;;  %v11609_v59 = vld [vmem:[%s20675_s3 + $0x578] sm:$0xf0] }
 0x3ff   : > { %4392 = vmatmul.bf16.gmra.mxu2 %v21179_v33 }
 0x400   : > { %4481 = vmatmul.bf16.gmra.mxu3 %v21180_v25  ;;  %21182 = vst [vmem:[#allocation24_spill] sm:$0xff] %v16148_v39 }
 0x402   : > { %v4353_v57 = vpop.f32.mrf.mxu2  ;;  %v4177_v47 = vpop.f32.mrf.mxu0 }
 0x403   : > { %v4354_v27 = vadd.f32 %v4353_v57, %v4264_v58  ;;  %v4442_v31 = vpop.f32.mrf.mxu3  ;;  %v16142_v46 = vadd.f32 %v4177_v47, %v15699_v11  ;;  %v4266_v53 = vpop.f32.mrf.mxu1  ;;  %v21184_v11 = vld [vmem:[#allocation46_spill] sm:$0xff] }
 0x405   : > { %21181 = vst [vmem:[#allocation23_spill] sm:$0xff] %v16142_v46  ;;  %v16144_v34 = vadd.f32 %v4442_v31, %v4354_v27  ;;  %v21185_v27 = vld [vmem:[#allocation47_spill] sm:$0xff]  ;;  %v21186_v31 = vld [vmem:[#allocation48_spill] sm:$0xff] }
 0x406   : > { %v13277_v46 = vld [vmem:[%s20675_s3 + $0x474] sm:$0xf] }
 0x40a   : > { %v4355_v19 = vpop.f32.mrf.mxu2  ;;  %v4180_v33 = vpop.f32.mrf.mxu0 }
 0x40b   : > { %v4356_v0 = vadd.f32 %v4355_v19, %v4266_v53  ;;  %v4444_v17 = vpop.f32.mrf.mxu3  ;;  %v16151_v25 = vadd.f32 %v4180_v33, %v15724_v9  ;;  %v4269_v58 = vpop.f32.mrf.mxu1  ;;  %v13293_v19 = vld [vmem:[%s20675_s3 + $0x4f4] sm:$0xf]  ;;  %v11545_v9 = vld [vmem:[%s20675_s3 + $0x4f8] sm:$0xf0] }
 0x40c   : > { %v11548_v47 = vor.u32 %v13293_v19, %v11545_v9  ;;  %v11417_v53 = vld [vmem:[%s20675_s3 + $0x3f8] sm:$0xf0] }
 0x40d   : > { %21183 = vst [vmem:[#allocation26_spill] sm:$0xff] %v16151_v25  ;;  %v16153_v57 = vadd.f32 %v4444_v17, %v4356_v0  ;;  %4219 = vmatmul.bf16.gmra.mxu0 %v16148_v39  ;;  %v13261_v17 = vld [vmem:[%s20675_s3 + $0x3f4] sm:$0xf] }
 0x40e   : > { %4308 = vmatmul.bf16.gmra.mxu1 %v21184_v11  ;;  %v11420_v33 = vor.u32 %v13261_v17, %v11417_v53  ;;  %v11612_v11 = vor.u32 %v13309_v23, %v11609_v59  ;;  %5031 = vmatpush.bf16.msrb.mxu2 %v11548_v47  ;;  %v11481_v17 = vld [vmem:[%s20675_s3 + $0x478] sm:$0xf0]  ;;  %v10907_v53 = vld [vmem:[%s14005_s8 + $0x648] sm:$0xf] }
 0x40f   : > { %4397 = vmatmul.bf16.gmra.mxu2 %v21185_v27  ;;  %v13134_v23 = vld [vmem:[%s14005_s8 + $0x678] sm:$0xf0] }
 0x410   : > { %4486 = vmatmul.bf16.gmra.mxu3 %v21186_v31  ;;  %4853 = vmatpush.bf16.msrb.mxu0 %v11420_v33 }
 0x411   : > { %5120 = vmatpush.bf16.msrb.mxu3 %v11612_v11 }
 0x412   : > { %v4358_v0 = vpop.f32.mrf.mxu2  ;;  %v4182_v19 = vpop.f32.mrf.mxu0 }
 0x413   : > { %v4359_v27 = vadd.f32 %v4358_v0, %v4269_v58  ;;  %v4447_v31 = vpop.f32.mrf.mxu3  ;;  %v16178_v9 = vadd.f32 %v4182_v19, %v15749_v56  ;;  %v4271_v25 = vpop.f32.mrf.mxu1  ;;  %v11484_v58 = vor.u32 %v13277_v46, %v11481_v17  ;;  %v16190_v56 = vor.u32 %v13134_v23, %v10907_v53  ;;  %v21190_v19 = vld [vmem:[#allocation50_spill] sm:$0xff]  ;;  %v21191_v46 = vld [vmem:[#allocation51_spill] sm:$0xff]  ;;  %v21192_v17 = vld [vmem:[#allocation52_spill] sm:$0xff] }
 0x415   : > { %21187 = vst [vmem:[#allocation27_spill] sm:$0xff] %v16178_v9  ;;  %v16180_v39 = vadd.f32 %v4447_v31, %v4359_v27  ;;  %4942 = vmatpush.bf16.msrb.mxu1 %v11484_v58 }
 0x416   : > { %21188 = vst [vmem:[#allocation28_spill] sm:$0xff] %v16190_v56 }
 0x41a   : > { %v4360_v47 = vpop.f32.mrf.mxu2  ;;  %v4185_v33 = vpop.f32.mrf.mxu0 }
 0x41b   : > { %v4361_v59 = vadd.f32 %v4360_v47, %v4271_v25  ;;  %v4449_v0 = vpop.f32.mrf.mxu3  ;;  %v16193_v11 = vadd.f32 %v4185_v33, %v15756_v38  ;;  %v4274_v27 = vpop.f32.mrf.mxu1 }
 0x41d   : > { %21189 = vst [vmem:[#allocation30_spill] sm:$0xff] %v16193_v11  ;;  %v16195_v31 = vadd.f32 %v4449_v0, %v4361_v59  ;;  %4224 = vmatmul.bf16.gmra.mxu0 %v16190_v56 }
 0x41e   : > { %4313 = vmatmul.bf16.gmra.mxu1 %v21190_v19 }
 0x41f   : > { %4402 = vmatmul.bf16.gmra.mxu2 %v21191_v46 }
 0x420   : > { %4491 = vmatmul.bf16.gmra.mxu3 %v21192_v17  ;;  %v21195_v17 = vld [vmem:[#allocation2_spill] sm:$0xff] }
 0x422   : > { %v4363_v58 = vpop.f32.mrf.mxu2  ;;  %v4187_v25 = vpop.f32.mrf.mxu0 }
 0x423   : > { %v4364_v53 = vadd.f32 %v4363_v58, %v4274_v27  ;;  %v4452_v23 = vpop.f32.mrf.mxu3  ;;  %v16202_v47 = vadd.f32 %v4187_v25, %v15763_v6  ;;  %v4276_v38 = vpop.f32.mrf.mxu1  ;;  %v21196_v27 = vld [vmem:[#allocation54_spill] sm:$0xff]  ;;  %v21197_v58 = vld [vmem:[#allocation55_spill] sm:$0xff]  ;;  %v21198_v6 = vld [vmem:[#allocation56_spill] sm:$0xff] }
 0x424   : > { %v13307_v25 = vld [vmem:[%s20675_s3 + $0x564] sm:$0xf] }
 0x425   : > { %21193 = vst [vmem:[#allocation31_spill] sm:$0xff] %v16202_v47  ;;  %v16204_v33 = vadd.f32 %v4452_v23, %v4364_v53  ;;  %v13291_v53 = vld [vmem:[%s20675_s3 + $0x4e4] sm:$0xf]  ;;  %v11409_v23 = vld [vmem:[%s20675_s3 + $0x3e8] sm:$0xf0] }
 0x426   : > { %v13275_v47 = vld [vmem:[%s20675_s3 + $0x464] sm:$0xf] }
 0x42a   : > { %v4365_v59 = vpop.f32.mrf.mxu2  ;;  %v4190_v56 = vpop.f32.mrf.mxu0 }
 0x42b   : > { %v4366_v0 = vadd.f32 %v4365_v59, %v4276_v38  ;;  %v4454_v11 = vpop.f32.mrf.mxu3  ;;  %v16207_v19 = vadd.f32 %v4190_v56, %v15788_v48  ;;  %v4279_v46 = vpop.f32.mrf.mxu1  ;;  %v11537_v48 = vld [vmem:[%s20675_s3 + $0x4e8] sm:$0xf0]  ;;  %v13259_v56 = vld [vmem:[%s20675_s3 + $0x3e4] sm:$0xf] }
 0x42c   : > { %v11601_v38 = vld [vmem:[%s20675_s3 + $0x568] sm:$0xf0] }
 0x42d   : > { %21194 = vst [vmem:[#allocation32_spill] sm:$0xff] %v16207_v19  ;;  %v16209_v9 = vadd.f32 %v4454_v11, %v4366_v0  ;;  %4505 = vmatmul.bf16.vlgmr.msra.gmra.mxu0 %v21195_v17  ;;  %v11540_v11 = vor.u32 %v13291_v53, %v11537_v48  ;;  %v11412_v0 = vor.u32 %v13259_v56, %v11409_v23  ;;  %v11473_v56 = vld [vmem:[%s20675_s3 + $0x468] sm:$0xf0] }
 0x42e   : > { %4594 = vmatmul.bf16.vlgmr.msra.gmra.mxu1 %v21196_v27  ;;  %v11604_v17 = vor.u32 %v13307_v25, %v11601_v38 }
 0x42f   : > { %4683 = vmatmul.bf16.vlgmr.msra.gmra.mxu2 %v21197_v58  ;;  %4854 = vmatpush.bf16.msrb.mxu0 %v11412_v0 }
 0x430   : > { %4772 = vmatmul.bf16.vlgmr.msra.gmra.mxu3 %v21198_v6  ;;  %5032 = vmatpush.bf16.msrb.mxu2 %v11540_v11 }
 0x431   : > { %5121 = vmatpush.bf16.msrb.mxu3 %v11604_v17  ;;  %v21201_v17 = vld [vmem:[#allocation3_spill] sm:$0xff] }
 0x432   : > { %v4368_v59 = vpop.f32.mrf.mxu2  ;;  %v4192_v6 = vpop.f32.mrf.mxu0 }
 0x433   : > { %v4369_v27 = vadd.f32 %v4368_v59, %v4279_v46  ;;  %v4457_v58 = vpop.f32.mrf.mxu3  ;;  %v16234_v53 = vadd.f32 %v4192_v6, %v15801_v5  ;;  %v4281_v48 = vpop.f32.mrf.mxu1  ;;  %v11476_v46 = vor.u32 %v13275_v47, %v11473_v56  ;;  %v21204_v6 = vld [vmem:[#allocation60_spill] sm:$0xff] }
 0x435   : > { %21199 = vst [vmem:[#allocation34_spill] sm:$0xff] %v16234_v53  ;;  %v16236_v19 = vadd.f32 %v4457_v58, %v4369_v27  ;;  %4943 = vmatpush.bf16.msrb.mxu1 %v11476_v46  ;;  %v21202_v27 = vld [vmem:[#allocation58_spill] sm:$0xff]  ;;  %v21203_v58 = vld [vmem:[#allocation59_spill] sm:$0xff] }
 0x43a   : > { %v4370_v23 = vpop.f32.mrf.mxu2  ;;  %v4195_v5 = vpop.f32.mrf.mxu0 }
 0x43b   : > { %v4371_v11 = vadd.f32 %v4370_v23, %v4281_v48  ;;  %v4459_v25 = vpop.f32.mrf.mxu3  ;;  %v16245_v38 = vadd.f32 %v4195_v5, %v15808_v29  ;;  %v4284_v59 = vpop.f32.mrf.mxu1 }
 0x43d   : > { %21200 = vst [vmem:[#allocation35_spill] sm:$0xff] %v16245_v38  ;;  %v16247_v0 = vadd.f32 %v4459_v25, %v4371_v11  ;;  %4510 = vmatmul.bf16.gmra.mxu0 %v21201_v17 }
 0x43e   : > { %4599 = vmatmul.bf16.gmra.mxu1 %v21202_v27 }
 0x43f   : > { %4688 = vmatmul.bf16.gmra.mxu2 %v21203_v58 }
 0x440   : > { %4777 = vmatmul.bf16.gmra.mxu3 %v21204_v6  ;;  %v21207_v6 = vld [vmem:[#allocation4_spill] sm:$0xff] }
 0x442   : > { %v4373_v47 = vpop.f32.mrf.mxu2  ;;  %v4197_v48 = vpop.f32.mrf.mxu0 }
 0x443   : > { %v4374_v56 = vadd.f32 %v4373_v47, %v4284_v59  ;;  %v4462_v46 = vpop.f32.mrf.mxu3  ;;  %v16254_v23 = vadd.f32 %v4197_v48, %v15815_v44  ;;  %v4286_v29 = vpop.f32.mrf.mxu1  ;;  %v21208_v59 = vld [vmem:[#allocation62_spill] sm:$0xff]  ;;  %v21209_v47 = vld [vmem:[#allocation63_spill] sm:$0xff]  ;;  %v21210_v44 = vld [vmem:[#allocation64_spill] sm:$0xff] }
 0x444   : > { %v11401_v48 = vld [vmem:[%s20675_s3 + $0x3d8] sm:$0xf0] }
 0x445   : > { %21205 = vst [vmem:[#allocation36_spill] sm:$0xff] %v16254_v23  ;;  %v16256_v5 = vadd.f32 %v4462_v46, %v4374_v56  ;;  %v13289_v56 = vld [vmem:[%s20675_s3 + $0x4d4] sm:$0xf] }
 0x446   : > { %v13273_v23 = vld [vmem:[%s20675_s3 + $0x454] sm:$0xf] }
 0x44a   : > { %v4375_v11 = vpop.f32.mrf.mxu2  ;;  %v4200_v17 = vpop.f32.mrf.mxu0 }
 0x44b   : > { %v4376_v25 = vadd.f32 %v4375_v11, %v4286_v29  ;;  %v4464_v38 = vpop.f32.mrf.mxu3  ;;  %v16259_v27 = vadd.f32 %v4200_v17, %v15840_v20  ;;  %v4289_v58 = vpop.f32.mrf.mxu1  ;;  %v11529_v20 = vld [vmem:[%s20675_s3 + $0x4d8] sm:$0xf0]  ;;  %v13305_v29 = vld [vmem:[%s20675_s3 + $0x554] sm:$0xf] }
 0x44c   : > { %v11532_v46 = vor.u32 %v13289_v56, %v11529_v20  ;;  %v11593_v11 = vld [vmem:[%s20675_s3 + $0x558] sm:$0xf0] }
 0x44d   : > { %21206 = vst [vmem:[#allocation38_spill] sm:$0xff] %v16259_v27  ;;  %v16261_v53 = vadd.f32 %v4464_v38, %v4376_v25  ;;  %4515 = vmatmul.bf16.gmra.mxu0 %v21207_v6  ;;  %v13257_v38 = vld [vmem:[%s20675_s3 + $0x3d4] sm:$0xf]  ;;  %v11596_v6 = vor.u32 %v13305_v29, %v11593_v11 }
 0x44e   : > { %4604 = vmatmul.bf16.gmra.mxu1 %v21208_v59  ;;  %v11404_v17 = vor.u32 %v13257_v38, %v11401_v48  ;;  %5033 = vmatpush.bf16.msrb.mxu2 %v11532_v46  ;;  %v11465_v38 = vld [vmem:[%s20675_s3 + $0x458] sm:$0xf0] }
 0x44f   : > { %4693 = vmatmul.bf16.gmra.mxu2 %v21209_v47  ;;  %5122 = vmatpush.bf16.msrb.mxu3 %v11596_v6  ;;  %v21213_v6 = vld [vmem:[#allocation5_spill] sm:$0xff] }
 0x450   : > { %4782 = vmatmul.bf16.gmra.mxu3 %v21210_v44  ;;  %4855 = vmatpush.bf16.msrb.mxu0 %v11404_v17 }
 0x452   : > { %v4378_v25 = vpop.f32.mrf.mxu2  ;;  %v4202_v44 = vpop.f32.mrf.mxu0 }
 0x453   : > { %v4379_v59 = vadd.f32 %v4378_v25, %v4289_v58  ;;  %v4467_v47 = vpop.f32.mrf.mxu3  ;;  %v16286_v56 = vadd.f32 %v4202_v44, %v15853_v24  ;;  %v4291_v20 = vpop.f32.mrf.mxu1  ;;  %v11468_v58 = vor.u32 %v13273_v23, %v11465_v38  ;;  %v21216_v44 = vld [vmem:[#allocation68_spill] sm:$0xff] }
 0x455   : > { %21211 = vst [vmem:[#allocation39_spill] sm:$0xff] %v16286_v56  ;;  %v16288_v27 = vadd.f32 %v4467_v47, %v4379_v59  ;;  %4944 = vmatpush.bf16.msrb.mxu1 %v11468_v58  ;;  %v21214_v59 = vld [vmem:[#allocation66_spill] sm:$0xff]  ;;  %v21215_v47 = vld [vmem:[#allocation67_spill] sm:$0xff] }
 0x45a   : > { %v4380_v48 = vpop.f32.mrf.mxu2  ;;  %v4205_v24 = vpop.f32.mrf.mxu0 }
 0x45b   : > { %v4381_v46 = vadd.f32 %v4380_v48, %v4291_v20  ;;  %v4469_v29 = vpop.f32.mrf.mxu3  ;;  %v16297_v11 = vadd.f32 %v4205_v24, %v15860_v41  ;;  %v4294_v25 = vpop.f32.mrf.mxu1 }
 0x45d   : > { %21212 = vst [vmem:[#allocation40_spill] sm:$0xff] %v16297_v11  ;;  %v16299_v17 = vadd.f32 %v4469_v29, %v4381_v46  ;;  %4520 = vmatmul.bf16.gmra.mxu0 %v21213_v6 }
 0x45e   : > { %4609 = vmatmul.bf16.gmra.mxu1 %v21214_v59 }
 0x45f   : > { %4698 = vmatmul.bf16.gmra.mxu2 %v21215_v47 }
 0x460   : > { %4787 = vmatmul.bf16.gmra.mxu3 %v21216_v44  ;;  %v21219_v44 = vld [vmem:[#allocation9_spill] sm:$0xff] }
 0x462   : > { %v4383_v23 = vpop.f32.mrf.mxu2  ;;  %v4207_v20 = vpop.f32.mrf.mxu0 }
 0x463   : > { %v4384_v38 = vadd.f32 %v4383_v23, %v4294_v25  ;;  %v4472_v58 = vpop.f32.mrf.mxu3  ;;  %v16306_v48 = vadd.f32 %v4207_v20, %v15867_v13  ;;  %v4296_v41 = vpop.f32.mrf.mxu1  ;;  %v21220_v25 = vld [vmem:[#allocation70_spill] sm:$0xff]  ;;  %v21221_v23 = vld [vmem:[#allocation71_spill] sm:$0xff]  ;;  %v21222_v13 = vld [vmem:[#allocation72_spill] sm:$0xff] }
 0x464   : > { %v11393_v20 = vld [vmem:[%s20675_s3 + $0x3c8] sm:$0xf0] }
 0x465   : > { %21217 = vst [vmem:[#allocation42_spill] sm:$0xff] %v16306_v48  ;;  %v16308_v24 = vadd.f32 %v4472_v58, %v4384_v38  ;;  %v13287_v38 = vld [vmem:[%s20675_s3 + $0x4c4] sm:$0xf] }
 0x466   : > { %v13271_v48 = vld [vmem:[%s20675_s3 + $0x444] sm:$0xf] }
 0x46a   : > { %v4385_v46 = vpop.f32.mrf.mxu2  ;;  %v4210_v6 = vpop.f32.mrf.mxu0 }
 0x46b   : > { %v4386_v29 = vadd.f32 %v4385_v46, %v4296_v41  ;;  %v4474_v11 = vpop.f32.mrf.mxu3  ;;  %v16311_v59 = vadd.f32 %v4210_v6, %v15892_v3  ;;  %v4299_v47 = vpop.f32.mrf.mxu1  ;;  %v11521_v3 = vld [vmem:[%s20675_s3 + $0x4c8] sm:$0xf0]  ;;  %v13303_v41 = vld [vmem:[%s20675_s3 + $0x544] sm:$0xf] }
 0x46c   : > { %v11524_v58 = vor.u32 %v13287_v38, %v11521_v3  ;;  %v11585_v46 = vld [vmem:[%s20675_s3 + $0x548] sm:$0xf0] }
 0x46d   : > { %21218 = vst [vmem:[#allocation43_spill] sm:$0xff] %v16311_v59  ;;  %v16313_v56 = vadd.f32 %v4474_v11, %v4386_v29  ;;  %4525 = vmatmul.bf16.gmra.mxu0 %v21219_v44  ;;  %v13255_v11 = vld [vmem:[%s20675_s3 + $0x3c4] sm:$0xf]  ;;  %v11588_v44 = vor.u32 %v13303_v41, %v11585_v46 }
 0x46e   : > { %4614 = vmatmul.bf16.gmra.mxu1 %v21220_v25  ;;  %v11396_v6 = vor.u32 %v13255_v11, %v11393_v20  ;;  %5034 = vmatpush.bf16.msrb.mxu2 %v11524_v58  ;;  %v11457_v11 = vld [vmem:[%s20675_s3 + $0x448] sm:$0xf0] }
 0x46f   : > { %4703 = vmatmul.bf16.gmra.mxu2 %v21221_v23  ;;  %5123 = vmatpush.bf16.msrb.mxu3 %v11588_v44  ;;  %v21225_v44 = vld [vmem:[#allocation13_spill] sm:$0xff] }
 0x470   : > { %4792 = vmatmul.bf16.gmra.mxu3 %v21222_v13  ;;  %4856 = vmatpush.bf16.msrb.mxu0 %v11396_v6 }
 0x472   : > { %v4388_v29 = vpop.f32.mrf.mxu2  ;;  %v4212_v13 = vpop.f32.mrf.mxu0 }
 0x473   : > { %v4389_v25 = vadd.f32 %v4388_v29, %v4299_v47  ;;  %v4477_v23 = vpop.f32.mrf.mxu3  ;;  %v16338_v38 = vadd.f32 %v4212_v13, %v15905_v50  ;;  %v4301_v3 = vpop.f32.mrf.mxu1  ;;  %v11460_v47 = vor.u32 %v13271_v48, %v11457_v11  ;;  %v21228_v13 = vld [vmem:[#allocation76_spill] sm:$0xff] }
 0x475   : > { %21223 = vst [vmem:[#allocation44_spill] sm:$0xff] %v16338_v38  ;;  %v16340_v59 = vadd.f32 %v4477_v23, %v4389_v25  ;;  %4945 = vmatpush.bf16.msrb.mxu1 %v11460_v47  ;;  %v21226_v25 = vld [vmem:[#allocation74_spill] sm:$0xff]  ;;  %v21227_v23 = vld [vmem:[#allocation75_spill] sm:$0xff] }
 0x47a   : > { %v4390_v20 = vpop.f32.mrf.mxu2  ;;  %v4215_v50 = vpop.f32.mrf.mxu0 }
 0x47b   : > { %v4391_v58 = vadd.f32 %v4390_v20, %v4301_v3  ;;  %v4479_v41 = vpop.f32.mrf.mxu3  ;;  %v16349_v46 = vadd.f32 %v4215_v50, %v15912_v7  ;;  %v4304_v29 = vpop.f32.mrf.mxu1 }
 0x47d   : > { %21224 = vst [vmem:[#allocation46_spill] sm:$0xff] %v16349_v46  ;;  %v16351_v6 = vadd.f32 %v4479_v41, %v4391_v58  ;;  %4530 = vmatmul.bf16.gmra.mxu0 %v21225_v44 }
 0x47e   : > { %4619 = vmatmul.bf16.gmra.mxu1 %v21226_v25 }
 0x47f   : > { %4708 = vmatmul.bf16.gmra.mxu2 %v21227_v23 }
 0x480   : > { %4797 = vmatmul.bf16.gmra.mxu3 %v21228_v13  ;;  %v21231_v13 = vld [vmem:[#allocation17_spill] sm:$0xff] }
 0x482   : > { %v4393_v48 = vpop.f32.mrf.mxu2  ;;  %v4217_v3 = vpop.f32.mrf.mxu0 }
 0x483   : > { %v4394_v11 = vadd.f32 %v4393_v48, %v4304_v29  ;;  %v4482_v47 = vpop.f32.mrf.mxu3  ;;  %v16358_v20 = vadd.f32 %v4217_v3, %v15919_v45  ;;  %v4306_v7 = vpop.f32.mrf.mxu1  ;;  %v21232_v29 = vld [vmem:[#allocation78_spill] sm:$0xff]  ;;  %v21233_v48 = vld [vmem:[#allocation79_spill] sm:$0xff]  ;;  %v21234_v45 = vld [vmem:[#allocation80_spill] sm:$0xff] }
 0x484   : > { %v11385_v3 = vld [vmem:[%s20675_s3 + $0x3b8] sm:$0xf0] }
 0x485   : > { %21229 = vst [vmem:[#allocation47_spill] sm:$0xff] %v16358_v20  ;;  %v16360_v50 = vadd.f32 %v4482_v47, %v4394_v11  ;;  %v13285_v11 = vld [vmem:[%s20675_s3 + $0x4b4] sm:$0xf] }
 0x486   : > { %v13269_v20 = vld [vmem:[%s20675_s3 + $0x434] sm:$0xf] }
 0x48a   : > { %v4395_v58 = vpop.f32.mrf.mxu2  ;;  %v4220_v44 = vpop.f32.mrf.mxu0 }
 0x48b   : > { %v4396_v41 = vadd.f32 %v4395_v58, %v4306_v7  ;;  %v4484_v46 = vpop.f32.mrf.mxu3  ;;  %v16363_v25 = vadd.f32 %v4220_v44, %v15944_v14  ;;  %v4309_v23 = vpop.f32.mrf.mxu1  ;;  %v11513_v14 = vld [vmem:[%s20675_s3 + $0x4b8] sm:$0xf0]  ;;  %v13301_v7 = vld [vmem:[%s20675_s3 + $0x534] sm:$0xf] }
 0x48c   : > { %v11516_v47 = vor.u32 %v13285_v11, %v11513_v14  ;;  %v11577_v58 = vld [vmem:[%s20675_s3 + $0x538] sm:$0xf0] }
 0x48d   : > { %21230 = vst [vmem:[#allocation48_spill] sm:$0xff] %v16363_v25  ;;  %v16365_v38 = vadd.f32 %v4484_v46, %v4396_v41  ;;  %4535 = vmatmul.bf16.gmra.mxu0 %v21231_v13  ;;  %v13253_v46 = vld [vmem:[%s20675_s3 + $0x3b4] sm:$0xf]  ;;  %v11580_v13 = vor.u32 %v13301_v7, %v11577_v58 }
 0x48e   : > { %4624 = vmatmul.bf16.gmra.mxu1 %v21232_v29  ;;  %v11388_v44 = vor.u32 %v13253_v46, %v11385_v3  ;;  %5035 = vmatpush.bf16.msrb.mxu2 %v11516_v47  ;;  %v11449_v46 = vld [vmem:[%s20675_s3 + $0x438] sm:$0xf0] }
 0x48f   : > { %4713 = vmatmul.bf16.gmra.mxu2 %v21233_v48  ;;  %5124 = vmatpush.bf16.msrb.mxu3 %v11580_v13  ;;  %v21237_v13 = vld [vmem:[#allocation21_spill] sm:$0xff] }
 0x490   : > { %4802 = vmatmul.bf16.gmra.mxu3 %v21234_v45  ;;  %4857 = vmatpush.bf16.msrb.mxu0 %v11388_v44 }
 0x492   : > { %v4398_v41 = vpop.f32.mrf.mxu2  ;;  %v4222_v45 = vpop.f32.mrf.mxu0 }
 0x493   : > { %v4399_v29 = vadd.f32 %v4398_v41, %v4309_v23  ;;  %v4487_v48 = vpop.f32.mrf.mxu3  ;;  %v16390_v11 = vadd.f32 %v4222_v45, %v15957_v15  ;;  %v4311_v14 = vpop.f32.mrf.mxu1  ;;  %v11452_v23 = vor.u32 %v13269_v20, %v11449_v46  ;;  %v21240_v45 = vld [vmem:[#allocation84_spill] sm:$0xff] }
 0x495   : > { %21235 = vst [vmem:[#allocation50_spill] sm:$0xff] %v16390_v11  ;;  %v16392_v25 = vadd.f32 %v4487_v48, %v4399_v29  ;;  %4946 = vmatpush.bf16.msrb.mxu1 %v11452_v23  ;;  %v21238_v29 = vld [vmem:[#allocation82_spill] sm:$0xff]  ;;  %v21239_v48 = vld [vmem:[#allocation83_spill] sm:$0xff] }
 0x49a   : > { %v4400_v3 = vpop.f32.mrf.mxu2  ;;  %v4225_v15 = vpop.f32.mrf.mxu0 }
 0x49b   : > { %v4401_v47 = vadd.f32 %v4400_v3, %v4311_v14  ;;  %v4489_v7 = vpop.f32.mrf.mxu3  ;;  %v16401_v58 = vadd.f32 %v4225_v15, %v15964_v2  ;;  %v4314_v41 = vpop.f32.mrf.mxu1 }
 0x49d   : > { %21236 = vst [vmem:[#allocation51_spill] sm:$0xff] %v16401_v58  ;;  %v16403_v44 = vadd.f32 %v4489_v7, %v4401_v47  ;;  %4540 = vmatmul.bf16.gmra.mxu0 %v21237_v13 }
 0x49e   : > { %4629 = vmatmul.bf16.gmra.mxu1 %v21238_v29 }
 0x49f   : > { %4718 = vmatmul.bf16.gmra.mxu2 %v21239_v48 }
 0x4a0   : > { %4807 = vmatmul.bf16.gmra.mxu3 %v21240_v45 }
 0x4a2   : > { %v4403_v20 = vpop.f32.mrf.mxu2  ;;  %v4227_v14 = vpop.f32.mrf.mxu0 }
 0x4a3   : > { %v4404_v46 = vadd.f32 %v4403_v20, %v4314_v41  ;;  %v4492_v23 = vpop.f32.mrf.mxu3  ;;  %v16410_v3 = vadd.f32 %v4227_v14, %v15973_v60  ;;  %v4316_v2 = vpop.f32.mrf.mxu1  ;;  %v21243_v41 = vld [vmem:[#allocation86_spill] sm:$0xff]  ;;  %v21244_v20 = vld [vmem:[#allocation87_spill] sm:$0xff]  ;;  %v21245_v60 = vld [vmem:[#allocation88_spill] sm:$0xff] }
 0x4a4   : > { %v11569_v14 = vld [vmem:[%s20675_s3 + $0x528] sm:$0xf0] }
 0x4a5   : > { %21241 = vst [vmem:[#allocation52_spill] sm:$0xff] %v16410_v3  ;;  %v16412_v15 = vadd.f32 %v4492_v23, %v4404_v46  ;;  %v13283_v46 = vld [vmem:[%s20675_s3 + $0x4a4] sm:$0xf]  ;;  %v21248_v3 = vld [vmem:[#allocation91_spill] sm:$0xff] }
 0x4a6   : > { %v13299_v23 = vld [vmem:[%s20675_s3 + $0x524] sm:$0xf] }
 0x4aa   : > { %v4405_v47 = vpop.f32.mrf.mxu2  ;;  %v4506_v13 = vpop.f32.mrf.mxu0 }
 0x4ab   : > { %v4406_v7 = vadd.f32 %v4405_v47, %v4316_v2  ;;  %v4494_v58 = vpop.f32.mrf.mxu3  ;;  %v4507_v29 = vadd.f32 %v4506_v13, %v16000_v40  ;;  %v4595_v11 = vpop.f32.mrf.mxu1  ;;  %v11505_v40 = vld [vmem:[%s20675_s3 + $0x4a8] sm:$0xf0] }
 0x4ad   : > { %v16415_v48 = vadd.f32 %v4494_v58, %v4406_v7  ;;  %v4596_v45 = vadd.f32 %v4595_v11, %v4507_v29  ;;  %4545 = vmatmul.bf16.gmra.mxu0 %v21242_v22  ;;  %v13251_v11 = vld [vmem:[%s20675_s3 + $0x3a4] sm:$0xf]  ;;  %v11508_v58 = vor.u32 %v13283_v46, %v11505_v40  ;;  %v11377_v22 = vld [vmem:[%s20675_s3 + $0x3a8] sm:$0xf0]  ;;  %v11572_v7 = vor.u32 %v13299_v23, %v11569_v14 }
 0x4ae   : > { %4634 = vmatmul.bf16.gmra.mxu1 %v21243_v41  ;;  %v11380_v47 = vor.u32 %v13251_v11, %v11377_v22  ;;  %v13267_v40 = vld [vmem:[%s20675_s3 + $0x424] sm:$0xf]  ;;  %v11441_v11 = vld [vmem:[%s20675_s3 + $0x428] sm:$0xf0] }
 0x4af   : > { %4723 = vmatmul.bf16.gmra.mxu2 %v21244_v20  ;;  %5125 = vmatpush.bf16.msrb.mxu3 %v11572_v7 }
 0x4b0   : > { %4812 = vmatmul.bf16.gmra.mxu3 %v21245_v60  ;;  %5036 = vmatpush.bf16.msrb.mxu2 %v11508_v58 }
 0x4b1   : > { %4858 = vmatpush.bf16.msrb.mxu0 %v11380_v47 }
 0x4b2   : > { %v4684_v2 = vpop.f32.mrf.mxu2  ;;  %v4508_v41 = vpop.f32.mrf.mxu0 }
 0x4b3   : > { %v4685_v13 = vadd.f32 %v4684_v2, %v4596_v45  ;;  %v4773_v29 = vpop.f32.mrf.mxu3  ;;  %v4509_v20 = vadd.f32 %v4508_v41, %v16015_v32  ;;  %v4597_v60 = vpop.f32.mrf.mxu1  ;;  %v11444_v45 = vor.u32 %v13267_v40, %v11441_v11  ;;  %v21247_v41 = vld [vmem:[#allocation90_spill] sm:$0xff] }
 0x4b5   : > { %v16440_v46 = vadd.f32 %v4773_v29, %v4685_v13  ;;  %v4598_v22 = vadd.f32 %v4597_v60, %v4509_v20  ;;  %4947 = vmatpush.bf16.msrb.mxu1 %v11444_v45  ;;  %v21246_v29 = vld [vmem:[#allocation29_spill] sm:$0xff] }
 0x4ba   : > { %v4686_v23 = vpop.f32.mrf.mxu2  ;;  %v4511_v32 = vpop.f32.mrf.mxu0 }
 0x4bb   : > { %v4687_v58 = vadd.f32 %v4686_v23, %v4598_v22  ;;  %v4775_v14 = vpop.f32.mrf.mxu3  ;;  %v4512_v2 = vadd.f32 %v4511_v32, %v16024_v10  ;;  %v4600_v47 = vpop.f32.mrf.mxu1 }
 0x4bd   : > { %v16449_v7 = vadd.f32 %v4775_v14, %v4687_v58  ;;  %v4601_v13 = vadd.f32 %v4600_v47, %v4512_v2  ;;  %4550 = vmatmul.bf16.gmra.mxu0 %v21246_v29 }
 0x4be   : > { %4639 = vmatmul.bf16.gmra.mxu1 %v21247_v41  ;;  %v21250_v41 = vld [vmem:[#allocation33_spill] sm:$0xff] }
 0x4bf   : > { %4728 = vmatmul.bf16.gmra.mxu2 %v21248_v3 }
 0x4c0   : > { %4817 = vmatmul.bf16.gmra.mxu3 %v21249_v12 }
 0x4c2   : > { %v4689_v20 = vpop.f32.mrf.mxu2  ;;  %v4513_v11 = vpop.f32.mrf.mxu0 }
 0x4c3   : > { %v4690_v60 = vadd.f32 %v4689_v20, %v4601_v13  ;;  %v4778_v40 = vpop.f32.mrf.mxu3  ;;  %v4514_v22 = vadd.f32 %v4513_v11, %v16033_v49  ;;  %v4602_v45 = vpop.f32.mrf.mxu1  ;;  %v21251_v13 = vld [vmem:[#allocation94_spill] sm:$0xff]  ;;  %v21252_v20 = vld [vmem:[#allocation95_spill] sm:$0xff]  ;;  %v21253_v49 = vld [vmem:[#allocation96_spill] sm:$0xff] }
 0x4c5   : > { %v16456_v10 = vadd.f32 %v4778_v40, %v4690_v60  ;;  %v4603_v23 = vadd.f32 %v4602_v45, %v4514_v22  ;;  %v13281_v60 = vld [vmem:[%s20675_s3 + $0x494] sm:$0xf]  ;;  %v11369_v22 = vld [vmem:[%s20675_s3 + $0x398] sm:$0xf0] }
 0x4c6   : > { %v13249_v40 = vld [vmem:[%s20675_s3 + $0x394] sm:$0xf] }
 0x4c7   : > { %v13297_v45 = vld [vmem:[%s20675_s3 + $0x514] sm:$0xf] }
 0x4ca   : > { %v4691_v58 = vpop.f32.mrf.mxu2  ;;  %v4516_v2 = vpop.f32.mrf.mxu0 }
 0x4cb   : > { %v4692_v14 = vadd.f32 %v4691_v58, %v4603_v23  ;;  %v4780_v32 = vpop.f32.mrf.mxu3  ;;  %v4517_v47 = vadd.f32 %v4516_v2, %v16060_v36  ;;  %v4605_v29 = vpop.f32.mrf.mxu1  ;;  %v11497_v36 = vld [vmem:[%s20675_s3 + $0x498] sm:$0xf0] }
 0x4cc   : > { %v11500_v11 = vor.u32 %v13281_v60, %v11497_v36  ;;  %v11561_v23 = vld [vmem:[%s20675_s3 + $0x518] sm:$0xf0] }
 0x4cd   : > { %v16459_v3 = vadd.f32 %v4780_v32, %v4692_v14  ;;  %v4606_v12 = vadd.f32 %v4605_v29, %v4517_v47  ;;  %4555 = vmatmul.bf16.gmra.mxu0 %v21250_v41  ;;  %v11372_v14 = vor.u32 %v13249_v40, %v11369_v22  ;;  %v11564_v32 = vor.u32 %v13297_v45, %v11561_v23  ;;  %v11433_v60 = vld [vmem:[%s20675_s3 + $0x418] sm:$0xf0] }
 0x4ce   : > { %4644 = vmatmul.bf16.gmra.mxu1 %v21251_v13  ;;  %5037 = vmatpush.bf16.msrb.mxu2 %v11500_v11 }
 0x4cf   : > { %4733 = vmatmul.bf16.gmra.mxu2 %v21252_v20  ;;  %4859 = vmatpush.bf16.msrb.mxu0 %v11372_v14 }
 0x4d0   : > { %4822 = vmatmul.bf16.gmra.mxu3 %v21253_v49  ;;  %v13265_v49 = vld [vmem:[%s20675_s3 + $0x414] sm:$0xf] }
 0x4d1   : > { %5126 = vmatpush.bf16.msrb.mxu3 %v11564_v32  ;;  %v21254_v32 = vld [vmem:[#allocation37_spill] sm:$0xff] }
 0x4d2   : > { %v4694_v58 = vpop.f32.mrf.mxu2  ;;  %v4518_v29 = vpop.f32.mrf.mxu0 }
 0x4d3   : > { %v4695_v2 = vadd.f32 %v4694_v58, %v4606_v12  ;;  %v4783_v47 = vpop.f32.mrf.mxu3  ;;  %v4519_v41 = vadd.f32 %v4518_v29, %v16075_v63  ;;  %v4607_v13 = vpop.f32.mrf.mxu1  ;;  %v11436_v12 = vor.u32 %v13265_v49, %v11433_v60  ;;  %v21257_v29 = vld [vmem:[#allocation100_spill] sm:$0xff] }
 0x4d5   : > { %v16484_v20 = vadd.f32 %v4783_v47, %v4695_v2  ;;  %v4608_v36 = vadd.f32 %v4607_v13, %v4519_v41  ;;  %4948 = vmatpush.bf16.msrb.mxu1 %v11436_v12  ;;  %v21255_v2 = vld [vmem:[#allocation98_spill] sm:$0xff]  ;;  %v21256_v47 = vld [vmem:[#allocation99_spill] sm:$0xff] }
 0x4da   : > { %v4696_v40 = vpop.f32.mrf.mxu2  ;;  %v4521_v63 = vpop.f32.mrf.mxu0 }
 0x4db   : > { %v4697_v11 = vadd.f32 %v4696_v40, %v4608_v36  ;;  %v4785_v22 = vpop.f32.mrf.mxu3  ;;  %v4522_v45 = vadd.f32 %v4521_v63, %v16084_v51  ;;  %v4610_v23 = vpop.f32.mrf.mxu1 }
 0x4dd   : > { %v16493_v58 = vadd.f32 %v4785_v22, %v4697_v11  ;;  %v4611_v14 = vadd.f32 %v4610_v23, %v4522_v45  ;;  %4560 = vmatmul.bf16.gmra.mxu0 %v21254_v32 }
 0x4de   : > { %4649 = vmatmul.bf16.gmra.mxu1 %v21255_v2 }
 0x4df   : > { %4738 = vmatmul.bf16.gmra.mxu2 %v21256_v47 }
 0x4e0   : > { %4827 = vmatmul.bf16.gmra.mxu3 %v21257_v29  ;;  %v21258_v29 = vld [vmem:[#allocation41_spill] sm:$0xff] }
 0x4e2   : > { %v4699_v41 = vpop.f32.mrf.mxu2  ;;  %v4523_v60 = vpop.f32.mrf.mxu0 }
 0x4e3   : > { %v4700_v13 = vadd.f32 %v4699_v41, %v4611_v14  ;;  %v4788_v49 = vpop.f32.mrf.mxu3  ;;  %v4524_v36 = vadd.f32 %v4523_v60, %v16093_v52  ;;  %v4612_v12 = vpop.f32.mrf.mxu1  ;;  %v21259_v14 = vld [vmem:[#allocation102_spill] sm:$0xff]  ;;  %v21260_v41 = vld [vmem:[#allocation103_spill] sm:$0xff]  ;;  %v21261_v52 = vld [vmem:[#allocation104_spill] sm:$0xff] }
 0x4e5   : > { %v16500_v51 = vadd.f32 %v4788_v49, %v4700_v13  ;;  %v4613_v40 = vadd.f32 %v4612_v12, %v4524_v36  ;;  %v13279_v13 = vld [vmem:[%s20675_s3 + $0x484] sm:$0xf]  ;;  %v11361_v36 = vld [vmem:[%s20675_s3 + $0x388] sm:$0xf0] }
 0x4e6   : > { %v13247_v49 = vld [vmem:[%s20675_s3 + $0x384] sm:$0xf] }
 0x4e7   : > { %v13295_v12 = vld [vmem:[%s20675_s3 + $0x504] sm:$0xf] }
 0x4ea   : > { %v4701_v11 = vpop.f32.mrf.mxu2  ;;  %v4526_v45 = vpop.f32.mrf.mxu0 }
 0x4eb   : > { %v4702_v22 = vadd.f32 %v4701_v11, %v4613_v40  ;;  %v4790_v63 = vpop.f32.mrf.mxu3  ;;  %v4527_v23 = vadd.f32 %v4526_v45, %v16120_v30  ;;  %v4615_v32 = vpop.f32.mrf.mxu1  ;;  %v11489_v30 = vld [vmem:[%s20675_s3 + $0x488] sm:$0xf0] }
 0x4ec   : > { %v11492_v60 = vor.u32 %v13279_v13, %v11489_v30  ;;  %v11553_v40 = vld [vmem:[%s20675_s3 + $0x508] sm:$0xf0] }
 0x4ed   : > { %v16503_v2 = vadd.f32 %v4790_v63, %v4702_v22  ;;  %v4616_v47 = vadd.f32 %v4615_v32, %v4527_v23  ;;  %4565 = vmatmul.bf16.gmra.mxu0 %v21258_v29  ;;  %v11364_v22 = vor.u32 %v13247_v49, %v11361_v36  ;;  %v11556_v63 = vor.u32 %v13295_v12, %v11553_v40  ;;  %v11425_v13 = vld [vmem:[%s20675_s3 + $0x408] sm:$0xf0] }
 0x4ee   : > { %4654 = vmatmul.bf16.gmra.mxu1 %v21259_v14  ;;  %5038 = vmatpush.bf16.msrb.mxu2 %v11492_v60 }
 0x4ef   : > { %4743 = vmatmul.bf16.gmra.mxu2 %v21260_v41  ;;  %4860 = vmatpush.bf16.msrb.mxu0 %v11364_v22 }
 0x4f0   : > { %4832 = vmatmul.bf16.gmra.mxu3 %v21261_v52  ;;  %v13263_v52 = vld [vmem:[%s20675_s3 + $0x404] sm:$0xf] }
 0x4f1   : > { %5127 = vmatpush.bf16.msrb.mxu3 %v11556_v63  ;;  %v21262_v63 = vld [vmem:[#allocation45_spill] sm:$0xff] }
 0x4f2   : > { %v4704_v11 = vpop.f32.mrf.mxu2  ;;  %v4528_v32 = vpop.f32.mrf.mxu0 }
 0x4f3   : > { %v4705_v45 = vadd.f32 %v4704_v11, %v4616_v47  ;;  %v4793_v23 = vpop.f32.mrf.mxu3  ;;  %v4529_v29 = vadd.f32 %v4528_v32, %v16135_v18  ;;  %v4617_v14 = vpop.f32.mrf.mxu1  ;;  %v11428_v47 = vor.u32 %v13263_v52, %v11425_v13  ;;  %v21265_v32 = vld [vmem:[#allocation108_spill] sm:$0xff] }
 0x4f5   : > { %v16528_v41 = vadd.f32 %v4793_v23, %v4705_v45  ;;  %v4618_v30 = vadd.f32 %v4617_v14, %v4529_v29  ;;  %4949 = vmatpush.bf16.msrb.mxu1 %v11428_v47  ;;  %v21263_v45 = vld [vmem:[#allocation106_spill] sm:$0xff]  ;;  %v21264_v23 = vld [vmem:[#allocation107_spill] sm:$0xff] }
 0x4fa   : > { %v4706_v49 = vpop.f32.mrf.mxu2  ;;  %v4531_v18 = vpop.f32.mrf.mxu0 }
 0x4fb   : > { %v4707_v60 = vadd.f32 %v4706_v49, %v4618_v30  ;;  %v4795_v36 = vpop.f32.mrf.mxu3  ;;  %v4532_v12 = vadd.f32 %v4531_v18, %v16144_v34  ;;  %v4620_v40 = vpop.f32.mrf.mxu1 }
 0x4fd   : > { %v16537_v11 = vadd.f32 %v4795_v36, %v4707_v60  ;;  %v4621_v22 = vadd.f32 %v4620_v40, %v4532_v12  ;;  %4570 = vmatmul.bf16.gmra.mxu0 %v21262_v63 }
 0x4fe   : > { %4659 = vmatmul.bf16.gmra.mxu1 %v21263_v45 }
 0x4ff   : > { %4748 = vmatmul.bf16.gmra.mxu2 %v21264_v23 }
 0x500   : > { %4837 = vmatmul.bf16.gmra.mxu3 %v21265_v32  ;;  %v21266_v32 = vld [vmem:[#allocation49_spill] sm:$0xff] }
 0x502   : > { %v4709_v29 = vpop.f32.mrf.mxu2  ;;  %v4533_v13 = vpop.f32.mrf.mxu0 }
 0x503   : > { %v4710_v14 = vadd.f32 %v4709_v29, %v4621_v22  ;;  %v4798_v52 = vpop.f32.mrf.mxu3  ;;  %v4534_v30 = vadd.f32 %v4533_v13, %v16153_v57  ;;  %v4622_v47 = vpop.f32.mrf.mxu1  ;;  %v21267_v22 = vld [vmem:[#allocation110_spill] sm:$0xff]  ;;  %v21268_v29 = vld [vmem:[#allocation111_spill] sm:$0xff]  ;;  %v21269_v57 = vld [vmem:[#allocation112_spill] sm:$0xff] }
 0x505   : > { %v16544_v34 = vadd.f32 %v4798_v52, %v4710_v14  ;;  %v4623_v49 = vadd.f32 %v4622_v47, %v4534_v30  ;;  %v12247_v14 = vld [vmem:[%s20674_s2 + $0x70] sm:$0xf]  ;;  %v13325_v52 = vld [vmem:[%s20675_s3 + $0x5f4] sm:$0xf]  ;;  %v11673_v30 = vld [vmem:[%s20675_s3 + $0x5f8] sm:$0xf0] }
 0x506   : > { %v12311_v47 = vld [vmem:[%s20674_s2 + $0xf0] sm:$0xf] }
 0x50a   : > { %v4711_v60 = vpop.f32.mrf.mxu2  ;;  %v4536_v12 = vpop.f32.mrf.mxu0 }
 0x50b   : > { %v4712_v36 = vadd.f32 %v4711_v60, %v4623_v49  ;;  %v4800_v18 = vpop.f32.mrf.mxu3  ;;  %v4537_v40 = vadd.f32 %v4536_v12, %v16180_v39  ;;  %v4625_v63 = vpop.f32.mrf.mxu1  ;;  %v12830_v39 = vld [vmem:[%s20674_s2 + $0x74] sm:$0xf0] }
 0x50c   : > { %v12248_v13 = vor.u32 %v12830_v39, %v12247_v14  ;;  %v12846_v49 = vld [vmem:[%s20674_s2 + $0xf4] sm:$0xf0]  ;;  %v11737_v14 = vld [vmem:[%s20675_s3 + $0x678] sm:$0xf0] }
 0x50d   : > { %v16547_v45 = vadd.f32 %v4800_v18, %v4712_v36  ;;  %v4626_v23 = vadd.f32 %v4625_v63, %v4537_v40  ;;  %4575 = vmatmul.bf16.gmra.mxu0 %v21266_v32  ;;  %v11676_v36 = vor.u32 %v13325_v52, %v11673_v30  ;;  %v12312_v18 = vor.u32 %v12846_v49, %v12311_v47 }
 0x50e   : > { %4664 = vmatmul.bf16.gmra.mxu1 %v21267_v22  ;;  %6523 = vmatpush.bf16.msra.mxu2 %v12248_v13 }
 0x50f   : > { %4753 = vmatmul.bf16.gmra.mxu2 %v21268_v29  ;;  %5209 = vmatpush.bf16.msra.mxu0 %v11676_v36 }
 0x510   : > { %4842 = vmatmul.bf16.gmra.mxu3 %v21269_v57  ;;  %v13341_v57 = vld [vmem:[%s20675_s3 + $0x674] sm:$0xf] }
 0x511   : > { %6612 = vmatpush.bf16.msra.mxu3 %v12312_v18  ;;  %v21270_v18 = vld [vmem:[#allocation53_spill] sm:$0xff] }
 0x512   : > { %v4714_v60 = vpop.f32.mrf.mxu2  ;;  %v4538_v63 = vpop.f32.mrf.mxu0 }
 0x513   : > { %v4715_v12 = vadd.f32 %v4714_v60, %v4626_v23  ;;  %v4803_v40 = vpop.f32.mrf.mxu3  ;;  %v4539_v32 = vadd.f32 %v4538_v63, %v16195_v31  ;;  %v4627_v22 = vpop.f32.mrf.mxu1  ;;  %v11740_v23 = vor.u32 %v13341_v57, %v11737_v14  ;;  %v21273_v63 = vld [vmem:[#allocation116_spill] sm:$0xff] }
 0x515   : > { %v16572_v29 = vadd.f32 %v4803_v40, %v4715_v12  ;;  %v4628_v39 = vadd.f32 %v4627_v22, %v4539_v32  ;;  %5298 = vmatpush.bf16.msra.mxu1 %v11740_v23  ;;  %v21271_v12 = vld [vmem:[#allocation114_spill] sm:$0xff]  ;;  %v21272_v40 = vld [vmem:[#allocation115_spill] sm:$0xff] }
 0x51a   : > { %v4716_v52 = vpop.f32.mrf.mxu2  ;;  %v4541_v31 = vpop.f32.mrf.mxu0 }
 0x51b   : > { %v4717_v13 = vadd.f32 %v4716_v52, %v4628_v39  ;;  %v4805_v30 = vpop.f32.mrf.mxu3  ;;  %v4542_v47 = vadd.f32 %v4541_v31, %v16204_v33  ;;  %v4630_v49 = vpop.f32.mrf.mxu1 }
 0x51d   : > { %v16581_v60 = vadd.f32 %v4805_v30, %v4717_v13  ;;  %v4631_v36 = vadd.f32 %v4630_v49, %v4542_v47  ;;  %4580 = vmatmul.bf16.gmra.mxu0 %v21270_v18 }
 0x51e   : > { %4669 = vmatmul.bf16.gmra.mxu1 %v21271_v12 }
 0x51f   : > { %4758 = vmatmul.bf16.gmra.mxu2 %v21272_v40 }
 0x520   : > { %4847 = vmatmul.bf16.gmra.mxu3 %v21273_v63  ;;  %v21274_v63 = vld [vmem:[#allocation57_spill] sm:$0xff] }
 0x522   : > { %v4719_v32 = vpop.f32.mrf.mxu2  ;;  %v4543_v14 = vpop.f32.mrf.mxu0 }
 0x523   : > { %v4720_v22 = vadd.f32 %v4719_v32, %v4631_v36  ;;  %v4808_v57 = vpop.f32.mrf.mxu3  ;;  %v4544_v39 = vadd.f32 %v4543_v14, %v16209_v9  ;;  %v4632_v23 = vpop.f32.mrf.mxu1  ;;  %v21275_v36 = vld [vmem:[#allocation118_spill] sm:$0xff]  ;;  %v21276_v32 = vld [vmem:[#allocation119_spill] sm:$0xff]  ;;  %v21277_v9 = vld [vmem:[#allocation120_spill] sm:$0xff] }
 0x525   : > { %v16588_v33 = vadd.f32 %v4808_v57, %v4720_v22  ;;  %v4633_v52 = vadd.f32 %v4632_v23, %v4544_v39  ;;  %v12239_v22 = vld [vmem:[%s20674_s2 + $0x60] sm:$0xf]  ;;  %v13323_v57 = vld [vmem:[%s20675_s3 + $0x5e4] sm:$0xf]  ;;  %v11665_v39 = vld [vmem:[%s20675_s3 + $0x5e8] sm:$0xf0] }
 0x526   : > { %v12303_v23 = vld [vmem:[%s20674_s2 + $0xe0] sm:$0xf] }
 0x52a   : > { %v4721_v13 = vpop.f32.mrf.mxu2  ;;  %v4546_v47 = vpop.f32.mrf.mxu0 }
 0x52b   : > { %v4722_v30 = vadd.f32 %v4721_v13, %v4633_v52  ;;  %v4810_v31 = vpop.f32.mrf.mxu3  ;;  %v4547_v49 = vadd.f32 %v4546_v47, %v16236_v19  ;;  %v4635_v18 = vpop.f32.mrf.mxu1  ;;  %v12828_v19 = vld [vmem:[%s20674_s2 + $0x64] sm:$0xf0] }
 0x52c   : > { %v12240_v14 = vor.u32 %v12828_v19, %v12239_v22  ;;  %v12844_v52 = vld [vmem:[%s20674_s2 + $0xe4] sm:$0xf0]  ;;  %v11729_v22 = vld [vmem:[%s20675_s3 + $0x668] sm:$0xf0] }
 0x52d   : > { %v16591_v12 = vadd.f32 %v4810_v31, %v4722_v30  ;;  %v4636_v40 = vadd.f32 %v4635_v18, %v4547_v49  ;;  %4861 = vmatmul.bf16.vlgmr.msrb.gmra.mxu0 %v21274_v63  ;;  %v11668_v30 = vor.u32 %v13323_v57, %v11665_v39  ;;  %v12304_v31 = vor.u32 %v12844_v52, %v12303_v23 }
 0x52e   : > { %4950 = vmatmul.bf16.vlgmr.msrb.gmra.mxu1 %v21275_v36  ;;  %6524 = vmatpush.bf16.msra.mxu2 %v12240_v14 }
 0x52f   : > { %5039 = vmatmul.bf16.vlgmr.msrb.gmra.mxu2 %v21276_v32  ;;  %5210 = vmatpush.bf16.msra.mxu0 %v11668_v30 }
 0x530   : > { %5128 = vmatmul.bf16.vlgmr.msrb.gmra.mxu3 %v21277_v9  ;;  %v13339_v9 = vld [vmem:[%s20675_s3 + $0x664] sm:$0xf] }
 0x531   : > { %6613 = vmatpush.bf16.msra.mxu3 %v12304_v31  ;;  %v21278_v31 = vld [vmem:[#allocation61_spill] sm:$0xff] }
 0x532   : > { %v4724_v13 = vpop.f32.mrf.mxu2  ;;  %v4548_v18 = vpop.f32.mrf.mxu0 }
 0x533   : > { %v4725_v47 = vadd.f32 %v4724_v13, %v4636_v40  ;;  %v4813_v49 = vpop.f32.mrf.mxu3  ;;  %v4549_v63 = vadd.f32 %v4548_v18, %v16247_v0  ;;  %v4637_v36 = vpop.f32.mrf.mxu1  ;;  %v11732_v40 = vor.u32 %v13339_v9, %v11729_v22  ;;  %v21281_v18 = vld [vmem:[#allocation124_spill] sm:$0xff] }
 0x535   : > { %v16616_v32 = vadd.f32 %v4813_v49, %v4725_v47  ;;  %v4638_v19 = vadd.f32 %v4637_v36, %v4549_v63  ;;  %5299 = vmatpush.bf16.msra.mxu1 %v11732_v40  ;;  %v21279_v47 = vld [vmem:[#allocation122_spill] sm:$0xff]  ;;  %v21280_v49 = vld [vmem:[#allocation123_spill] sm:$0xff] }
 0x53a   : > { %v4726_v57 = vpop.f32.mrf.mxu2  ;;  %v4551_v0 = vpop.f32.mrf.mxu0 }
 0x53b   : > { %v4727_v14 = vadd.f32 %v4726_v57, %v4638_v19  ;;  %v4815_v39 = vpop.f32.mrf.mxu3  ;;  %v4552_v23 = vadd.f32 %v4551_v0, %v16256_v5  ;;  %v4640_v52 = vpop.f32.mrf.mxu1 }
 0x53d   : > { %v16625_v13 = vadd.f32 %v4815_v39, %v4727_v14  ;;  %v4641_v30 = vadd.f32 %v4640_v52, %v4552_v23  ;;  %4866 = vmatmul.bf16.gmra.mxu0 %v21278_v31 }
 0x53e   : > { %4955 = vmatmul.bf16.gmra.mxu1 %v21279_v47 }
 0x53f   : > { %5044 = vmatmul.bf16.gmra.mxu2 %v21280_v49 }
 0x540   : > { %5133 = vmatmul.bf16.gmra.mxu3 %v21281_v18  ;;  %v21282_v18 = vld [vmem:[#allocation65_spill] sm:$0xff] }
 0x542   : > { %v4729_v63 = vpop.f32.mrf.mxu2  ;;  %v4553_v22 = vpop.f32.mrf.mxu0 }
 0x543   : > { %v4730_v36 = vadd.f32 %v4729_v63, %v4641_v30  ;;  %v4818_v9 = vpop.f32.mrf.mxu3  ;;  %v4554_v19 = vadd.f32 %v4553_v22, %v16261_v53  ;;  %v4642_v40 = vpop.f32.mrf.mxu1  ;;  %v21283_v30 = vld [vmem:[#allocation126_spill] sm:$0xff]  ;;  %v21284_v63 = vld [vmem:[#allocation127_spill] sm:$0xff]  ;;  %v21285_v53 = vld [vmem:[#allocation128_spill] sm:$0xff] }
 0x545   : > { %v16632_v5 = vadd.f32 %v4818_v9, %v4730_v36  ;;  %v4643_v57 = vadd.f32 %v4642_v40, %v4554_v19  ;;  %v12231_v36 = vld [vmem:[%s20674_s2 + $0x50] sm:$0xf]  ;;  %v13321_v9 = vld [vmem:[%s20675_s3 + $0x5d4] sm:$0xf]  ;;  %v11657_v19 = vld [vmem:[%s20675_s3 + $0x5d8] sm:$0xf0] }
 0x546   : > { %v12295_v40 = vld [vmem:[%s20674_s2 + $0xd0] sm:$0xf] }
 0x54a   : > { %v4731_v14 = vpop.f32.mrf.mxu2  ;;  %v4556_v23 = vpop.f32.mrf.mxu0 }
 0x54b   : > { %v4732_v39 = vadd.f32 %v4731_v14, %v4643_v57  ;;  %v4820_v0 = vpop.f32.mrf.mxu3  ;;  %v4557_v52 = vadd.f32 %v4556_v23, %v16288_v27  ;;  %v4645_v31 = vpop.f32.mrf.mxu1  ;;  %v12826_v27 = vld [vmem:[%s20674_s2 + $0x54] sm:$0xf0] }
 0x54c   : > { %v12232_v22 = vor.u32 %v12826_v27, %v12231_v36  ;;  %v12842_v57 = vld [vmem:[%s20674_s2 + $0xd4] sm:$0xf0]  ;;  %v11721_v36 = vld [vmem:[%s20675_s3 + $0x658] sm:$0xf0] }
 0x54d   : > { %v16635_v47 = vadd.f32 %v4820_v0, %v4732_v39  ;;  %v4646_v49 = vadd.f32 %v4645_v31, %v4557_v52  ;;  %4871 = vmatmul.bf16.gmra.mxu0 %v21282_v18  ;;  %v11660_v39 = vor.u32 %v13321_v9, %v11657_v19  ;;  %v12296_v0 = vor.u32 %v12842_v57, %v12295_v40 }
 0x54e   : > { %4960 = vmatmul.bf16.gmra.mxu1 %v21283_v30  ;;  %6525 = vmatpush.bf16.msra.mxu2 %v12232_v22 }
 0x54f   : > { %5049 = vmatmul.bf16.gmra.mxu2 %v21284_v63  ;;  %5211 = vmatpush.bf16.msra.mxu0 %v11660_v39 }
 0x550   : > { %5138 = vmatmul.bf16.gmra.mxu3 %v21285_v53  ;;  %v13337_v53 = vld [vmem:[%s20675_s3 + $0x654] sm:$0xf] }
 0x551   : > { %6614 = vmatpush.bf16.msra.mxu3 %v12296_v0  ;;  %v21286_v0 = vld [vmem:[#allocation69_spill] sm:$0xff] }
 0x552   : > { %v4734_v14 = vpop.f32.mrf.mxu2  ;;  %v4558_v31 = vpop.f32.mrf.mxu0 }
 0x553   : > { %v4735_v23 = vadd.f32 %v4734_v14, %v4646_v49  ;;  %v4823_v52 = vpop.f32.mrf.mxu3  ;;  %v4559_v18 = vadd.f32 %v4558_v31, %v16299_v17  ;;  %v4647_v30 = vpop.f32.mrf.mxu1  ;;  %v11724_v49 = vor.u32 %v13337_v53, %v11721_v36  ;;  %v21289_v31 = vld [vmem:[#allocation132_spill] sm:$0xff] }
 0x555   : > { %v16660_v63 = vadd.f32 %v4823_v52, %v4735_v23  ;;  %v4648_v27 = vadd.f32 %v4647_v30, %v4559_v18  ;;  %5300 = vmatpush.bf16.msra.mxu1 %v11724_v49  ;;  %v21287_v23 = vld [vmem:[#allocation130_spill] sm:$0xff]  ;;  %v21288_v52 = vld [vmem:[#allocation131_spill] sm:$0xff] }
 0x55a   : > { %v4736_v9 = vpop.f32.mrf.mxu2  ;;  %v4561_v17 = vpop.f32.mrf.mxu0 }
 0x55b   : > { %v4737_v22 = vadd.f32 %v4736_v9, %v4648_v27  ;;  %v4825_v19 = vpop.f32.mrf.mxu3  ;;  %v4562_v40 = vadd.f32 %v4561_v17, %v16308_v24  ;;  %v4650_v57 = vpop.f32.mrf.mxu1 }
 0x55d   : > { %v16669_v14 = vadd.f32 %v4825_v19, %v4737_v22  ;;  %v4651_v39 = vadd.f32 %v4650_v57, %v4562_v40  ;;  %4876 = vmatmul.bf16.gmra.mxu0 %v21286_v0 }
 0x55e   : > { %4965 = vmatmul.bf16.gmra.mxu1 %v21287_v23 }
 0x55f   : > { %5054 = vmatmul.bf16.gmra.mxu2 %v21288_v52 }
 0x560   : > { %5143 = vmatmul.bf16.gmra.mxu3 %v21289_v31  ;;  %v21290_v31 = vld [vmem:[#allocation73_spill] sm:$0xff] }
 0x562   : > { %v4739_v18 = vpop.f32.mrf.mxu2  ;;  %v4563_v36 = vpop.f32.mrf.mxu0 }
 0x563   : > { %v4740_v30 = vadd.f32 %v4739_v18, %v4651_v39  ;;  %v4828_v53 = vpop.f32.mrf.mxu3  ;;  %v4564_v27 = vadd.f32 %v4563_v36, %v16313_v56  ;;  %v4652_v49 = vpop.f32.mrf.mxu1  ;;  %v21291_v39 = vld [vmem:[#allocation134_spill] sm:$0xff]  ;;  %v21292_v18 = vld [vmem:[#allocation135_spill] sm:$0xff]  ;;  %v21293_v56 = vld [vmem:[#allocation136_spill] sm:$0xff] }
 0x565   : > { %v16676_v24 = vadd.f32 %v4828_v53, %v4740_v30  ;;  %v4653_v9 = vadd.f32 %v4652_v49, %v4564_v27  ;;  %v12223_v30 = vld [vmem:[%s20674_s2 + $0x40] sm:$0xf]  ;;  %v13319_v53 = vld [vmem:[%s20675_s3 + $0x5c4] sm:$0xf]  ;;  %v11649_v27 = vld [vmem:[%s20675_s3 + $0x5c8] sm:$0xf0] }
 0x566   : > { %v12287_v49 = vld [vmem:[%s20674_s2 + $0xc0] sm:$0xf] }
 0x56a   : > { %v4741_v22 = vpop.f32.mrf.mxu2  ;;  %v4566_v40 = vpop.f32.mrf.mxu0 }
 0x56b   : > { %v4742_v19 = vadd.f32 %v4741_v22, %v4653_v9  ;;  %v4830_v17 = vpop.f32.mrf.mxu3  ;;  %v4567_v57 = vadd.f32 %v4566_v40, %v16340_v59  ;;  %v4655_v0 = vpop.f32.mrf.mxu1  ;;  %v12824_v59 = vld [vmem:[%s20674_s2 + $0x44] sm:$0xf0] }
 0x56c   : > { %v12224_v36 = vor.u32 %v12824_v59, %v12223_v30  ;;  %v12840_v9 = vld [vmem:[%s20674_s2 + $0xc4] sm:$0xf0]  ;;  %v11713_v30 = vld [vmem:[%s20675_s3 + $0x648] sm:$0xf0] }
 0x56d   : > { %v16679_v23 = vadd.f32 %v4830_v17, %v4742_v19  ;;  %v4656_v52 = vadd.f32 %v4655_v0, %v4567_v57  ;;  %4881 = vmatmul.bf16.gmra.mxu0 %v21290_v31  ;;  %v11652_v19 = vor.u32 %v13319_v53, %v11649_v27  ;;  %v12288_v17 = vor.u32 %v12840_v9, %v12287_v49 }
 0x56e   : > { %4970 = vmatmul.bf16.gmra.mxu1 %v21291_v39  ;;  %6526 = vmatpush.bf16.msra.mxu2 %v12224_v36 }
 0x56f   : > { %5059 = vmatmul.bf16.gmra.mxu2 %v21292_v18  ;;  %5212 = vmatpush.bf16.msra.mxu0 %v11652_v19 }
 0x570   : > { %5148 = vmatmul.bf16.gmra.mxu3 %v21293_v56  ;;  %v13335_v56 = vld [vmem:[%s20675_s3 + $0x644] sm:$0xf] }
 0x571   : > { %6615 = vmatpush.bf16.msra.mxu3 %v12288_v17  ;;  %v21294_v17 = vld [vmem:[#allocation77_spill] sm:$0xff] }
 0x572   : > { %v4744_v22 = vpop.f32.mrf.mxu2  ;;  %v4568_v0 = vpop.f32.mrf.mxu0 }
 0x573   : > { %v4745_v40 = vadd.f32 %v4744_v22, %v4656_v52  ;;  %v4833_v57 = vpop.f32.mrf.mxu3  ;;  %v4569_v31 = vadd.f32 %v4568_v0, %v16351_v6  ;;  %v4657_v39 = vpop.f32.mrf.mxu1  ;;  %v11716_v52 = vor.u32 %v13335_v56, %v11713_v30  ;;  %v21297_v0 = vld [vmem:[#allocation140_spill] sm:$0xff] }
 0x575   : > { %v16704_v18 = vadd.f32 %v4833_v57, %v4745_v40  ;;  %v4658_v59 = vadd.f32 %v4657_v39, %v4569_v31  ;;  %5301 = vmatpush.bf16.msra.mxu1 %v11716_v52  ;;  %v21295_v40 = vld [vmem:[#allocation138_spill] sm:$0xff]  ;;  %v21296_v57 = vld [vmem:[#allocation139_spill] sm:$0xff] }
 0x57a   : > { %v4746_v53 = vpop.f32.mrf.mxu2  ;;  %v4571_v6 = vpop.f32.mrf.mxu0 }
 0x57b   : > { %v4747_v36 = vadd.f32 %v4746_v53, %v4658_v59  ;;  %v4835_v27 = vpop.f32.mrf.mxu3  ;;  %v4572_v49 = vadd.f32 %v4571_v6, %v16360_v50  ;;  %v4660_v9 = vpop.f32.mrf.mxu1 }
 0x57d   : > { %v16713_v22 = vadd.f32 %v4835_v27, %v4747_v36  ;;  %v4661_v19 = vadd.f32 %v4660_v9, %v4572_v49  ;;  %4886 = vmatmul.bf16.gmra.mxu0 %v21294_v17 }
 0x57e   : > { %4975 = vmatmul.bf16.gmra.mxu1 %v21295_v40 }
 0x57f   : > { %5064 = vmatmul.bf16.gmra.mxu2 %v21296_v57 }
 0x580   : > { %5153 = vmatmul.bf16.gmra.mxu3 %v21297_v0  ;;  %v21298_v0 = vld [vmem:[#allocation81_spill] sm:$0xff] }
 0x582   : > { %v4749_v31 = vpop.f32.mrf.mxu2  ;;  %v4573_v30 = vpop.f32.mrf.mxu0 }
 0x583   : > { %v4750_v39 = vadd.f32 %v4749_v31, %v4661_v19  ;;  %v4838_v56 = vpop.f32.mrf.mxu3  ;;  %v4574_v59 = vadd.f32 %v4573_v30, %v16365_v38  ;;  %v4662_v52 = vpop.f32.mrf.mxu1  ;;  %v21299_v19 = vld [vmem:[#allocation142_spill] sm:$0xff]  ;;  %v21300_v31 = vld [vmem:[#allocation143_spill] sm:$0xff]  ;;  %v21301_v38 = vld [vmem:[#allocation144_spill] sm:$0xff] }
 0x585   : > { %v16720_v50 = vadd.f32 %v4838_v56, %v4750_v39  ;;  %v4663_v53 = vadd.f32 %v4662_v52, %v4574_v59  ;;  %v12215_v39 = vld [vmem:[%s20674_s2 + $0x30] sm:$0xf]  ;;  %v13317_v56 = vld [vmem:[%s20675_s3 + $0x5b4] sm:$0xf]  ;;  %v11641_v59 = vld [vmem:[%s20675_s3 + $0x5b8] sm:$0xf0] }
 0x586   : > { %v12279_v52 = vld [vmem:[%s20674_s2 + $0xb0] sm:$0xf] }
 0x58a   : > { %v4751_v36 = vpop.f32.mrf.mxu2  ;;  %v4576_v49 = vpop.f32.mrf.mxu0 }
 0x58b   : > { %v4752_v27 = vadd.f32 %v4751_v36, %v4663_v53  ;;  %v4840_v6 = vpop.f32.mrf.mxu3  ;;  %v4577_v9 = vadd.f32 %v4576_v49, %v16392_v25  ;;  %v4665_v17 = vpop.f32.mrf.mxu1  ;;  %v12822_v25 = vld [vmem:[%s20674_s2 + $0x34] sm:$0xf0] }
 0x58c   : > { %v12216_v30 = vor.u32 %v12822_v25, %v12215_v39  ;;  %v12838_v53 = vld [vmem:[%s20674_s2 + $0xb4] sm:$0xf0]  ;;  %v11705_v39 = vld [vmem:[%s20675_s3 + $0x638] sm:$0xf0] }
 0x58d   : > { %v16723_v40 = vadd.f32 %v4840_v6, %v4752_v27  ;;  %v4666_v57 = vadd.f32 %v4665_v17, %v4577_v9  ;;  %4891 = vmatmul.bf16.gmra.mxu0 %v21298_v0  ;;  %v11644_v27 = vor.u32 %v13317_v56, %v11641_v59  ;;  %v12280_v6 = vor.u32 %v12838_v53, %v12279_v52 }
 0x58e   : > { %4980 = vmatmul.bf16.gmra.mxu1 %v21299_v19  ;;  %6527 = vmatpush.bf16.msra.mxu2 %v12216_v30 }
 0x58f   : > { %5069 = vmatmul.bf16.gmra.mxu2 %v21300_v31  ;;  %5213 = vmatpush.bf16.msra.mxu0 %v11644_v27 }
 0x590   : > { %5158 = vmatmul.bf16.gmra.mxu3 %v21301_v38  ;;  %v13333_v38 = vld [vmem:[%s20675_s3 + $0x634] sm:$0xf] }
 0x591   : > { %6616 = vmatpush.bf16.msra.mxu3 %v12280_v6  ;;  %v21302_v6 = vld [vmem:[#allocation85_spill] sm:$0xff] }
 0x592   : > { %v4754_v36 = vpop.f32.mrf.mxu2  ;;  %v4578_v17 = vpop.f32.mrf.mxu0 }
 0x593   : > { %v4755_v49 = vadd.f32 %v4754_v36, %v4666_v57  ;;  %v4843_v9 = vpop.f32.mrf.mxu3  ;;  %v4579_v0 = vadd.f32 %v4578_v17, %v16403_v44  ;;  %v4667_v19 = vpop.f32.mrf.mxu1  ;;  %v11708_v57 = vor.u32 %v13333_v38, %v11705_v39  ;;  %v21305_v17 = vld [vmem:[#allocation148_spill] sm:$0xff] }
 0x595   : > { %v16748_v31 = vadd.f32 %v4843_v9, %v4755_v49  ;;  %v4668_v25 = vadd.f32 %v4667_v19, %v4579_v0  ;;  %5302 = vmatpush.bf16.msra.mxu1 %v11708_v57  ;;  %v21303_v49 = vld [vmem:[#allocation146_spill] sm:$0xff]  ;;  %v21304_v9 = vld [vmem:[#allocation147_spill] sm:$0xff] }
 0x59a   : > { %v4756_v56 = vpop.f32.mrf.mxu2  ;;  %v4581_v44 = vpop.f32.mrf.mxu0 }
 0x59b   : > { %v4757_v30 = vadd.f32 %v4756_v56, %v4668_v25  ;;  %v4845_v59 = vpop.f32.mrf.mxu3  ;;  %v4582_v52 = vadd.f32 %v4581_v44, %v16412_v15  ;;  %v4670_v53 = vpop.f32.mrf.mxu1 }
 0x59d   : > { %v16757_v36 = vadd.f32 %v4845_v59, %v4757_v30  ;;  %v4671_v27 = vadd.f32 %v4670_v53, %v4582_v52  ;;  %4896 = vmatmul.bf16.gmra.mxu0 %v21302_v6 }
 0x59e   : > { %4985 = vmatmul.bf16.gmra.mxu1 %v21303_v49 }
 0x59f   : > { %5074 = vmatmul.bf16.gmra.mxu2 %v21304_v9 }
 0x5a0   : > { %5163 = vmatmul.bf16.gmra.mxu3 %v21305_v17  ;;  %v21306_v17 = vld [vmem:[#allocation89_spill] sm:$0xff] }
 0x5a2   : > { %v4759_v0 = vpop.f32.mrf.mxu2  ;;  %v4583_v39 = vpop.f32.mrf.mxu0 }
 0x5a3   : > { %v4760_v19 = vadd.f32 %v4759_v0, %v4671_v27  ;;  %v4848_v38 = vpop.f32.mrf.mxu3  ;;  %v4584_v25 = vadd.f32 %v4583_v39, %v16415_v48  ;;  %v4672_v57 = vpop.f32.mrf.mxu1  ;;  %v21307_v27 = vld [vmem:[#allocation150_spill] sm:$0xff]  ;;  %v21308_v0 = vld [vmem:[#allocation151_spill] sm:$0xff]  ;;  %v21309_v48 = vld [vmem:[#allocation152_spill] sm:$0xff] }
 0x5a5   : > { %v16764_v15 = vadd.f32 %v4848_v38, %v4760_v19  ;;  %v4673_v56 = vadd.f32 %v4672_v57, %v4584_v25  ;;  %v12207_v19 = vld [vmem:[%s20674_s2 + $0x20] sm:$0xf]  ;;  %v13315_v38 = vld [vmem:[%s20675_s3 + $0x5a4] sm:$0xf]  ;;  %v11633_v25 = vld [vmem:[%s20675_s3 + $0x5a8] sm:$0xf0] }
 0x5a6   : > { %v12271_v57 = vld [vmem:[%s20674_s2 + $0xa0] sm:$0xf] }
 0x5aa   : > { %v4761_v30 = vpop.f32.mrf.mxu2  ;;  %v4862_v52 = vpop.f32.mrf.mxu0 }
 0x5ab   : > { %v4762_v59 = vadd.f32 %v4761_v30, %v4673_v56  ;;  %v4850_v44 = vpop.f32.mrf.mxu3  ;;  %v4863_v53 = vadd.f32 %v4862_v52, %v16440_v46  ;;  %v4951_v6 = vpop.f32.mrf.mxu1  ;;  %v12820_v46 = vld [vmem:[%s20674_s2 + $0x24] sm:$0xf0] }
 0x5ac   : > { %v12208_v39 = vor.u32 %v12820_v46, %v12207_v19  ;;  %v12836_v56 = vld [vmem:[%s20674_s2 + $0xa4] sm:$0xf0]  ;;  %v11697_v19 = vld [vmem:[%s20675_s3 + $0x628] sm:$0xf0] }
 0x5ad   : > { %v16767_v49 = vadd.f32 %v4850_v44, %v4762_v59  ;;  %v4952_v9 = vadd.f32 %v4951_v6, %v4863_v53  ;;  %4901 = vmatmul.bf16.gmra.mxu0 %v21306_v17  ;;  %v11636_v59 = vor.u32 %v13315_v38, %v11633_v25  ;;  %v12272_v44 = vor.u32 %v12836_v56, %v12271_v57 }
 0x5ae   : > { %4990 = vmatmul.bf16.gmra.mxu1 %v21307_v27  ;;  %6528 = vmatpush.bf16.msra.mxu2 %v12208_v39 }
 0x5af   : > { %5079 = vmatmul.bf16.gmra.mxu2 %v21308_v0  ;;  %5214 = vmatpush.bf16.msra.mxu0 %v11636_v59 }
 0x5b0   : > { %5168 = vmatmul.bf16.gmra.mxu3 %v21309_v48  ;;  %v13331_v48 = vld [vmem:[%s20675_s3 + $0x624] sm:$0xf] }
 0x5b1   : > { %6617 = vmatpush.bf16.msra.mxu3 %v12272_v44  ;;  %v21310_v44 = vld [vmem:[#allocation93_spill] sm:$0xff] }
 0x5b2   : > { %v5040_v30 = vpop.f32.mrf.mxu2  ;;  %v4864_v6 = vpop.f32.mrf.mxu0 }
 0x5b3   : > { %v5041_v52 = vadd.f32 %v5040_v30, %v4952_v9  ;;  %v5129_v53 = vpop.f32.mrf.mxu3  ;;  %v4865_v17 = vadd.f32 %v4864_v6, %v16449_v7  ;;  %v4953_v27 = vpop.f32.mrf.mxu1  ;;  %v11700_v9 = vor.u32 %v13331_v48, %v11697_v19  ;;  %v21313_v6 = vld [vmem:[#allocation156_spill] sm:$0xff] }
 0x5b5   : > { %v16792_v0 = vadd.f32 %v5129_v53, %v5041_v52  ;;  %v4954_v46 = vadd.f32 %v4953_v27, %v4865_v17  ;;  %5303 = vmatpush.bf16.msra.mxu1 %v11700_v9  ;;  %v21311_v52 = vld [vmem:[#allocation154_spill] sm:$0xff]  ;;  %v21312_v53 = vld [vmem:[#allocation155_spill] sm:$0xff] }
 0x5ba   : > { %v5042_v38 = vpop.f32.mrf.mxu2  ;;  %v4867_v7 = vpop.f32.mrf.mxu0 }
 0x5bb   : > { %v5043_v39 = vadd.f32 %v5042_v38, %v4954_v46  ;;  %v5131_v25 = vpop.f32.mrf.mxu3  ;;  %v4868_v57 = vadd.f32 %v4867_v7, %v16456_v10  ;;  %v4956_v56 = vpop.f32.mrf.mxu1 }
 0x5bd   : > { %v16801_v30 = vadd.f32 %v5131_v25, %v5043_v39  ;;  %v4957_v59 = vadd.f32 %v4956_v56, %v4868_v57  ;;  %4906 = vmatmul.bf16.gmra.mxu0 %v21310_v44 }
 0x5be   : > { %4995 = vmatmul.bf16.gmra.mxu1 %v21311_v52 }
 0x5bf   : > { %5084 = vmatmul.bf16.gmra.mxu2 %v21312_v53 }
 0x5c0   : > { %5173 = vmatmul.bf16.gmra.mxu3 %v21313_v6  ;;  %v21314_v6 = vld [vmem:[#allocation97_spill] sm:$0xff] }
 0x5c2   : > { %v5045_v17 = vpop.f32.mrf.mxu2  ;;  %v4869_v19 = vpop.f32.mrf.mxu0 }
 0x5c3   : > { %v5046_v27 = vadd.f32 %v5045_v17, %v4957_v59  ;;  %v5134_v48 = vpop.f32.mrf.mxu3  ;;  %v4870_v46 = vadd.f32 %v4869_v19, %v16459_v3  ;;  %v4958_v9 = vpop.f32.mrf.mxu1  ;;  %v21315_v59 = vld [vmem:[#allocation158_spill] sm:$0xff]  ;;  %v21316_v17 = vld [vmem:[#allocation159_spill] sm:$0xff]  ;;  %v21317_v3 = vld [vmem:[#allocation160_spill] sm:$0xff] }
 0x5c5   : > { %v16808_v10 = vadd.f32 %v5134_v48, %v5046_v27  ;;  %v4959_v38 = vadd.f32 %v4958_v9, %v4870_v46  ;;  %v12199_v27 = vld [vmem:[%s20674_s2 + $0x10] sm:$0xf]  ;;  %v13313_v48 = vld [vmem:[%s20675_s3 + $0x594] sm:$0xf]  ;;  %v11625_v46 = vld [vmem:[%s20675_s3 + $0x598] sm:$0xf0] }
 0x5c6   : > { %v12263_v9 = vld [vmem:[%s20674_s2 + $0x90] sm:$0xf] }
 0x5ca   : > { %v5047_v39 = vpop.f32.mrf.mxu2  ;;  %v4872_v57 = vpop.f32.mrf.mxu0 }
 0x5cb   : > { %v5048_v25 = vadd.f32 %v5047_v39, %v4959_v38  ;;  %v5136_v7 = vpop.f32.mrf.mxu3  ;;  %v4873_v56 = vadd.f32 %v4872_v57, %v16484_v20  ;;  %v4961_v44 = vpop.f32.mrf.mxu1  ;;  %v12818_v20 = vld [vmem:[%s20674_s2 + $0x14] sm:$0xf0] }
 0x5cc   : > { %v12200_v19 = vor.u32 %v12818_v20, %v12199_v27  ;;  %v12834_v38 = vld [vmem:[%s20674_s2 + $0x94] sm:$0xf0]  ;;  %v11689_v27 = vld [vmem:[%s20675_s3 + $0x618] sm:$0xf0] }
 0x5cd   : > { %v16811_v52 = vadd.f32 %v5136_v7, %v5048_v25  ;;  %v4962_v53 = vadd.f32 %v4961_v44, %v4873_v56  ;;  %4911 = vmatmul.bf16.gmra.mxu0 %v21314_v6  ;;  %v11628_v25 = vor.u32 %v13313_v48, %v11625_v46  ;;  %v12264_v7 = vor.u32 %v12834_v38, %v12263_v9 }
 0x5ce   : > { %5000 = vmatmul.bf16.gmra.mxu1 %v21315_v59  ;;  %6529 = vmatpush.bf16.msra.mxu2 %v12200_v19 }
 0x5cf   : > { %5089 = vmatmul.bf16.gmra.mxu2 %v21316_v17  ;;  %5215 = vmatpush.bf16.msra.mxu0 %v11628_v25 }
 0x5d0   : > { %5178 = vmatmul.bf16.gmra.mxu3 %v21317_v3  ;;  %v13329_v3 = vld [vmem:[%s20675_s3 + $0x614] sm:$0xf] }
 0x5d1   : > { %6618 = vmatpush.bf16.msra.mxu3 %v12264_v7  ;;  %v21318_v7 = vld [vmem:[#allocation101_spill] sm:$0xff] }
 0x5d2   : > { %v5050_v39 = vpop.f32.mrf.mxu2  ;;  %v4874_v44 = vpop.f32.mrf.mxu0 }
 0x5d3   : > { %v5051_v57 = vadd.f32 %v5050_v39, %v4962_v53  ;;  %v5139_v56 = vpop.f32.mrf.mxu3  ;;  %v4875_v6 = vadd.f32 %v4874_v44, %v16493_v58  ;;  %v4963_v59 = vpop.f32.mrf.mxu1  ;;  %v11692_v53 = vor.u32 %v13329_v3, %v11689_v27  ;;  %v21321_v44 = vld [vmem:[#allocation164_spill] sm:$0xff] }
 0x5d5   : > { %v16836_v17 = vadd.f32 %v5139_v56, %v5051_v57  ;;  %v4964_v20 = vadd.f32 %v4963_v59, %v4875_v6  ;;  %5304 = vmatpush.bf16.msra.mxu1 %v11692_v53  ;;  %v21319_v57 = vld [vmem:[#allocation162_spill] sm:$0xff]  ;;  %v21320_v56 = vld [vmem:[#allocation163_spill] sm:$0xff] }
 0x5da   : > { %v5052_v48 = vpop.f32.mrf.mxu2  ;;  %v4877_v58 = vpop.f32.mrf.mxu0 }
 0x5db   : > { %v5053_v19 = vadd.f32 %v5052_v48, %v4964_v20  ;;  %v5141_v46 = vpop.f32.mrf.mxu3  ;;  %v4878_v9 = vadd.f32 %v4877_v58, %v16500_v51  ;;  %v4966_v38 = vpop.f32.mrf.mxu1 }
 0x5dd   : > { %v16845_v39 = vadd.f32 %v5141_v46, %v5053_v19  ;;  %v4967_v25 = vadd.f32 %v4966_v38, %v4878_v9  ;;  %4916 = vmatmul.bf16.gmra.mxu0 %v21318_v7 }
 0x5de   : > { %5005 = vmatmul.bf16.gmra.mxu1 %v21319_v57 }
 0x5df   : > { %5094 = vmatmul.bf16.gmra.mxu2 %v21320_v56 }
 0x5e0   : > { %5183 = vmatmul.bf16.gmra.mxu3 %v21321_v44  ;;  %v21322_v44 = vld [vmem:[#allocation105_spill] sm:$0xff] }
 0x5e2   : > { %v5055_v6 = vpop.f32.mrf.mxu2  ;;  %v4879_v27 = vpop.f32.mrf.mxu0 }
 0x5e3   : > { %v5056_v59 = vadd.f32 %v5055_v6, %v4967_v25  ;;  %v5144_v3 = vpop.f32.mrf.mxu3  ;;  %v4880_v20 = vadd.f32 %v4879_v27, %v16503_v2  ;;  %v4968_v53 = vpop.f32.mrf.mxu1  ;;  %v21323_v25 = vld [vmem:[#allocation166_spill] sm:$0xff]  ;;  %v21324_v6 = vld [vmem:[#allocation167_spill] sm:$0xff]  ;;  %v21325_v2 = vld [vmem:[#allocation168_spill] sm:$0xff] }
 0x5e5   : > { %v16852_v51 = vadd.f32 %v5144_v3, %v5056_v59  ;;  %v4969_v48 = vadd.f32 %v4968_v53, %v4880_v20  ;;  %v12191_v59 = vld [vmem:[%s20674_s2] sm:$0xf]  ;;  %v13311_v3 = vld [vmem:[%s20675_s3 + $0x584] sm:$0xf]  ;;  %v11617_v20 = vld [vmem:[%s20675_s3 + $0x588] sm:$0xf0] }
 0x5e6   : > { %v12255_v53 = vld [vmem:[%s20674_s2 + $0x80] sm:$0xf] }
 0x5ea   : > { %v5057_v19 = vpop.f32.mrf.mxu2  ;;  %v4882_v9 = vpop.f32.mrf.mxu0 }
 0x5eb   : > { %v5058_v46 = vadd.f32 %v5057_v19, %v4969_v48  ;;  %v5146_v58 = vpop.f32.mrf.mxu3  ;;  %v4883_v38 = vadd.f32 %v4882_v9, %v16528_v41  ;;  %v4971_v7 = vpop.f32.mrf.mxu1  ;;  %v12816_v41 = vld [vmem:[%s20674_s2 + $0x4] sm:$0xf0] }
 0x5ec   : > { %v12192_v27 = vor.u32 %v12816_v41, %v12191_v59  ;;  %v12832_v48 = vld [vmem:[%s20674_s2 + $0x84] sm:$0xf0]  ;;  %v11681_v59 = vld [vmem:[%s20675_s3 + $0x608] sm:$0xf0] }
 0x5ed   : > { %v16855_v57 = vadd.f32 %v5146_v58, %v5058_v46  ;;  %v4972_v56 = vadd.f32 %v4971_v7, %v4883_v38  ;;  %4921 = vmatmul.bf16.gmra.mxu0 %v21322_v44  ;;  %v11620_v46 = vor.u32 %v13311_v3, %v11617_v20  ;;  %v12256_v58 = vor.u32 %v12832_v48, %v12255_v53 }
 0x5ee   : > { %5010 = vmatmul.bf16.gmra.mxu1 %v21323_v25  ;;  %6530 = vmatpush.bf16.msra.mxu2 %v12192_v27 }
 0x5ef   : > { %5099 = vmatmul.bf16.gmra.mxu2 %v21324_v6  ;;  %5216 = vmatpush.bf16.msra.mxu0 %v11620_v46 }
 0x5f0   : > { %5188 = vmatmul.bf16.gmra.mxu3 %v21325_v2  ;;  %v13327_v2 = vld [vmem:[%s20675_s3 + $0x604] sm:$0xf] }
 0x5f1   : > { %6619 = vmatpush.bf16.msra.mxu3 %v12256_v58  ;;  %v21326_v58 = vld [vmem:[#allocation109_spill] sm:$0xff] }
 0x5f2   : > { %v5060_v19 = vpop.f32.mrf.mxu2  ;;  %v4884_v7 = vpop.f32.mrf.mxu0 }
 0x5f3   : > { %v5061_v9 = vadd.f32 %v5060_v19, %v4972_v56  ;;  %v5149_v38 = vpop.f32.mrf.mxu3  ;;  %v4885_v44 = vadd.f32 %v4884_v7, %v16537_v11  ;;  %v4973_v25 = vpop.f32.mrf.mxu1  ;;  %v11684_v56 = vor.u32 %v13327_v2, %v11681_v59  ;;  %v21329_v7 = vld [vmem:[#allocation172_spill] sm:$0xff] }
 0x5f5   : > { %v16880_v6 = vadd.f32 %v5149_v38, %v5061_v9  ;;  %v4974_v41 = vadd.f32 %v4973_v25, %v4885_v44  ;;  %5305 = vmatpush.bf16.msra.mxu1 %v11684_v56  ;;  %v21327_v9 = vld [vmem:[#allocation170_spill] sm:$0xff]  ;;  %v21328_v38 = vld [vmem:[#allocation171_spill] sm:$0xff] }
 0x5fa   : > { %v5062_v3 = vpop.f32.mrf.mxu2  ;;  %v4887_v11 = vpop.f32.mrf.mxu0 }
 0x5fb   : > { %v5063_v27 = vadd.f32 %v5062_v3, %v4974_v41  ;;  %v5151_v20 = vpop.f32.mrf.mxu3  ;;  %v4888_v53 = vadd.f32 %v4887_v11, %v16544_v34  ;;  %v4976_v48 = vpop.f32.mrf.mxu1 }
 0x5fd   : > { %v16889_v19 = vadd.f32 %v5151_v20, %v5063_v27  ;;  %v4977_v46 = vadd.f32 %v4976_v48, %v4888_v53  ;;  %4926 = vmatmul.bf16.gmra.mxu0 %v21326_v58 }
 0x5fe   : > { %5015 = vmatmul.bf16.gmra.mxu1 %v21327_v9 }
 0x5ff   : > { %5104 = vmatmul.bf16.gmra.mxu2 %v21328_v38 }
 0x600   : > { %5193 = vmatmul.bf16.gmra.mxu3 %v21329_v7  ;;  %v21330_v7 = vld [vmem:[#allocation113_spill] sm:$0xff] }
 0x602   : > { %v5065_v44 = vpop.f32.mrf.mxu2  ;;  %v4889_v59 = vpop.f32.mrf.mxu0 }
 0x603   : > { %v5066_v25 = vadd.f32 %v5065_v44, %v4977_v46  ;;  %v5154_v2 = vpop.f32.mrf.mxu3  ;;  %v4890_v41 = vadd.f32 %v4889_v59, %v16547_v45  ;;  %v4978_v56 = vpop.f32.mrf.mxu1  ;;  %v21331_v46 = vld [vmem:[#allocation174_spill] sm:$0xff]  ;;  %v21332_v44 = vld [vmem:[#allocation175_spill] sm:$0xff]  ;;  %v21333_v45 = vld [vmem:[#allocation176_spill] sm:$0xff] }
 0x605   : > { %v16896_v34 = vadd.f32 %v5154_v2, %v5066_v25  ;;  %v4979_v3 = vadd.f32 %v4978_v56, %v4890_v41  ;;  %v12503_v25 = vld [vmem:[%s20674_s2 + $0x270] sm:$0xf]  ;;  %v12862_v41 = vld [vmem:[%s20674_s2 + $0x174] sm:$0xf0] }
 0x606   : > { %v12375_v2 = vld [vmem:[%s20674_s2 + $0x170] sm:$0xf] }
 0x607   : > { %v12567_v56 = vld [vmem:[%s20674_s2 + $0x2f0] sm:$0xf] }
 0x60a   : > { %v5067_v27 = vpop.f32.mrf.mxu2  ;;  %v4892_v53 = vpop.f32.mrf.mxu0 }
 0x60b   : > { %v5068_v20 = vadd.f32 %v5067_v27, %v4979_v3  ;;  %v5156_v11 = vpop.f32.mrf.mxu3  ;;  %v4893_v48 = vadd.f32 %v4892_v53, %v16572_v29  ;;  %v4981_v58 = vpop.f32.mrf.mxu1  ;;  %v12894_v29 = vld [vmem:[%s20674_s2 + $0x274] sm:$0xf0] }
 0x60c   : > { %v12504_v59 = vor.u32 %v12894_v29, %v12503_v25  ;;  %v12910_v3 = vld [vmem:[%s20674_s2 + $0x2f4] sm:$0xf0] }
 0x60d   : > { %v16899_v9 = vadd.f32 %v5156_v11, %v5068_v20  ;;  %v4982_v38 = vadd.f32 %v4981_v58, %v4893_v48  ;;  %4931 = vmatmul.bf16.gmra.mxu0 %v21330_v7  ;;  %v12376_v20 = vor.u32 %v12862_v41, %v12375_v2  ;;  %v12568_v11 = vor.u32 %v12910_v3, %v12567_v56  ;;  %v12878_v25 = vld [vmem:[%s20674_s2 + $0x1f4] sm:$0xf0] }
 0x60e   : > { %5020 = vmatmul.bf16.gmra.mxu1 %v21331_v46  ;;  %6879 = vmatpush.bf16.msrb.mxu2 %v12504_v59 }
 0x60f   : > { %5109 = vmatmul.bf16.gmra.mxu2 %v21332_v44  ;;  %6701 = vmatpush.bf16.msrb.mxu0 %v12376_v20 }
 0x610   : > { %5198 = vmatmul.bf16.gmra.mxu3 %v21333_v45  ;;  %v12439_v45 = vld [vmem:[%s20674_s2 + $0x1f0] sm:$0xf] }
 0x611   : > { %6968 = vmatpush.bf16.msrb.mxu3 %v12568_v11  ;;  %v12440_v29 = vor.u32 %v12878_v25, %v12439_v45  ;;  %v21334_v11 = vld [vmem:[#allocation117_spill] sm:$0xff]  ;;  %v12703_v25 = vld [vmem:[%s16946_s18 + $0x4] sm:$0xf] }
 0x612   : > { %v5070_v27 = vpop.f32.mrf.mxu2  ;;  %v4894_v58 = vpop.f32.mrf.mxu0 }
 0x613   : > { %v5071_v53 = vadd.f32 %v5070_v27, %v4982_v38  ;;  %v5159_v48 = vpop.f32.mrf.mxu3  ;;  %v4895_v7 = vadd.f32 %v4894_v58, %v16581_v60  ;;  %v4983_v46 = vpop.f32.mrf.mxu1  ;;  %6790 = vmatpush.bf16.msrb.mxu1 %v12440_v29 }
 0x615   : > { %v16924_v44 = vadd.f32 %v5159_v48, %v5071_v53  ;;  %v4984_v38 = vadd.f32 %v4983_v46, %v4895_v7 }
 0x61a   : > { %v5072_v2 = vpop.f32.mrf.mxu2  ;;  %v4897_v41 = vpop.f32.mrf.mxu0 }
 0x61b   : > { %v5073_v59 = vadd.f32 %v5072_v2, %v4984_v38  ;;  %v5161_v60 = vpop.f32.mrf.mxu3  ;;  %v4898_v56 = vadd.f32 %v4897_v41, %v16588_v33  ;;  %v4986_v3 = vpop.f32.mrf.mxu1  ;;  %v11745_v38 = vld [vmem:[%s16946_s18 + $0x1c] sm:$0xf0] }
 0x61d   : > { %v16933_v27 = vadd.f32 %v5161_v60, %v5073_v59  ;;  %v4987_v20 = vadd.f32 %v4986_v3, %v4898_v56  ;;  %4936 = vmatmul.bf16.gmra.mxu0 %v21334_v11  ;;  %v16955_v3 = vor.u32 %v12703_v25, %v11745_v38 }
 0x61e   : > { %5025 = vmatmul.bf16.gmra.mxu1 %v15740_v43  ;;  %v12706_v43 = vld [vmem:[%s16946_s18 + $0x18] sm:$0xf0] }
 0x61f   : > { %5114 = vmatmul.bf16.gmra.mxu2 %v15742_v35  ;;  %v11743_v35 = vld [vmem:[%s16946_s18] sm:$0xf] }
 0x620   : > { %5203 = vmatmul.bf16.gmra.mxu3 %v15744_v21  ;;  %v16952_v60 = vor.u32 %v12706_v43, %v11743_v35 }
 0x622   : > { %v5075_v53 = vpop.f32.mrf.mxu2  ;;  %v4899_v7 = vpop.f32.mrf.mxu0 }
 0x623   : > { %v5076_v48 = vadd.f32 %v5075_v53, %v4987_v20  ;;  %v5164_v58 = vpop.f32.mrf.mxu3  ;;  %v4900_v46 = vadd.f32 %v4899_v7, %v16591_v12  ;;  %v4988_v33 = vpop.f32.mrf.mxu1  ;;  %v21335_v53 = vld [vmem:[#allocation121_spill] sm:$0xff] }
 0x625   : > { %v16941_v45 = vadd.f32 %v5164_v58, %v5076_v48  ;;  %v4989_v21 = vadd.f32 %v4988_v33, %v4900_v46  ;;  %v12495_v48 = vld [vmem:[%s20674_s2 + $0x260] sm:$0xf]  ;;  %v12908_v33 = vld [vmem:[%s20674_s2 + $0x2e4] sm:$0xf0] }
 0x626   : > { %v12367_v58 = vld [vmem:[%s20674_s2 + $0x160] sm:$0xf] }
 0x627   : > { %v12559_v46 = vld [vmem:[%s20674_s2 + $0x2e0] sm:$0xf] }
 0x628   : > { %v12560_v43 = vor.u32 %v12908_v33, %v12559_v46 }
 0x62a   : > { %v5077_v29 = vpop.f32.mrf.mxu2  ;;  %v4902_v59 = vpop.f32.mrf.mxu0  ;;  %6969 = vmatpush.bf16.msrb.mxu3 %v12560_v43 }
 0x62b   : > { %v5078_v2 = vadd.f32 %v5077_v29, %v4989_v21  ;;  %v5166_v12 = vpop.f32.mrf.mxu3  ;;  %v4903_v41 = vadd.f32 %v4902_v59, %v16616_v32  ;;  %v4991_v56 = vpop.f32.mrf.mxu1  ;;  %v12892_v32 = vld [vmem:[%s20674_s2 + $0x264] sm:$0xf0] }
 0x62c   : > { %v12496_v7 = vor.u32 %v12892_v32, %v12495_v48  ;;  %v11771_v48 = vld [vmem:[%s16946_s18 + $0x38] sm:$0xf]  ;;  %v12713_v32 = vld [vmem:[%s16946_s18 + $0x50] sm:$0xf0] }
 0x62d   : > { %v16957_v20 = vadd.f32 %v5166_v12, %v5078_v2  ;;  %v4992_v11 = vadd.f32 %v4991_v56, %v4903_v41  ;;  %5217 = vmatmul.bf16.vlgmr.msra.gmra.mxu0 %v21335_v53  ;;  %v12431_v41 = vld [vmem:[%s20674_s2 + $0x1e0] sm:$0xf]  ;;  %v12876_v56 = vld [vmem:[%s20674_s2 + $0x1e4] sm:$0xf0] }
 0x62e   : > { %5306 = vmatmul.bf16.vlgmr.msra.gmra.mxu1 %v15760_v61  ;;  %v12860_v61 = vld [vmem:[%s20674_s2 + $0x164] sm:$0xf0]  ;;  %6880 = vmatpush.bf16.msrb.mxu2 %v12496_v7  ;;  %v12432_v53 = vor.u32 %v12876_v56, %v12431_v41 }
 0x62f   : > { %6531 = vmatmul.bf16.vlgmr.msra.gmra.mxu2 %v16952_v60  ;;  %v12368_v35 = vor.u32 %v12860_v61, %v12367_v58  ;;  %v12710_v58 = vld [vmem:[%s16946_s18 + $0x3c] sm:$0xf] }
 0x630   : > { %6620 = vmatmul.bf16.vlgmr.msra.gmra.mxu3 %v16955_v3  ;;  %6791 = vmatpush.bf16.msrb.mxu1 %v12432_v53 }
 0x631   : > { %6702 = vmatpush.bf16.msrb.mxu0 %v12368_v35 }
 0x632   : > { %v5080_v21 = vpop.f32.mrf.mxu2  ;;  %v4904_v29 = vpop.f32.mrf.mxu0 }
 0x633   : > { %v5081_v25 = vadd.f32 %v5080_v21, %v4992_v11  ;;  %v5169_v38 = vpop.f32.mrf.mxu3  ;;  %v4905_v2 = vadd.f32 %v4904_v29, %v16625_v13  ;;  %v4993_v12 = vpop.f32.mrf.mxu1  ;;  %v11773_v13 = vld [vmem:[%s16946_s18 + $0x54] sm:$0xf0]  ;;  %v16994_v21 = vor.u32 %v12713_v32, %v11771_v48 }
 0x635   : > { %v16982_v59 = vadd.f32 %v5169_v38, %v5081_v25  ;;  %v4994_v11 = vadd.f32 %v4993_v12, %v4905_v2  ;;  %v16997_v25 = vor.u32 %v12710_v58, %v11773_v13  ;;  %v21336_v2 = vld [vmem:[#allocation125_spill] sm:$0xff]  ;;  %v11799_v58 = vld [vmem:[%s16946_s18 + $0x70] sm:$0xf]  ;;  %v12720_v13 = vld [vmem:[%s16946_s18 + $0x88] sm:$0xf0] }
 0x63a   : > { %v5082_v7 = vpop.f32.mrf.mxu2  ;;  %v4907_v33 = vpop.f32.mrf.mxu0 }
 0x63b   : > { %v5083_v61 = vadd.f32 %v5082_v7, %v4994_v11  ;;  %v5171_v46 = vpop.f32.mrf.mxu3  ;;  %v4908_v35 = vadd.f32 %v4907_v33, %v16632_v5  ;;  %v4996_v43 = vpop.f32.mrf.mxu1  ;;  %v12717_v7 = vld [vmem:[%s16946_s18 + $0x74] sm:$0xf] }
 0x63d   : > { %v16999_v38 = vadd.f32 %v5171_v46, %v5083_v61  ;;  %v4997_v29 = vadd.f32 %v4996_v43, %v4908_v35  ;;  %5222 = vmatmul.bf16.gmra.mxu0 %v21336_v2  ;;  %v11801_v61 = vld [vmem:[%s16946_s18 + $0x8c] sm:$0xf0]  ;;  %v17012_v43 = vor.u32 %v12720_v13, %v11799_v58  ;;  %v12906_v58 = vld [vmem:[%s20674_s2 + $0x2d4] sm:$0xf0] }
 0x63e   : > { %5311 = vmatmul.bf16.gmra.mxu1 %v15798_v4 }
 0x63f   : > { %6536 = vmatmul.bf16.gmra.mxu2 %v16994_v21 }
 0x640   : > { %6625 = vmatmul.bf16.gmra.mxu3 %v16997_v25 }
 0x642   : > { %v5085_v12 = vpop.f32.mrf.mxu2  ;;  %v4909_v56 = vpop.f32.mrf.mxu0 }
 0x643   : > { %v5086_v5 = vadd.f32 %v5085_v12, %v4997_v29  ;;  %v5174_v41 = vpop.f32.mrf.mxu3  ;;  %v4910_v11 = vadd.f32 %v4909_v56, %v16635_v47  ;;  %v4998_v53 = vpop.f32.mrf.mxu1  ;;  %v17015_v12 = vor.u32 %v12717_v7, %v11801_v61  ;;  %v12487_v56 = vld [vmem:[%s20674_s2 + $0x250] sm:$0xf] }
 0x645   : > { %v17006_v48 = vadd.f32 %v5174_v41, %v5086_v5  ;;  %v4999_v32 = vadd.f32 %v4998_v53, %v4910_v11  ;;  %v21337_v41 = vld [vmem:[#allocation129_spill] sm:$0xff]  ;;  %v12359_v11 = vld [vmem:[%s20674_s2 + $0x150] sm:$0xf] }
 0x64a   : > { %v5087_v46 = vpop.f32.mrf.mxu2  ;;  %v4912_v35 = vpop.f32.mrf.mxu0 }
 0x64b   : > { %v5088_v4 = vadd.f32 %v5087_v46, %v4999_v32  ;;  %v5176_v33 = vpop.f32.mrf.mxu3  ;;  %v4913_v29 = vadd.f32 %v4912_v35, %v16660_v63  ;;  %v5001_v2 = vpop.f32.mrf.mxu1  ;;  %v12890_v63 = vld [vmem:[%s20674_s2 + $0x254] sm:$0xf0]  ;;  %v12551_v32 = vld [vmem:[%s20674_s2 + $0x2d0] sm:$0xf] }
 0x64c   : > { %v12488_v53 = vor.u32 %v12890_v63, %v12487_v56  ;;  %v12552_v61 = vor.u32 %v12906_v58, %v12551_v32 }
 0x64d   : > { %v17017_v47 = vadd.f32 %v5176_v33, %v5088_v4  ;;  %v5002_v5 = vadd.f32 %v5001_v2, %v4913_v29  ;;  %5227 = vmatmul.bf16.gmra.mxu0 %v21337_v41  ;;  %v12423_v41 = vld [vmem:[%s20674_s2 + $0x1d0] sm:$0xf] }
 0x64e   : > { %5316 = vmatmul.bf16.gmra.mxu1 %v15812_v55  ;;  %v12858_v55 = vld [vmem:[%s20674_s2 + $0x154] sm:$0xf0]  ;;  %6881 = vmatpush.bf16.msrb.mxu2 %v12488_v53  ;;  %v12724_v53 = vld [vmem:[%s16946_s18 + $0xac] sm:$0xf] }
 0x64f   : > { %6541 = vmatmul.bf16.gmra.mxu2 %v17012_v43  ;;  %v12360_v7 = vor.u32 %v12858_v55, %v12359_v11  ;;  %6970 = vmatpush.bf16.msrb.mxu3 %v12552_v61  ;;  %v11827_v11 = vld [vmem:[%s16946_s18 + $0xa8] sm:$0xf]  ;;  %v12727_v55 = vld [vmem:[%s16946_s18 + $0xc0] sm:$0xf0] }
 0x650   : > { %6630 = vmatmul.bf16.gmra.mxu3 %v17015_v12  ;;  %v17054_v61 = vor.u32 %v12727_v55, %v11827_v11 }
 0x651   : > { %6703 = vmatpush.bf16.msrb.mxu0 %v12360_v7 }
 0x652   : > { %v5090_v13 = vpop.f32.mrf.mxu2  ;;  %v4914_v33 = vpop.f32.mrf.mxu0  ;;  %21338 = vst [vmem:[#allocation2_spill] sm:$0xff] %v17054_v61 }
 0x653   : > { %v5091_v46 = vadd.f32 %v5090_v13, %v5002_v5  ;;  %v5179_v4 = vpop.f32.mrf.mxu3  ;;  %v4915_v35 = vadd.f32 %v4914_v33, %v16669_v14  ;;  %v5003_v29 = vpop.f32.mrf.mxu1  ;;  %v12874_v5 = vld [vmem:[%s20674_s2 + $0x1d4] sm:$0xf0]  ;;  %v11829_v14 = vld [vmem:[%s16946_s18 + $0xc4] sm:$0xf0] }
 0x654   : > { %v12424_v63 = vor.u32 %v12874_v5, %v12423_v41  ;;  %v17057_v33 = vor.u32 %v12724_v53, %v11829_v14  ;;  %v21340_v41 = vld [vmem:[#allocation133_spill] sm:$0xff] }
 0x655   : > { %v17042_v2 = vadd.f32 %v5179_v4, %v5091_v46  ;;  %v5004_v56 = vadd.f32 %v5003_v29, %v4915_v35 }
 0x656   : > { %6792 = vmatpush.bf16.msrb.mxu1 %v12424_v63  ;;  %21339 = vst [vmem:[#allocation54_spill] sm:$0xff] %v17057_v33 }
 0x65a   : > { %v5092_v32 = vpop.f32.mrf.mxu2  ;;  %v4917_v7 = vpop.f32.mrf.mxu0 }
 0x65b   : > { %v5093_v58 = vadd.f32 %v5092_v32, %v5004_v56  ;;  %v5181_v13 = vpop.f32.mrf.mxu3  ;;  %v4918_v46 = vadd.f32 %v4917_v7, %v16676_v24  ;;  %v5006_v4 = vpop.f32.mrf.mxu1  ;;  %v11855_v32 = vld [vmem:[%s16946_s18 + $0xe0] sm:$0xf] }
 0x65c   : > { %v11857_v7 = vld [vmem:[%s16946_s18 + $0xfc] sm:$0xf0] }
 0x65d   : > { %v17059_v35 = vadd.f32 %v5181_v13, %v5093_v58  ;;  %v5007_v29 = vadd.f32 %v5006_v4, %v4918_v46  ;;  %5232 = vmatmul.bf16.gmra.mxu0 %v21340_v41  ;;  %v12734_v58 = vld [vmem:[%s16946_s18 + $0xf8] sm:$0xf0]  ;;  %v12731_v13 = vld [vmem:[%s16946_s18 + $0xe4] sm:$0xf] }
 0x65e   : > { %5321 = vmatmul.bf16.gmra.mxu1 %v15850_v42 }
 0x65f   : > { %6546 = vmatmul.bf16.gmra.mxu2 %v17054_v61  ;;  %v17072_v61 = vor.u32 %v12734_v58, %v11855_v32  ;;  %v12904_v32 = vld [vmem:[%s20674_s2 + $0x2c4] sm:$0xf0] }
 0x660   : > { %6635 = vmatmul.bf16.gmra.mxu3 %v17057_v33  ;;  %v17075_v33 = vor.u32 %v12731_v13, %v11857_v7 }
 0x662   : > { %v5095_v5 = vpop.f32.mrf.mxu2  ;;  %v4919_v63 = vpop.f32.mrf.mxu0 }
 0x663   : > { %v5096_v24 = vadd.f32 %v5095_v5, %v5007_v29  ;;  %v5184_v56 = vpop.f32.mrf.mxu3  ;;  %v4920_v11 = vadd.f32 %v4919_v63, %v16679_v23  ;;  %v5008_v55 = vpop.f32.mrf.mxu1  ;;  %v12479_v63 = vld [vmem:[%s20674_s2 + $0x240] sm:$0xf] }
 0x665   : > { %v17066_v53 = vadd.f32 %v5184_v56, %v5096_v24  ;;  %v5009_v14 = vadd.f32 %v5008_v55, %v4920_v11  ;;  %v21341_v56 = vld [vmem:[#allocation137_spill] sm:$0xff]  ;;  %v12351_v11 = vld [vmem:[%s20674_s2 + $0x140] sm:$0xf] }
 0x66a   : > { %v5097_v46 = vpop.f32.mrf.mxu2  ;;  %v4922_v41 = vpop.f32.mrf.mxu0 }
 0x66b   : > { %v5098_v42 = vadd.f32 %v5097_v46, %v5009_v14  ;;  %v5186_v4 = vpop.f32.mrf.mxu3  ;;  %v4923_v29 = vadd.f32 %v4922_v41, %v16704_v18  ;;  %v5011_v5 = vpop.f32.mrf.mxu1  ;;  %v12888_v18 = vld [vmem:[%s20674_s2 + $0x244] sm:$0xf0]  ;;  %v12543_v14 = vld [vmem:[%s20674_s2 + $0x2c0] sm:$0xf] }
 0x66c   : > { %v12480_v55 = vor.u32 %v12888_v18, %v12479_v63  ;;  %v12544_v7 = vor.u32 %v12904_v32, %v12543_v14 }
 0x66d   : > { %v17077_v23 = vadd.f32 %v5186_v4, %v5098_v42  ;;  %v5012_v24 = vadd.f32 %v5011_v5, %v4923_v29  ;;  %5237 = vmatmul.bf16.gmra.mxu0 %v21341_v56  ;;  %v12415_v56 = vld [vmem:[%s20674_s2 + $0x1c0] sm:$0xf] }
 0x66e   : > { %5326 = vmatmul.bf16.gmra.mxu1 %v15864_v28  ;;  %v12856_v28 = vld [vmem:[%s20674_s2 + $0x144] sm:$0xf0]  ;;  %6882 = vmatpush.bf16.msrb.mxu2 %v12480_v55  ;;  %v12738_v55 = vld [vmem:[%s16946_s18 + $0x11c] sm:$0xf] }
 0x66f   : > { %6551 = vmatmul.bf16.gmra.mxu2 %v17072_v61  ;;  %v12352_v13 = vor.u32 %v12856_v28, %v12351_v11  ;;  %6971 = vmatpush.bf16.msrb.mxu3 %v12544_v7  ;;  %v11883_v11 = vld [vmem:[%s16946_s18 + $0x118] sm:$0xf]  ;;  %v12741_v28 = vld [vmem:[%s16946_s18 + $0x130] sm:$0xf0] }
 0x670   : > { %6640 = vmatmul.bf16.gmra.mxu3 %v17075_v33  ;;  %v17114_v7 = vor.u32 %v12741_v28, %v11883_v11 }
 0x671   : > { %6704 = vmatpush.bf16.msrb.mxu0 %v12352_v13 }
 0x672   : > { %v5100_v58 = vpop.f32.mrf.mxu2  ;;  %v4924_v4 = vpop.f32.mrf.mxu0  ;;  %21342 = vst [vmem:[#allocation55_spill] sm:$0xff] %v17114_v7 }
 0x673   : > { %v5101_v46 = vadd.f32 %v5100_v58, %v5012_v24  ;;  %v5189_v42 = vpop.f32.mrf.mxu3  ;;  %v4925_v41 = vadd.f32 %v4924_v4, %v16713_v22  ;;  %v5013_v29 = vpop.f32.mrf.mxu1  ;;  %v12872_v24 = vld [vmem:[%s20674_s2 + $0x1c4] sm:$0xf0]  ;;  %v11885_v22 = vld [vmem:[%s16946_s18 + $0x134] sm:$0xf0] }
 0x674   : > { %v12416_v18 = vor.u32 %v12872_v24, %v12415_v56  ;;  %v17117_v4 = vor.u32 %v12738_v55, %v11885_v22  ;;  %v21344_v56 = vld [vmem:[#allocation141_spill] sm:$0xff] }
 0x675   : > { %v17102_v5 = vadd.f32 %v5189_v42, %v5101_v46  ;;  %v5014_v63 = vadd.f32 %v5013_v29, %v4925_v41 }
 0x676   : > { %6793 = vmatpush.bf16.msrb.mxu1 %v12416_v18  ;;  %21343 = vst [vmem:[#allocation56_spill] sm:$0xff] %v17117_v4 }
 0x67a   : > { %v5102_v14 = vpop.f32.mrf.mxu2  ;;  %v4927_v13 = vpop.f32.mrf.mxu0 }
 0x67b   : > { %v5103_v32 = vadd.f32 %v5102_v14, %v5014_v63  ;;  %v5191_v58 = vpop.f32.mrf.mxu3  ;;  %v4928_v46 = vadd.f32 %v4927_v13, %v16720_v50  ;;  %v5016_v42 = vpop.f32.mrf.mxu1  ;;  %v11911_v14 = vld [vmem:[%s16946_s18 + $0x150] sm:$0xf] }
 0x67c   : > { %v11913_v13 = vld [vmem:[%s16946_s18 + $0x16c] sm:$0xf0] }
 0x67d   : > { %v17119_v41 = vadd.f32 %v5191_v58, %v5103_v32  ;;  %v5017_v29 = vadd.f32 %v5016_v42, %v4928_v46  ;;  %5242 = vmatmul.bf16.gmra.mxu0 %v21344_v56  ;;  %v12748_v32 = vld [vmem:[%s16946_s18 + $0x168] sm:$0xf0]  ;;  %v12745_v58 = vld [vmem:[%s16946_s18 + $0x154] sm:$0xf] }
 0x67e   : > { %5331 = vmatmul.bf16.gmra.mxu1 %v15902_v1 }
 0x67f   : > { %6556 = vmatmul.bf16.gmra.mxu2 %v17114_v7  ;;  %v17132_v7 = vor.u32 %v12748_v32, %v11911_v14  ;;  %v12902_v14 = vld [vmem:[%s20674_s2 + $0x2b4] sm:$0xf0] }
 0x680   : > { %6645 = vmatmul.bf16.gmra.mxu3 %v17117_v4  ;;  %v17135_v4 = vor.u32 %v12745_v58, %v11913_v13 }
 0x681   : > { %21345 = vst [vmem:[#allocation3_spill] sm:$0xff] %v17132_v7 }
 0x682   : > { %v5105_v24 = vpop.f32.mrf.mxu2  ;;  %v4929_v18 = vpop.f32.mrf.mxu0  ;;  %21346 = vst [vmem:[#allocation58_spill] sm:$0xff] %v17135_v4 }
 0x683   : > { %v5106_v50 = vadd.f32 %v5105_v24, %v5017_v29  ;;  %v5194_v63 = vpop.f32.mrf.mxu3  ;;  %v4930_v11 = vadd.f32 %v4929_v18, %v16723_v40  ;;  %v5018_v28 = vpop.f32.mrf.mxu1  ;;  %v12471_v18 = vld [vmem:[%s20674_s2 + $0x230] sm:$0xf] }
 0x685   : > { %v17126_v55 = vadd.f32 %v5194_v63, %v5106_v50  ;;  %v5019_v22 = vadd.f32 %v5018_v28, %v4930_v11  ;;  %v21347_v63 = vld [vmem:[#allocation145_spill] sm:$0xff]  ;;  %v12343_v11 = vld [vmem:[%s20674_s2 + $0x130] sm:$0xf] }
 0x68a   : > { %v5107_v46 = vpop.f32.mrf.mxu2  ;;  %v4932_v56 = vpop.f32.mrf.mxu0 }
 0x68b   : > { %v5108_v1 = vadd.f32 %v5107_v46, %v5019_v22  ;;  %v5196_v42 = vpop.f32.mrf.mxu3  ;;  %v4933_v29 = vadd.f32 %v4932_v56, %v16748_v31  ;;  %v5021_v24 = vpop.f32.mrf.mxu1  ;;  %v12886_v31 = vld [vmem:[%s20674_s2 + $0x234] sm:$0xf0]  ;;  %v12535_v22 = vld [vmem:[%s20674_s2 + $0x2b0] sm:$0xf] }
 0x68c   : > { %v12472_v28 = vor.u32 %v12886_v31, %v12471_v18  ;;  %v12536_v13 = vor.u32 %v12902_v14, %v12535_v22 }
 0x68d   : > { %v17137_v40 = vadd.f32 %v5196_v42, %v5108_v1  ;;  %v5022_v50 = vadd.f32 %v5021_v24, %v4933_v29  ;;  %5247 = vmatmul.bf16.gmra.mxu0 %v21347_v63  ;;  %v12407_v63 = vld [vmem:[%s20674_s2 + $0x1b0] sm:$0xf] }
 0x68e   : > { %5336 = vmatmul.bf16.gmra.mxu1 %v15916_v54  ;;  %v12854_v54 = vld [vmem:[%s20674_s2 + $0x134] sm:$0xf0]  ;;  %6883 = vmatpush.bf16.msrb.mxu2 %v12472_v28  ;;  %v12752_v28 = vld [vmem:[%s16946_s18 + $0x18c] sm:$0xf] }
 0x68f   : > { %6561 = vmatmul.bf16.gmra.mxu2 %v17132_v7  ;;  %v12344_v58 = vor.u32 %v12854_v54, %v12343_v11  ;;  %6972 = vmatpush.bf16.msrb.mxu3 %v12536_v13  ;;  %v11939_v11 = vld [vmem:[%s16946_s18 + $0x188] sm:$0xf]  ;;  %v12755_v54 = vld [vmem:[%s16946_s18 + $0x1a0] sm:$0xf0] }
 0x690   : > { %6650 = vmatmul.bf16.gmra.mxu3 %v17135_v4  ;;  %v17174_v13 = vor.u32 %v12755_v54, %v11939_v11 }
 0x691   : > { %6705 = vmatpush.bf16.msrb.mxu0 %v12344_v58 }
 0x692   : > { %v5110_v32 = vpop.f32.mrf.mxu2  ;;  %v4934_v42 = vpop.f32.mrf.mxu0  ;;  %21348 = vst [vmem:[#allocation59_spill] sm:$0xff] %v17174_v13 }
 0x693   : > { %v5111_v46 = vadd.f32 %v5110_v32, %v5022_v50  ;;  %v5199_v1 = vpop.f32.mrf.mxu3  ;;  %v4935_v56 = vadd.f32 %v4934_v42, %v16757_v36  ;;  %v5023_v29 = vpop.f32.mrf.mxu1  ;;  %v12870_v50 = vld [vmem:[%s20674_s2 + $0x1b4] sm:$0xf0]  ;;  %v11941_v36 = vld [vmem:[%s16946_s18 + $0x1a4] sm:$0xf0] }
 0x694   : > { %v12408_v31 = vor.u32 %v12870_v50, %v12407_v63  ;;  %v17177_v42 = vor.u32 %v12752_v28, %v11941_v36  ;;  %v21350_v63 = vld [vmem:[#allocation149_spill] sm:$0xff] }
 0x695   : > { %v17162_v24 = vadd.f32 %v5199_v1, %v5111_v46  ;;  %v5024_v18 = vadd.f32 %v5023_v29, %v4935_v56 }
 0x696   : > { %6794 = vmatpush.bf16.msrb.mxu1 %v12408_v31  ;;  %21349 = vst [vmem:[#allocation60_spill] sm:$0xff] %v17177_v42 }
 0x69a   : > { %v5112_v22 = vpop.f32.mrf.mxu2  ;;  %v4937_v58 = vpop.f32.mrf.mxu0 }
 0x69b   : > { %v5113_v14 = vadd.f32 %v5112_v22, %v5024_v18  ;;  %v5201_v32 = vpop.f32.mrf.mxu3  ;;  %v4938_v46 = vadd.f32 %v4937_v58, %v16764_v15  ;;  %v5026_v1 = vpop.f32.mrf.mxu1  ;;  %v11967_v22 = vld [vmem:[%s16946_s18 + $0x1c0] sm:$0xf] }
 0x69c   : > { %v11969_v58 = vld [vmem:[%s16946_s18 + $0x1dc] sm:$0xf0] }
 0x69d   : > { %v17179_v56 = vadd.f32 %v5201_v32, %v5113_v14  ;;  %v5027_v29 = vadd.f32 %v5026_v1, %v4938_v46  ;;  %5252 = vmatmul.bf16.gmra.mxu0 %v21350_v63  ;;  %v12762_v14 = vld [vmem:[%s16946_s18 + $0x1d8] sm:$0xf0]  ;;  %v12759_v32 = vld [vmem:[%s16946_s18 + $0x1c4] sm:$0xf] }
 0x69e   : > { %5341 = vmatmul.bf16.gmra.mxu1 %v15954_v37 }
 0x69f   : > { %6566 = vmatmul.bf16.gmra.mxu2 %v17174_v13  ;;  %v17192_v13 = vor.u32 %v12762_v14, %v11967_v22  ;;  %v12900_v22 = vld [vmem:[%s20674_s2 + $0x2a4] sm:$0xf0] }
 0x6a0   : > { %6655 = vmatmul.bf16.gmra.mxu3 %v17177_v42  ;;  %v17195_v42 = vor.u32 %v12759_v32, %v11969_v58 }
 0x6a1   : > { %21351 = vst [vmem:[#allocation4_spill] sm:$0xff] %v17192_v13 }
 0x6a2   : > { %v5115_v50 = vpop.f32.mrf.mxu2  ;;  %v4939_v31 = vpop.f32.mrf.mxu0  ;;  %21352 = vst [vmem:[#allocation62_spill] sm:$0xff] %v17195_v42 }
 0x6a3   : > { %v5116_v15 = vadd.f32 %v5115_v50, %v5027_v29  ;;  %v5204_v18 = vpop.f32.mrf.mxu3  ;;  %v4940_v11 = vadd.f32 %v4939_v31, %v16767_v49  ;;  %v5028_v54 = vpop.f32.mrf.mxu1  ;;  %v12463_v31 = vld [vmem:[%s20674_s2 + $0x220] sm:$0xf] }
 0x6a5   : > { %v17186_v28 = vadd.f32 %v5204_v18, %v5116_v15  ;;  %v5029_v36 = vadd.f32 %v5028_v54, %v4940_v11  ;;  %v21354_v18 = vld [vmem:[#allocation153_spill] sm:$0xff]  ;;  %v12335_v11 = vld [vmem:[%s20674_s2 + $0x120] sm:$0xf] }
 0x6aa   : > { %v5117_v46 = vpop.f32.mrf.mxu2  ;;  %v5218_v63 = vpop.f32.mrf.mxu0 }
 0x6ab   : > { %v5118_v37 = vadd.f32 %v5117_v46, %v5029_v36  ;;  %v5206_v1 = vpop.f32.mrf.mxu3  ;;  %v5219_v29 = vadd.f32 %v5218_v63, %v16792_v0  ;;  %v5307_v50 = vpop.f32.mrf.mxu1  ;;  %v12884_v0 = vld [vmem:[%s20674_s2 + $0x224] sm:$0xf0]  ;;  %v12527_v36 = vld [vmem:[%s20674_s2 + $0x2a0] sm:$0xf] }
 0x6ac   : > { %v12464_v54 = vor.u32 %v12884_v0, %v12463_v31  ;;  %v12528_v58 = vor.u32 %v12900_v22, %v12527_v36 }
 0x6ad   : > { %v17197_v49 = vadd.f32 %v5206_v1, %v5118_v37  ;;  %v17199_v15 = vadd.f32 %v5307_v50, %v5219_v29  ;;  %5257 = vmatmul.bf16.gmra.mxu0 %v21354_v18  ;;  %v12399_v18 = vld [vmem:[%s20674_s2 + $0x1a0] sm:$0xf] }
 0x6ae   : > { %5346 = vmatmul.bf16.gmra.mxu1 %v15968_v8  ;;  %v12852_v8 = vld [vmem:[%s20674_s2 + $0x124] sm:$0xf0]  ;;  %6884 = vmatpush.bf16.msrb.mxu2 %v12464_v54  ;;  %v12769_v54 = vld [vmem:[%s16946_s18 + $0x210] sm:$0xf0] }
 0x6af   : > { %21353 = vst [vmem:[#allocation63_spill] sm:$0xff] %v17199_v15  ;;  %6571 = vmatmul.bf16.gmra.mxu2 %v17192_v13  ;;  %v12336_v32 = vor.u32 %v12852_v8, %v12335_v11  ;;  %6973 = vmatpush.bf16.msrb.mxu3 %v12528_v58  ;;  %v11995_v11 = vld [vmem:[%s16946_s18 + $0x1f8] sm:$0xf] }
 0x6b0   : > { %6660 = vmatmul.bf16.gmra.mxu3 %v17195_v42  ;;  %v11997_v8 = vld [vmem:[%s16946_s18 + $0x214] sm:$0xf0]  ;;  %v17240_v58 = vor.u32 %v12769_v54, %v11995_v11 }
 0x6b1   : > { %6706 = vmatpush.bf16.msrb.mxu0 %v12336_v32 }
 0x6b2   : > { %v6532_v14 = vpop.f32.mrf.mxu2  ;;  %v5220_v1 = vpop.f32.mrf.mxu0  ;;  %21356 = vst [vmem:[#allocation5_spill] sm:$0xff] %v17240_v58 }
 0x6b3   : > { %v6533_v46 = vadd.f32 %v6532_v14, %v15971_v26  ;;  %v6621_v37 = vpop.f32.mrf.mxu3  ;;  %v5221_v63 = vadd.f32 %v5220_v1, %v16801_v30  ;;  %v5309_v29 = vpop.f32.mrf.mxu1  ;;  %v12868_v26 = vld [vmem:[%s20674_s2 + $0x1a4] sm:$0xf0]  ;;  %v12766_v30 = vld [vmem:[%s16946_s18 + $0x1fc] sm:$0xf] }
 0x6b4   : > { %v12400_v0 = vor.u32 %v12868_v26, %v12399_v18  ;;  %v17243_v1 = vor.u32 %v12766_v30, %v11997_v8  ;;  %v21359_v18 = vld [vmem:[#allocation157_spill] sm:$0xff] }
 0x6b5   : > { %v17225_v50 = vadd.f32 %v6621_v37, %v6533_v46  ;;  %v17233_v31 = vadd.f32 %v5309_v29, %v5221_v63 }
 0x6b6   : > { %6795 = vmatpush.bf16.msrb.mxu1 %v12400_v0  ;;  %21357 = vst [vmem:[#allocation66_spill] sm:$0xff] %v17243_v1 }
 0x6b7   : > { %21355 = vst [vmem:[#allocation64_spill] sm:$0xff] %v17233_v31 }
 0x6ba   : > { %v6534_v36 = vpop.f32.mrf.mxu2  ;;  %v5223_v32 = vpop.f32.mrf.mxu0 }
 0x6bb   : > { %v6535_v22 = vadd.f32 %v6534_v36, %v15998_v62  ;;  %v6623_v14 = vpop.f32.mrf.mxu3  ;;  %v5224_v46 = vadd.f32 %v5223_v32, %v16808_v10  ;;  %v5312_v37 = vpop.f32.mrf.mxu1  ;;  %v21360_v10 = vld [vmem:[#allocation6_spill] sm:$0xff]  ;;  %v12773_v32 = vld [vmem:[%s16946_s18 + $0x234] sm:$0xf] }
 0x6bd   : > { %v17245_v63 = vadd.f32 %v6623_v14, %v6535_v22  ;;  %v17247_v29 = vadd.f32 %v5312_v37, %v5224_v46  ;;  %5262 = vmatmul.bf16.gmra.mxu0 %v21359_v18  ;;  %v12023_v22 = vld [vmem:[%s16946_s18 + $0x230] sm:$0xf]  ;;  %v12776_v14 = vld [vmem:[%s16946_s18 + $0x248] sm:$0xf0] }
 0x6be   : > { %5351 = vmatmul.bf16.gmra.mxu1 %v16010_v16  ;;  %v12025_v16 = vld [vmem:[%s16946_s18 + $0x24c] sm:$0xf0]  ;;  %v21362_v37 = vld [vmem:[#allocation7_spill] sm:$0xff] }
 0x6bf   : > { %21358 = vst [vmem:[#allocation67_spill] sm:$0xff] %v17247_v29  ;;  %6576 = vmatmul.bf16.gmra.mxu2 %v17240_v58  ;;  %v17264_v29 = vor.u32 %v12776_v14, %v12023_v22  ;;  %v12850_v22 = vld [vmem:[%s20674_s2 + $0x114] sm:$0xf0]  ;;  %v12519_v14 = vld [vmem:[%s20674_s2 + $0x290] sm:$0xf] }
 0x6c0   : > { %6665 = vmatmul.bf16.gmra.mxu3 %v17243_v1 }
 0x6c1   : > { %21363 = vst [vmem:[#allocation9_spill] sm:$0xff] %v17264_v29 }
 0x6c2   : > { %v6537_v62 = vpop.f32.mrf.mxu2  ;;  %v5225_v11 = vpop.f32.mrf.mxu0 }
 0x6c3   : > { %v6538_v26 = vadd.f32 %v6537_v62, %v21360_v10  ;;  %v6626_v0 = vpop.f32.mrf.mxu3  ;;  %v5226_v54 = vadd.f32 %v5225_v11, %v16811_v52  ;;  %v5314_v30 = vpop.f32.mrf.mxu1  ;;  %v17267_v52 = vor.u32 %v12773_v32, %v12025_v16  ;;  %v21366_v11 = vld [vmem:[#allocation161_spill] sm:$0xff] }
 0x6c4   : > { %v12898_v32 = vld [vmem:[%s20674_s2 + $0x294] sm:$0xf0] }
 0x6c5   : > { %v17255_v8 = vadd.f32 %v6626_v0, %v6538_v26  ;;  %v17257_v36 = vadd.f32 %v5314_v30, %v5226_v54  ;;  %21364 = vst [vmem:[#allocation70_spill] sm:$0xff] %v17267_v52  ;;  %v21367_v54 = vld [vmem:[#allocation8_spill] sm:$0xff] }
 0x6c6   : > { %v12455_v30 = vld [vmem:[%s20674_s2 + $0x210] sm:$0xf] }
 0x6c7   : > { %21361 = vst [vmem:[#allocation68_spill] sm:$0xff] %v17257_v36 }
 0x6ca   : > { %v6539_v46 = vpop.f32.mrf.mxu2  ;;  %v5228_v58 = vpop.f32.mrf.mxu0 }
 0x6cb   : > { %v6540_v18 = vadd.f32 %v6539_v46, %v21362_v37  ;;  %v6628_v1 = vpop.f32.mrf.mxu3  ;;  %v5229_v62 = vadd.f32 %v5228_v58, %v16836_v17  ;;  %v5317_v10 = vpop.f32.mrf.mxu1  ;;  %v12882_v17 = vld [vmem:[%s20674_s2 + $0x214] sm:$0xf0]  ;;  %v12327_v58 = vld [vmem:[%s20674_s2 + $0x110] sm:$0xf]  ;;  %v12520_v37 = vor.u32 %v12898_v32, %v12519_v14 }
 0x6cc   : > { %v12328_v46 = vor.u32 %v12850_v22, %v12327_v58  ;;  %v12391_v58 = vld [vmem:[%s20674_s2 + $0x190] sm:$0xf]  ;;  %v12866_v22 = vld [vmem:[%s20674_s2 + $0x194] sm:$0xf0] }
 0x6cd   : > { %v17269_v26 = vadd.f32 %v6628_v1, %v6540_v18  ;;  %v17271_v0 = vadd.f32 %v5317_v10, %v5229_v62  ;;  %5267 = vmatmul.bf16.gmra.mxu0 %v21366_v11  ;;  %v12456_v1 = vor.u32 %v12882_v17, %v12455_v30  ;;  %v21368_v18 = vld [vmem:[#allocation10_spill] sm:$0xff]  ;;  %6974 = vmatpush.bf16.msrb.mxu3 %v12520_v37  ;;  %v21370_v37 = vld [vmem:[#allocation11_spill] sm:$0xff] }
 0x6ce   : > { %5356 = vmatmul.bf16.gmra.mxu1 %v21367_v54  ;;  %6707 = vmatpush.bf16.msrb.mxu0 %v12328_v46  ;;  %v12392_v32 = vor.u32 %v12866_v22, %v12391_v58  ;;  %v21374_v58 = vld [vmem:[#allocation165_spill] sm:$0xff]  ;;  %v21375_v22 = vld [vmem:[#allocation12_spill] sm:$0xff] }
 0x6cf   : > { %21365 = vst [vmem:[#allocation71_spill] sm:$0xff] %v17271_v0  ;;  %6581 = vmatmul.bf16.gmra.mxu2 %v17264_v29 }
 0x6d0   : > { %6670 = vmatmul.bf16.gmra.mxu3 %v17267_v52  ;;  %6885 = vmatpush.bf16.msrb.mxu2 %v12456_v1  ;;  %v12783_v1 = vld [vmem:[%s16946_s18 + $0x280] sm:$0xf0] }
 0x6d1   : > { %6796 = vmatpush.bf16.msrb.mxu1 %v12392_v32  ;;  %v21376_v32 = vld [vmem:[#allocation14_spill] sm:$0xff] }
 0x6d2   : > { %v6542_v16 = vpop.f32.mrf.mxu2  ;;  %v5230_v11 = vpop.f32.mrf.mxu0 }
 0x6d3   : > { %v6543_v62 = vadd.f32 %v6542_v16, %v21368_v18  ;;  %v6631_v10 = vpop.f32.mrf.mxu3  ;;  %v5231_v54 = vadd.f32 %v5230_v11, %v16845_v39  ;;  %v5319_v30 = vpop.f32.mrf.mxu1  ;;  %v12051_v16 = vld [vmem:[%s16946_s18 + $0x268] sm:$0xf]  ;;  %v12780_v39 = vld [vmem:[%s16946_s18 + $0x26c] sm:$0xf] }
 0x6d4   : > { %v12053_v18 = vld [vmem:[%s16946_s18 + $0x284] sm:$0xf0]  ;;  %v17312_v52 = vor.u32 %v12783_v1, %v12051_v16 }
 0x6d5   : > { %v17297_v17 = vadd.f32 %v6631_v10, %v6543_v62  ;;  %v17305_v14 = vadd.f32 %v5319_v30, %v5231_v54  ;;  %v17315_v36 = vor.u32 %v12780_v39, %v12053_v18 }
 0x6d6   : > { %21371 = vst [vmem:[#allocation13_spill] sm:$0xff] %v17312_v52 }
 0x6d7   : > { %21369 = vst [vmem:[#allocation72_spill] sm:$0xff] %v17305_v14 }
 0x6d8   : > { %21372 = vst [vmem:[#allocation74_spill] sm:$0xff] %v17315_v36 }
 0x6da   : > { %v6544_v46 = vpop.f32.mrf.mxu2  ;;  %v5233_v11 = vpop.f32.mrf.mxu0 }
 0x6db   : > { %v6545_v62 = vadd.f32 %v6544_v46, %v21370_v37  ;;  %v6633_v10 = vpop.f32.mrf.mxu3  ;;  %v5234_v29 = vadd.f32 %v5233_v11, %v16852_v51  ;;  %v5322_v0 = vpop.f32.mrf.mxu1  ;;  %v12081_v11 = vld [vmem:[%s16946_s18 + $0x2bc] sm:$0xf0] }
 0x6dd   : > { %v17317_v54 = vadd.f32 %v6633_v10, %v6545_v62  ;;  %v17319_v30 = vadd.f32 %v5322_v0, %v5234_v29  ;;  %5272 = vmatmul.bf16.gmra.mxu0 %v21374_v58  ;;  %v12079_v0 = vld [vmem:[%s16946_s18 + $0x2a0] sm:$0xf]  ;;  %v12790_v62 = vld [vmem:[%s16946_s18 + $0x2b8] sm:$0xf0]  ;;  %v12787_v10 = vld [vmem:[%s16946_s18 + $0x2a4] sm:$0xf] }
 0x6de   : > { %5361 = vmatmul.bf16.gmra.mxu1 %v21375_v22  ;;  %v21378_v22 = vld [vmem:[#allocation15_spill] sm:$0xff]  ;;  %v17336_v14 = vor.u32 %v12790_v62, %v12079_v0  ;;  %v12511_v0 = vld [vmem:[%s20674_s2 + $0x280] sm:$0xf] }
 0x6df   : > { %21373 = vst [vmem:[#allocation75_spill] sm:$0xff] %v17319_v30  ;;  %6586 = vmatmul.bf16.gmra.mxu2 %v17312_v52  ;;  %v12896_v62 = vld [vmem:[%s20674_s2 + $0x284] sm:$0xf0] }
 0x6e0   : > { %6675 = vmatmul.bf16.gmra.mxu3 %v17315_v36  ;;  %21379 = vst [vmem:[#allocation17_spill] sm:$0xff] %v17336_v14 }
 0x6e2   : > { %v6547_v51 = vpop.f32.mrf.mxu2  ;;  %v5235_v39 = vpop.f32.mrf.mxu0 }
 0x6e3   : > { %v6548_v16 = vadd.f32 %v6547_v51, %v21376_v32  ;;  %v6636_v1 = vpop.f32.mrf.mxu3  ;;  %v5236_v18 = vadd.f32 %v5235_v39, %v16855_v57  ;;  %v5324_v46 = vpop.f32.mrf.mxu1  ;;  %v17339_v57 = vor.u32 %v12787_v10, %v12081_v11  ;;  %v21382_v39 = vld [vmem:[#allocation169_spill] sm:$0xff] }
 0x6e5   : > { %v17327_v37 = vadd.f32 %v6636_v1, %v6548_v16  ;;  %v17329_v29 = vadd.f32 %v5324_v46, %v5236_v18  ;;  %21380 = vst [vmem:[#allocation78_spill] sm:$0xff] %v17339_v57  ;;  %v21383_v18 = vld [vmem:[#allocation16_spill] sm:$0xff]  ;;  %v12447_v46 = vld [vmem:[%s20674_s2 + $0x200] sm:$0xf] }
 0x6e7   : > { %21377 = vst [vmem:[#allocation76_spill] sm:$0xff] %v17329_v29 }
 0x6ea   : > { %v6549_v58 = vpop.f32.mrf.mxu2  ;;  %v5238_v30 = vpop.f32.mrf.mxu0 }
 0x6eb   : > { %v6550_v52 = vadd.f32 %v6549_v58, %v21378_v22  ;;  %v6638_v36 = vpop.f32.mrf.mxu3  ;;  %v5239_v51 = vadd.f32 %v5238_v30, %v16880_v6  ;;  %v5327_v32 = vpop.f32.mrf.mxu1  ;;  %v12880_v6 = vld [vmem:[%s20674_s2 + $0x204] sm:$0xf0]  ;;  %v12512_v58 = vor.u32 %v12896_v62, %v12511_v0  ;;  %v21384_v22 = vld [vmem:[#allocation18_spill] sm:$0xff] }
 0x6ec   : > { %v12848_v30 = vld [vmem:[%s20674_s2 + $0x104] sm:$0xf0] }
 0x6ed   : > { %v17341_v16 = vadd.f32 %v6638_v36, %v6550_v52  ;;  %v17343_v1 = vadd.f32 %v5327_v32, %v5239_v51  ;;  %5277 = vmatmul.bf16.gmra.mxu0 %v21382_v39  ;;  %v12319_v36 = vld [vmem:[%s20674_s2 + $0x100] sm:$0xf]  ;;  %v12448_v52 = vor.u32 %v12880_v6, %v12447_v46  ;;  %6975 = vmatpush.bf16.msrb.mxu3 %v12512_v58  ;;  %v21386_v58 = vld [vmem:[#allocation19_spill] sm:$0xff] }
 0x6ee   : > { %5366 = vmatmul.bf16.gmra.mxu1 %v21383_v18  ;;  %v12320_v11 = vor.u32 %v12848_v30, %v12319_v36  ;;  %v12383_v36 = vld [vmem:[%s20674_s2 + $0x180] sm:$0xf]  ;;  %v12864_v30 = vld [vmem:[%s20674_s2 + $0x184] sm:$0xf0] }
 0x6ef   : > { %21381 = vst [vmem:[#allocation79_spill] sm:$0xff] %v17343_v1  ;;  %6591 = vmatmul.bf16.gmra.mxu2 %v17336_v14  ;;  %v12384_v62 = vor.u32 %v12864_v30, %v12383_v36  ;;  %v21390_v36 = vld [vmem:[#allocation173_spill] sm:$0xff]  ;;  %v21391_v30 = vld [vmem:[#allocation20_spill] sm:$0xff] }
 0x6f0   : > { %6680 = vmatmul.bf16.gmra.mxu3 %v17339_v57  ;;  %6886 = vmatpush.bf16.msrb.mxu2 %v12448_v52  ;;  %v12797_v52 = vld [vmem:[%s16946_s18 + $0x2f0] sm:$0xf0] }
 0x6f1   : > { %6708 = vmatpush.bf16.msrb.mxu0 %v12320_v11  ;;  %6797 = vmatpush.bf16.msrb.mxu1 %v12384_v62  ;;  %v21392_v62 = vld [vmem:[#allocation22_spill] sm:$0xff] }
 0x6f2   : > { %v6552_v10 = vpop.f32.mrf.mxu2  ;;  %v5240_v39 = vpop.f32.mrf.mxu0 }
 0x6f3   : > { %v6553_v51 = vadd.f32 %v6552_v10, %v21384_v22  ;;  %v6641_v32 = vpop.f32.mrf.mxu3  ;;  %v5241_v18 = vadd.f32 %v5240_v39, %v16889_v19  ;;  %v5329_v46 = vpop.f32.mrf.mxu1  ;;  %v12107_v10 = vld [vmem:[%s16946_s18 + $0x2d8] sm:$0xf]  ;;  %v12794_v19 = vld [vmem:[%s16946_s18 + $0x2dc] sm:$0xf] }
 0x6f4   : > { %v12109_v22 = vld [vmem:[%s16946_s18 + $0x2f4] sm:$0xf0]  ;;  %v17384_v57 = vor.u32 %v12797_v52, %v12107_v10 }
 0x6f5   : > { %v17369_v6 = vadd.f32 %v6641_v32, %v6553_v51  ;;  %v17377_v0 = vadd.f32 %v5329_v46, %v5241_v18  ;;  %v17387_v29 = vor.u32 %v12794_v19, %v12109_v22 }
 0x6f6   : > { %21387 = vst [vmem:[#allocation21_spill] sm:$0xff] %v17384_v57 }
 0x6f7   : > { %21385 = vst [vmem:[#allocation80_spill] sm:$0xff] %v17377_v0 }
 0x6f8   : > { %21388 = vst [vmem:[#allocation82_spill] sm:$0xff] %v17387_v29 }
 0x6fa   : > { %v6554_v11 = vpop.f32.mrf.mxu2  ;;  %v5243_v39 = vpop.f32.mrf.mxu0 }
 0x6fb   : > { %v6555_v51 = vadd.f32 %v6554_v11, %v21386_v58  ;;  %v6643_v32 = vpop.f32.mrf.mxu3  ;;  %v5244_v14 = vadd.f32 %v5243_v39, %v16896_v34  ;;  %v5332_v1 = vpop.f32.mrf.mxu1  ;;  %v12137_v39 = vld [vmem:[%s16946_s18 + $0x32c] sm:$0xf0] }
 0x6fd   : > { %v17389_v18 = vadd.f32 %v6643_v32, %v6555_v51  ;;  %v17391_v46 = vadd.f32 %v5332_v1, %v5244_v14  ;;  %5282 = vmatmul.bf16.gmra.mxu0 %v21390_v36  ;;  %v12135_v1 = vld [vmem:[%s16946_s18 + $0x310] sm:$0xf]  ;;  %v12804_v51 = vld [vmem:[%s16946_s18 + $0x328] sm:$0xf0]  ;;  %v12801_v32 = vld [vmem:[%s16946_s18 + $0x314] sm:$0xf] }
 0x6fe   : > { %5371 = vmatmul.bf16.gmra.mxu1 %v21391_v30  ;;  %v21394_v30 = vld [vmem:[#allocation23_spill] sm:$0xff]  ;;  %v17408_v0 = vor.u32 %v12804_v51, %v12135_v1  ;;  %v12861_v1 = vld [vmem:[%s20674_s2 + $0x174] sm:$0xf]  ;;  %v12377_v51 = vld [vmem:[%s20674_s2 + $0x178] sm:$0xf0] }
 0x6ff   : > { %21389 = vst [vmem:[#allocation83_spill] sm:$0xff] %v17391_v46  ;;  %6596 = vmatmul.bf16.gmra.mxu2 %v17384_v57 }
 0x700   : > { %6685 = vmatmul.bf16.gmra.mxu3 %v17387_v29  ;;  %21395 = vst [vmem:[#allocation25_spill] sm:$0xff] %v17408_v0 }
 0x702   : > { %v6557_v34 = vpop.f32.mrf.mxu2  ;;  %v5245_v19 = vpop.f32.mrf.mxu0 }
 0x703   : > { %v6558_v10 = vadd.f32 %v6557_v34, %v21392_v62  ;;  %v6646_v52 = vpop.f32.mrf.mxu3  ;;  %v5246_v22 = vadd.f32 %v5245_v19, %v16899_v9  ;;  %v5334_v11 = vpop.f32.mrf.mxu1  ;;  %v17411_v9 = vor.u32 %v12801_v32, %v12137_v39  ;;  %v21398_v19 = vld [vmem:[#allocation177_spill] sm:$0xff] }
 0x705   : > { %v17399_v58 = vadd.f32 %v6646_v52, %v6558_v10  ;;  %v17401_v14 = vadd.f32 %v5334_v11, %v5246_v22  ;;  %21396 = vst [vmem:[#allocation86_spill] sm:$0xff] %v17411_v9  ;;  %v21399_v22 = vld [vmem:[#allocation24_spill] sm:$0xff] }
 0x706   : > { %v12845_v11 = vld [vmem:[%s20674_s2 + $0xf4] sm:$0xf] }
 0x707   : > { %21393 = vst [vmem:[#allocation84_spill] sm:$0xff] %v17401_v14 }
 0x70a   : > { %v6559_v36 = vpop.f32.mrf.mxu2  ;;  %v5248_v46 = vpop.f32.mrf.mxu0 }
 0x70b   : > { %v6560_v57 = vadd.f32 %v6559_v36, %v21394_v30  ;;  %v6648_v29 = vpop.f32.mrf.mxu3  ;;  %v5249_v34 = vadd.f32 %v5248_v46, %v16924_v44  ;;  %v5337_v62 = vpop.f32.mrf.mxu1  ;;  %v12313_v44 = vld [vmem:[%s20674_s2 + $0xf8] sm:$0xf0]  ;;  %v12926_v46 = vld [vmem:[%s20674_s2 + $0x374] sm:$0xf0]  ;;  %v12380_v36 = vor.u32 %v12861_v1, %v12377_v51  ;;  %v21400_v30 = vld [vmem:[#allocation26_spill] sm:$0xff] }
 0x70d   : > { %v17413_v10 = vadd.f32 %v6648_v29, %v6560_v57  ;;  %v17415_v52 = vadd.f32 %v5337_v62, %v5249_v34  ;;  %5287 = vmatmul.bf16.gmra.mxu0 %v21398_v19  ;;  %v12631_v29 = vld [vmem:[%s20674_s2 + $0x370] sm:$0xf]  ;;  %v12316_v57 = vor.u32 %v12845_v11, %v12313_v44  ;;  %7324 = vmatpush.bf16.msra.mxu3 %v12380_v36  ;;  %v21402_v36 = vld [vmem:[#allocation27_spill] sm:$0xff] }
 0x70e   : > { %5376 = vmatmul.bf16.gmra.mxu1 %v21399_v22  ;;  %v12632_v39 = vor.u32 %v12926_v46, %v12631_v29  ;;  %v12829_v29 = vld [vmem:[%s20674_s2 + $0x74] sm:$0xf]  ;;  %v12249_v46 = vld [vmem:[%s20674_s2 + $0x78] sm:$0xf0] }
 0x70f   : > { %21397 = vst [vmem:[#allocation87_spill] sm:$0xff] %v17415_v52  ;;  %6601 = vmatmul.bf16.gmra.mxu2 %v17408_v0  ;;  %v12252_v51 = vor.u32 %v12829_v29, %v12249_v46  ;;  %v21406_v29 = vld [vmem:[#allocation178_spill] sm:$0xff]  ;;  %v21407_v46 = vld [vmem:[#allocation28_spill] sm:$0xff] }
 0x710   : > { %6690 = vmatmul.bf16.gmra.mxu3 %v17411_v9  ;;  %7235 = vmatpush.bf16.msra.mxu2 %v12316_v57  ;;  %v12811_v57 = vld [vmem:[%s16946_s18 + $0x360] sm:$0xf0] }
 0x711   : > { %7057 = vmatpush.bf16.msra.mxu0 %v12632_v39  ;;  %7146 = vmatpush.bf16.msra.mxu1 %v12252_v51  ;;  %v21408_v51 = vld [vmem:[#allocation30_spill] sm:$0xff] }
 0x712   : > { %v6562_v32 = vpop.f32.mrf.mxu2  ;;  %v5250_v19 = vpop.f32.mrf.mxu0 }
 0x713   : > { %v6563_v34 = vadd.f32 %v6562_v32, %v21400_v30  ;;  %v6651_v62 = vpop.f32.mrf.mxu3  ;;  %v5251_v22 = vadd.f32 %v5250_v19, %v16933_v27  ;;  %v5339_v11 = vpop.f32.mrf.mxu1  ;;  %v12163_v32 = vld [vmem:[%s16946_s18 + $0x348] sm:$0xf]  ;;  %v12808_v27 = vld [vmem:[%s16946_s18 + $0x34c] sm:$0xf] }
 0x714   : > { %v12165_v30 = vld [vmem:[%s16946_s18 + $0x364] sm:$0xf0]  ;;  %v17456_v9 = vor.u32 %v12811_v57, %v12163_v32 }
 0x715   : > { %v17441_v44 = vadd.f32 %v6651_v62, %v6563_v34  ;;  %v17449_v1 = vadd.f32 %v5339_v11, %v5251_v22  ;;  %v17459_v14 = vor.u32 %v12808_v27, %v12165_v30 }
 0x716   : > { %21403 = vst [vmem:[#allocation29_spill] sm:$0xff] %v17456_v9 }
 0x717   : > { %21401 = vst [vmem:[#allocation88_spill] sm:$0xff] %v17449_v1 }
 0x718   : > { %21404 = vst [vmem:[#allocation90_spill] sm:$0xff] %v17459_v14 }
 0x71a   : > { %v6564_v39 = vpop.f32.mrf.mxu2  ;;  %v5253_v19 = vpop.f32.mrf.mxu0 }
 0x71b   : > { %v6565_v34 = vadd.f32 %v6564_v39, %v21402_v36  ;;  %v6653_v62 = vpop.f32.mrf.mxu3  ;;  %v5254_v0 = vadd.f32 %v5253_v19, %v16941_v45  ;;  %v5342_v52 = vpop.f32.mrf.mxu1  ;;  %v11751_v36 = vld [vmem:[%s16946_s18 + $0x8] sm:$0xf] }
 0x71c   : > { %v11753_v19 = vld [vmem:[%s16946_s18 + $0x24] sm:$0xf0] }
 0x71d   : > { %v17461_v22 = vadd.f32 %v6653_v62, %v6565_v34  ;;  %v17463_v11 = vadd.f32 %v5342_v52, %v5254_v0  ;;  %5292 = vmatmul.bf16.gmra.mxu0 %v21406_v29  ;;  %v12707_v34 = vld [vmem:[%s16946_s18 + $0x20] sm:$0xf0]  ;;  %v12704_v62 = vld [vmem:[%s16946_s18 + $0xc] sm:$0xf]  ;;  %v11759_v29 = vld [vmem:[%s16946_s18 + $0x10] sm:$0xf] }
 0x71e   : > { %5381 = vmatmul.bf16.gmra.mxu1 %v21407_v46  ;;  %v12708_v46 = vld [vmem:[%s16946_s18 + $0x28] sm:$0xf0]  ;;  %v17483_v1 = vor.u32 %v12707_v34, %v11751_v36  ;;  %v12859_v36 = vld [vmem:[%s20674_s2 + $0x164] sm:$0xf] }
 0x71f   : > { %21405 = vst [vmem:[#allocation91_spill] sm:$0xff] %v17463_v11  ;;  %6606 = vmatmul.bf16.gmra.mxu2 %v17456_v9  ;;  %v11761_v9 = vld [vmem:[%s16946_s18 + $0x2c] sm:$0xf0]  ;;  %v12369_v34 = vld [vmem:[%s20674_s2 + $0x168] sm:$0xf0] }
 0x720   : > { %6695 = vmatmul.bf16.gmra.mxu3 %v17459_v14  ;;  %v12705_v14 = vld [vmem:[%s16946_s18 + $0x14] sm:$0xf] }
 0x722   : > { %v6567_v45 = vpop.f32.mrf.mxu2  ;;  %v5255_v27 = vpop.f32.mrf.mxu0 }
 0x723   : > { %v6568_v32 = vadd.f32 %v6567_v45, %v21408_v51  ;;  %v6656_v57 = vpop.f32.mrf.mxu3  ;;  %v5256_v0 = vadd.f32 %v5255_v27, %v16957_v20  ;;  %v5344_v52 = vpop.f32.mrf.mxu1  ;;  %v21410_v45 = vld [vmem:[#allocation31_spill] sm:$0xff]  ;;  %v17486_v27 = vor.u32 %v12704_v62, %v11753_v19 }
 0x725   : > { %v17471_v30 = vadd.f32 %v6656_v57, %v6568_v32  ;;  %v17473_v39 = vadd.f32 %v5344_v52, %v5256_v0  ;;  %21411 = vst [vmem:[#allocation33_spill] sm:$0xff] %v17486_v27  ;;  %v17488_v32 = vor.u32 %v12708_v46, %v11759_v29  ;;  %v17491_v52 = vor.u32 %v12705_v14, %v11761_v9  ;;  %v12924_v9 = vld [vmem:[%s20674_s2 + $0x364] sm:$0xf0]  ;;  %v21415_v46 = vld [vmem:[#allocation32_spill] sm:$0xff] }
 0x726   : > { %v12372_v29 = vor.u32 %v12859_v36, %v12369_v34  ;;  %v11779_v36 = vld [vmem:[%s16946_s18 + $0x40] sm:$0xf]  ;;  %v12711_v34 = vld [vmem:[%s16946_s18 + $0x44] sm:$0xf] }
 0x727   : > { %21409 = vst [vmem:[#allocation92_spill] sm:$0xff] %v17473_v39 }
 0x728   : > { %21412 = vst [vmem:[#allocation94_spill] sm:$0xff] %v17488_v32  ;;  %7325 = vmatpush.bf16.msra.mxu3 %v12372_v29  ;;  %v12712_v29 = vld [vmem:[%s16946_s18 + $0x4c] sm:$0xf] }
 0x729   : > { %21413 = vst [vmem:[#allocation95_spill] sm:$0xff] %v17491_v52 }
 0x72a   : > { %v6569_v11 = vpop.f32.mrf.mxu2  ;;  %v5258_v20 = vpop.f32.mrf.mxu0 }
 0x72b   : > { %v6570_v51 = vadd.f32 %v6569_v11, %v21410_v45  ;;  %v6658_v31 = vpop.f32.mrf.mxu3  ;;  %v5259_v57 = vadd.f32 %v5258_v20, %v16982_v59  ;;  %v5347_v0 = vpop.f32.mrf.mxu1  ;;  %v12843_v11 = vld [vmem:[%s20674_s2 + $0xe4] sm:$0xf]  ;;  %v12305_v59 = vld [vmem:[%s20674_s2 + $0xe8] sm:$0xf0] }
 0x72c   : > { %v12308_v14 = vor.u32 %v12843_v11, %v12305_v59  ;;  %v12827_v59 = vld [vmem:[%s20674_s2 + $0x64] sm:$0xf] }
 0x72d   : > { %v17493_v39 = vadd.f32 %v6658_v31, %v6570_v51  ;;  %v17495_v42 = vadd.f32 %v5347_v0, %v5259_v57  ;;  %6709 = vmatmul.bf16.vlgmr.msrb.gmra.mxu0 %v17483_v1  ;;  %v12623_v31 = vld [vmem:[%s20674_s2 + $0x360] sm:$0xf] }
 0x72e   : > { %6798 = vmatmul.bf16.vlgmr.msrb.gmra.mxu1 %v17486_v27  ;;  %v12624_v19 = vor.u32 %v12924_v9, %v12623_v31  ;;  %7236 = vmatpush.bf16.msra.mxu2 %v12308_v14  ;;  %v12241_v31 = vld [vmem:[%s20674_s2 + $0x68] sm:$0xf0] }
 0x72f   : > { %21414 = vst [vmem:[#allocation96_spill] sm:$0xff] %v17495_v42  ;;  %6887 = vmatmul.bf16.vlgmr.msrb.gmra.mxu2 %v17488_v32  ;;  %v12244_v14 = vor.u32 %v12827_v59, %v12241_v31 }
 0x730   : > { %6976 = vmatmul.bf16.vlgmr.msrb.gmra.mxu3 %v17491_v52  ;;  %7058 = vmatpush.bf16.msra.mxu0 %v12624_v19  ;;  %v12715_v19 = vld [vmem:[%s16946_s18 + $0x60] sm:$0xf0] }
 0x731   : > { %7147 = vmatpush.bf16.msra.mxu1 %v12244_v14  ;;  %v21417_v52 = vld [vmem:[#allocation34_spill] sm:$0xff] }
 0x732   : > { %v6572_v62 = vpop.f32.mrf.mxu2  ;;  %v5260_v20 = vpop.f32.mrf.mxu0 }
 0x733   : > { %v6573_v45 = vadd.f32 %v6572_v62, %v21415_v46  ;;  %v6661_v51 = vpop.f32.mrf.mxu3  ;;  %v5261_v57 = vadd.f32 %v5260_v20, %v16999_v38  ;;  %v5349_v0 = vpop.f32.mrf.mxu1  ;;  %v12714_v38 = vld [vmem:[%s16946_s18 + $0x58] sm:$0xf0]  ;;  %v11781_v62 = vld [vmem:[%s16946_s18 + $0x5c] sm:$0xf0]  ;;  %v11787_v46 = vld [vmem:[%s16946_s18 + $0x48] sm:$0xf] }
 0x734   : > { %v17539_v20 = vor.u32 %v12714_v38, %v11779_v36  ;;  %v17542_v13 = vor.u32 %v12711_v34, %v11781_v62 }
 0x735   : > { %v17521_v11 = vadd.f32 %v6661_v51, %v6573_v45  ;;  %v17529_v9 = vadd.f32 %v5349_v0, %v5261_v57  ;;  %v11789_v45 = vld [vmem:[%s16946_s18 + $0x64] sm:$0xf0]  ;;  %v17544_v57 = vor.u32 %v12715_v19, %v11787_v46  ;;  %v11807_v19 = vld [vmem:[%s16946_s18 + $0x78] sm:$0xf] }
 0x736   : > { %21418 = vst [vmem:[#allocation98_spill] sm:$0xff] %v17542_v13  ;;  %v17547_v31 = vor.u32 %v12712_v29, %v11789_v45  ;;  %v12721_v29 = vld [vmem:[%s16946_s18 + $0x90] sm:$0xf0]  ;;  %v12718_v45 = vld [vmem:[%s16946_s18 + $0x7c] sm:$0xf] }
 0x737   : > { %21416 = vst [vmem:[#allocation37_spill] sm:$0xff] %v17529_v9 }
 0x738   : > { %21419 = vst [vmem:[#allocation99_spill] sm:$0xff] %v17544_v57 }
 0x739   : > { %21420 = vst [vmem:[#allocation100_spill] sm:$0xff] %v17547_v31 }
 0x73a   : > { %v6574_v51 = vpop.f32.mrf.mxu2  ;;  %v5263_v42 = vpop.f32.mrf.mxu0 }
 0x73b   : > { %v6575_v32 = vadd.f32 %v6574_v51, %v21417_v52  ;;  %v6663_v27 = vpop.f32.mrf.mxu3  ;;  %v5264_v0 = vadd.f32 %v5263_v42, %v17006_v48  ;;  %v5352_v59 = vpop.f32.mrf.mxu1  ;;  %v21422_v42 = vld [vmem:[#allocation35_spill] sm:$0xff]  ;;  %v11809_v51 = vld [vmem:[%s16946_s18 + $0x94] sm:$0xf0] }
 0x73d   : > { %v17549_v14 = vadd.f32 %v6663_v27, %v6575_v32  ;;  %v17551_v36 = vadd.f32 %v5352_v59, %v5264_v0  ;;  %6714 = vmatmul.bf16.gmra.mxu0 %v17539_v20  ;;  %v11815_v0 = vld [vmem:[%s16946_s18 + $0x80] sm:$0xf]  ;;  %v12722_v59 = vld [vmem:[%s16946_s18 + $0x98] sm:$0xf0] }
 0x73e   : > { %6803 = vmatmul.bf16.gmra.mxu1 %v17542_v13 }
 0x73f   : > { %21421 = vst [vmem:[#allocation41_spill] sm:$0xff] %v17551_v36  ;;  %6892 = vmatmul.bf16.gmra.mxu2 %v17544_v57  ;;  %v11817_v57 = vld [vmem:[%s16946_s18 + $0x9c] sm:$0xf0]  ;;  %v17571_v36 = vor.u32 %v12721_v29, %v11807_v19  ;;  %v12857_v19 = vld [vmem:[%s20674_s2 + $0x154] sm:$0xf] }
 0x740   : > { %6981 = vmatmul.bf16.gmra.mxu3 %v17547_v31  ;;  %v12719_v31 = vld [vmem:[%s16946_s18 + $0x84] sm:$0xf]  ;;  %v12361_v29 = vld [vmem:[%s20674_s2 + $0x158] sm:$0xf0] }
 0x742   : > { %v6577_v48 = vpop.f32.mrf.mxu2  ;;  %v5265_v52 = vpop.f32.mrf.mxu0 }
 0x743   : > { %v6578_v27 = vadd.f32 %v6577_v48, %v21422_v42  ;;  %v6666_v32 = vpop.f32.mrf.mxu3  ;;  %v5266_v38 = vadd.f32 %v5265_v52, %v17017_v47  ;;  %v5354_v34 = vpop.f32.mrf.mxu1  ;;  %v21424_v48 = vld [vmem:[#allocation36_spill] sm:$0xff]  ;;  %v17574_v52 = vor.u32 %v12718_v45, %v11809_v51 }
 0x745   : > { %v17559_v62 = vadd.f32 %v6666_v32, %v6578_v27  ;;  %v17561_v46 = vadd.f32 %v5354_v34, %v5266_v38  ;;  %21425 = vst [vmem:[#allocation103_spill] sm:$0xff] %v17574_v52  ;;  %v17576_v27 = vor.u32 %v12722_v59, %v11815_v0  ;;  %v17579_v34 = vor.u32 %v12719_v31, %v11817_v57  ;;  %v12922_v31 = vld [vmem:[%s20674_s2 + $0x354] sm:$0xf0]  ;;  %v21429_v59 = vld [vmem:[#allocation38_spill] sm:$0xff] }
 0x746   : > { %v12364_v0 = vor.u32 %v12857_v19, %v12361_v29  ;;  %v11835_v19 = vld [vmem:[%s16946_s18 + $0xb0] sm:$0xf]  ;;  %v12725_v29 = vld [vmem:[%s16946_s18 + $0xb4] sm:$0xf] }
 0x747   : > { %21423 = vst [vmem:[#allocation102_spill] sm:$0xff] %v17561_v46 }
 0x748   : > { %21426 = vst [vmem:[#allocation104_spill] sm:$0xff] %v17576_v27  ;;  %7326 = vmatpush.bf16.msra.mxu3 %v12364_v0  ;;  %v12726_v0 = vld [vmem:[%s16946_s18 + $0xbc] sm:$0xf] }
 0x749   : > { %21427 = vst [vmem:[#allocation45_spill] sm:$0xff] %v17579_v34 }
 0x74a   : > { %v6579_v13 = vpop.f32.mrf.mxu2  ;;  %v5268_v47 = vpop.f32.mrf.mxu0 }
 0x74b   : > { %v6580_v42 = vadd.f32 %v6579_v13, %v21424_v48  ;;  %v6668_v9 = vpop.f32.mrf.mxu3  ;;  %v5269_v32 = vadd.f32 %v5268_v47, %v17042_v2  ;;  %v5357_v38 = vpop.f32.mrf.mxu1  ;;  %v12841_v13 = vld [vmem:[%s20674_s2 + $0xd4] sm:$0xf]  ;;  %v12297_v2 = vld [vmem:[%s20674_s2 + $0xd8] sm:$0xf0] }
 0x74c   : > { %v12300_v57 = vor.u32 %v12841_v13, %v12297_v2  ;;  %v12825_v2 = vld [vmem:[%s20674_s2 + $0x54] sm:$0xf] }
 0x74d   : > { %v17581_v46 = vadd.f32 %v6668_v9, %v6580_v42  ;;  %v17583_v15 = vadd.f32 %v5357_v38, %v5269_v32  ;;  %6719 = vmatmul.bf16.gmra.mxu0 %v17571_v36  ;;  %v12615_v9 = vld [vmem:[%s20674_s2 + $0x350] sm:$0xf] }
 0x74e   : > { %6808 = vmatmul.bf16.gmra.mxu1 %v17574_v52  ;;  %v12616_v51 = vor.u32 %v12922_v31, %v12615_v9  ;;  %7237 = vmatpush.bf16.msra.mxu2 %v12300_v57  ;;  %v12233_v9 = vld [vmem:[%s20674_s2 + $0x58] sm:$0xf0] }
 0x74f   : > { %21428 = vst [vmem:[#allocation106_spill] sm:$0xff] %v17583_v15  ;;  %6897 = vmatmul.bf16.gmra.mxu2 %v17576_v27  ;;  %v12236_v57 = vor.u32 %v12825_v2, %v12233_v9 }
 0x750   : > { %6986 = vmatmul.bf16.gmra.mxu3 %v17579_v34  ;;  %7059 = vmatpush.bf16.msra.mxu0 %v12616_v51  ;;  %v12729_v51 = vld [vmem:[%s16946_s18 + $0xd0] sm:$0xf0]  ;;  %v21431_v34 = vld [vmem:[#allocation39_spill] sm:$0xff] }
 0x751   : > { %7148 = vmatpush.bf16.msra.mxu1 %v12236_v57 }
 0x752   : > { %v6582_v45 = vpop.f32.mrf.mxu2  ;;  %v5270_v47 = vpop.f32.mrf.mxu0 }
 0x753   : > { %v6583_v48 = vadd.f32 %v6582_v45, %v21429_v59  ;;  %v6671_v42 = vpop.f32.mrf.mxu3  ;;  %v5271_v32 = vadd.f32 %v5270_v47, %v17059_v35  ;;  %v5359_v38 = vpop.f32.mrf.mxu1  ;;  %v12728_v35 = vld [vmem:[%s16946_s18 + $0xc8] sm:$0xf0]  ;;  %v11837_v45 = vld [vmem:[%s16946_s18 + $0xcc] sm:$0xf0]  ;;  %v11843_v59 = vld [vmem:[%s16946_s18 + $0xb8] sm:$0xf] }
 0x754   : > { %v17627_v47 = vor.u32 %v12728_v35, %v11835_v19  ;;  %v17630_v4 = vor.u32 %v12725_v29, %v11837_v45 }
 0x755   : > { %v17609_v13 = vadd.f32 %v6671_v42, %v6583_v48  ;;  %v17617_v31 = vadd.f32 %v5359_v38, %v5271_v32  ;;  %v11845_v48 = vld [vmem:[%s16946_s18 + $0xd4] sm:$0xf0]  ;;  %v17632_v32 = vor.u32 %v12729_v51, %v11843_v59  ;;  %v11863_v51 = vld [vmem:[%s16946_s18 + $0xe8] sm:$0xf] }
 0x756   : > { %21432 = vst [vmem:[#allocation108_spill] sm:$0xff] %v17630_v4  ;;  %v17635_v9 = vor.u32 %v12726_v0, %v11845_v48  ;;  %v12735_v0 = vld [vmem:[%s16946_s18 + $0x100] sm:$0xf0]  ;;  %v12732_v48 = vld [vmem:[%s16946_s18 + $0xec] sm:$0xf] }
 0x757   : > { %21430 = vst [vmem:[#allocation107_spill] sm:$0xff] %v17617_v31 }
 0x758   : > { %21433 = vst [vmem:[#allocation49_spill] sm:$0xff] %v17632_v32 }
 0x759   : > { %21434 = vst [vmem:[#allocation110_spill] sm:$0xff] %v17635_v9 }
 0x75a   : > { %v6584_v42 = vpop.f32.mrf.mxu2  ;;  %v5273_v15 = vpop.f32.mrf.mxu0 }
 0x75b   : > { %v6585_v27 = vadd.f32 %v6584_v42, %v21431_v34  ;;  %v6673_v52 = vpop.f32.mrf.mxu3  ;;  %v5274_v38 = vadd.f32 %v5273_v15, %v17066_v53  ;;  %v5362_v2 = vpop.f32.mrf.mxu1  ;;  %v21436_v15 = vld [vmem:[#allocation40_spill] sm:$0xff]  ;;  %v11865_v42 = vld [vmem:[%s16946_s18 + $0x104] sm:$0xf0] }
 0x75d   : > { %v17637_v57 = vadd.f32 %v6673_v52, %v6585_v27  ;;  %v17639_v19 = vadd.f32 %v5362_v2, %v5274_v38  ;;  %6724 = vmatmul.bf16.gmra.mxu0 %v17627_v47  ;;  %v11871_v38 = vld [vmem:[%s16946_s18 + $0xf0] sm:$0xf]  ;;  %v12736_v2 = vld [vmem:[%s16946_s18 + $0x108] sm:$0xf0] }
 0x75e   : > { %6813 = vmatmul.bf16.gmra.mxu1 %v17630_v4 }
 0x75f   : > { %21435 = vst [vmem:[#allocation111_spill] sm:$0xff] %v17639_v19  ;;  %6902 = vmatmul.bf16.gmra.mxu2 %v17632_v32  ;;  %v11873_v32 = vld [vmem:[%s16946_s18 + $0x10c] sm:$0xf0]  ;;  %v17659_v19 = vor.u32 %v12735_v0, %v11863_v51  ;;  %v12855_v51 = vld [vmem:[%s20674_s2 + $0x144] sm:$0xf] }
 0x760   : > { %6991 = vmatmul.bf16.gmra.mxu3 %v17635_v9  ;;  %v12733_v9 = vld [vmem:[%s16946_s18 + $0xf4] sm:$0xf]  ;;  %v12353_v0 = vld [vmem:[%s20674_s2 + $0x148] sm:$0xf0] }
 0x761   : > { %21438 = vst [vmem:[#allocation53_spill] sm:$0xff] %v17659_v19 }
 0x762   : > { %v6587_v53 = vpop.f32.mrf.mxu2  ;;  %v5275_v34 = vpop.f32.mrf.mxu0 }
 0x763   : > { %v6588_v52 = vadd.f32 %v6587_v53, %v21436_v15  ;;  %v6676_v27 = vpop.f32.mrf.mxu3  ;;  %v5276_v35 = vadd.f32 %v5275_v34, %v17077_v23  ;;  %v5364_v29 = vpop.f32.mrf.mxu1  ;;  %v21439_v53 = vld [vmem:[#allocation42_spill] sm:$0xff]  ;;  %v17662_v34 = vor.u32 %v12732_v48, %v11865_v42 }
 0x765   : > { %v17647_v45 = vadd.f32 %v6676_v27, %v6588_v52  ;;  %v17649_v59 = vadd.f32 %v5364_v29, %v5276_v35  ;;  %21440 = vst [vmem:[#allocation114_spill] sm:$0xff] %v17662_v34  ;;  %v17664_v52 = vor.u32 %v12736_v2, %v11871_v38  ;;  %v17667_v29 = vor.u32 %v12733_v9, %v11873_v32  ;;  %v12920_v9 = vld [vmem:[%s20674_s2 + $0x344] sm:$0xf0] }
 0x766   : > { %v12356_v38 = vor.u32 %v12855_v51, %v12353_v0  ;;  %v21444_v2 = vld [vmem:[#allocation43_spill] sm:$0xff]  ;;  %v11891_v51 = vld [vmem:[%s16946_s18 + $0x120] sm:$0xf]  ;;  %v12739_v0 = vld [vmem:[%s16946_s18 + $0x124] sm:$0xf] }
 0x767   : > { %21437 = vst [vmem:[#allocation112_spill] sm:$0xff] %v17649_v59 }
 0x768   : > { %21441 = vst [vmem:[#allocation115_spill] sm:$0xff] %v17664_v52  ;;  %7327 = vmatpush.bf16.msra.mxu3 %v12356_v38  ;;  %v12740_v38 = vld [vmem:[%s16946_s18 + $0x12c] sm:$0xf] }
 0x769   : > { %21442 = vst [vmem:[#allocation116_spill] sm:$0xff] %v17667_v29 }
 0x76a   : > { %v6589_v4 = vpop.f32.mrf.mxu2  ;;  %v5278_v23 = vpop.f32.mrf.mxu0 }
 0x76b   : > { %v6590_v15 = vadd.f32 %v6589_v4, %v21439_v53  ;;  %v6678_v31 = vpop.f32.mrf.mxu3  ;;  %v5279_v27 = vadd.f32 %v5278_v23, %v17102_v5  ;;  %v5367_v35 = vpop.f32.mrf.mxu1  ;;  %v12839_v4 = vld [vmem:[%s20674_s2 + $0xc4] sm:$0xf]  ;;  %v12289_v5 = vld [vmem:[%s20674_s2 + $0xc8] sm:$0xf0] }
 0x76c   : > { %v12292_v32 = vor.u32 %v12839_v4, %v12289_v5  ;;  %v12823_v5 = vld [vmem:[%s20674_s2 + $0x44] sm:$0xf] }
 0x76d   : > { %v17669_v59 = vadd.f32 %v6678_v31, %v6590_v15  ;;  %v17671_v7 = vadd.f32 %v5367_v35, %v5279_v27  ;;  %6729 = vmatmul.bf16.gmra.mxu0 %v17659_v19  ;;  %v12607_v31 = vld [vmem:[%s20674_s2 + $0x340] sm:$0xf] }
 0x76e   : > { %6818 = vmatmul.bf16.gmra.mxu1 %v17662_v34  ;;  %v12608_v42 = vor.u32 %v12920_v9, %v12607_v31  ;;  %7238 = vmatpush.bf16.msra.mxu2 %v12292_v32  ;;  %v12225_v31 = vld [vmem:[%s20674_s2 + $0x48] sm:$0xf0] }
 0x76f   : > { %21443 = vst [vmem:[#allocation57_spill] sm:$0xff] %v17671_v7  ;;  %6907 = vmatmul.bf16.gmra.mxu2 %v17664_v52  ;;  %v12228_v32 = vor.u32 %v12823_v5, %v12225_v31 }
 0x770   : > { %6996 = vmatmul.bf16.gmra.mxu3 %v17667_v29  ;;  %7060 = vmatpush.bf16.msra.mxu0 %v12608_v42  ;;  %v12743_v42 = vld [vmem:[%s16946_s18 + $0x140] sm:$0xf0]  ;;  %v21447_v29 = vld [vmem:[#allocation44_spill] sm:$0xff] }
 0x771   : > { %7149 = vmatpush.bf16.msra.mxu1 %v12228_v32 }
 0x772   : > { %v6592_v48 = vpop.f32.mrf.mxu2  ;;  %v5280_v23 = vpop.f32.mrf.mxu0 }
 0x773   : > { %v6593_v53 = vadd.f32 %v6592_v48, %v21444_v2  ;;  %v6681_v15 = vpop.f32.mrf.mxu3  ;;  %v5281_v27 = vadd.f32 %v5280_v23, %v17119_v41  ;;  %v5369_v35 = vpop.f32.mrf.mxu1  ;;  %v12742_v41 = vld [vmem:[%s16946_s18 + $0x138] sm:$0xf0]  ;;  %v11893_v48 = vld [vmem:[%s16946_s18 + $0x13c] sm:$0xf0]  ;;  %v11899_v2 = vld [vmem:[%s16946_s18 + $0x128] sm:$0xf] }
 0x774   : > { %v17715_v23 = vor.u32 %v12742_v41, %v11891_v51  ;;  %v17718_v19 = vor.u32 %v12739_v0, %v11893_v48 }
 0x775   : > { %v17697_v4 = vadd.f32 %v6681_v15, %v6593_v53  ;;  %v17705_v9 = vadd.f32 %v5369_v35, %v5281_v27  ;;  %v11901_v53 = vld [vmem:[%s16946_s18 + $0x144] sm:$0xf0]  ;;  %v17720_v27 = vor.u32 %v12743_v42, %v11899_v2  ;;  %v11919_v42 = vld [vmem:[%s16946_s18 + $0x158] sm:$0xf] }
 0x776   : > { %21446 = vst [vmem:[#allocation119_spill] sm:$0xff] %v17715_v23  ;;  %v17723_v31 = vor.u32 %v12740_v38, %v11901_v53  ;;  %v12749_v38 = vld [vmem:[%s16946_s18 + $0x170] sm:$0xf0]  ;;  %v12746_v53 = vld [vmem:[%s16946_s18 + $0x15c] sm:$0xf] }
 0x777   : > { %21445 = vst [vmem:[#allocation118_spill] sm:$0xff] %v17705_v9 }
 0x778   : > { %21448 = vst [vmem:[#allocation120_spill] sm:$0xff] %v17718_v19 }
 0x779   : > { %21449 = vst [vmem:[#allocation61_spill] sm:$0xff] %v17720_v27 }
 0x77a   : > { %v6594_v15 = vpop.f32.mrf.mxu2  ;;  %v5283_v7 = vpop.f32.mrf.mxu0  ;;  %21450 = vst [vmem:[#allocation122_spill] sm:$0xff] %v17723_v31 }
 0x77b   : > { %v6595_v52 = vadd.f32 %v6594_v15, %v21447_v29  ;;  %v6683_v34 = vpop.f32.mrf.mxu3  ;;  %v5284_v35 = vadd.f32 %v5283_v7, %v17126_v55  ;;  %v5372_v5 = vpop.f32.mrf.mxu1  ;;  %v21452_v55 = vld [vmem:[#allocation46_spill] sm:$0xff]  ;;  %v11921_v15 = vld [vmem:[%s16946_s18 + $0x174] sm:$0xf0] }
 0x77d   : > { %v17725_v32 = vadd.f32 %v6683_v34, %v6595_v52  ;;  %v17727_v51 = vadd.f32 %v5372_v5, %v5284_v35  ;;  %6734 = vmatmul.bf16.gmra.mxu0 %v17715_v23  ;;  %v11927_v35 = vld [vmem:[%s16946_s18 + $0x160] sm:$0xf]  ;;  %v12750_v5 = vld [vmem:[%s16946_s18 + $0x178] sm:$0xf0] }
 0x77e   : > { %6823 = vmatmul.bf16.gmra.mxu1 %v17718_v19 }
 0x77f   : > { %21451 = vst [vmem:[#allocation123_spill] sm:$0xff] %v17727_v51  ;;  %6912 = vmatmul.bf16.gmra.mxu2 %v17720_v27  ;;  %v11929_v27 = vld [vmem:[%s16946_s18 + $0x17c] sm:$0xf0]  ;;  %v17747_v51 = vor.u32 %v12749_v38, %v11919_v42  ;;  %v12853_v42 = vld [vmem:[%s20674_s2 + $0x134] sm:$0xf] }
 0x780   : > { %7001 = vmatmul.bf16.gmra.mxu3 %v17723_v31  ;;  %v12747_v31 = vld [vmem:[%s16946_s18 + $0x164] sm:$0xf]  ;;  %v12345_v38 = vld [vmem:[%s20674_s2 + $0x138] sm:$0xf0] }
 0x781   : > { %21454 = vst [vmem:[#allocation65_spill] sm:$0xff] %v17747_v51 }
 0x782   : > { %v6597_v7 = vpop.f32.mrf.mxu2  ;;  %v5285_v29 = vpop.f32.mrf.mxu0 }
 0x783   : > { %v6598_v34 = vadd.f32 %v6597_v7, %v21452_v55  ;;  %v6686_v52 = vpop.f32.mrf.mxu3  ;;  %v5286_v41 = vadd.f32 %v5285_v29, %v17137_v40  ;;  %v5374_v0 = vpop.f32.mrf.mxu1  ;;  %v21455_v7 = vld [vmem:[#allocation47_spill] sm:$0xff]  ;;  %v17750_v29 = vor.u32 %v12746_v53, %v11921_v15 }
 0x785   : > { %v17735_v48 = vadd.f32 %v6686_v52, %v6598_v34  ;;  %v17737_v2 = vadd.f32 %v5374_v0, %v5286_v41  ;;  %21456 = vst [vmem:[#allocation126_spill] sm:$0xff] %v17750_v29  ;;  %v17752_v34 = vor.u32 %v12750_v5, %v11927_v35  ;;  %v17755_v0 = vor.u32 %v12747_v31, %v11929_v27  ;;  %v12918_v31 = vld [vmem:[%s20674_s2 + $0x334] sm:$0xf0]  ;;  %v21460_v5 = vld [vmem:[#allocation48_spill] sm:$0xff] }
 0x786   : > { %v12348_v35 = vor.u32 %v12853_v42, %v12345_v38  ;;  %v11947_v42 = vld [vmem:[%s16946_s18 + $0x190] sm:$0xf]  ;;  %v12753_v38 = vld [vmem:[%s16946_s18 + $0x194] sm:$0xf] }
 0x787   : > { %21453 = vst [vmem:[#allocation124_spill] sm:$0xff] %v17737_v2 }
 0x788   : > { %21457 = vst [vmem:[#allocation127_spill] sm:$0xff] %v17752_v34  ;;  %7328 = vmatpush.bf16.msra.mxu3 %v12348_v35  ;;  %v12754_v35 = vld [vmem:[%s16946_s18 + $0x19c] sm:$0xf] }
 0x789   : > { %21458 = vst [vmem:[#allocation128_spill] sm:$0xff] %v17755_v0 }
 0x78a   : > { %v6599_v19 = vpop.f32.mrf.mxu2  ;;  %v5288_v40 = vpop.f32.mrf.mxu0 }
 0x78b   : > { %v6600_v55 = vadd.f32 %v6599_v19, %v21455_v7  ;;  %v6688_v9 = vpop.f32.mrf.mxu3  ;;  %v5289_v52 = vadd.f32 %v5288_v40, %v17162_v24  ;;  %v5377_v41 = vpop.f32.mrf.mxu1  ;;  %v12837_v19 = vld [vmem:[%s20674_s2 + $0xb4] sm:$0xf]  ;;  %v12281_v24 = vld [vmem:[%s20674_s2 + $0xb8] sm:$0xf0] }
 0x78c   : > { %v12284_v27 = vor.u32 %v12837_v19, %v12281_v24  ;;  %v12821_v24 = vld [vmem:[%s20674_s2 + $0x34] sm:$0xf] }
 0x78d   : > { %v17757_v2 = vadd.f32 %v6688_v9, %v6600_v55  ;;  %v17759_v23 = vadd.f32 %v5377_v41, %v5289_v52  ;;  %6739 = vmatmul.bf16.gmra.mxu0 %v17747_v51  ;;  %v12599_v9 = vld [vmem:[%s20674_s2 + $0x330] sm:$0xf] }
 0x78e   : > { %6828 = vmatmul.bf16.gmra.mxu1 %v17750_v29  ;;  %v12600_v15 = vor.u32 %v12918_v31, %v12599_v9  ;;  %7239 = vmatpush.bf16.msra.mxu2 %v12284_v27  ;;  %v12217_v9 = vld [vmem:[%s20674_s2 + $0x38] sm:$0xf0] }
 0x78f   : > { %21459 = vst [vmem:[#allocation69_spill] sm:$0xff] %v17759_v23  ;;  %6917 = vmatmul.bf16.gmra.mxu2 %v17752_v34  ;;  %v12220_v27 = vor.u32 %v12821_v24, %v12217_v9 }
 0x790   : > { %7006 = vmatmul.bf16.gmra.mxu3 %v17755_v0  ;;  %7061 = vmatpush.bf16.msra.mxu0 %v12600_v15  ;;  %v12757_v15 = vld [vmem:[%s16946_s18 + $0x1b0] sm:$0xf0]  ;;  %v21463_v0 = vld [vmem:[#allocation50_spill] sm:$0xff] }
 0x791   : > { %7150 = vmatpush.bf16.msra.mxu1 %v12220_v27 }
 0x792   : > { %v6602_v53 = vpop.f32.mrf.mxu2  ;;  %v5290_v40 = vpop.f32.mrf.mxu0 }
 0x793   : > { %v6603_v7 = vadd.f32 %v6602_v53, %v21460_v5  ;;  %v6691_v55 = vpop.f32.mrf.mxu3  ;;  %v5291_v52 = vadd.f32 %v5290_v40, %v17179_v56  ;;  %v5379_v41 = vpop.f32.mrf.mxu1  ;;  %v12756_v56 = vld [vmem:[%s16946_s18 + $0x1a8] sm:$0xf0]  ;;  %v11949_v53 = vld [vmem:[%s16946_s18 + $0x1ac] sm:$0xf0]  ;;  %v11955_v5 = vld [vmem:[%s16946_s18 + $0x198] sm:$0xf] }
 0x794   : > { %v17803_v40 = vor.u32 %v12756_v56, %v11947_v42  ;;  %v17806_v51 = vor.u32 %v12753_v38, %v11949_v53 }
 0x795   : > { %v17785_v19 = vadd.f32 %v6691_v55, %v6603_v7  ;;  %v17793_v31 = vadd.f32 %v5379_v41, %v5291_v52  ;;  %v11957_v7 = vld [vmem:[%s16946_s18 + $0x1b4] sm:$0xf0]  ;;  %v17808_v52 = vor.u32 %v12757_v15, %v11955_v5  ;;  %v11975_v15 = vld [vmem:[%s16946_s18 + $0x1c8] sm:$0xf] }
 0x796   : > { %21462 = vst [vmem:[#allocation131_spill] sm:$0xff] %v17803_v40  ;;  %v17811_v9 = vor.u32 %v12754_v35, %v11957_v7  ;;  %v12763_v35 = vld [vmem:[%s16946_s18 + $0x1e0] sm:$0xf0]  ;;  %v12760_v7 = vld [vmem:[%s16946_s18 + $0x1cc] sm:$0xf] }
 0x797   : > { %21461 = vst [vmem:[#allocation130_spill] sm:$0xff] %v17793_v31 }
 0x798   : > { %21464 = vst [vmem:[#allocation132_spill] sm:$0xff] %v17806_v51 }
 0x799   : > { %21465 = vst [vmem:[#allocation73_spill] sm:$0xff] %v17808_v52 }
 0x79a   : > { %v6604_v55 = vpop.f32.mrf.mxu2  ;;  %v5293_v23 = vpop.f32.mrf.mxu0  ;;  %21466 = vst [vmem:[#allocation134_spill] sm:$0xff] %v17811_v9 }
 0x79b   : > { %v6605_v34 = vadd.f32 %v6604_v55, %v21463_v0  ;;  %v6693_v29 = vpop.f32.mrf.mxu3  ;;  %v5294_v41 = vadd.f32 %v5293_v23, %v17186_v28  ;;  %v5382_v24 = vpop.f32.mrf.mxu1  ;;  %v21468_v23 = vld [vmem:[#allocation51_spill] sm:$0xff] }
 0x79c   : > { %v11977_v55 = vld [vmem:[%s16946_s18 + $0x1e4] sm:$0xf0] }
 0x79d   : > { %v17813_v27 = vadd.f32 %v6693_v29, %v6605_v34  ;;  %v17815_v42 = vadd.f32 %v5382_v24, %v5294_v41  ;;  %6744 = vmatmul.bf16.gmra.mxu0 %v17803_v40  ;;  %v11983_v41 = vld [vmem:[%s16946_s18 + $0x1d0] sm:$0xf]  ;;  %v12764_v24 = vld [vmem:[%s16946_s18 + $0x1e8] sm:$0xf0] }
 0x79e   : > { %6833 = vmatmul.bf16.gmra.mxu1 %v17806_v51 }
 0x79f   : > { %21467 = vst [vmem:[#allocation135_spill] sm:$0xff] %v17815_v42  ;;  %6922 = vmatmul.bf16.gmra.mxu2 %v17808_v52  ;;  %v11985_v52 = vld [vmem:[%s16946_s18 + $0x1ec] sm:$0xf0]  ;;  %v17835_v42 = vor.u32 %v12763_v35, %v11975_v15  ;;  %v12851_v15 = vld [vmem:[%s20674_s2 + $0x124] sm:$0xf] }
 0x7a0   : > { %7011 = vmatmul.bf16.gmra.mxu3 %v17811_v9  ;;  %v12761_v9 = vld [vmem:[%s16946_s18 + $0x1d4] sm:$0xf]  ;;  %v12337_v35 = vld [vmem:[%s20674_s2 + $0x128] sm:$0xf0] }
 0x7a1   : > { %21470 = vst [vmem:[#allocation77_spill] sm:$0xff] %v17835_v42 }
 0x7a2   : > { %v6607_v28 = vpop.f32.mrf.mxu2  ;;  %v5295_v0 = vpop.f32.mrf.mxu0 }
 0x7a3   : > { %v6608_v29 = vadd.f32 %v6607_v28, %v21468_v23  ;;  %v6696_v34 = vpop.f32.mrf.mxu3  ;;  %v5296_v56 = vadd.f32 %v5295_v0, %v17197_v49  ;;  %v5384_v38 = vpop.f32.mrf.mxu1  ;;  %v21471_v28 = vld [vmem:[#allocation52_spill] sm:$0xff]  ;;  %v17838_v0 = vor.u32 %v12760_v7, %v11977_v55 }
 0x7a5   : > { %v17823_v53 = vadd.f32 %v6696_v34, %v6608_v29  ;;  %v17825_v5 = vadd.f32 %v5384_v38, %v5296_v56  ;;  %21472 = vst [vmem:[#allocation138_spill] sm:$0xff] %v17838_v0  ;;  %v17840_v29 = vor.u32 %v12764_v24, %v11983_v41  ;;  %v17843_v38 = vor.u32 %v12761_v9, %v11985_v52  ;;  %v12916_v9 = vld [vmem:[%s20674_s2 + $0x324] sm:$0xf0] }
 0x7a6   : > { %v12340_v41 = vor.u32 %v12851_v15, %v12337_v35  ;;  %v12005_v15 = vld [vmem:[%s16946_s18 + $0x21c] sm:$0xf0]  ;;  %v12011_v35 = vld [vmem:[%s16946_s18 + $0x208] sm:$0xf] }
 0x7a7   : > { %21469 = vst [vmem:[#allocation136_spill] sm:$0xff] %v17825_v5 }
 0x7a8   : > { %21473 = vst [vmem:[#allocation139_spill] sm:$0xff] %v17840_v29  ;;  %7329 = vmatpush.bf16.msra.mxu3 %v12340_v41  ;;  %v12013_v41 = vld [vmem:[%s16946_s18 + $0x224] sm:$0xf0] }
 0x7a9   : > { %21474 = vst [vmem:[#allocation140_spill] sm:$0xff] %v17843_v38 }
 0x7aa   : > { %v6609_v51 = vpop.f32.mrf.mxu2  ;;  %v6710_v49 = vpop.f32.mrf.mxu0 }
 0x7ab   : > { %v6610_v23 = vadd.f32 %v6609_v51, %v21471_v28  ;;  %v6698_v31 = vpop.f32.mrf.mxu3  ;;  %v6711_v34 = vadd.f32 %v6710_v49, %v17225_v50  ;;  %v6799_v56 = vpop.f32.mrf.mxu1  ;;  %v12835_v51 = vld [vmem:[%s20674_s2 + $0xa4] sm:$0xf]  ;;  %v12273_v50 = vld [vmem:[%s20674_s2 + $0xa8] sm:$0xf0] }
 0x7ac   : > { %v12276_v52 = vor.u32 %v12835_v51, %v12273_v50  ;;  %v12819_v51 = vld [vmem:[%s20674_s2 + $0x24] sm:$0xf] }
 0x7ad   : > { %v17845_v5 = vadd.f32 %v6698_v31, %v6610_v23  ;;  %v6800_v40 = vadd.f32 %v6799_v56, %v6711_v34  ;;  %6749 = vmatmul.bf16.gmra.mxu0 %v17835_v42  ;;  %v12591_v31 = vld [vmem:[%s20674_s2 + $0x320] sm:$0xf] }
 0x7ae   : > { %6838 = vmatmul.bf16.gmra.mxu1 %v17838_v0  ;;  %v12592_v55 = vor.u32 %v12916_v9, %v12591_v31  ;;  %7240 = vmatpush.bf16.msra.mxu2 %v12276_v52  ;;  %v12003_v52 = vld [vmem:[%s16946_s18 + $0x200] sm:$0xf]  ;;  %v12770_v9 = vld [vmem:[%s16946_s18 + $0x218] sm:$0xf0] }
 0x7af   : > { %6927 = vmatmul.bf16.gmra.mxu2 %v17840_v29 }
 0x7b0   : > { %7016 = vmatmul.bf16.gmra.mxu3 %v17843_v38  ;;  %7062 = vmatpush.bf16.msra.mxu0 %v12592_v55  ;;  %v12768_v55 = vld [vmem:[%s16946_s18 + $0x20c] sm:$0xf] }
 0x7b2   : > { %v6888_v7 = vpop.f32.mrf.mxu2  ;;  %v6712_v23 = vpop.f32.mrf.mxu0 }
 0x7b3   : > { %v6889_v24 = vadd.f32 %v6888_v7, %v6800_v40  ;;  %v6977_v28 = vpop.f32.mrf.mxu3  ;;  %v6713_v49 = vadd.f32 %v6712_v23, %v17245_v63  ;;  %v6801_v34 = vpop.f32.mrf.mxu1  ;;  %v12209_v40 = vld [vmem:[%s20674_s2 + $0x28] sm:$0xf0]  ;;  %v12767_v63 = vld [vmem:[%s16946_s18 + $0x204] sm:$0xf] }
 0x7b4   : > { %v12212_v31 = vor.u32 %v12819_v51, %v12209_v40  ;;  %v12771_v7 = vld [vmem:[%s16946_s18 + $0x220] sm:$0xf0]  ;;  %v17888_v0 = vor.u32 %v12767_v63, %v12005_v15  ;;  %v17893_v51 = vor.u32 %v12768_v55, %v12013_v41  ;;  %v12774_v55 = vld [vmem:[%s16946_s18 + $0x23c] sm:$0xf]  ;;  %v12033_v41 = vld [vmem:[%s16946_s18 + $0x254] sm:$0xf0] }
 0x7b5   : > { %v17870_v56 = vadd.f32 %v6977_v28, %v6889_v24  ;;  %v6802_v50 = vadd.f32 %v6801_v34, %v6713_v49  ;;  %v17886_v28 = vor.u32 %v12770_v9, %v12003_v52  ;;  %v17890_v42 = vor.u32 %v12771_v7, %v12011_v35  ;;  %v12031_v35 = vld [vmem:[%s16946_s18 + $0x238] sm:$0xf]  ;;  %v12777_v7 = vld [vmem:[%s16946_s18 + $0x250] sm:$0xf0] }
 0x7b6   : > { %7151 = vmatpush.bf16.msra.mxu1 %v12212_v31  ;;  %21476 = vst [vmem:[#allocation142_spill] sm:$0xff] %v17888_v0 }
 0x7b7   : > { %21475 = vst [vmem:[#allocation81_spill] sm:$0xff] %v17886_v28 }
 0x7b8   : > { %21477 = vst [vmem:[#allocation143_spill] sm:$0xff] %v17890_v42 }
 0x7b9   : > { %21478 = vst [vmem:[#allocation144_spill] sm:$0xff] %v17893_v51 }
 0x7ba   : > { %v6890_v24 = vpop.f32.mrf.mxu2  ;;  %v6715_v29 = vpop.f32.mrf.mxu0 }
 0x7bb   : > { %v6891_v23 = vadd.f32 %v6890_v24, %v6802_v50  ;;  %v6979_v38 = vpop.f32.mrf.mxu3  ;;  %v6716_v49 = vadd.f32 %v6715_v29, %v17255_v8  ;;  %v6804_v34 = vpop.f32.mrf.mxu1  ;;  %v12039_v24 = vld [vmem:[%s16946_s18 + $0x240] sm:$0xf] }
 0x7bd   : > { %v17895_v40 = vadd.f32 %v6979_v38, %v6891_v23  ;;  %v6805_v31 = vadd.f32 %v6804_v34, %v6716_v49  ;;  %6754 = vmatmul.bf16.gmra.mxu0 %v17886_v28  ;;  %v12778_v23 = vld [vmem:[%s16946_s18 + $0x258] sm:$0xf0]  ;;  %v12775_v49 = vld [vmem:[%s16946_s18 + $0x244] sm:$0xf]  ;;  %v12041_v34 = vld [vmem:[%s16946_s18 + $0x25c] sm:$0xf0]  ;;  %v17914_v28 = vor.u32 %v12774_v55, %v12033_v41 }
 0x7be   : > { %6843 = vmatmul.bf16.gmra.mxu1 %v17888_v0  ;;  %v12329_v55 = vld [vmem:[%s20674_s2 + $0x118] sm:$0xf0] }
 0x7bf   : > { %6932 = vmatmul.bf16.gmra.mxu2 %v17890_v42  ;;  %v17912_v42 = vor.u32 %v12777_v7, %v12031_v35  ;;  %21480 = vst [vmem:[#allocation146_spill] sm:$0xff] %v17914_v28  ;;  %v12914_v35 = vld [vmem:[%s20674_s2 + $0x314] sm:$0xf0]  ;;  %v12849_v7 = vld [vmem:[%s20674_s2 + $0x114] sm:$0xf] }
 0x7c0   : > { %7021 = vmatmul.bf16.gmra.mxu3 %v17893_v51 }
 0x7c1   : > { %21479 = vst [vmem:[#allocation85_spill] sm:$0xff] %v17912_v42 }
 0x7c2   : > { %v6893_v8 = vpop.f32.mrf.mxu2  ;;  %v6717_v38 = vpop.f32.mrf.mxu0 }
 0x7c3   : > { %v6894_v29 = vadd.f32 %v6893_v8, %v6805_v31  ;;  %v6982_v50 = vpop.f32.mrf.mxu3  ;;  %v6718_v52 = vadd.f32 %v6717_v38, %v17269_v26  ;;  %v6806_v9 = vpop.f32.mrf.mxu1  ;;  %v17916_v26 = vor.u32 %v12778_v23, %v12039_v24  ;;  %v17919_v38 = vor.u32 %v12775_v49, %v12041_v34 }
 0x7c4   : > { %v12332_v23 = vor.u32 %v12849_v7, %v12329_v55  ;;  %v12061_v7 = vld [vmem:[%s16946_s18 + $0x28c] sm:$0xf0]  ;;  %v12067_v55 = vld [vmem:[%s16946_s18 + $0x278] sm:$0xf] }
 0x7c5   : > { %v17902_v63 = vadd.f32 %v6982_v50, %v6894_v29  ;;  %v6807_v15 = vadd.f32 %v6806_v9, %v6718_v52  ;;  %21481 = vst [vmem:[#allocation147_spill] sm:$0xff] %v17916_v26 }
 0x7c6   : > { %21482 = vst [vmem:[#allocation148_spill] sm:$0xff] %v17919_v38  ;;  %7330 = vmatpush.bf16.msra.mxu3 %v12332_v23  ;;  %v12069_v23 = vld [vmem:[%s16946_s18 + $0x294] sm:$0xf0] }
 0x7ca   : > { %v6895_v51 = vpop.f32.mrf.mxu2  ;;  %v6720_v0 = vpop.f32.mrf.mxu0 }
 0x7cb   : > { %v6896_v31 = vadd.f32 %v6895_v51, %v6807_v15  ;;  %v6984_v8 = vpop.f32.mrf.mxu3  ;;  %v6721_v29 = vadd.f32 %v6720_v0, %v17297_v17  ;;  %v6809_v50 = vpop.f32.mrf.mxu1  ;;  %v12833_v51 = vld [vmem:[%s20674_s2 + $0x94] sm:$0xf]  ;;  %v12265_v17 = vld [vmem:[%s20674_s2 + $0x98] sm:$0xf0]  ;;  %v12583_v0 = vld [vmem:[%s20674_s2 + $0x310] sm:$0xf] }
 0x7cc   : > { %v12268_v15 = vor.u32 %v12833_v51, %v12265_v17  ;;  %v12584_v24 = vor.u32 %v12914_v35, %v12583_v0  ;;  %v12817_v51 = vld [vmem:[%s20674_s2 + $0x14] sm:$0xf]  ;;  %v12784_v35 = vld [vmem:[%s16946_s18 + $0x288] sm:$0xf0] }
 0x7cd   : > { %v17921_v52 = vadd.f32 %v6984_v8, %v6896_v31  ;;  %v6810_v9 = vadd.f32 %v6809_v50, %v6721_v29  ;;  %6759 = vmatmul.bf16.gmra.mxu0 %v17912_v42 }
 0x7ce   : > { %6848 = vmatmul.bf16.gmra.mxu1 %v17914_v28  ;;  %7241 = vmatpush.bf16.msra.mxu2 %v12268_v15  ;;  %v12059_v15 = vld [vmem:[%s16946_s18 + $0x270] sm:$0xf] }
 0x7cf   : > { %6937 = vmatmul.bf16.gmra.mxu2 %v17916_v26  ;;  %7063 = vmatpush.bf16.msra.mxu0 %v12584_v24  ;;  %v12782_v24 = vld [vmem:[%s16946_s18 + $0x27c] sm:$0xf] }
 0x7d0   : > { %7026 = vmatmul.bf16.gmra.mxu3 %v17919_v38 }
 0x7d2   : > { %v6898_v41 = vpop.f32.mrf.mxu2  ;;  %v6722_v31 = vpop.f32.mrf.mxu0 }
 0x7d3   : > { %v6899_v49 = vadd.f32 %v6898_v41, %v6810_v9  ;;  %v6987_v34 = vpop.f32.mrf.mxu3  ;;  %v6723_v8 = vadd.f32 %v6722_v31, %v17317_v54  ;;  %v6811_v29 = vpop.f32.mrf.mxu1  ;;  %v12201_v9 = vld [vmem:[%s20674_s2 + $0x18] sm:$0xf0]  ;;  %v12781_v54 = vld [vmem:[%s16946_s18 + $0x274] sm:$0xf] }
 0x7d4   : > { %v12204_v0 = vor.u32 %v12817_v51, %v12201_v9  ;;  %v12785_v41 = vld [vmem:[%s16946_s18 + $0x290] sm:$0xf0]  ;;  %v17964_v28 = vor.u32 %v12781_v54, %v12061_v7  ;;  %v17969_v51 = vor.u32 %v12782_v24, %v12069_v23  ;;  %v12788_v24 = vld [vmem:[%s16946_s18 + $0x2ac] sm:$0xf]  ;;  %v12089_v23 = vld [vmem:[%s16946_s18 + $0x2c4] sm:$0xf0] }
 0x7d5   : > { %v17946_v50 = vadd.f32 %v6987_v34, %v6899_v49  ;;  %v6812_v17 = vadd.f32 %v6811_v29, %v6723_v8  ;;  %v17962_v34 = vor.u32 %v12784_v35, %v12059_v15  ;;  %v17966_v42 = vor.u32 %v12785_v41, %v12067_v55  ;;  %v12087_v55 = vld [vmem:[%s16946_s18 + $0x2a8] sm:$0xf]  ;;  %v12791_v41 = vld [vmem:[%s16946_s18 + $0x2c0] sm:$0xf0] }
 0x7d6   : > { %7152 = vmatpush.bf16.msra.mxu1 %v12204_v0  ;;  %21484 = vst [vmem:[#allocation150_spill] sm:$0xff] %v17964_v28 }
 0x7d7   : > { %21483 = vst [vmem:[#allocation89_spill] sm:$0xff] %v17962_v34 }
 0x7d8   : > { %21485 = vst [vmem:[#allocation151_spill] sm:$0xff] %v17966_v42 }
 0x7d9   : > { %21486 = vst [vmem:[#allocation152_spill] sm:$0xff] %v17969_v51 }
 0x7da   : > { %v6900_v49 = vpop.f32.mrf.mxu2  ;;  %v6725_v26 = vpop.f32.mrf.mxu0 }
 0x7db   : > { %v6901_v31 = vadd.f32 %v6900_v49, %v6812_v17  ;;  %v6989_v38 = vpop.f32.mrf.mxu3  ;;  %v6726_v8 = vadd.f32 %v6725_v26, %v17327_v37  ;;  %v6814_v29 = vpop.f32.mrf.mxu1  ;;  %v12095_v49 = vld [vmem:[%s16946_s18 + $0x2b0] sm:$0xf] }
 0x7dd   : > { %v17971_v9 = vadd.f32 %v6989_v38, %v6901_v31  ;;  %v6815_v0 = vadd.f32 %v6814_v29, %v6726_v8  ;;  %6764 = vmatmul.bf16.gmra.mxu0 %v17962_v34  ;;  %v12792_v31 = vld [vmem:[%s16946_s18 + $0x2c8] sm:$0xf0]  ;;  %v12789_v8 = vld [vmem:[%s16946_s18 + $0x2b4] sm:$0xf]  ;;  %v12097_v29 = vld [vmem:[%s16946_s18 + $0x2cc] sm:$0xf0]  ;;  %v17990_v34 = vor.u32 %v12788_v24, %v12089_v23 }
 0x7de   : > { %6853 = vmatmul.bf16.gmra.mxu1 %v17964_v28  ;;  %v12321_v24 = vld [vmem:[%s20674_s2 + $0x108] sm:$0xf0] }
 0x7df   : > { %6942 = vmatmul.bf16.gmra.mxu2 %v17966_v42  ;;  %v17988_v42 = vor.u32 %v12791_v41, %v12087_v55  ;;  %21488 = vst [vmem:[#allocation154_spill] sm:$0xff] %v17990_v34  ;;  %v12912_v55 = vld [vmem:[%s20674_s2 + $0x304] sm:$0xf0]  ;;  %v12847_v41 = vld [vmem:[%s20674_s2 + $0x104] sm:$0xf] }
 0x7e0   : > { %7031 = vmatmul.bf16.gmra.mxu3 %v17969_v51 }
 0x7e1   : > { %21487 = vst [vmem:[#allocation93_spill] sm:$0xff] %v17988_v42 }
 0x7e2   : > { %v6903_v37 = vpop.f32.mrf.mxu2  ;;  %v6727_v38 = vpop.f32.mrf.mxu0 }
 0x7e3   : > { %v6904_v26 = vadd.f32 %v6903_v37, %v6815_v0  ;;  %v6992_v17 = vpop.f32.mrf.mxu3  ;;  %v6728_v15 = vadd.f32 %v6727_v38, %v17341_v16  ;;  %v6816_v35 = vpop.f32.mrf.mxu1  ;;  %v17992_v16 = vor.u32 %v12792_v31, %v12095_v49  ;;  %v17995_v38 = vor.u32 %v12789_v8, %v12097_v29 }
 0x7e4   : > { %v12324_v31 = vor.u32 %v12847_v41, %v12321_v24  ;;  %v12117_v41 = vld [vmem:[%s16946_s18 + $0x2fc] sm:$0xf0]  ;;  %v12123_v24 = vld [vmem:[%s16946_s18 + $0x2e8] sm:$0xf] }
 0x7e5   : > { %v17978_v54 = vadd.f32 %v6992_v17, %v6904_v26  ;;  %v6817_v7 = vadd.f32 %v6816_v35, %v6728_v15  ;;  %21489 = vst [vmem:[#allocation155_spill] sm:$0xff] %v17992_v16 }
 0x7e6   : > { %21490 = vst [vmem:[#allocation156_spill] sm:$0xff] %v17995_v38  ;;  %7331 = vmatpush.bf16.msra.mxu3 %v12324_v31  ;;  %v12125_v31 = vld [vmem:[%s16946_s18 + $0x304] sm:$0xf0] }
 0x7ea   : > { %v6905_v51 = vpop.f32.mrf.mxu2  ;;  %v6730_v28 = vpop.f32.mrf.mxu0 }
 0x7eb   : > { %v6906_v0 = vadd.f32 %v6905_v51, %v6817_v7  ;;  %v6994_v37 = vpop.f32.mrf.mxu3  ;;  %v6731_v26 = vadd.f32 %v6730_v28, %v17369_v6  ;;  %v6819_v17 = vpop.f32.mrf.mxu1  ;;  %v12831_v51 = vld [vmem:[%s20674_s2 + $0x84] sm:$0xf]  ;;  %v12257_v6 = vld [vmem:[%s20674_s2 + $0x88] sm:$0xf0]  ;;  %v12575_v28 = vld [vmem:[%s20674_s2 + $0x300] sm:$0xf] }
 0x7ec   : > { %v12260_v7 = vor.u32 %v12831_v51, %v12257_v6  ;;  %v12576_v49 = vor.u32 %v12912_v55, %v12575_v28  ;;  %v12815_v51 = vld [vmem:[%s20674_s2 + $0x4] sm:$0xf]  ;;  %v12798_v55 = vld [vmem:[%s16946_s18 + $0x2f8] sm:$0xf0] }
 0x7ed   : > { %v17997_v15 = vadd.f32 %v6994_v37, %v6906_v0  ;;  %v6820_v35 = vadd.f32 %v6819_v17, %v6731_v26  ;;  %6769 = vmatmul.bf16.gmra.mxu0 %v17988_v42 }
 0x7ee   : > { %6858 = vmatmul.bf16.gmra.mxu1 %v17990_v34  ;;  %7242 = vmatpush.bf16.msra.mxu2 %v12260_v7  ;;  %v12115_v7 = vld [vmem:[%s16946_s18 + $0x2e0] sm:$0xf] }
 0x7ef   : > { %6947 = vmatmul.bf16.gmra.mxu2 %v17992_v16  ;;  %7064 = vmatpush.bf16.msra.mxu0 %v12576_v49  ;;  %v12796_v49 = vld [vmem:[%s16946_s18 + $0x2ec] sm:$0xf] }
 0x7f0   : > { %7036 = vmatmul.bf16.gmra.mxu3 %v17995_v38 }
 0x7f2   : > { %v6908_v23 = vpop.f32.mrf.mxu2  ;;  %v6732_v0 = vpop.f32.mrf.mxu0 }
 0x7f3   : > { %v6909_v8 = vadd.f32 %v6908_v23, %v6820_v35  ;;  %v6997_v29 = vpop.f32.mrf.mxu3  ;;  %v6733_v37 = vadd.f32 %v6732_v0, %v17389_v18  ;;  %v6821_v26 = vpop.f32.mrf.mxu1  ;;  %v12193_v35 = vld [vmem:[%s20674_s2 + $0x8] sm:$0xf0]  ;;  %v12795_v18 = vld [vmem:[%s16946_s18 + $0x2e4] sm:$0xf] }
 0x7f4   : > { %v12196_v28 = vor.u32 %v12815_v51, %v12193_v35  ;;  %v12799_v23 = vld [vmem:[%s16946_s18 + $0x300] sm:$0xf0]  ;;  %v18040_v34 = vor.u32 %v12795_v18, %v12117_v41  ;;  %v18045_v51 = vor.u32 %v12796_v49, %v12125_v31  ;;  %v12802_v49 = vld [vmem:[%s16946_s18 + $0x31c] sm:$0xf]  ;;  %v12145_v31 = vld [vmem:[%s16946_s18 + $0x334] sm:$0xf0] }
 0x7f5   : > { %v18022_v17 = vadd.f32 %v6997_v29, %v6909_v8  ;;  %v6822_v6 = vadd.f32 %v6821_v26, %v6733_v37  ;;  %v18038_v29 = vor.u32 %v12798_v55, %v12115_v7  ;;  %v18042_v42 = vor.u32 %v12799_v23, %v12123_v24  ;;  %v12143_v24 = vld [vmem:[%s16946_s18 + $0x318] sm:$0xf]  ;;  %v12805_v23 = vld [vmem:[%s16946_s18 + $0x330] sm:$0xf0] }
 0x7f6   : > { %7153 = vmatpush.bf16.msra.mxu1 %v12196_v28  ;;  %21492 = vst [vmem:[#allocation158_spill] sm:$0xff] %v18040_v34 }
 0x7f7   : > { %21491 = vst [vmem:[#allocation97_spill] sm:$0xff] %v18038_v29 }
 0x7f8   : > { %21493 = vst [vmem:[#allocation159_spill] sm:$0xff] %v18042_v42 }
 0x7f9   : > { %21494 = vst [vmem:[#allocation160_spill] sm:$0xff] %v18045_v51 }
 0x7fa   : > { %v6910_v8 = vpop.f32.mrf.mxu2  ;;  %v6735_v16 = vpop.f32.mrf.mxu0 }
 0x7fb   : > { %v6911_v0 = vadd.f32 %v6910_v8, %v6822_v6  ;;  %v6999_v38 = vpop.f32.mrf.mxu3  ;;  %v6736_v37 = vadd.f32 %v6735_v16, %v17399_v58  ;;  %v6824_v26 = vpop.f32.mrf.mxu1  ;;  %v12151_v8 = vld [vmem:[%s16946_s18 + $0x320] sm:$0xf] }
 0x7fd   : > { %v18047_v35 = vadd.f32 %v6999_v38, %v6911_v0  ;;  %v6825_v28 = vadd.f32 %v6824_v26, %v6736_v37  ;;  %6774 = vmatmul.bf16.gmra.mxu0 %v18038_v29  ;;  %v12806_v0 = vld [vmem:[%s16946_s18 + $0x338] sm:$0xf0]  ;;  %v12803_v37 = vld [vmem:[%s16946_s18 + $0x324] sm:$0xf]  ;;  %v12153_v26 = vld [vmem:[%s16946_s18 + $0x33c] sm:$0xf0]  ;;  %v18066_v29 = vor.u32 %v12802_v49, %v12145_v31 }
 0x7fe   : > { %6863 = vmatmul.bf16.gmra.mxu1 %v18040_v34  ;;  %v12633_v49 = vld [vmem:[%s20674_s2 + $0x378] sm:$0xf0] }
 0x7ff   : > { %6952 = vmatmul.bf16.gmra.mxu2 %v18042_v42  ;;  %v18064_v42 = vor.u32 %v12805_v23, %v12143_v24  ;;  %21496 = vst [vmem:[#allocation162_spill] sm:$0xff] %v18066_v29  ;;  %v12441_v24 = vld [vmem:[%s20674_s2 + $0x1f8] sm:$0xf0]  ;;  %v12925_v23 = vld [vmem:[%s20674_s2 + $0x374] sm:$0xf] }
 0x800   : > { %7041 = vmatmul.bf16.gmra.mxu3 %v18045_v51 }
 0x801   : > { %21495 = vst [vmem:[#allocation101_spill] sm:$0xff] %v18064_v42 }
 0x802   : > { %v6913_v58 = vpop.f32.mrf.mxu2  ;;  %v6737_v38 = vpop.f32.mrf.mxu0 }
 0x803   : > { %v6914_v16 = vadd.f32 %v6913_v58, %v6825_v28  ;;  %v7002_v6 = vpop.f32.mrf.mxu3  ;;  %v6738_v7 = vadd.f32 %v6737_v38, %v17413_v10  ;;  %v6826_v55 = vpop.f32.mrf.mxu1  ;;  %v18068_v10 = vor.u32 %v12806_v0, %v12151_v8  ;;  %v18071_v38 = vor.u32 %v12803_v37, %v12153_v26 }
 0x804   : > { %v12636_v0 = vor.u32 %v12925_v23, %v12633_v49  ;;  %v12173_v23 = vld [vmem:[%s16946_s18 + $0x36c] sm:$0xf0]  ;;  %v12179_v49 = vld [vmem:[%s16946_s18 + $0x358] sm:$0xf] }
 0x805   : > { %v18054_v18 = vadd.f32 %v7002_v6, %v6914_v16  ;;  %v6827_v41 = vadd.f32 %v6826_v55, %v6738_v7  ;;  %21497 = vst [vmem:[#allocation163_spill] sm:$0xff] %v18068_v10 }
 0x806   : > { %21498 = vst [vmem:[#allocation164_spill] sm:$0xff] %v18071_v38  ;;  %7680 = vmatpush.bf16.msrb.mxu3 %v12636_v0  ;;  %v12181_v0 = vld [vmem:[%s16946_s18 + $0x374] sm:$0xf0] }
 0x80a   : > { %v6915_v51 = vpop.f32.mrf.mxu2  ;;  %v6740_v34 = vpop.f32.mrf.mxu0 }
 0x80b   : > { %v6916_v28 = vadd.f32 %v6915_v51, %v6827_v41  ;;  %v7004_v58 = vpop.f32.mrf.mxu3  ;;  %v6741_v16 = vadd.f32 %v6740_v34, %v17441_v44  ;;  %v6829_v6 = vpop.f32.mrf.mxu1  ;;  %v12909_v51 = vld [vmem:[%s20674_s2 + $0x2f4] sm:$0xf]  ;;  %v12569_v44 = vld [vmem:[%s20674_s2 + $0x2f8] sm:$0xf0] }
 0x80c   : > { %v12877_v34 = vld [vmem:[%s20674_s2 + $0x1f4] sm:$0xf]  ;;  %v12572_v41 = vor.u32 %v12909_v51, %v12569_v44 }
 0x80d   : > { %v18073_v7 = vadd.f32 %v7004_v58, %v6916_v28  ;;  %v6830_v55 = vadd.f32 %v6829_v6, %v6741_v16  ;;  %6779 = vmatmul.bf16.gmra.mxu0 %v18064_v42  ;;  %v12444_v8 = vor.u32 %v12877_v34, %v12441_v24  ;;  %v12893_v51 = vld [vmem:[%s20674_s2 + $0x274] sm:$0xf]  ;;  %v12812_v24 = vld [vmem:[%s16946_s18 + $0x368] sm:$0xf0] }
 0x80e   : > { %6868 = vmatmul.bf16.gmra.mxu1 %v18066_v29  ;;  %7591 = vmatpush.bf16.msrb.mxu2 %v12572_v41  ;;  %v12171_v41 = vld [vmem:[%s16946_s18 + $0x350] sm:$0xf] }
 0x80f   : > { %6957 = vmatmul.bf16.gmra.mxu2 %v18068_v10  ;;  %7413 = vmatpush.bf16.msrb.mxu0 %v12444_v8  ;;  %v12810_v8 = vld [vmem:[%s16946_s18 + $0x35c] sm:$0xf] }
 0x810   : > { %7046 = vmatmul.bf16.gmra.mxu3 %v18071_v38 }
 0x812   : > { %v6918_v31 = vpop.f32.mrf.mxu2  ;;  %v6742_v28 = vpop.f32.mrf.mxu0 }
 0x813   : > { %v6919_v37 = vadd.f32 %v6918_v31, %v6830_v55  ;;  %v7007_v26 = vpop.f32.mrf.mxu3  ;;  %v6743_v58 = vadd.f32 %v6742_v28, %v17461_v22  ;;  %v6831_v16 = vpop.f32.mrf.mxu1  ;;  %v12505_v55 = vld [vmem:[%s20674_s2 + $0x278] sm:$0xf0]  ;;  %v12809_v22 = vld [vmem:[%s16946_s18 + $0x354] sm:$0xf] }
 0x814   : > { %v12508_v34 = vor.u32 %v12893_v51, %v12505_v55  ;;  %v12813_v31 = vld [vmem:[%s16946_s18 + $0x370] sm:$0xf0]  ;;  %v18116_v29 = vor.u32 %v12809_v22, %v12173_v23  ;;  %v18121_v51 = vor.u32 %v12810_v8, %v12181_v0 }
 0x815   : > { %v18098_v6 = vadd.f32 %v7007_v26, %v6919_v37  ;;  %v6832_v44 = vadd.f32 %v6831_v16, %v6743_v58  ;;  %v18114_v26 = vor.u32 %v12812_v24, %v12171_v41  ;;  %v18118_v42 = vor.u32 %v12813_v31, %v12179_v49  ;;  %v11767_v49 = vld [vmem:[%s16946_s18 + $0x18] sm:$0xf]  ;;  %v12709_v31 = vld [vmem:[%s16946_s18 + $0x30] sm:$0xf0] }
 0x816   : > { %7502 = vmatpush.bf16.msrb.mxu1 %v12508_v34  ;;  %21499 = vst [vmem:[#allocation105_spill] sm:$0xff] %v18116_v29  ;;  %v18134_v0 = vor.u32 %v12709_v31, %v11767_v49 }
 0x817   : > { %21500 = vst [vmem:[#allocation166_spill] sm:$0xff] %v18118_v42 }
 0x818   : > { %21501 = vst [vmem:[#allocation167_spill] sm:$0xff] %v18121_v51 }
 0x81a   : > { %v6920_v37 = vpop.f32.mrf.mxu2  ;;  %v6745_v10 = vpop.f32.mrf.mxu0 }
 0x81b   : > { %v6921_v28 = vadd.f32 %v6920_v37, %v6832_v44  ;;  %v7009_v38 = vpop.f32.mrf.mxu3  ;;  %v6746_v58 = vadd.f32 %v6745_v10, %v17471_v30  ;;  %v6834_v16 = vpop.f32.mrf.mxu1 }
 0x81d   : > { %v18123_v55 = vadd.f32 %v7009_v38, %v6921_v28  ;;  %v6835_v34 = vadd.f32 %v6834_v16, %v6746_v58  ;;  %6784 = vmatmul.bf16.gmra.mxu0 %v18114_v26 }
 0x81e   : > { %6873 = vmatmul.bf16.gmra.mxu1 %v18116_v29 }
 0x81f   : > { %6962 = vmatmul.bf16.gmra.mxu2 %v18118_v42 }
 0x820   : > { %7051 = vmatmul.bf16.gmra.mxu3 %v18121_v51 }
 0x822   : > { %v6923_v44 = vpop.f32.mrf.mxu2  ;;  %v6747_v30 = vpop.f32.mrf.mxu0 }
 0x823   : > { %v6924_v41 = vadd.f32 %v6923_v44, %v6835_v34  ;;  %v7012_v24 = vpop.f32.mrf.mxu3  ;;  %v6748_v10 = vadd.f32 %v6747_v30, %v17493_v39  ;;  %v6836_v22 = vpop.f32.mrf.mxu1  ;;  %v12907_v39 = vld [vmem:[%s20674_s2 + $0x2e4] sm:$0xf] }
 0x825   : > { %v18130_v23 = vadd.f32 %v7012_v24, %v6924_v41  ;;  %v6837_v38 = vadd.f32 %v6836_v22, %v6748_v10 }
 0x82a   : > { %v6925_v8 = vpop.f32.mrf.mxu2  ;;  %v6750_v58 = vpop.f32.mrf.mxu0 }
 0x82b   : > { %v6926_v37 = vadd.f32 %v6925_v8, %v6837_v38  ;;  %v7014_v28 = vpop.f32.mrf.mxu3  ;;  %v6751_v16 = vadd.f32 %v6750_v58, %v17521_v11  ;;  %v6839_v51 = vpop.f32.mrf.mxu1  ;;  %v12561_v11 = vld [vmem:[%s20674_s2 + $0x2e8] sm:$0xf0] }
 0x82c   : > { %v12564_v41 = vor.u32 %v12907_v39, %v12561_v11  ;;  %v12497_v58 = vld [vmem:[%s20674_s2 + $0x268] sm:$0xf0]  ;;  %v11795_v39 = vld [vmem:[%s16946_s18 + $0x50] sm:$0xf] }
 0x82d   : > { %v18137_v34 = vadd.f32 %v7014_v28, %v6926_v37  ;;  %v6840_v44 = vadd.f32 %v6839_v51, %v6751_v16  ;;  %7065 = vmatmul.bf16.vlgmr.msra.gmra.mxu0 %v18134_v0  ;;  %v12875_v51 = vld [vmem:[%s20674_s2 + $0x1e4] sm:$0xf]  ;;  %v12716_v11 = vld [vmem:[%s16946_s18 + $0x68] sm:$0xf0] }
 0x82e   : > { %7154 = vmatmul.bf16.vlgmr.msra.gmra.mxu1 %v16952_v60  ;;  %v12433_v60 = vld [vmem:[%s20674_s2 + $0x1e8] sm:$0xf0]  ;;  %7592 = vmatpush.bf16.msrb.mxu2 %v12564_v41  ;;  %v12891_v28 = vld [vmem:[%s20674_s2 + $0x264] sm:$0xf] }
 0x82f   : > { %7243 = vmatmul.bf16.vlgmr.msra.gmra.mxu2 %v16955_v3  ;;  %v12923_v3 = vld [vmem:[%s20674_s2 + $0x364] sm:$0xf]  ;;  %v12436_v30 = vor.u32 %v12875_v51, %v12433_v60 }
 0x830   : > { %7332 = vmatmul.bf16.vlgmr.msra.gmra.mxu3 %v17483_v1  ;;  %v12625_v1 = vld [vmem:[%s20674_s2 + $0x368] sm:$0xf0] }
 0x831   : > { %v12628_v10 = vor.u32 %v12923_v3, %v12625_v1  ;;  %7414 = vmatpush.bf16.msrb.mxu0 %v12436_v30 }
 0x832   : > { %v6928_v24 = vpop.f32.mrf.mxu2  ;;  %v6752_v49 = vpop.f32.mrf.mxu0 }
 0x833   : > { %v6929_v22 = vadd.f32 %v6928_v24, %v6840_v44  ;;  %v7017_v38 = vpop.f32.mrf.mxu3  ;;  %v6753_v31 = vadd.f32 %v6752_v49, %v17549_v14  ;;  %v6841_v8 = vpop.f32.mrf.mxu1  ;;  %7681 = vmatpush.bf16.msrb.mxu3 %v12628_v10  ;;  %v12500_v44 = vor.u32 %v12891_v28, %v12497_v58  ;;  %v18172_v14 = vor.u32 %v12716_v11, %v11795_v39 }
 0x835   : > { %v18162_v37 = vadd.f32 %v7017_v38, %v6929_v22  ;;  %v6842_v16 = vadd.f32 %v6841_v8, %v6753_v31  ;;  %7503 = vmatpush.bf16.msrb.mxu1 %v12500_v44  ;;  %v12723_v44 = vld [vmem:[%s16946_s18 + $0xa0] sm:$0xf0] }
 0x83a   : > { %v6930_v51 = vpop.f32.mrf.mxu2  ;;  %v6755_v3 = vpop.f32.mrf.mxu0 }
 0x83b   : > { %v6931_v41 = vadd.f32 %v6930_v51, %v6842_v16  ;;  %v7019_v60 = vpop.f32.mrf.mxu3  ;;  %v6756_v1 = vadd.f32 %v6755_v3, %v17559_v62  ;;  %v6844_v24 = vpop.f32.mrf.mxu1  ;;  %v11823_v16 = vld [vmem:[%s16946_s18 + $0x88] sm:$0xf] }
 0x83c   : > { %v18186_v11 = vor.u32 %v12723_v44, %v11823_v16  ;;  %v12889_v44 = vld [vmem:[%s20674_s2 + $0x254] sm:$0xf] }
 0x83d   : > { %v18175_v30 = vadd.f32 %v7019_v60, %v6931_v41  ;;  %v6845_v10 = vadd.f32 %v6844_v24, %v6756_v1  ;;  %7070 = vmatmul.bf16.gmra.mxu0 %v18172_v14  ;;  %v12873_v1 = vld [vmem:[%s20674_s2 + $0x1d4] sm:$0xf] }
 0x83e   : > { %7159 = vmatmul.bf16.gmra.mxu1 %v16994_v21 }
 0x83f   : > { %7248 = vmatmul.bf16.gmra.mxu2 %v16997_v25 }
 0x840   : > { %7337 = vmatmul.bf16.gmra.mxu3 %v17539_v20 }
 0x842   : > { %v6933_v22 = vpop.f32.mrf.mxu2  ;;  %v6757_v31 = vpop.f32.mrf.mxu0 }
 0x843   : > { %v6934_v38 = vadd.f32 %v6933_v22, %v6845_v10  ;;  %v7022_v49 = vpop.f32.mrf.mxu3  ;;  %v6758_v62 = vadd.f32 %v6757_v31, %v17581_v46  ;;  %v6846_v8 = vpop.f32.mrf.mxu1  ;;  %v12905_v46 = vld [vmem:[%s20674_s2 + $0x2d4] sm:$0xf] }
 0x845   : > { %v18182_v28 = vadd.f32 %v7022_v49, %v6934_v38  ;;  %v6847_v58 = vadd.f32 %v6846_v8, %v6758_v62 }
 0x84a   : > { %v6935_v39 = vpop.f32.mrf.mxu2  ;;  %v6760_v25 = vpop.f32.mrf.mxu0 }
 0x84b   : > { %v6936_v21 = vadd.f32 %v6935_v39, %v6847_v58  ;;  %v7024_v51 = vpop.f32.mrf.mxu3  ;;  %v6761_v20 = vadd.f32 %v6760_v25, %v17609_v13  ;;  %v6849_v41 = vpop.f32.mrf.mxu1  ;;  %v12553_v13 = vld [vmem:[%s20674_s2 + $0x2d8] sm:$0xf0]  ;;  %v11851_v25 = vld [vmem:[%s16946_s18 + $0xc0] sm:$0xf] }
 0x84c   : > { %v12556_v24 = vor.u32 %v12905_v46, %v12553_v13  ;;  %v12489_v39 = vld [vmem:[%s20674_s2 + $0x258] sm:$0xf0] }
 0x84d   : > { %v18189_v60 = vadd.f32 %v7024_v51, %v6936_v21  ;;  %v6850_v3 = vadd.f32 %v6849_v41, %v6761_v20  ;;  %7075 = vmatmul.bf16.gmra.mxu0 %v18186_v11  ;;  %v12492_v51 = vor.u32 %v12889_v44, %v12489_v39  ;;  %v12730_v20 = vld [vmem:[%s16946_s18 + $0xd8] sm:$0xf0]  ;;  %v11879_v44 = vld [vmem:[%s16946_s18 + $0xf8] sm:$0xf]  ;;  %v12737_v39 = vld [vmem:[%s16946_s18 + $0x110] sm:$0xf0] }
 0x84e   : > { %7164 = vmatmul.bf16.gmra.mxu1 %v17012_v43  ;;  %v12425_v43 = vld [vmem:[%s20674_s2 + $0x1d8] sm:$0xf0]  ;;  %7593 = vmatpush.bf16.msrb.mxu2 %v12556_v24 }
 0x84f   : > { %7253 = vmatmul.bf16.gmra.mxu2 %v17015_v12  ;;  %v12921_v12 = vld [vmem:[%s20674_s2 + $0x354] sm:$0xf]  ;;  %v12428_v22 = vor.u32 %v12873_v1, %v12425_v43  ;;  %7504 = vmatpush.bf16.msrb.mxu1 %v12492_v51  ;;  %v18238_v51 = vor.u32 %v12737_v39, %v11879_v44  ;;  %v12887_v39 = vld [vmem:[%s20674_s2 + $0x244] sm:$0xf] }
 0x850   : > { %7342 = vmatmul.bf16.gmra.mxu3 %v17571_v36  ;;  %v12617_v36 = vld [vmem:[%s20674_s2 + $0x358] sm:$0xf0] }
 0x851   : > { %v12620_v38 = vor.u32 %v12921_v12, %v12617_v36  ;;  %7415 = vmatpush.bf16.msrb.mxu0 %v12428_v22  ;;  %v21502_v36 = vld [vmem:[#allocation2_spill] sm:$0xff] }
 0x852   : > { %v6938_v10 = vpop.f32.mrf.mxu2  ;;  %v6762_v62 = vpop.f32.mrf.mxu0 }
 0x853   : > { %v6939_v49 = vadd.f32 %v6938_v10, %v6850_v3  ;;  %v7027_v31 = vpop.f32.mrf.mxu3  ;;  %v6763_v8 = vadd.f32 %v6762_v62, %v17637_v57  ;;  %v6851_v58 = vpop.f32.mrf.mxu1  ;;  %7682 = vmatpush.bf16.msrb.mxu3 %v12620_v38  ;;  %v18224_v57 = vor.u32 %v12730_v20, %v11851_v25  ;;  %v21503_v10 = vld [vmem:[#allocation54_spill] sm:$0xff] }
 0x855   : > { %v18214_v16 = vadd.f32 %v7027_v31, %v6939_v49  ;;  %v6852_v21 = vadd.f32 %v6851_v58, %v6763_v8 }
 0x85a   : > { %v6940_v41 = vpop.f32.mrf.mxu2  ;;  %v6765_v13 = vpop.f32.mrf.mxu0 }
 0x85b   : > { %v6941_v3 = vadd.f32 %v6940_v41, %v6852_v21  ;;  %v7029_v46 = vpop.f32.mrf.mxu3  ;;  %v6766_v1 = vadd.f32 %v6765_v13, %v17647_v45  ;;  %v6854_v24 = vpop.f32.mrf.mxu1 }
 0x85d   : > { %v18227_v43 = vadd.f32 %v7029_v46, %v6941_v3  ;;  %v6855_v12 = vadd.f32 %v6854_v24, %v6766_v1  ;;  %7080 = vmatmul.bf16.gmra.mxu0 %v18224_v57  ;;  %v12903_v1 = vld [vmem:[%s20674_s2 + $0x2c4] sm:$0xf] }
 0x85e   : > { %7169 = vmatmul.bf16.gmra.mxu1 %v21502_v36  ;;  %v12871_v24 = vld [vmem:[%s20674_s2 + $0x1c4] sm:$0xf]  ;;  %v12609_v36 = vld [vmem:[%s20674_s2 + $0x348] sm:$0xf0] }
 0x85f   : > { %7258 = vmatmul.bf16.gmra.mxu2 %v21503_v10 }
 0x860   : > { %7347 = vmatmul.bf16.gmra.mxu3 %v17627_v47 }
 0x862   : > { %v6943_v22 = vpop.f32.mrf.mxu2  ;;  %v6767_v31 = vpop.f32.mrf.mxu0 }
 0x863   : > { %v6944_v38 = vadd.f32 %v6943_v22, %v6855_v12  ;;  %v7032_v49 = vpop.f32.mrf.mxu3  ;;  %v6768_v45 = vadd.f32 %v6767_v31, %v17669_v59  ;;  %v6856_v62 = vpop.f32.mrf.mxu1  ;;  %v21504_v59 = vld [vmem:[#allocation53_spill] sm:$0xff] }
 0x865   : > { %v18234_v8 = vadd.f32 %v7032_v49, %v6944_v38  ;;  %v6857_v58 = vadd.f32 %v6856_v62, %v6768_v45 }
 0x86a   : > { %v6945_v21 = vpop.f32.mrf.mxu2  ;;  %v6770_v41 = vpop.f32.mrf.mxu0 }
 0x86b   : > { %v6946_v25 = vadd.f32 %v6945_v21, %v6857_v58  ;;  %v7034_v20 = vpop.f32.mrf.mxu3  ;;  %v6771_v47 = vadd.f32 %v6770_v41, %v17697_v4  ;;  %v6859_v3 = vpop.f32.mrf.mxu1  ;;  %v12545_v4 = vld [vmem:[%s20674_s2 + $0x2c8] sm:$0xf0]  ;;  %v11907_v41 = vld [vmem:[%s16946_s18 + $0x130] sm:$0xf] }
 0x86c   : > { %v12548_v12 = vor.u32 %v12903_v1, %v12545_v4  ;;  %v12481_v21 = vld [vmem:[%s20674_s2 + $0x248] sm:$0xf0] }
 0x86d   : > { %v18241_v46 = vadd.f32 %v7034_v20, %v6946_v25  ;;  %v6860_v13 = vadd.f32 %v6859_v3, %v6771_v47  ;;  %7085 = vmatmul.bf16.gmra.mxu0 %v18238_v51  ;;  %v12484_v20 = vor.u32 %v12887_v39, %v12481_v21  ;;  %v12744_v47 = vld [vmem:[%s16946_s18 + $0x148] sm:$0xf0]  ;;  %v11935_v39 = vld [vmem:[%s16946_s18 + $0x168] sm:$0xf]  ;;  %v12751_v21 = vld [vmem:[%s16946_s18 + $0x180] sm:$0xf0] }
 0x86e   : > { %7174 = vmatmul.bf16.gmra.mxu1 %v17072_v61  ;;  %v12417_v61 = vld [vmem:[%s20674_s2 + $0x1c8] sm:$0xf0]  ;;  %7594 = vmatpush.bf16.msrb.mxu2 %v12548_v12 }
 0x86f   : > { %7263 = vmatmul.bf16.gmra.mxu2 %v17075_v33  ;;  %v12919_v33 = vld [vmem:[%s20674_s2 + $0x344] sm:$0xf]  ;;  %v12420_v22 = vor.u32 %v12871_v24, %v12417_v61  ;;  %7505 = vmatpush.bf16.msrb.mxu1 %v12484_v20  ;;  %v18290_v20 = vor.u32 %v12751_v21, %v11935_v39 }
 0x870   : > { %7352 = vmatmul.bf16.gmra.mxu3 %v21504_v59  ;;  %v12612_v38 = vor.u32 %v12919_v33, %v12609_v36  ;;  %v21505_v33 = vld [vmem:[#allocation55_spill] sm:$0xff]  ;;  %v21506_v36 = vld [vmem:[#allocation56_spill] sm:$0xff] }
 0x871   : > { %7416 = vmatpush.bf16.msrb.mxu0 %v12420_v22 }
 0x872   : > { %v6948_v10 = vpop.f32.mrf.mxu2  ;;  %v6772_v45 = vpop.f32.mrf.mxu0  ;;  %7683 = vmatpush.bf16.msrb.mxu3 %v12612_v38 }
 0x873   : > { %v6949_v49 = vadd.f32 %v6948_v10, %v6860_v13  ;;  %v7037_v31 = vpop.f32.mrf.mxu3  ;;  %v6773_v62 = vadd.f32 %v6772_v45, %v17725_v32  ;;  %v6861_v58 = vpop.f32.mrf.mxu1  ;;  %v18276_v32 = vor.u32 %v12744_v47, %v11907_v41  ;;  %v21507_v10 = vld [vmem:[#allocation119_spill] sm:$0xff] }
 0x875   : > { %v18266_v44 = vadd.f32 %v7037_v31, %v6949_v49  ;;  %v6862_v25 = vadd.f32 %v6861_v58, %v6773_v62 }
 0x87a   : > { %v6950_v3 = vpop.f32.mrf.mxu2  ;;  %v6775_v1 = vpop.f32.mrf.mxu0 }
 0x87b   : > { %v6951_v13 = vadd.f32 %v6950_v3, %v6862_v25  ;;  %v7039_v59 = vpop.f32.mrf.mxu3  ;;  %v6776_v4 = vadd.f32 %v6775_v1, %v17735_v48  ;;  %v6864_v24 = vpop.f32.mrf.mxu1 }
 0x87d   : > { %v18279_v12 = vadd.f32 %v7039_v59, %v6951_v13  ;;  %v6865_v61 = vadd.f32 %v6864_v24, %v6776_v4  ;;  %7090 = vmatmul.bf16.gmra.mxu0 %v18276_v32  ;;  %v21508_v4 = vld [vmem:[#allocation3_spill] sm:$0xff]  ;;  %v21509_v24 = vld [vmem:[#allocation58_spill] sm:$0xff] }
 0x87e   : > { %7179 = vmatmul.bf16.gmra.mxu1 %v21505_v33 }
 0x87f   : > { %7268 = vmatmul.bf16.gmra.mxu2 %v21506_v36 }
 0x880   : > { %7357 = vmatmul.bf16.gmra.mxu3 %v21507_v10 }
 0x882   : > { %v6953_v22 = vpop.f32.mrf.mxu2  ;;  %v6777_v31 = vpop.f32.mrf.mxu0 }
 0x883   : > { %v6954_v38 = vadd.f32 %v6953_v22, %v6865_v61  ;;  %v7042_v49 = vpop.f32.mrf.mxu3  ;;  %v6778_v48 = vadd.f32 %v6777_v31, %v17757_v2  ;;  %v6866_v45 = vpop.f32.mrf.mxu1  ;;  %v21510_v61 = vld [vmem:[#allocation65_spill] sm:$0xff] }
 0x885   : > { %v18286_v62 = vadd.f32 %v7042_v49, %v6954_v38  ;;  %v6867_v58 = vadd.f32 %v6866_v45, %v6778_v48  ;;  %v11963_v48 = vld [vmem:[%s16946_s18 + $0x1a0] sm:$0xf]  ;;  %v12758_v45 = vld [vmem:[%s16946_s18 + $0x1b8] sm:$0xf0] }
 0x886   : > { %v18304_v39 = vor.u32 %v12758_v45, %v11963_v48  ;;  %v21512_v48 = vld [vmem:[#allocation60_spill] sm:$0xff]  ;;  %v21513_v45 = vld [vmem:[#allocation131_spill] sm:$0xff] }
 0x88a   : > { %v6955_v25 = vpop.f32.mrf.mxu2  ;;  %v6780_v3 = vpop.f32.mrf.mxu0 }
 0x88b   : > { %v6956_v41 = vadd.f32 %v6955_v25, %v6867_v58  ;;  %v7044_v47 = vpop.f32.mrf.mxu3  ;;  %v6781_v13 = vadd.f32 %v6780_v3, %v17785_v19  ;;  %v6869_v59 = vpop.f32.mrf.mxu1  ;;  %v12869_v3 = vld [vmem:[%s20674_s2 + $0x1b4] sm:$0xf] }
 0x88d   : > { %v18293_v1 = vadd.f32 %v7044_v47, %v6956_v41  ;;  %v6870_v2 = vadd.f32 %v6869_v59, %v6781_v13  ;;  %7095 = vmatmul.bf16.gmra.mxu0 %v18290_v20  ;;  %v12901_v47 = vld [vmem:[%s20674_s2 + $0x2b4] sm:$0xf] }
 0x88e   : > { %7184 = vmatmul.bf16.gmra.mxu1 %v21508_v4  ;;  %v12409_v4 = vld [vmem:[%s20674_s2 + $0x1b8] sm:$0xf0] }
 0x88f   : > { %7273 = vmatmul.bf16.gmra.mxu2 %v21509_v24  ;;  %v12917_v24 = vld [vmem:[%s20674_s2 + $0x334] sm:$0xf] }
 0x890   : > { %7362 = vmatmul.bf16.gmra.mxu3 %v21510_v61  ;;  %v12601_v61 = vld [vmem:[%s20674_s2 + $0x338] sm:$0xf0] }
 0x892   : > { %v6958_v33 = vpop.f32.mrf.mxu2  ;;  %v6782_v22 = vpop.f32.mrf.mxu0 }
 0x893   : > { %v6959_v36 = vadd.f32 %v6958_v33, %v6870_v2  ;;  %v7047_v10 = vpop.f32.mrf.mxu3  ;;  %v6783_v19 = vadd.f32 %v6782_v22, %v17813_v27  ;;  %v6871_v38 = vpop.f32.mrf.mxu1  ;;  %v12537_v27 = vld [vmem:[%s20674_s2 + $0x2b8] sm:$0xf0] }
 0x894   : > { %v12540_v2 = vor.u32 %v12901_v47, %v12537_v27  ;;  %v12473_v22 = vld [vmem:[%s20674_s2 + $0x238] sm:$0xf0] }
 0x895   : > { %v18300_v49 = vadd.f32 %v7047_v10, %v6959_v36  ;;  %v6872_v31 = vadd.f32 %v6871_v38, %v6783_v19  ;;  %v12412_v36 = vor.u32 %v12869_v3, %v12409_v4  ;;  %v12604_v10 = vor.u32 %v12917_v24, %v12601_v61 }
 0x896   : > { %7595 = vmatpush.bf16.msrb.mxu2 %v12540_v2  ;;  %v12765_v2 = vld [vmem:[%s16946_s18 + $0x1f0] sm:$0xf0] }
 0x897   : > { %7417 = vmatpush.bf16.msrb.mxu0 %v12412_v36  ;;  %7684 = vmatpush.bf16.msrb.mxu3 %v12604_v10 }
 0x89a   : > { %v6960_v58 = vpop.f32.mrf.mxu2  ;;  %v6785_v41 = vpop.f32.mrf.mxu0 }
 0x89b   : > { %v6961_v21 = vadd.f32 %v6960_v58, %v6872_v31  ;;  %v7049_v25 = vpop.f32.mrf.mxu3  ;;  %v6786_v13 = vadd.f32 %v6785_v41, %v17823_v53  ;;  %v6874_v59 = vpop.f32.mrf.mxu1  ;;  %v12885_v53 = vld [vmem:[%s20674_s2 + $0x234] sm:$0xf]  ;;  %v21511_v31 = vld [vmem:[#allocation59_spill] sm:$0xff] }
 0x89c   : > { %v12476_v38 = vor.u32 %v12885_v53, %v12473_v22 }
 0x89d   : > { %v18325_v33 = vadd.f32 %v7049_v25, %v6961_v21  ;;  %v6875_v19 = vadd.f32 %v6874_v59, %v6786_v13  ;;  %7100 = vmatmul.bf16.gmra.mxu0 %v18304_v39  ;;  %v11991_v59 = vld [vmem:[%s16946_s18 + $0x1d8] sm:$0xf] }
 0x89e   : > { %7189 = vmatmul.bf16.gmra.mxu1 %v21511_v31  ;;  %v18342_v24 = vor.u32 %v12765_v2, %v11991_v59  ;;  %v21516_v31 = vld [vmem:[#allocation4_spill] sm:$0xff] }
 0x89f   : > { %7278 = vmatmul.bf16.gmra.mxu2 %v21512_v48  ;;  %7506 = vmatpush.bf16.msrb.mxu1 %v12476_v38  ;;  %v21517_v48 = vld [vmem:[#allocation62_spill] sm:$0xff]  ;;  %v12019_v2 = vld [vmem:[%s16946_s18 + $0x210] sm:$0xf] }
 0x8a0   : > { %7367 = vmatmul.bf16.gmra.mxu3 %v21513_v45  ;;  %v21518_v45 = vld [vmem:[#allocation77_spill] sm:$0xff] }
 0x8a2   : > { %v6963_v58 = vpop.f32.mrf.mxu2  ;;  %v6787_v41 = vpop.f32.mrf.mxu0 }
 0x8a3   : > { %v6964_v21 = vadd.f32 %v6963_v58, %v6875_v19  ;;  %v7052_v25 = vpop.f32.mrf.mxu3  ;;  %v6788_v47 = vadd.f32 %v6787_v41, %v17845_v5  ;;  %v6876_v27 = vpop.f32.mrf.mxu1  ;;  %v21515_v5 = vld [vmem:[#allocation63_spill] sm:$0xff] }
 0x8a5   : > { %v18338_v3 = vadd.f32 %v7052_v25, %v6964_v21  ;;  %v6877_v13 = vadd.f32 %v6876_v27, %v6788_v47 }
 0x8aa   : > { %v6965_v4 = vpop.f32.mrf.mxu2  ;;  %v7066_v36 = vpop.f32.mrf.mxu0 }
 0x8ab   : > { %v6966_v61 = vadd.f32 %v6965_v4, %v6877_v13  ;;  %v7054_v53 = vpop.f32.mrf.mxu3  ;;  %v18345_v10 = vadd.f32 %v7066_v36, %v17870_v56  ;;  %v7155_v22 = vpop.f32.mrf.mxu1  ;;  %v21520_v13 = vld [vmem:[#allocation64_spill] sm:$0xff]  ;;  %v12772_v4 = vld [vmem:[%s16946_s18 + $0x228] sm:$0xf0] }
 0x8ac   : > { %v7156_v38 = vadd.f32 %v7155_v22, %v21515_v5 }
 0x8ad   : > { %21514 = vst [vmem:[#allocation168_spill] sm:$0xff] %v18345_v10  ;;  %v18347_v19 = vadd.f32 %v7054_v53, %v6966_v61  ;;  %7105 = vmatmul.bf16.gmra.mxu0 %v18342_v24  ;;  %v18362_v53 = vor.u32 %v12772_v4, %v12019_v2  ;;  %v12883_v4 = vld [vmem:[%s20674_s2 + $0x224] sm:$0xf] }
 0x8ae   : > { %7194 = vmatmul.bf16.gmra.mxu1 %v21516_v31  ;;  %v12867_v31 = vld [vmem:[%s20674_s2 + $0x1a4] sm:$0xf] }
 0x8af   : > { %7283 = vmatmul.bf16.gmra.mxu2 %v21517_v48 }
 0x8b0   : > { %7372 = vmatmul.bf16.gmra.mxu3 %v21518_v45 }
 0x8b2   : > { %v7244_v58 = vpop.f32.mrf.mxu2  ;;  %v7068_v56 = vpop.f32.mrf.mxu0 }
 0x8b3   : > { %v7245_v21 = vadd.f32 %v7244_v58, %v7156_v38  ;;  %v7333_v25 = vpop.f32.mrf.mxu3  ;;  %v18355_v41 = vadd.f32 %v7068_v56, %v17895_v40  ;;  %v7157_v47 = vpop.f32.mrf.mxu1  ;;  %v12899_v38 = vld [vmem:[%s20674_s2 + $0x2a4] sm:$0xf]  ;;  %v12529_v40 = vld [vmem:[%s20674_s2 + $0x2a8] sm:$0xf0] }
 0x8b4   : > { %v7158_v59 = vadd.f32 %v7157_v47, %v21520_v13  ;;  %v12532_v58 = vor.u32 %v12899_v38, %v12529_v40  ;;  %v12593_v56 = vld [vmem:[%s20674_s2 + $0x328] sm:$0xf0]  ;;  %v21523_v38 = vld [vmem:[#allocation5_spill] sm:$0xff] }
 0x8b5   : > { %21519 = vst [vmem:[#allocation109_spill] sm:$0xff] %v18355_v41  ;;  %v18357_v27 = vadd.f32 %v7333_v25, %v7245_v21  ;;  %v12401_v21 = vld [vmem:[%s20674_s2 + $0x1a8] sm:$0xf0]  ;;  %v12915_v25 = vld [vmem:[%s20674_s2 + $0x324] sm:$0xf] }
 0x8b6   : > { %v21522_v13 = vld [vmem:[#allocation67_spill] sm:$0xff]  ;;  %v12596_v2 = vor.u32 %v12915_v25, %v12593_v56  ;;  %7596 = vmatpush.bf16.msrb.mxu2 %v12532_v58  ;;  %v12807_v41 = vld [vmem:[%s16946_s18 + $0x340] sm:$0xf0] }
 0x8b8   : > { %7685 = vmatpush.bf16.msrb.mxu3 %v12596_v2 }
 0x8ba   : > { %v7246_v61 = vpop.f32.mrf.mxu2  ;;  %v7071_v5 = vpop.f32.mrf.mxu0 }
 0x8bb   : > { %v7247_v36 = vadd.f32 %v7246_v61, %v7158_v59  ;;  %v7335_v22 = vpop.f32.mrf.mxu3  ;;  %v18374_v48 = vadd.f32 %v7071_v5, %v17902_v63  ;;  %v7160_v45 = vpop.f32.mrf.mxu1  ;;  %v12404_v63 = vor.u32 %v12867_v31, %v12401_v21  ;;  %v12465_v61 = vld [vmem:[%s20674_s2 + $0x228] sm:$0xf0] }
 0x8bc   : > { %v7161_v59 = vadd.f32 %v7160_v45, %v21522_v13  ;;  %v12468_v5 = vor.u32 %v12883_v4, %v12465_v61  ;;  %v21527_v13 = vld [vmem:[#allocation68_spill] sm:$0xff]  ;;  %v12047_v61 = vld [vmem:[%s16946_s18 + $0x248] sm:$0xf] }
 0x8bd   : > { %21521 = vst [vmem:[#allocation170_spill] sm:$0xff] %v18374_v48  ;;  %v18385_v47 = vadd.f32 %v7335_v22, %v7247_v36  ;;  %7110 = vmatmul.bf16.gmra.mxu0 %v18362_v53  ;;  %v21524_v36 = vld [vmem:[#allocation66_spill] sm:$0xff]  ;;  %v21525_v22 = vld [vmem:[#allocation81_spill] sm:$0xff] }
 0x8be   : > { %7199 = vmatmul.bf16.gmra.mxu1 %v21523_v38  ;;  %7418 = vmatpush.bf16.msrb.mxu0 %v12404_v63  ;;  %v12779_v38 = vld [vmem:[%s16946_s18 + $0x260] sm:$0xf0] }
 0x8bf   : > { %7288 = vmatmul.bf16.gmra.mxu2 %v21524_v36  ;;  %7507 = vmatpush.bf16.msrb.mxu1 %v12468_v5  ;;  %v18406_v42 = vor.u32 %v12779_v38, %v12047_v61 }
 0x8c0   : > { %7377 = vmatmul.bf16.gmra.mxu3 %v21525_v22 }
 0x8c2   : > { %v7249_v40 = vpop.f32.mrf.mxu2  ;;  %v7073_v21 = vpop.f32.mrf.mxu0 }
 0x8c3   : > { %v7250_v31 = vadd.f32 %v7249_v40, %v7161_v59  ;;  %v7338_v45 = vpop.f32.mrf.mxu3  ;;  %v18399_v25 = vadd.f32 %v7073_v21, %v17921_v52  ;;  %v7162_v58 = vpop.f32.mrf.mxu1  ;;  %v21529_v40 = vld [vmem:[#allocation71_spill] sm:$0xff]  ;;  %v21531_v21 = vld [vmem:[#allocation70_spill] sm:$0xff] }
 0x8c4   : > { %v7163_v4 = vadd.f32 %v7162_v58, %v21527_v13  ;;  %v21532_v58 = vld [vmem:[#allocation85_spill] sm:$0xff] }
 0x8c5   : > { %21526 = vst [vmem:[#allocation171_spill] sm:$0xff] %v18399_v25  ;;  %v18401_v56 = vadd.f32 %v7338_v45, %v7250_v31  ;;  %v21530_v45 = vld [vmem:[#allocation9_spill] sm:$0xff]  ;;  %v12793_v25 = vld [vmem:[%s16946_s18 + $0x2d0] sm:$0xf0] }
 0x8ca   : > { %v7251_v36 = vpop.f32.mrf.mxu2  ;;  %v7076_v5 = vpop.f32.mrf.mxu0 }
 0x8cb   : > { %v7252_v63 = vadd.f32 %v7251_v36, %v7163_v4  ;;  %v7340_v2 = vpop.f32.mrf.mxu3  ;;  %v18409_v59 = vadd.f32 %v7076_v5, %v17946_v50  ;;  %v7165_v22 = vpop.f32.mrf.mxu1 }
 0x8cc   : > { %v7166_v31 = vadd.f32 %v7165_v22, %v21529_v40  ;;  %v12075_v22 = vld [vmem:[%s16946_s18 + $0x280] sm:$0xf]  ;;  %v12786_v40 = vld [vmem:[%s16946_s18 + $0x298] sm:$0xf0] }
 0x8cd   : > { %21528 = vst [vmem:[#allocation172_spill] sm:$0xff] %v18409_v59  ;;  %v18411_v52 = vadd.f32 %v7340_v2, %v7252_v63  ;;  %7115 = vmatmul.bf16.gmra.mxu0 %v18406_v42  ;;  %v21534_v2 = vld [vmem:[#allocation72_spill] sm:$0xff] }
 0x8ce   : > { %7204 = vmatmul.bf16.gmra.mxu1 %v21530_v45  ;;  %v18426_v45 = vor.u32 %v12786_v40, %v12075_v22  ;;  %v21536_v22 = vld [vmem:[#allocation75_spill] sm:$0xff] }
 0x8cf   : > { %7293 = vmatmul.bf16.gmra.mxu2 %v21531_v21 }
 0x8d0   : > { %7382 = vmatmul.bf16.gmra.mxu3 %v21532_v58 }
 0x8d2   : > { %v7254_v13 = vpop.f32.mrf.mxu2  ;;  %v7078_v50 = vpop.f32.mrf.mxu0 }
 0x8d3   : > { %v7255_v4 = vadd.f32 %v7254_v13, %v7166_v31  ;;  %v7343_v61 = vpop.f32.mrf.mxu3  ;;  %v18419_v38 = vadd.f32 %v7078_v50, %v17971_v9  ;;  %v7167_v36 = vpop.f32.mrf.mxu1  ;;  %v12897_v31 = vld [vmem:[%s20674_s2 + $0x294] sm:$0xf]  ;;  %v12521_v9 = vld [vmem:[%s20674_s2 + $0x298] sm:$0xf0] }
 0x8d4   : > { %v7168_v5 = vadd.f32 %v7167_v36, %v21534_v2  ;;  %v12865_v13 = vld [vmem:[%s20674_s2 + $0x194] sm:$0xf]  ;;  %v12524_v50 = vor.u32 %v12897_v31, %v12521_v9  ;;  %v12585_v2 = vld [vmem:[%s20674_s2 + $0x318] sm:$0xf0] }
 0x8d5   : > { %21533 = vst [vmem:[#allocation113_spill] sm:$0xff] %v18419_v38  ;;  %v18421_v63 = vadd.f32 %v7343_v61, %v7255_v4  ;;  %v12913_v36 = vld [vmem:[%s20674_s2 + $0x314] sm:$0xf]  ;;  %v12457_v9 = vld [vmem:[%s20674_s2 + $0x218] sm:$0xf0] }
 0x8d6   : > { %v12881_v31 = vld [vmem:[%s20674_s2 + $0x214] sm:$0xf]  ;;  %7597 = vmatpush.bf16.msrb.mxu2 %v12524_v50  ;;  %v21537_v38 = vld [vmem:[#allocation13_spill] sm:$0xff] }
 0x8da   : > { %v7256_v59 = vpop.f32.mrf.mxu2  ;;  %v7081_v58 = vpop.f32.mrf.mxu0 }
 0x8db   : > { %v7257_v21 = vadd.f32 %v7256_v59, %v7168_v5  ;;  %v7345_v29 = vpop.f32.mrf.mxu3  ;;  %v18438_v4 = vadd.f32 %v7081_v58, %v17978_v54  ;;  %v7170_v61 = vpop.f32.mrf.mxu1  ;;  %v12393_v59 = vld [vmem:[%s20674_s2 + $0x198] sm:$0xf0]  ;;  %v12588_v58 = vor.u32 %v12913_v36, %v12585_v2 }
 0x8dc   : > { %v7171_v40 = vadd.f32 %v7170_v61, %v21536_v22  ;;  %v12396_v54 = vor.u32 %v12865_v13, %v12393_v59 }
 0x8dd   : > { %21535 = vst [vmem:[#allocation174_spill] sm:$0xff] %v18438_v4  ;;  %v18449_v5 = vadd.f32 %v7345_v29, %v7257_v21  ;;  %7120 = vmatmul.bf16.gmra.mxu0 %v18426_v45  ;;  %v12460_v4 = vor.u32 %v12881_v31, %v12457_v9  ;;  %v21538_v29 = vld [vmem:[#allocation74_spill] sm:$0xff]  ;;  %v21539_v21 = vld [vmem:[#allocation89_spill] sm:$0xff]  ;;  %7686 = vmatpush.bf16.msrb.mxu3 %v12588_v58  ;;  %v21541_v31 = vld [vmem:[#allocation76_spill] sm:$0xff] }
 0x8de   : > { %7209 = vmatmul.bf16.gmra.mxu1 %v21537_v38  ;;  %7419 = vmatpush.bf16.msrb.mxu0 %v12396_v54  ;;  %v12103_v38 = vld [vmem:[%s16946_s18 + $0x2b8] sm:$0xf] }
 0x8df   : > { %7298 = vmatmul.bf16.gmra.mxu2 %v21538_v29  ;;  %7508 = vmatpush.bf16.msrb.mxu1 %v12460_v4  ;;  %v18470_v48 = vor.u32 %v12793_v25, %v12103_v38  ;;  %v21546_v25 = vld [vmem:[#allocation93_spill] sm:$0xff] }
 0x8e0   : > { %7387 = vmatmul.bf16.gmra.mxu3 %v21539_v21 }
 0x8e2   : > { %v7259_v13 = vpop.f32.mrf.mxu2  ;;  %v7083_v36 = vpop.f32.mrf.mxu0 }
 0x8e3   : > { %v7260_v61 = vadd.f32 %v7259_v13, %v7171_v40  ;;  %v7348_v59 = vpop.f32.mrf.mxu3  ;;  %v18463_v2 = vadd.f32 %v7083_v36, %v17997_v15  ;;  %v7172_v50 = vpop.f32.mrf.mxu1  ;;  %v21543_v13 = vld [vmem:[#allocation79_spill] sm:$0xff]  ;;  %v21545_v36 = vld [vmem:[#allocation78_spill] sm:$0xff] }
 0x8e4   : > { %v7173_v9 = vadd.f32 %v7172_v50, %v21541_v31 }
 0x8e5   : > { %21540 = vst [vmem:[#allocation175_spill] sm:$0xff] %v18463_v2  ;;  %v18465_v22 = vadd.f32 %v7348_v59, %v7260_v61  ;;  %v21544_v59 = vld [vmem:[#allocation17_spill] sm:$0xff] }
 0x8ea   : > { %v7261_v29 = vpop.f32.mrf.mxu2  ;;  %v7086_v4 = vpop.f32.mrf.mxu0 }
 0x8eb   : > { %v7262_v54 = vadd.f32 %v7261_v29, %v7173_v9  ;;  %v7350_v58 = vpop.f32.mrf.mxu3  ;;  %v18473_v40 = vadd.f32 %v7086_v4, %v18022_v17  ;;  %v7175_v21 = vpop.f32.mrf.mxu1 }
 0x8ec   : > { %v7176_v61 = vadd.f32 %v7175_v21, %v21543_v13  ;;  %v12131_v21 = vld [vmem:[%s16946_s18 + $0x2f0] sm:$0xf]  ;;  %v12800_v13 = vld [vmem:[%s16946_s18 + $0x308] sm:$0xf0] }
 0x8ed   : > { %21542 = vst [vmem:[#allocation176_spill] sm:$0xff] %v18473_v40  ;;  %v18475_v15 = vadd.f32 %v7350_v58, %v7262_v54  ;;  %7125 = vmatmul.bf16.gmra.mxu0 %v18470_v48  ;;  %v21548_v58 = vld [vmem:[#allocation80_spill] sm:$0xff] }
 0x8ee   : > { %7214 = vmatmul.bf16.gmra.mxu1 %v21544_v59  ;;  %v18490_v59 = vor.u32 %v12800_v13, %v12131_v21  ;;  %v21550_v21 = vld [vmem:[#allocation83_spill] sm:$0xff] }
 0x8ef   : > { %7303 = vmatmul.bf16.gmra.mxu2 %v21545_v36 }
 0x8f0   : > { %7392 = vmatmul.bf16.gmra.mxu3 %v21546_v25 }
 0x8f2   : > { %v7264_v50 = vpop.f32.mrf.mxu2  ;;  %v7088_v17 = vpop.f32.mrf.mxu0 }
 0x8f3   : > { %v7265_v31 = vadd.f32 %v7264_v50, %v7176_v61  ;;  %v7353_v9 = vpop.f32.mrf.mxu3  ;;  %v18483_v38 = vadd.f32 %v7088_v17, %v18047_v35  ;;  %v7177_v29 = vpop.f32.mrf.mxu1  ;;  %v12895_v61 = vld [vmem:[%s20674_s2 + $0x284] sm:$0xf]  ;;  %v12513_v35 = vld [vmem:[%s20674_s2 + $0x288] sm:$0xf0] }
 0x8f4   : > { %v7178_v4 = vadd.f32 %v7177_v29, %v21548_v58  ;;  %v12863_v50 = vld [vmem:[%s20674_s2 + $0x184] sm:$0xf]  ;;  %v12516_v17 = vor.u32 %v12895_v61, %v12513_v35  ;;  %v12577_v58 = vld [vmem:[%s20674_s2 + $0x308] sm:$0xf0] }
 0x8f5   : > { %21547 = vst [vmem:[#allocation117_spill] sm:$0xff] %v18483_v38  ;;  %v18485_v54 = vadd.f32 %v7353_v9, %v7265_v31  ;;  %v12911_v29 = vld [vmem:[%s20674_s2 + $0x304] sm:$0xf]  ;;  %v12449_v35 = vld [vmem:[%s20674_s2 + $0x208] sm:$0xf0]  ;;  %v21551_v38 = vld [vmem:[#allocation21_spill] sm:$0xff] }
 0x8f6   : > { %v12879_v61 = vld [vmem:[%s20674_s2 + $0x204] sm:$0xf]  ;;  %7598 = vmatpush.bf16.msrb.mxu2 %v12516_v17 }
 0x8fa   : > { %v7266_v40 = vpop.f32.mrf.mxu2  ;;  %v7091_v25 = vpop.f32.mrf.mxu0 }
 0x8fb   : > { %v7267_v36 = vadd.f32 %v7266_v40, %v7178_v4  ;;  %v7355_v2 = vpop.f32.mrf.mxu3  ;;  %v18502_v31 = vadd.f32 %v7091_v25, %v18054_v18  ;;  %v7180_v9 = vpop.f32.mrf.mxu1  ;;  %v12385_v40 = vld [vmem:[%s20674_s2 + $0x188] sm:$0xf0]  ;;  %v12580_v25 = vor.u32 %v12911_v29, %v12577_v58 }
 0x8fc   : > { %v7181_v13 = vadd.f32 %v7180_v9, %v21550_v21  ;;  %v12388_v18 = vor.u32 %v12863_v50, %v12385_v40 }
 0x8fd   : > { %21549 = vst [vmem:[#allocation121_spill] sm:$0xff] %v18502_v31  ;;  %v18513_v4 = vadd.f32 %v7355_v2, %v7267_v36  ;;  %7130 = vmatmul.bf16.gmra.mxu0 %v18490_v59  ;;  %v12452_v31 = vor.u32 %v12879_v61, %v12449_v35  ;;  %v21552_v2 = vld [vmem:[#allocation82_spill] sm:$0xff]  ;;  %v21553_v36 = vld [vmem:[#allocation97_spill] sm:$0xff]  ;;  %7687 = vmatpush.bf16.msrb.mxu3 %v12580_v25  ;;  %v21555_v61 = vld [vmem:[#allocation84_spill] sm:$0xff] }
 0x8fe   : > { %7219 = vmatmul.bf16.gmra.mxu1 %v21551_v38  ;;  %7420 = vmatpush.bf16.msrb.mxu0 %v12388_v18  ;;  %v12159_v38 = vld [vmem:[%s16946_s18 + $0x328] sm:$0xf] }
 0x8ff   : > { %7308 = vmatmul.bf16.gmra.mxu2 %v21552_v2  ;;  %7509 = vmatpush.bf16.msrb.mxu1 %v12452_v31  ;;  %v18534_v10 = vor.u32 %v12807_v41, %v12159_v38  ;;  %v21561_v41 = vld [vmem:[#allocation101_spill] sm:$0xff] }
 0x900   : > { %7397 = vmatmul.bf16.gmra.mxu3 %v21553_v36 }
 0x901   : > { %21556 = vst [vmem:[#allocation129_spill] sm:$0xff] %v18534_v10 }
 0x902   : > { %v7269_v50 = vpop.f32.mrf.mxu2  ;;  %v7093_v29 = vpop.f32.mrf.mxu0 }
 0x903   : > { %v7270_v9 = vadd.f32 %v7269_v50, %v7181_v13  ;;  %v7358_v40 = vpop.f32.mrf.mxu3  ;;  %v18527_v58 = vadd.f32 %v7093_v29, %v18073_v7  ;;  %v7182_v17 = vpop.f32.mrf.mxu1  ;;  %v21558_v50 = vld [vmem:[#allocation87_spill] sm:$0xff]  ;;  %v21560_v29 = vld [vmem:[#allocation86_spill] sm:$0xff] }
 0x904   : > { %v7183_v35 = vadd.f32 %v7182_v17, %v21555_v61 }
 0x905   : > { %21554 = vst [vmem:[#allocation125_spill] sm:$0xff] %v18527_v58  ;;  %v18529_v21 = vadd.f32 %v7358_v40, %v7270_v9  ;;  %v21559_v40 = vld [vmem:[#allocation25_spill] sm:$0xff] }
 0x90a   : > { %v7271_v2 = vpop.f32.mrf.mxu2  ;;  %v7096_v31 = vpop.f32.mrf.mxu0 }
 0x90b   : > { %v7272_v18 = vadd.f32 %v7271_v2, %v7183_v35  ;;  %v7360_v25 = vpop.f32.mrf.mxu3  ;;  %v18537_v13 = vadd.f32 %v7096_v31, %v18098_v6  ;;  %v7185_v36 = vpop.f32.mrf.mxu1 }
 0x90c   : > { %v7186_v9 = vadd.f32 %v7185_v36, %v21558_v50  ;;  %v12187_v36 = vld [vmem:[%s16946_s18 + $0x360] sm:$0xf]  ;;  %v12814_v50 = vld [vmem:[%s16946_s18 + $0x378] sm:$0xf0] }
 0x90d   : > { %21557 = vst [vmem:[#allocation133_spill] sm:$0xff] %v18537_v13  ;;  %v18539_v7 = vadd.f32 %v7360_v25, %v7272_v18  ;;  %7135 = vmatmul.bf16.gmra.mxu0 %v18534_v10  ;;  %v21563_v25 = vld [vmem:[#allocation88_spill] sm:$0xff] }
 0x90e   : > { %7224 = vmatmul.bf16.gmra.mxu1 %v21559_v40  ;;  %v18554_v40 = vor.u32 %v12814_v50, %v12187_v36  ;;  %v21568_v50 = vld [vmem:[#allocation92_spill] sm:$0xff] }
 0x90f   : > { %7313 = vmatmul.bf16.gmra.mxu2 %v21560_v29 }
 0x910   : > { %7402 = vmatmul.bf16.gmra.mxu3 %v21561_v41 }
 0x912   : > { %v7274_v17 = vpop.f32.mrf.mxu2  ;;  %v7098_v6 = vpop.f32.mrf.mxu0 }
 0x913   : > { %v7275_v61 = vadd.f32 %v7274_v17, %v7186_v9  ;;  %v7363_v35 = vpop.f32.mrf.mxu3  ;;  %v18547_v38 = vadd.f32 %v7098_v6, %v18123_v55  ;;  %v7187_v2 = vpop.f32.mrf.mxu1  ;;  %v21565_v55 = vld [vmem:[#allocation91_spill] sm:$0xff] }
 0x914   : > { %v7188_v31 = vadd.f32 %v7187_v2, %v21563_v25 }
 0x915   : > { %21562 = vst [vmem:[#allocation137_spill] sm:$0xff] %v18547_v38  ;;  %v18549_v18 = vadd.f32 %v7363_v35, %v7275_v61  ;;  %v21566_v61 = vld [vmem:[#allocation29_spill] sm:$0xff]  ;;  %v21567_v35 = vld [vmem:[#allocation90_spill] sm:$0xff] }
 0x916   : > { %v21571_v38 = vld [vmem:[#allocation33_spill] sm:$0xff] }
 0x91a   : > { %v7276_v13 = vpop.f32.mrf.mxu2  ;;  %v7101_v41 = vpop.f32.mrf.mxu0 }
 0x91b   : > { %v7277_v29 = vadd.f32 %v7276_v13, %v7188_v31  ;;  %v7365_v58 = vpop.f32.mrf.mxu3  ;;  %v18557_v9 = vadd.f32 %v7101_v41, %v18130_v23  ;;  %v7190_v17 = vpop.f32.mrf.mxu1 }
 0x91c   : > { %v7191_v6 = vadd.f32 %v7190_v17, %v21565_v55 }
 0x91d   : > { %21564 = vst [vmem:[#allocation141_spill] sm:$0xff] %v18557_v9  ;;  %v18559_v10 = vadd.f32 %v7365_v58, %v7277_v29  ;;  %7140 = vmatmul.bf16.gmra.mxu0 %v18554_v40 }
 0x91e   : > { %7229 = vmatmul.bf16.gmra.mxu1 %v21566_v61 }
 0x91f   : > { %7318 = vmatmul.bf16.gmra.mxu2 %v21567_v35 }
 0x920   : > { %7407 = vmatmul.bf16.gmra.mxu3 %v18114_v26 }
 0x922   : > { %v7279_v2 = vpop.f32.mrf.mxu2  ;;  %v7103_v31 = vpop.f32.mrf.mxu0 }
 0x923   : > { %v7280_v13 = vadd.f32 %v7279_v2, %v7191_v6  ;;  %v7368_v25 = vpop.f32.mrf.mxu3  ;;  %v18567_v23 = vadd.f32 %v7103_v31, %v18137_v34  ;;  %v7192_v36 = vpop.f32.mrf.mxu1  ;;  %v21570_v6 = vld [vmem:[#allocation96_spill] sm:$0xff]  ;;  %v21572_v34 = vld [vmem:[#allocation94_spill] sm:$0xff] }
 0x924   : > { %v7193_v29 = vadd.f32 %v7192_v36, %v21568_v50 }
 0x925   : > { %v18569_v58 = vadd.f32 %v7368_v25, %v7280_v13  ;;  %v21573_v13 = vld [vmem:[#allocation95_spill] sm:$0xff] }
 0x92a   : > { %v7281_v41 = vpop.f32.mrf.mxu2  ;;  %v7106_v61 = vpop.f32.mrf.mxu0 }
 0x92b   : > { %v7282_v17 = vadd.f32 %v7281_v41, %v7193_v29  ;;  %v7370_v55 = vpop.f32.mrf.mxu3  ;;  %v18573_v35 = vadd.f32 %v7106_v61, %v18162_v37  ;;  %v7195_v26 = vpop.f32.mrf.mxu1 }
 0x92c   : > { %v7196_v2 = vadd.f32 %v7195_v26, %v21570_v6 }
 0x92d   : > { %21569 = vst [vmem:[#allocation145_spill] sm:$0xff] %v18573_v35  ;;  %v18575_v9 = vadd.f32 %v7370_v55, %v7282_v17  ;;  %7421 = vmatmul.bf16.vlgmr.msrb.gmra.mxu0 %v21571_v38  ;;  %v21574_v17 = vld [vmem:[#allocation37_spill] sm:$0xff]  ;;  %v21577_v35 = vld [vmem:[#allocation98_spill] sm:$0xff] }
 0x92e   : > { %7510 = vmatmul.bf16.vlgmr.msrb.gmra.mxu1 %v21572_v34 }
 0x92f   : > { %7599 = vmatmul.bf16.vlgmr.msrb.gmra.mxu2 %v21573_v13 }
 0x930   : > { %7688 = vmatmul.bf16.vlgmr.msrb.gmra.mxu3 %v18134_v0 }
 0x932   : > { %v7284_v25 = vpop.f32.mrf.mxu2  ;;  %v7108_v50 = vpop.f32.mrf.mxu0 }
 0x933   : > { %v7285_v31 = vadd.f32 %v7284_v25, %v7196_v2  ;;  %v7373_v36 = vpop.f32.mrf.mxu3  ;;  %v18583_v37 = vadd.f32 %v7108_v50, %v18175_v30  ;;  %v7197_v29 = vpop.f32.mrf.mxu1  ;;  %v21576_v2 = vld [vmem:[#allocation41_spill] sm:$0xff]  ;;  %v21578_v30 = vld [vmem:[#allocation99_spill] sm:$0xff] }
 0x934   : > { %v7198_v55 = vadd.f32 %v7197_v29, %v21574_v17 }
 0x935   : > { %v18585_v41 = vadd.f32 %v7373_v36, %v7285_v31  ;;  %v21579_v31 = vld [vmem:[#allocation100_spill] sm:$0xff] }
 0x93a   : > { %v7286_v61 = vpop.f32.mrf.mxu2  ;;  %v7111_v6 = vpop.f32.mrf.mxu0 }
 0x93b   : > { %v7287_v38 = vadd.f32 %v7286_v61, %v7198_v55  ;;  %v7375_v26 = vpop.f32.mrf.mxu3  ;;  %v18589_v34 = vadd.f32 %v7111_v6, %v18182_v28  ;;  %v7200_v0 = vpop.f32.mrf.mxu1 }
 0x93c   : > { %v7201_v25 = vadd.f32 %v7200_v0, %v21576_v2 }
 0x93d   : > { %21575 = vst [vmem:[#allocation149_spill] sm:$0xff] %v18589_v34  ;;  %v18591_v13 = vadd.f32 %v7375_v26, %v7287_v38  ;;  %7426 = vmatmul.bf16.gmra.mxu0 %v21577_v35  ;;  %v21580_v38 = vld [vmem:[#allocation102_spill] sm:$0xff]  ;;  %v21583_v34 = vld [vmem:[#allocation103_spill] sm:$0xff] }
 0x93e   : > { %7515 = vmatmul.bf16.gmra.mxu1 %v21578_v30 }
 0x93f   : > { %7604 = vmatmul.bf16.gmra.mxu2 %v21579_v31 }
 0x940   : > { %7693 = vmatmul.bf16.gmra.mxu3 %v18172_v14 }
 0x942   : > { %v7289_v36 = vpop.f32.mrf.mxu2  ;;  %v7113_v17 = vpop.f32.mrf.mxu0 }
 0x943   : > { %v7290_v50 = vadd.f32 %v7289_v36, %v7201_v25  ;;  %v7378_v29 = vpop.f32.mrf.mxu3  ;;  %v18599_v28 = vadd.f32 %v7113_v17, %v18189_v60  ;;  %v7202_v55 = vpop.f32.mrf.mxu1  ;;  %v21582_v25 = vld [vmem:[#allocation106_spill] sm:$0xff]  ;;  %v21584_v60 = vld [vmem:[#allocation104_spill] sm:$0xff] }
 0x944   : > { %v7203_v26 = vadd.f32 %v7202_v55, %v21580_v38 }
 0x945   : > { %v18601_v61 = vadd.f32 %v7378_v29, %v7290_v50  ;;  %v21585_v50 = vld [vmem:[#allocation45_spill] sm:$0xff] }
 0x94a   : > { %v7291_v6 = vpop.f32.mrf.mxu2  ;;  %v7116_v2 = vpop.f32.mrf.mxu0 }
 0x94b   : > { %v7292_v35 = vadd.f32 %v7291_v6, %v7203_v26  ;;  %v7380_v0 = vpop.f32.mrf.mxu3  ;;  %v18605_v30 = vadd.f32 %v7116_v2, %v18214_v16  ;;  %v7205_v14 = vpop.f32.mrf.mxu1 }
 0x94c   : > { %v7206_v36 = vadd.f32 %v7205_v14, %v21582_v25 }
 0x94d   : > { %21581 = vst [vmem:[#allocation153_spill] sm:$0xff] %v18605_v30  ;;  %v18607_v31 = vadd.f32 %v7380_v0, %v7292_v35  ;;  %7431 = vmatmul.bf16.gmra.mxu0 %v21583_v34  ;;  %v21586_v35 = vld [vmem:[#allocation107_spill] sm:$0xff]  ;;  %v21589_v30 = vld [vmem:[#allocation108_spill] sm:$0xff] }
 0x94e   : > { %7520 = vmatmul.bf16.gmra.mxu1 %v21584_v60 }
 0x94f   : > { %7609 = vmatmul.bf16.gmra.mxu2 %v21585_v50 }
 0x950   : > { %7698 = vmatmul.bf16.gmra.mxu3 %v18186_v11 }
 0x952   : > { %v7294_v29 = vpop.f32.mrf.mxu2  ;;  %v7118_v38 = vpop.f32.mrf.mxu0 }
 0x953   : > { %v7295_v17 = vadd.f32 %v7294_v29, %v7206_v36  ;;  %v7383_v55 = vpop.f32.mrf.mxu3  ;;  %v18615_v16 = vadd.f32 %v7118_v38, %v18227_v43  ;;  %v7207_v26 = vpop.f32.mrf.mxu1  ;;  %v21588_v36 = vld [vmem:[#allocation111_spill] sm:$0xff]  ;;  %v21590_v43 = vld [vmem:[#allocation49_spill] sm:$0xff] }
 0x954   : > { %v7208_v0 = vadd.f32 %v7207_v26, %v21586_v35 }
 0x955   : > { %v18617_v6 = vadd.f32 %v7383_v55, %v7295_v17  ;;  %v21591_v17 = vld [vmem:[#allocation110_spill] sm:$0xff] }
 0x95a   : > { %v7296_v2 = vpop.f32.mrf.mxu2  ;;  %v7121_v25 = vpop.f32.mrf.mxu0 }
 0x95b   : > { %v7297_v34 = vadd.f32 %v7296_v2, %v7208_v0  ;;  %v7385_v14 = vpop.f32.mrf.mxu3  ;;  %v18621_v60 = vadd.f32 %v7121_v25, %v18234_v8  ;;  %v7210_v11 = vpop.f32.mrf.mxu1 }
 0x95c   : > { %v7211_v29 = vadd.f32 %v7210_v11, %v21588_v36 }
 0x95d   : > { %21587 = vst [vmem:[#allocation157_spill] sm:$0xff] %v18621_v60  ;;  %v18623_v50 = vadd.f32 %v7385_v14, %v7297_v34  ;;  %7436 = vmatmul.bf16.gmra.mxu0 %v21589_v30  ;;  %v21592_v34 = vld [vmem:[#allocation112_spill] sm:$0xff]  ;;  %v21595_v60 = vld [vmem:[#allocation114_spill] sm:$0xff] }
 0x95e   : > { %7525 = vmatmul.bf16.gmra.mxu1 %v21590_v43 }
 0x95f   : > { %7614 = vmatmul.bf16.gmra.mxu2 %v21591_v17 }
 0x960   : > { %7703 = vmatmul.bf16.gmra.mxu3 %v18224_v57 }
 0x962   : > { %v7299_v55 = vpop.f32.mrf.mxu2  ;;  %v7123_v35 = vpop.f32.mrf.mxu0 }
 0x963   : > { %v7300_v38 = vadd.f32 %v7299_v55, %v7211_v29  ;;  %v7388_v26 = vpop.f32.mrf.mxu3  ;;  %v18631_v8 = vadd.f32 %v7123_v35, %v18241_v46  ;;  %v7212_v0 = vpop.f32.mrf.mxu1  ;;  %v21594_v29 = vld [vmem:[#allocation57_spill] sm:$0xff]  ;;  %v21596_v46 = vld [vmem:[#allocation115_spill] sm:$0xff] }
 0x964   : > { %v7213_v14 = vadd.f32 %v7212_v0, %v21592_v34 }
 0x965   : > { %v18633_v2 = vadd.f32 %v7388_v26, %v7300_v38  ;;  %v21597_v38 = vld [vmem:[#allocation116_spill] sm:$0xff] }
 0x96a   : > { %v7301_v25 = vpop.f32.mrf.mxu2  ;;  %v7126_v36 = vpop.f32.mrf.mxu0 }
 0x96b   : > { %v7302_v30 = vadd.f32 %v7301_v25, %v7213_v14  ;;  %v7390_v11 = vpop.f32.mrf.mxu3  ;;  %v18637_v43 = vadd.f32 %v7126_v36, %v18266_v44  ;;  %v7215_v57 = vpop.f32.mrf.mxu1 }
 0x96c   : > { %v7216_v55 = vadd.f32 %v7215_v57, %v21594_v29 }
 0x96d   : > { %21593 = vst [vmem:[#allocation6_spill] sm:$0xff] %v18637_v43  ;;  %v18639_v17 = vadd.f32 %v7390_v11, %v7302_v30  ;;  %7441 = vmatmul.bf16.gmra.mxu0 %v21595_v60  ;;  %v21598_v30 = vld [vmem:[#allocation118_spill] sm:$0xff]  ;;  %v21601_v43 = vld [vmem:[#allocation120_spill] sm:$0xff] }
 0x96e   : > { %7530 = vmatmul.bf16.gmra.mxu1 %v21596_v46 }
 0x96f   : > { %7619 = vmatmul.bf16.gmra.mxu2 %v21597_v38 }
 0x970   : > { %7708 = vmatmul.bf16.gmra.mxu3 %v18238_v51 }
 0x972   : > { %v7304_v26 = vpop.f32.mrf.mxu2  ;;  %v7128_v34 = vpop.f32.mrf.mxu0 }
 0x973   : > { %v7305_v35 = vadd.f32 %v7304_v26, %v7216_v55  ;;  %v7393_v0 = vpop.f32.mrf.mxu3  ;;  %v18647_v44 = vadd.f32 %v7128_v34, %v18279_v12  ;;  %v7217_v14 = vpop.f32.mrf.mxu1  ;;  %v21600_v55 = vld [vmem:[#allocation123_spill] sm:$0xff]  ;;  %v21602_v12 = vld [vmem:[#allocation61_spill] sm:$0xff] }
 0x974   : > { %v7218_v11 = vadd.f32 %v7217_v14, %v21598_v30 }
 0x975   : > { %v18649_v25 = vadd.f32 %v7393_v0, %v7305_v35  ;;  %v21603_v35 = vld [vmem:[#allocation122_spill] sm:$0xff] }
 0x97a   : > { %v7306_v36 = vpop.f32.mrf.mxu2  ;;  %v7131_v29 = vpop.f32.mrf.mxu0 }
 0x97b   : > { %v7307_v60 = vadd.f32 %v7306_v36, %v7218_v11  ;;  %v7395_v57 = vpop.f32.mrf.mxu3  ;;  %v18653_v46 = vadd.f32 %v7131_v29, %v18286_v62  ;;  %v7220_v51 = vpop.f32.mrf.mxu1 }
 0x97c   : > { %v7221_v26 = vadd.f32 %v7220_v51, %v21600_v55 }
 0x97d   : > { %21599 = vst [vmem:[#allocation7_spill] sm:$0xff] %v18653_v46  ;;  %v18655_v38 = vadd.f32 %v7395_v57, %v7307_v60  ;;  %7446 = vmatmul.bf16.gmra.mxu0 %v21601_v43  ;;  %v21604_v60 = vld [vmem:[#allocation124_spill] sm:$0xff]  ;;  %v21607_v46 = vld [vmem:[#allocation126_spill] sm:$0xff] }
 0x97e   : > { %7535 = vmatmul.bf16.gmra.mxu1 %v21602_v12 }
 0x97f   : > { %7624 = vmatmul.bf16.gmra.mxu2 %v21603_v35 }
 0x980   : > { %7713 = vmatmul.bf16.gmra.mxu3 %v18276_v32 }
 0x982   : > { %v7309_v0 = vpop.f32.mrf.mxu2  ;;  %v7133_v30 = vpop.f32.mrf.mxu0 }
 0x983   : > { %v7310_v34 = vadd.f32 %v7309_v0, %v7221_v26  ;;  %v7398_v14 = vpop.f32.mrf.mxu3  ;;  %v18663_v62 = vadd.f32 %v7133_v30, %v18293_v1  ;;  %v7222_v11 = vpop.f32.mrf.mxu1  ;;  %v21606_v26 = vld [vmem:[#allocation69_spill] sm:$0xff]  ;;  %v21608_v1 = vld [vmem:[#allocation127_spill] sm:$0xff] }
 0x984   : > { %v7223_v57 = vadd.f32 %v7222_v11, %v21604_v60 }
 0x985   : > { %v18665_v36 = vadd.f32 %v7398_v14, %v7310_v34  ;;  %v21609_v34 = vld [vmem:[#allocation128_spill] sm:$0xff] }
 0x98a   : > { %v7311_v29 = vpop.f32.mrf.mxu2  ;;  %v7136_v55 = vpop.f32.mrf.mxu0 }
 0x98b   : > { %v7312_v43 = vadd.f32 %v7311_v29, %v7223_v57  ;;  %v7400_v51 = vpop.f32.mrf.mxu3  ;;  %v18669_v12 = vadd.f32 %v7136_v55, %v18300_v49  ;;  %v7225_v32 = vpop.f32.mrf.mxu1 }
 0x98c   : > { %v7226_v0 = vadd.f32 %v7225_v32, %v21606_v26 }
 0x98d   : > { %21605 = vst [vmem:[#allocation161_spill] sm:$0xff] %v18669_v12  ;;  %v18671_v35 = vadd.f32 %v7400_v51, %v7312_v43  ;;  %7451 = vmatmul.bf16.gmra.mxu0 %v21607_v46  ;;  %v21610_v43 = vld [vmem:[#allocation130_spill] sm:$0xff]  ;;  %v21613_v12 = vld [vmem:[#allocation132_spill] sm:$0xff] }
 0x98e   : > { %7540 = vmatmul.bf16.gmra.mxu1 %v21608_v1 }
 0x98f   : > { %7629 = vmatmul.bf16.gmra.mxu2 %v21609_v34 }
 0x990   : > { %7718 = vmatmul.bf16.gmra.mxu3 %v18290_v20 }
 0x992   : > { %v7314_v14 = vpop.f32.mrf.mxu2  ;;  %v7138_v60 = vpop.f32.mrf.mxu0 }
 0x993   : > { %v7315_v30 = vadd.f32 %v7314_v14, %v7226_v0  ;;  %v7403_v11 = vpop.f32.mrf.mxu3  ;;  %v18679_v49 = vadd.f32 %v7138_v60, %v18325_v33  ;;  %v7227_v57 = vpop.f32.mrf.mxu1  ;;  %v21612_v0 = vld [vmem:[#allocation135_spill] sm:$0xff]  ;;  %v21614_v33 = vld [vmem:[#allocation73_spill] sm:$0xff] }
 0x994   : > { %v7228_v51 = vadd.f32 %v7227_v57, %v21610_v43 }
 0x995   : > { %v18681_v29 = vadd.f32 %v7403_v11, %v7315_v30  ;;  %v21615_v30 = vld [vmem:[#allocation134_spill] sm:$0xff] }
 0x99a   : > { %v7316_v55 = vpop.f32.mrf.mxu2  ;;  %v7141_v26 = vpop.f32.mrf.mxu0 }
 0x99b   : > { %v7317_v46 = vadd.f32 %v7316_v55, %v7228_v51  ;;  %v7405_v32 = vpop.f32.mrf.mxu3  ;;  %v18685_v1 = vadd.f32 %v7141_v26, %v18338_v3  ;;  %v7230_v20 = vpop.f32.mrf.mxu1 }
 0x99c   : > { %v7231_v14 = vadd.f32 %v7230_v20, %v21612_v0 }
 0x99d   : > { %21611 = vst [vmem:[#allocation8_spill] sm:$0xff] %v18685_v1  ;;  %v18687_v34 = vadd.f32 %v7405_v32, %v7317_v46  ;;  %7456 = vmatmul.bf16.gmra.mxu0 %v21613_v12  ;;  %v21617_v46 = vld [vmem:[#allocation136_spill] sm:$0xff] }
 0x99e   : > { %7545 = vmatmul.bf16.gmra.mxu1 %v21614_v33 }
 0x99f   : > { %7634 = vmatmul.bf16.gmra.mxu2 %v21615_v30 }
 0x9a0   : > { %7723 = vmatmul.bf16.gmra.mxu3 %v18304_v39 }
 0x9a2   : > { %v7319_v11 = vpop.f32.mrf.mxu2  ;;  %v7143_v43 = vpop.f32.mrf.mxu0 }
 0x9a3   : > { %v7320_v60 = vadd.f32 %v7319_v11, %v7231_v14  ;;  %v7408_v57 = vpop.f32.mrf.mxu3  ;;  %v18695_v3 = vadd.f32 %v7143_v43, %v18347_v19  ;;  %v7232_v51 = vpop.f32.mrf.mxu1  ;;  %v21618_v14 = vld [vmem:[#allocation138_spill] sm:$0xff]  ;;  %v21619_v11 = vld [vmem:[#allocation139_spill] sm:$0xff]  ;;  %v21620_v19 = vld [vmem:[#allocation140_spill] sm:$0xff] }
 0x9a4   : > { %v7233_v32 = vadd.f32 %v7232_v51, %v21617_v46 }
 0x9a5   : > { %21616 = vst [vmem:[#allocation10_spill] sm:$0xff] %v18695_v3  ;;  %v18697_v55 = vadd.f32 %v7408_v57, %v7320_v60  ;;  %v18710_v57 = vld [vmem:[%s20676_s4] sm:$0x3] }
 0x9a6   : > { %v21621_v3 = vld [vmem:[#allocation142_spill] sm:$0xff] }
 0x9aa   : > { %v7321_v26 = vpop.f32.mrf.mxu2  ;;  %v7422_v0 = vpop.f32.mrf.mxu0 }
 0x9ab   : > { %v7322_v12 = vadd.f32 %v7321_v26, %v7233_v32  ;;  %v7410_v20 = vpop.f32.mrf.mxu3  ;;  %v7511_v33 = vpop.f32.mrf.mxu1  ;;  %v7423_v39 = vadd.f32 %v7422_v0, %v18357_v27  ;;  %v18713_v32 = vperm.slane %v18710_v57, 1 }
 0x9ad   : > { %v18700_v30 = vadd.f32 %v7410_v20, %v7322_v12  ;;  %7461 = vmatmul.bf16.gmra.mxu0 %v21618_v14  ;;  %v7512_v60 = vadd.f32 %v7511_v33, %v7423_v39 }
 0x9ae   : > { %7550 = vmatmul.bf16.gmra.mxu1 %v21619_v11 }
 0x9af   : > { %7639 = vmatmul.bf16.gmra.mxu2 %v21620_v19 }
 0x9b0   : > { %7728 = vmatmul.bf16.gmra.mxu3 %v18342_v24 }
 0x9b2   : > { %v7600_v43 = vpop.f32.mrf.mxu2  ;;  %v7424_v27 = vpop.f32.mrf.mxu0 }
 0x9b3   : > { %v7601_v51 = vadd.f32 %v7600_v43, %v7512_v60  ;;  %v7689_v46 = vpop.f32.mrf.mxu3  ;;  %v7513_v26 = vpop.f32.mrf.mxu1  ;;  %v7425_v20 = vadd.f32 %v7424_v27, %v18385_v47  ;;  %v21622_v47 = vld [vmem:[#allocation143_spill] sm:$0xff] }
 0x9b5   : > { %v7690_v12 = vadd.f32 %v7689_v46, %v7601_v51  ;;  %v7514_v24 = vadd.f32 %v7513_v26, %v7425_v20  ;;  %v21623_v46 = vld [vmem:[#allocation144_spill] sm:$0xff] }
 0x9b7   : > { %v18717_v0 = vadd.f32 %v18713_v32, %v7690_v12 }
 0x9b9   : > { %13354 = vtanh.f32 %v18717_v0 }
 0x9ba   : > { %v7602_v33 = vpop.f32.mrf.mxu2  ;;  %v7427_v11 = vpop.f32.mrf.mxu0 }
 0x9bb   : > { %v7603_v39 = vadd.f32 %v7602_v33, %v7514_v24  ;;  %v7691_v14 = vpop.f32.mrf.mxu3  ;;  %v7516_v19 = vpop.f32.mrf.mxu1  ;;  %v7428_v43 = vadd.f32 %v7427_v11, %v18401_v56 }
 0x9bd   : > { %v7692_v60 = vadd.f32 %v7691_v14, %v7603_v39  ;;  %7466 = vmatmul.bf16.gmra.mxu0 %v21621_v3  ;;  %v7517_v27 = vadd.f32 %v7516_v19, %v7428_v43 }
 0x9be   : > { %7555 = vmatmul.bf16.gmra.mxu1 %v21622_v47 }
 0x9bf   : > { %v13355_v1 = vpop.eup %13354  ;;  %v18723_v51 = vadd.f32 %v18713_v32, %v7692_v60  ;;  %7644 = vmatmul.bf16.gmra.mxu2 %v21623_v46 }
 0x9c0   : > { %7733 = vmatmul.bf16.gmra.mxu3 %v18362_v53  ;;  %9183 = vrot.lane.b32.xlu0 %v13355_v1, %s13746_s9 }
 0x9c1   : > { %13356 = vtanh.f32 %v18723_v51 }
 0x9c2   : > { %v7605_v26 = vpop.f32.mrf.mxu2  ;;  %v7429_v3 = vpop.f32.mrf.mxu0 }
 0x9c3   : > { %v7606_v56 = vadd.f32 %v7605_v26, %v7517_v27  ;;  %v7694_v12 = vpop.f32.mrf.mxu3  ;;  %v7518_v20 = vpop.f32.mrf.mxu1  ;;  %v7430_v33 = vadd.f32 %v7429_v3, %v18411_v52  ;;  %v21624_v27 = vld [vmem:[#allocation146_spill] sm:$0xff] }
 0x9c5   : > { %v7695_v24 = vadd.f32 %v7694_v12, %v7606_v56  ;;  %v7519_v53 = vadd.f32 %v7518_v20, %v7430_v33  ;;  %v21625_v56 = vld [vmem:[#allocation147_spill] sm:$0xff]  ;;  %v21626_v12 = vld [vmem:[#allocation148_spill] sm:$0xff] }
 0x9c7   : > { %v13357_v39 = vpop.eup %13356  ;;  %v18732_v14 = vadd.f32 %v18713_v32, %v7695_v24 }
 0x9c8   : > { %9185 = vrot.lane.b32.xlu0 %v13357_v39, %s13746_s9 }
 0x9c9   : > { %13358 = vtanh.f32 %v18732_v14 }
 0x9ca   : > { %v7607_v1 = vpop.f32.mrf.mxu2  ;;  %v7432_v60 = vpop.f32.mrf.mxu0 }
 0x9cb   : > { %v7608_v11 = vadd.f32 %v7607_v1, %v7519_v53  ;;  %v7696_v19 = vpop.f32.mrf.mxu3  ;;  %v7521_v43 = vpop.f32.mrf.mxu1  ;;  %v7433_v46 = vadd.f32 %v7432_v60, %v18421_v63 }
 0x9cd   : > { %v7697_v47 = vadd.f32 %v7696_v19, %v7608_v11  ;;  %7471 = vmatmul.bf16.gmra.mxu0 %v21624_v27  ;;  %v7522_v3 = vadd.f32 %v7521_v43, %v7433_v46 }
 0x9ce   : > { %7560 = vmatmul.bf16.gmra.mxu1 %v21625_v56 }
 0x9cf   : > { %v13359_v52 = vpop.eup %13358  ;;  %v18739_v26 = vadd.f32 %v18713_v32, %v7697_v47  ;;  %7649 = vmatmul.bf16.gmra.mxu2 %v21626_v12  ;;  %v21627_v12 = vld [vmem:[#allocation150_spill] sm:$0xff] }
 0x9d0   : > { %7738 = vmatmul.bf16.gmra.mxu3 %v18406_v42  ;;  %9187 = vrot.lane.b32.xlu1 %v13359_v52, %s13746_s9 }
 0x9d1   : > { %13360 = vtanh.f32 %v18739_v26 }
 0x9d2   : > { %v7610_v20 = vpop.f32.mrf.mxu2  ;;  %v7434_v33 = vpop.f32.mrf.mxu0 }
 0x9d3   : > { %v7611_v24 = vadd.f32 %v7610_v20, %v7522_v3  ;;  %v7699_v63 = vpop.f32.mrf.mxu3  ;;  %v7523_v39 = vpop.f32.mrf.mxu1  ;;  %v7435_v1 = vadd.f32 %v7434_v33, %v18449_v5  ;;  %v21628_v20 = vld [vmem:[#allocation151_spill] sm:$0xff] }
 0x9d5   : > { %v7700_v53 = vadd.f32 %v7699_v63, %v7611_v24  ;;  %v7524_v42 = vadd.f32 %v7523_v39, %v7435_v1  ;;  %v21629_v24 = vld [vmem:[#allocation152_spill] sm:$0xff] }
 0x9d7   : > { %v13361_v11 = vpop.eup %13360  ;;  %v18748_v19 = vadd.f32 %v18713_v32, %v7700_v53 }
 0x9d8   : > { %9189 = vrot.lane.b32.xlu1 %v13361_v11, %s13746_s9 }
 0x9d9   : > { %13362 = vtanh.f32 %v18748_v19 }
 0x9da   : > { %v7612_v60 = vpop.f32.mrf.mxu2  ;;  %v7437_v46 = vpop.f32.mrf.mxu0 }
 0x9db   : > { %v7613_v47 = vadd.f32 %v7612_v60, %v7524_v42  ;;  %v7701_v43 = vpop.f32.mrf.mxu3  ;;  %v7526_v27 = vpop.f32.mrf.mxu1  ;;  %v7438_v56 = vadd.f32 %v7437_v46, %v18465_v22 }
 0x9dd   : > { %v7702_v52 = vadd.f32 %v7701_v43, %v7613_v47  ;;  %7476 = vmatmul.bf16.gmra.mxu0 %v21627_v12  ;;  %v7527_v63 = vadd.f32 %v7526_v27, %v7438_v56 }
 0x9de   : > { %7565 = vmatmul.bf16.gmra.mxu1 %v21628_v20  ;;  %v21630_v20 = vld [vmem:[#allocation154_spill] sm:$0xff] }
 0x9df   : > { %v13363_v5 = vpop.eup %13362  ;;  %v18755_v3 = vadd.f32 %v18713_v32, %v7702_v52  ;;  %7654 = vmatmul.bf16.gmra.mxu2 %v21629_v24 }
 0x9e0   : > { %7743 = vmatmul.bf16.gmra.mxu3 %v18426_v45  ;;  %9191 = vrot.lane.b32.xlu2 %v13363_v5, %s13746_s9 }
 0x9e1   : > { %13364 = vtanh.f32 %v18755_v3 }
 0x9e2   : > { %v7615_v33 = vpop.f32.mrf.mxu2  ;;  %v7439_v53 = vpop.f32.mrf.mxu0 }
 0x9e3   : > { %v7616_v39 = vadd.f32 %v7615_v33, %v7527_v63  ;;  %v7704_v22 = vpop.f32.mrf.mxu3  ;;  %v7528_v1 = vpop.f32.mrf.mxu1  ;;  %v7440_v42 = vadd.f32 %v7439_v53, %v18475_v15  ;;  %v21631_v63 = vld [vmem:[#allocation155_spill] sm:$0xff]  ;;  %v21632_v33 = vld [vmem:[#allocation156_spill] sm:$0xff] }
 0x9e5   : > { %v7705_v11 = vadd.f32 %v7704_v22, %v7616_v39  ;;  %v7529_v45 = vadd.f32 %v7528_v1, %v7440_v42 }
 0x9e7   : > { %v13365_v60 = vpop.eup %13364  ;;  %v18764_v47 = vadd.f32 %v18713_v32, %v7705_v11 }
 0x9e8   : > { %9193 = vrot.lane.b32.xlu2 %v13365_v60, %s13746_s9 }
 0x9e9   : > { %13366 = vtanh.f32 %v18764_v47 }
 0x9ea   : > { %v7617_v43 = vpop.f32.mrf.mxu2  ;;  %v7442_v52 = vpop.f32.mrf.mxu0 }
 0x9eb   : > { %v7618_v46 = vadd.f32 %v7617_v43, %v7529_v45  ;;  %v7706_v27 = vpop.f32.mrf.mxu3  ;;  %v7531_v56 = vpop.f32.mrf.mxu1  ;;  %v7443_v5 = vadd.f32 %v7442_v52, %v18485_v54 }
 0x9ed   : > { %v7707_v12 = vadd.f32 %v7706_v27, %v7618_v46  ;;  %7481 = vmatmul.bf16.gmra.mxu0 %v21630_v20  ;;  %v7532_v39 = vadd.f32 %v7531_v56, %v7443_v5 }
 0x9ee   : > { %7570 = vmatmul.bf16.gmra.mxu1 %v21631_v63  ;;  %v18787_v63 = vperm.slane %v18710_v57, 0 }
 0x9ef   : > { %v13367_v15 = vpop.eup %13366  ;;  %v18771_v24 = vadd.f32 %v18713_v32, %v7707_v12  ;;  %7659 = vmatmul.bf16.gmra.mxu2 %v21632_v33 }
 0x9f0   : > { %7748 = vmatmul.bf16.gmra.mxu3 %v18470_v48  ;;  %9195 = vrot.lane.b32.xlu0 %v13367_v15, %s13746_s9  ;;  %v21633_v15 = vld [vmem:[#allocation158_spill] sm:$0xff] }
 0x9f1   : > { %13368 = vtanh.f32 %v18771_v24 }
 0x9f2   : > { %v7620_v22 = vpop.f32.mrf.mxu2  ;;  %v7444_v1 = vpop.f32.mrf.mxu0 }
 0x9f3   : > { %v7621_v53 = vadd.f32 %v7620_v22, %v7532_v39  ;;  %v7709_v54 = vpop.f32.mrf.mxu3  ;;  %v7533_v11 = vpop.f32.mrf.mxu1  ;;  %v7445_v60 = vadd.f32 %v7444_v1, %v18513_v4  ;;  %v21634_v39 = vld [vmem:[#allocation159_spill] sm:$0xff]  ;;  %v21635_v22 = vld [vmem:[#allocation160_spill] sm:$0xff] }
 0x9f5   : > { %v7710_v42 = vadd.f32 %v7709_v54, %v7621_v53  ;;  %v7534_v48 = vadd.f32 %v7533_v11, %v7445_v60  ;;  %v21636_v54 = vld [vmem:[#allocation168_spill] sm:$0xff] }
 0x9f6   : > { %v7775_v1 = vadd.f32 %v18787_v63, %v21636_v54 }
 0x9f7   : > { %v13369_v45 = vpop.eup %13368  ;;  %v18780_v43 = vadd.f32 %v18713_v32, %v7710_v42 }
 0x9f8   : > { %9197 = vrot.lane.b32.xlu1 %v13369_v45, %s13746_s9 }
 0x9f9   : > { %13370 = vtanh.f32 %v18780_v43 }
 0x9fa   : > { %v7622_v46 = vpop.f32.mrf.mxu2  ;;  %v7447_v56 = vpop.f32.mrf.mxu0 }
 0x9fb   : > { %v7623_v27 = vadd.f32 %v7622_v46, %v7534_v48  ;;  %v7711_v52 = vpop.f32.mrf.mxu3  ;;  %v7536_v12 = vpop.f32.mrf.mxu1  ;;  %v7448_v20 = vadd.f32 %v7447_v56, %v18529_v21 }
 0x9fd   : > { %v7712_v5 = vadd.f32 %v7711_v52, %v7623_v27  ;;  %7486 = vmatmul.bf16.gmra.mxu0 %v21633_v15  ;;  %v7537_v21 = vadd.f32 %v7536_v12, %v7448_v20  ;;  %v12637_v27 = vmul.f32 -1.442695, %v7775_v1  ;;  %v21638_v12 = vld [vmem:[#allocation109_spill] sm:$0xff] }
 0x9fe   : > { %7575 = vmatmul.bf16.gmra.mxu1 %v21634_v39 }
 0x9ff   : > { %v13371_v4 = vpop.eup %13370  ;;  %v18790_v33 = vadd.f32 %v18713_v32, %v7712_v5  ;;  %7664 = vmatmul.bf16.gmra.mxu2 %v21635_v22  ;;  %v7777_v5 = vadd.f32 %v18787_v63, %v21638_v12 }
 0xa00   : > { %7753 = vmatmul.bf16.gmra.mxu3 %v18490_v59  ;;  %9199 = vrot.lane.b32.xlu2 %v13371_v4, %s13746_s9 }
 0xa01   : > { %13372 = vtanh.f32 %v18790_v33  ;;  %v12638_v54 = vmul.f32 -1.442695, %v7777_v5 }
 0xa02   : > { %v7625_v53 = vpop.f32.mrf.mxu2  ;;  %v7449_v42 = vpop.f32.mrf.mxu0 }
 0xa03   : > { %v7626_v57 = vadd.f32 %v7625_v53, %v7537_v21  ;;  %v7714_v11 = vpop.f32.mrf.mxu3  ;;  %v7538_v60 = vpop.f32.mrf.mxu1  ;;  %v7450_v48 = vadd.f32 %v7449_v42, %v18539_v7  ;;  %v21639_v21 = vld [vmem:[#allocation162_spill] sm:$0xff]  ;;  %v21643_v42 = vld [vmem:[#allocation129_spill] sm:$0xff] }
 0xa05   : > { %v7715_v45 = vadd.f32 %v7714_v11, %v7626_v57  ;;  %v7539_v52 = vadd.f32 %v7538_v60, %v7450_v48  ;;  %v21641_v57 = vld [vmem:[#allocation163_spill] sm:$0xff]  ;;  %v21642_v11 = vld [vmem:[#allocation164_spill] sm:$0xff]  ;;  %v21644_v48 = vld [vmem:[#allocation170_spill] sm:$0xff] }
 0xa07   : > { %v13373_v46 = vpop.eup %13372  ;;  %v18801_v59 = vadd.f32 %v18713_v32, %v7715_v45 }
 0xa08   : > { %9201 = vrot.lane.b32.xlu0 %v13373_v46, %s13746_s9  ;;  %v7779_v46 = vadd.f32 %v18787_v63, %v21644_v48 }
 0xa09   : > { %21637 = vst [vmem:[#allocation11_spill] sm:$0xff] %v18801_v59  ;;  %13374 = vtanh.f32 %v18801_v59 }
 0xa0a   : > { %v7627_v56 = vpop.f32.mrf.mxu2  ;;  %13376 = vpow2.f32 %v12637_v27  ;;  %v7452_v4 = vpop.f32.mrf.mxu0 }
 0xa0b   : > { %v7628_v20 = vadd.f32 %v7627_v56, %v7539_v52  ;;  %v7716_v15 = vpop.f32.mrf.mxu3  ;;  %v7541_v39 = vpop.f32.mrf.mxu1  ;;  %v7453_v22 = vadd.f32 %v7452_v4, %v18549_v18 }
 0xa0d   : > { %v7717_v7 = vadd.f32 %v7716_v15, %v7628_v20  ;;  %7491 = vmatmul.bf16.gmra.mxu0 %v21639_v21  ;;  %v7542_v45 = vadd.f32 %v7541_v39, %v7453_v22 }
 0xa0e   : > { %7580 = vmatmul.bf16.gmra.mxu1 %v21641_v57 }
 0xa0f   : > { %v13375_v53 = vpop.eup %13374  ;;  %v18810_v1 = vadd.f32 %v18713_v32, %v7717_v7  ;;  %7669 = vmatmul.bf16.gmra.mxu2 %v21642_v11  ;;  %v12639_v7 = vmul.f32 -1.442695, %v7779_v46 }
 0xa10   : > { %7758 = vmatmul.bf16.gmra.mxu3 %v21643_v42  ;;  %9203 = vrot.lane.b32.xlu1 %v13375_v53, %s13746_s9  ;;  %v13377_v60 = vpop.eup %13376 }
 0xa11   : > { %21640 = vst [vmem:[#allocation165_spill] sm:$0xff] %v18810_v1  ;;  %13378 = vtanh.f32 %v18810_v1  ;;  %v18819_v12 = vadd.f32 1.0, %v13377_v60 }
 0xa12   : > { %v7630_v18 = vpop.f32.mrf.mxu2  ;;  %13380 = vpow2.f32 %v12638_v54  ;;  %v7454_v56 = vpop.f32.mrf.mxu0  ;;  %v21646_v54 = vld [vmem:[#allocation171_spill] sm:$0xff] }
 0xa13   : > { %v7631_v27 = vadd.f32 %v7630_v18, %v7542_v45  ;;  %v7719_v52 = vpop.f32.mrf.mxu3  ;;  %v7543_v5 = vpop.f32.mrf.mxu1  ;;  %v7455_v15 = vadd.f32 %v7454_v56, %v18559_v10  ;;  %13382 = vrcp.f32 %v18819_v12  ;;  %v7781_v57 = vadd.f32 %v18787_v63, %v21646_v54 }
 0xa14   : > { %vm7972_vm1 = vweird.f32 %v18819_v12 }
 0xa15   : > { %v7720_v20 = vadd.f32 %v7719_v52, %v7631_v27  ;;  %v7544_v22 = vadd.f32 %v7543_v5, %v7455_v15  ;;  %v21647_v27 = vld [vmem:[#allocation105_spill] sm:$0xff]  ;;  %v12640_v56 = vmul.f32 -1.442695, %v7781_v57  ;;  %v21650_v15 = vld [vmem:[#allocation167_spill] sm:$0xff] }
 0xa17   : > { %v13379_v4 = vpop.eup %13378  ;;  %v18823_v21 = vadd.f32 %v18713_v32, %v7720_v20  ;;  %v21649_v20 = vld [vmem:[#allocation166_spill] sm:$0xff] }
 0xa18   : > { %9205 = vrot.lane.b32.xlu2 %v13379_v4, %s13746_s9  ;;  %v13381_v39 = vpop.eup %13380 }
 0xa19   : > { %21645 = vst [vmem:[#allocation12_spill] sm:$0xff] %v18823_v21  ;;  %13384 = vtanh.f32 %v18823_v21  ;;  %v18830_v60 = vadd.f32 1.0, %v13381_v39  ;;  %v18833_v46 = vpop.eup %13382 }
 0xa1a   : > { %v7632_v53 = vpop.f32.mrf.mxu2  ;;  %13386 = vpow2.f32 %v12639_v7  ;;  %v7457_v42 = vpop.f32.mrf.mxu0  ;;  %v7968_v39 = vmul.f32 %v18833_v46, %v18819_v12  ;;  %vm7973_vm0 = vweird.f32 %v18833_v46 }
 0xa1b   : > { %v7633_v11 = vadd.f32 %v7632_v53, %v7544_v22  ;;  %v7721_v10 = vpop.f32.mrf.mxu3  ;;  %v7546_v45 = vpop.f32.mrf.mxu1  ;;  %v7458_v48 = vadd.f32 %v7457_v42, %v18569_v58  ;;  %13388 = vrcp.f32 %v18830_v60  ;;  %v21651_v22 = vld [vmem:[#allocation172_spill] sm:$0xff]  ;;  %vm18881_vm2 = vmor %vm7972_vm1, %vm7973_vm0  ;;  %vm7987_vm5 = vweird.f32 %v18830_v60 }
 0xa1c   : > { %v7783_v53 = vadd.f32 %v18787_v63, %v21651_v22 }
 0xa1d   : > { %v7722_v18 = vadd.f32 %v7721_v10, %v7633_v11  ;;  %7496 = vmatmul.bf16.gmra.mxu0 %v21647_v27  ;;  %v7547_v4 = vadd.f32 %v7546_v45, %v7458_v48  ;;  %v7969_v45 = vsub.f32 1.0, %v7968_v39 }
 0xa1e   : > { %7585 = vmatmul.bf16.gmra.mxu1 %v21649_v20 }
 0xa1f   : > { %v13385_v52 = vpop.eup %13384  ;;  %v18837_v5 = vadd.f32 %v18713_v32, %v7722_v18  ;;  %7674 = vmatmul.bf16.gmra.mxu2 %v21650_v15 }
 0xa20   : > { %7763 = vmatmul.bf16.gmra.mxu3 %v18554_v40  ;;  %9207 = vrot.lane.b32.xlu0 %v13385_v52, %s13746_s9  ;;  %v13387_v58 = vpop.eup %13386  ;;  %v12641_v52 = vmul.f32 -1.442695, %v7783_v53 }
 0xa21   : > { %21648 = vst [vmem:[#allocation14_spill] sm:$0xff] %v18837_v5  ;;  %13390 = vtanh.f32 %v18837_v5  ;;  %v18849_v10 = vadd.f32 1.0, %v13387_v58  ;;  %v18852_v27 = vpop.eup %13388 }
 0xa22   : > { %v7635_v7 = vpop.f32.mrf.mxu2  ;;  %13392 = vpow2.f32 %v12640_v56  ;;  %v7459_v11 = vpop.f32.mrf.mxu0  ;;  %vm7988_vm4 = vweird.f32 %v18852_v27 }
 0xa23   : > { %v7636_v54 = vadd.f32 %v7635_v7, %v7547_v4  ;;  %v7724_v57 = vpop.f32.mrf.mxu3  ;;  %v7548_v40 = vpop.f32.mrf.mxu1  ;;  %v7460_v18 = vadd.f32 %v7459_v11, %v18575_v9  ;;  %13394 = vrcp.f32 %v18849_v10  ;;  %v7970_v4 = vmul.f32 %v18833_v46, %v7969_v45  ;;  %v21653_v7 = vld [vmem:[#allocation113_spill] sm:$0xff]  ;;  %vm18913_vm6 = vmor %vm7987_vm5, %vm7988_vm4 }
 0xa24   : > { %v7983_v9 = vmul.f32 %v18852_v27, %v18830_v60  ;;  %v7785_v39 = vadd.f32 %v18787_v63, %v21653_v7  ;;  %vm8002_vm9 = vweird.f32 %v18849_v10 }
 0xa25   : > { %v7725_v42 = vadd.f32 %v7724_v57, %v7636_v54  ;;  %v7549_v15 = vadd.f32 %v7548_v40, %v7460_v18  ;;  %v7971_v18 = vadd.f32 %v18833_v46, %v7970_v4 }
 0xa26   : > { %v7984_v45 = vsub.f32 1.0, %v7983_v9 }
 0xa27   : > { %v13391_v48 = vpop.eup %13390  ;;  %v18855_v20 = vadd.f32 %v18713_v32, %v7725_v42 }
 0xa28   : > { %9209 = vrot.lane.b32.xlu1 %v13391_v48, %s13746_s9  ;;  %v13393_v56 = vpop.eup %13392 }
 0xa29   : > { %21652 = vst [vmem:[#allocation15_spill] sm:$0xff] %v18855_v20  ;;  %13396 = vtanh.f32 %v18855_v20  ;;  %v18865_v57 = vadd.f32 1.0, %v13393_v56  ;;  %v18868_v40 = vpop.eup %13394  ;;  %v12642_v20 = vmul.f32 -1.442695, %v7785_v39 }
 0xa2a   : > { %v7637_v58 = vpop.f32.mrf.mxu2  ;;  %13398 = vpow2.f32 %v12641_v52  ;;  %v7462_v54 = vpop.f32.mrf.mxu0  ;;  %vm8003_vm8 = vweird.f32 %v18868_v40 }
 0xa2b   : > { %v7638_v22 = vadd.f32 %v7637_v58, %v7549_v15  ;;  %v7726_v53 = vpop.f32.mrf.mxu3  ;;  %v7551_v11 = vpop.f32.mrf.mxu1  ;;  %v7463_v48 = vadd.f32 %v7462_v54, %v18585_v41  ;;  %v7978_v15 = vand.u32 2147483648, %v18819_v12  ;;  %13400 = vrcp.f32 %v18865_v57  ;;  %vm18945_vm10 = vmor %vm8002_vm9, %vm8003_vm8 }
 0xa2c   : > { %v7976_v41 = vand.u32 2147483647, %v18819_v12  ;;  %v7998_v54 = vmul.f32 %v18868_v40, %v18849_v10  ;;  %v21657_v12 = vld [vmem:[#allocation174_spill] sm:$0xff]  ;;  %vm8017_vm13 = vweird.f32 %v18865_v57 }
 0xa2d   : > { %v7727_v42 = vadd.f32 %v7726_v53, %v7638_v22  ;;  %v7552_v58 = vadd.f32 %v7551_v11, %v7463_v48  ;;  %v7975_v22 = vsel %vm18881_vm2, %v18833_v46, %v7971_v18  ;;  %v7985_v53 = vmul.f32 %v18852_v27, %v7984_v45 }
 0xa2e   : > { %vm7977_vm3 = vcmp.eq.f32.partialorder %v7976_v41, 8.507059e+37  ;;  %v7993_v41 = vand.u32 2147483648, %v18830_v60 }
 0xa2f   : > { %v13397_v52 = vpop.eup %13396  ;;  %v18873_v7 = vadd.f32 %v18713_v32, %v7727_v42  ;;  %v7787_v42 = vadd.f32 %v18787_v63, %v21657_v12  ;;  %v7986_v45 = vadd.f32 %v18852_v27, %v7985_v53 }
 0xa30   : > { %9211 = vrot.lane.b32.xlu2 %v13397_v52, %s13746_s9  ;;  %v13399_v56 = vpop.eup %13398  ;;  %v7979_v52 = vor.u32 1.1754944e-38, %v7978_v15 }
 0xa31   : > { %21654 = vst [vmem:[#allocation169_spill] sm:$0xff] %v18873_v7  ;;  %13402 = vtanh.f32 %v18873_v7  ;;  %v18893_v5 = vadd.f32 1.0, %v13399_v56  ;;  %v18898_v18 = vpop.eup %13400  ;;  %v7990_v53 = vsel %vm18913_vm6, %v18852_v27, %v7986_v45 }
 0xa32   : > { %v7640_v9 = vpop.f32.mrf.mxu2  ;;  %v9184_v39 = vpop.permute.xlu0 %9183  ;;  %13404 = vpow2.f32 %v12642_v20  ;;  %v18895_v4 = vsel %vm7977_vm3, %v7979_v52, %v7975_v22  ;;  %v8013_v12 = vmul.f32 %v18898_v18, %v18865_v57  ;;  %v7994_v52 = vor.u32 1.1754944e-38, %v7993_v41 }
 0xa33   : > { %v7641_v11 = vadd.f32 %v7640_v9, %v7552_v58  ;;  %v7729_v48 = vpop.f32.mrf.mxu3  ;;  %v7464_v7 = vpop.f32.mrf.mxu0  ;;  %v9279_v20 = vmul.f32 %v9184_v39, %v18895_v4  ;;  %v7999_v58 = vsub.f32 1.0, %v7998_v54  ;;  %v12643_v9 = vmul.f32 -1.442695, %v7787_v42 }
 0xa34   : > { %v7553_v21 = vpop.f32.mrf.mxu1  ;;  %v7465_v46 = vadd.f32 %v7464_v7, %v18591_v13  ;;  %13406 = vrcp.f32 %v18893_v5  ;;  %v7991_v13 = vand.u32 2147483647, %v18830_v60  ;;  %v21661_v60 = vld [vmem:[#allocation175_spill] sm:$0xff]  ;;  %vm8018_vm12 = vweird.f32 %v18898_v18 }
 0xa35   : > { %v7730_v1 = vadd.f32 %v7729_v48, %v7641_v11  ;;  %v8000_v54 = vmul.f32 %v18868_v40, %v7999_v58  ;;  %v7789_v42 = vadd.f32 %v18787_v63, %v21661_v60  ;;  %vm18977_vm14 = vmor %vm8017_vm13, %vm8018_vm12  ;;  %vm8032_vm1 = vweird.f32 %v18893_v5 }
 0xa36   : > { %v7554_v39 = vadd.f32 %v7553_v21, %v7465_v46  ;;  %vm7992_vm7 = vcmp.eq.f32.partialorder %v7991_v13, 8.507059e+37 }
 0xa37   : > { %v13403_v15 = vpop.eup %13402  ;;  %v18904_v56 = vadd.f32 %v18713_v32, %v7730_v1  ;;  %v18927_v27 = vsel %vm7992_vm7, %v7994_v52, %v7990_v53  ;;  %v8001_v60 = vadd.f32 %v18868_v40, %v8000_v54 }
 0xa38   : > { %9213 = vrot.lane.b32.xlu0 %v13403_v15, %s13746_s9  ;;  %9343 = vrot.lane.b32.xlu2 %v9279_v20, %s13746_s9  ;;  %v13405_v7 = vpop.eup %13404 }
 0xa39   : > { %21658 = vst [vmem:[#allocation16_spill] sm:$0xff] %v18904_v56  ;;  %13408 = vtanh.f32 %v18904_v56  ;;  %v18925_v46 = vadd.f32 1.0, %v13405_v7  ;;  %v12644_v7 = vmul.f32 -1.442695, %v7789_v42 }
 0xa3a   : > { %v7642_v1 = vpop.f32.mrf.mxu2  ;;  %13410 = vpow2.f32 %v12643_v9  ;;  %v9186_v48 = vpop.permute.xlu0 %9185 }
 0xa3b   : > { %v7643_v11 = vadd.f32 %v7642_v1, %v7554_v39  ;;  %v7731_v21 = vpop.f32.mrf.mxu3  ;;  %v7467_v20 = vpop.f32.mrf.mxu0  ;;  %v9280_v9 = vmul.f32 %v9186_v48, %v18927_v27  ;;  %v8014_v39 = vsub.f32 1.0, %v8013_v12  ;;  %v8008_v1 = vand.u32 2147483648, %v18849_v10 }
 0xa3c   : > { %v7556_v15 = vpop.f32.mrf.mxu1  ;;  %v7468_v45 = vadd.f32 %v7467_v20, %v18601_v61  ;;  %v18930_v58 = vpop.eup %13406  ;;  %13412 = vrcp.f32 %v18925_v46  ;;  %v8006_v61 = vand.u32 2147483647, %v18849_v10  ;;  %v21665_v10 = vld [vmem:[#allocation176_spill] sm:$0xff]  ;;  %v8023_v12 = vand.u32 2147483648, %v18865_v57 }
 0xa3d   : > { %v7732_v22 = vadd.f32 %v7731_v21, %v7643_v11  ;;  %v8028_v42 = vmul.f32 %v18930_v58, %v18893_v5  ;;  %v8005_v21 = vsel %vm18945_vm10, %v18868_v40, %v8001_v60  ;;  %v8015_v48 = vmul.f32 %v18898_v18, %v8014_v39 }
 0xa3e   : > { %v7557_v54 = vadd.f32 %v7556_v15, %v7468_v45  ;;  %v7791_v52 = vadd.f32 %v18787_v63, %v21665_v10  ;;  %v8009_v45 = vor.u32 1.1754944e-38, %v8008_v1  ;;  %vm8007_vm11 = vcmp.eq.f32.partialorder %v8006_v61, 8.507059e+37 }
 0xa3f   : > { %v13409_v41 = vpop.eup %13408  ;;  %v18936_v13 = vadd.f32 %v18713_v32, %v7732_v22  ;;  %v8029_v39 = vsub.f32 1.0, %v8028_v42  ;;  %vm8033_vm0 = vweird.f32 %v18930_v58  ;;  %vm8047_vm5 = vweird.f32 %v18925_v46 }
 0xa40   : > { %9215 = vrot.lane.b32.xlu1 %v13409_v41, %s13746_s9  ;;  %9345 = vrot.lane.b32.xlu0 %v9280_v9, %s13746_s9  ;;  %v13411_v53 = vpop.eup %13410  ;;  %v18959_v59 = vsel %vm8007_vm11, %v8009_v45, %v8005_v21  ;;  %v8024_v45 = vor.u32 1.1754944e-38, %v8023_v12  ;;  %vm19008_vm2 = vmor %vm8032_vm1, %vm8033_vm0 }
 0xa41   : > { %21662 = vst [vmem:[#allocation18_spill] sm:$0xff] %v18936_v13  ;;  %13414 = vtanh.f32 %v18936_v13  ;;  %v18957_v9 = vadd.f32 1.0, %v13411_v53  ;;  %v12645_v53 = vmul.f32 -1.442695, %v7791_v52 }
 0xa42   : > { %v7645_v11 = vpop.f32.mrf.mxu2  ;;  %13416 = vpow2.f32 %v12644_v7  ;;  %v9188_v22 = vpop.permute.xlu1 %9187 }
 0xa43   : > { %v7646_v20 = vadd.f32 %v7645_v11, %v7557_v54  ;;  %v7734_v15 = vpop.f32.mrf.mxu3  ;;  %v7469_v41 = vpop.f32.mrf.mxu0  ;;  %v9281_v7 = vmul.f32 %v9188_v22, %v18959_v59  ;;  %v8016_v54 = vadd.f32 %v18898_v18, %v8015_v48  ;;  %13418 = vrcp.f32 %v18957_v9 }
 0xa44   : > { %v7558_v13 = vpop.f32.mrf.mxu1  ;;  %v7470_v40 = vadd.f32 %v7469_v41, %v18607_v31  ;;  %v18962_v60 = vpop.eup %13412  ;;  %v8021_v31 = vand.u32 2147483647, %v18865_v57  ;;  %v21669_v57 = vld [vmem:[#allocation117_spill] sm:$0xff]  ;;  %vm8062_vm9 = vweird.f32 %v18957_v9 }
 0xa45   : > { %v7735_v56 = vadd.f32 %v7734_v15, %v7646_v20  ;;  %v8043_v48 = vmul.f32 %v18962_v60, %v18925_v46  ;;  %v8020_v52 = vsel %vm18977_vm14, %v18898_v18, %v8016_v54  ;;  %v7793_v20 = vadd.f32 %v18787_v63, %v21669_v57 }
 0xa46   : > { %v7559_v11 = vadd.f32 %v7558_v13, %v7470_v40  ;;  %vm8022_vm15 = vcmp.eq.f32.partialorder %v8021_v31, 8.507059e+37  ;;  %v8038_v31 = vand.u32 2147483648, %v18893_v5  ;;  %vm8048_vm4 = vweird.f32 %v18962_v60 }
 0xa47   : > { %v13415_v1 = vpop.eup %13414  ;;  %v18968_v61 = vadd.f32 %v18713_v32, %v7735_v56  ;;  %v8030_v56 = vmul.f32 %v18930_v58, %v8029_v39  ;;  %v8044_v54 = vsub.f32 1.0, %v8043_v48  ;;  %v9192_v48 = vpop.permute.xlu2 %9191  ;;  %vm19040_vm6 = vmor %vm8047_vm5, %vm8048_vm4 }
 0xa48   : > { %9347 = vrot.lane.b32.xlu1 %v9281_v7, %s13746_s9  ;;  %9217 = vrot.lane.b32.xlu2 %v13415_v1, %s13746_s9  ;;  %v13417_v42 = vpop.eup %13416  ;;  %v18991_v1 = vsel %vm8022_vm15, %v8024_v45, %v8020_v52  ;;  %v8039_v45 = vor.u32 1.1754944e-38, %v8038_v31 }
 0xa49   : > { %21666 = vst [vmem:[#allocation19_spill] sm:$0xff] %v18968_v61  ;;  %13420 = vtanh.f32 %v18968_v61  ;;  %v18989_v41 = vadd.f32 1.0, %v13417_v42  ;;  %v18994_v21 = vpop.eup %13418  ;;  %v8031_v18 = vadd.f32 %v18930_v58, %v8030_v56  ;;  %v12646_v42 = vmul.f32 -1.442695, %v7793_v20 }
 0xa4a   : > { %v7647_v10 = vpop.f32.mrf.mxu2  ;;  %13422 = vpow2.f32 %v12645_v53  ;;  %v9190_v22 = vpop.permute.xlu1 %9189  ;;  %v8045_v20 = vmul.f32 %v18962_v60, %v8044_v54  ;;  %vm8063_vm8 = vweird.f32 %v18994_v21 }
 0xa4b   : > { %v7648_v15 = vadd.f32 %v7647_v10, %v7559_v11  ;;  %v7736_v13 = vpop.f32.mrf.mxu3  ;;  %v7472_v40 = vpop.f32.mrf.mxu0  ;;  %v9282_v53 = vmul.f32 %v9190_v22, %v18991_v1  ;;  %13424 = vrcp.f32 %v18989_v41  ;;  %v8035_v57 = vsel %vm19008_vm2, %v18930_v58, %v8031_v18  ;;  %vm19073_vm10 = vmor %vm8062_vm9, %vm8063_vm8 }
 0xa4c   : > { %v7561_v39 = vpop.f32.mrf.mxu1  ;;  %v7473_v61 = vadd.f32 %v7472_v40, %v18617_v6  ;;  %v8036_v6 = vand.u32 2147483647, %v18893_v5  ;;  %v8046_v10 = vadd.f32 %v18962_v60, %v8045_v20  ;;  %vm8077_vm13 = vweird.f32 %v18989_v41 }
 0xa4d   : > { %v7737_v7 = vadd.f32 %v7736_v13, %v7648_v15  ;;  %v8058_v15 = vmul.f32 %v18994_v21, %v18957_v9  ;;  %v21673_v13 = vld [vmem:[#allocation121_spill] sm:$0xff] }
 0xa4e   : > { %v7562_v52 = vadd.f32 %v7561_v39, %v7473_v61  ;;  %v7795_v22 = vadd.f32 %v18787_v63, %v21673_v13  ;;  %vm8037_vm3 = vcmp.eq.f32.partialorder %v8036_v6, 8.507059e+37  ;;  %v8053_v6 = vand.u32 2147483648, %v18925_v46 }
 0xa4f   : > { %v13421_v12 = vpop.eup %13420  ;;  %v19001_v11 = vadd.f32 %v18713_v32, %v7737_v7  ;;  %v8059_v31 = vsub.f32 1.0, %v8058_v15  ;;  %v8050_v15 = vsel %vm19040_vm6, %v18962_v60, %v8046_v10 }
 0xa50   : > { %9219 = vrot.lane.b32.xlu0 %v13421_v12, %s13746_s9  ;;  %9349 = vrot.lane.b32.xlu2 %v9282_v53, %s13746_s9  ;;  %v13423_v56 = vpop.eup %13422  ;;  %v19023_v12 = vsel %vm8037_vm3, %v8039_v45, %v8035_v57  ;;  %v21677_v45 = vld [vmem:[#allocation125_spill] sm:$0xff] }
 0xa51   : > { %21670 = vst [vmem:[#allocation173_spill] sm:$0xff] %v19001_v11  ;;  %13426 = vtanh.f32 %v19001_v11  ;;  %v19021_v53 = vadd.f32 1.0, %v13423_v56  ;;  %v19026_v54 = vpop.eup %13424  ;;  %v12647_v56 = vmul.f32 -1.442695, %v7795_v22  ;;  %v8060_v22 = vmul.f32 %v18994_v21, %v8059_v31 }
 0xa52   : > { %v7650_v5 = vpop.f32.mrf.mxu2  ;;  %13428 = vpow2.f32 %v12646_v42  ;;  %v9283_v42 = vmul.f32 %v9192_v48, %v19023_v12  ;;  %vm8078_vm12 = vweird.f32 %v19026_v54 }
 0xa53   : > { %v7651_v40 = vadd.f32 %v7650_v5, %v7562_v52  ;;  %v7739_v7 = vpop.f32.mrf.mxu3  ;;  %v7474_v61 = vpop.f32.mrf.mxu0  ;;  %13430 = vrcp.f32 %v19021_v53  ;;  %vm19105_vm14 = vmor %vm8077_vm13, %vm8078_vm12  ;;  %vm8092_vm1 = vweird.f32 %v19021_v53 }
 0xa54   : > { %v7563_v39 = vpop.f32.mrf.mxu1  ;;  %v7475_v18 = vadd.f32 %v7474_v61, %v18623_v50  ;;  %v8051_v50 = vand.u32 2147483647, %v18925_v46  ;;  %v8073_v46 = vmul.f32 %v19026_v54, %v18989_v41  ;;  %v8054_v61 = vor.u32 1.1754944e-38, %v8053_v6 }
 0xa55   : > { %v7740_v58 = vadd.f32 %v7739_v7, %v7651_v40  ;;  %v7797_v40 = vadd.f32 %v18787_v63, %v21677_v45  ;;  %v9194_v7 = vpop.permute.xlu2 %9193  ;;  %v8061_v45 = vadd.f32 %v18994_v21, %v8060_v22 }
 0xa56   : > { %v7564_v20 = vadd.f32 %v7563_v39, %v7475_v18  ;;  %vm8052_vm7 = vcmp.eq.f32.partialorder %v8051_v50, 8.507059e+37  ;;  %v8074_v6 = vsub.f32 1.0, %v8073_v46  ;;  %v8083_v46 = vand.u32 2147483648, %v18989_v41 }
 0xa57   : > { %v13427_v52 = vpop.eup %13426  ;;  %v19033_v5 = vadd.f32 %v18713_v32, %v7740_v58  ;;  %v19055_v60 = vsel %vm8052_vm7, %v8054_v61, %v8050_v15  ;;  %v8068_v15 = vand.u32 2147483648, %v18957_v9  ;;  %v8065_v61 = vsel %vm19073_vm10, %v18994_v21, %v8061_v45 }
 0xa58   : > { %9221 = vrot.lane.b32.xlu1 %v13427_v52, %s13746_s9  ;;  %9351 = vrot.lane.b32.xlu0 %v9283_v42, %s13746_s9  ;;  %v13429_v48 = vpop.eup %13428 }
 0xa59   : > { %21674 = vst [vmem:[#allocation20_spill] sm:$0xff] %v19033_v5  ;;  %13432 = vtanh.f32 %v19033_v5  ;;  %v19053_v52 = vadd.f32 1.0, %v13429_v48  ;;  %v19058_v57 = vpop.eup %13430  ;;  %v12648_v48 = vmul.f32 -1.442695, %v7797_v40 }
 0xa5a   : > { %v7652_v13 = vpop.f32.mrf.mxu2  ;;  %13434 = vpow2.f32 %v12647_v56  ;;  %v9284_v56 = vmul.f32 %v9194_v7, %v19055_v60  ;;  %v8088_v40 = vmul.f32 %v19058_v57, %v19021_v53  ;;  %vm8093_vm0 = vweird.f32 %v19058_v57 }
 0xa5b   : > { %v7653_v58 = vadd.f32 %v7652_v13, %v7564_v20  ;;  %v7741_v42 = vpop.f32.mrf.mxu3  ;;  %v7477_v39 = vpop.f32.mrf.mxu0  ;;  %13436 = vrcp.f32 %v19053_v52  ;;  %vm19136_vm2 = vmor %vm8092_vm1, %vm8093_vm0  ;;  %vm8107_vm5 = vweird.f32 %v19053_v52 }
 0xa5c   : > { %v7566_v18 = vpop.f32.mrf.mxu1  ;;  %v7478_v31 = vadd.f32 %v7477_v39, %v18633_v2  ;;  %v8066_v2 = vand.u32 2147483647, %v18957_v9  ;;  %v21681_v9 = vld [vmem:[#allocation133_spill] sm:$0xff] }
 0xa5d   : > { %v7742_v10 = vadd.f32 %v7741_v42, %v7653_v58  ;;  %v8075_v58 = vmul.f32 %v19026_v54, %v8074_v6  ;;  %v7799_v42 = vadd.f32 %v18787_v63, %v21681_v9  ;;  %v8089_v6 = vsub.f32 1.0, %v8088_v40 }
 0xa5e   : > { %v7567_v22 = vadd.f32 %v7566_v18, %v7478_v31  ;;  %v8069_v31 = vor.u32 1.1754944e-38, %v8068_v15  ;;  %vm8067_vm11 = vcmp.eq.f32.partialorder %v8066_v2, 8.507059e+37 }
 0xa5f   : > { %v13433_v20 = vpop.eup %13432  ;;  %v19064_v50 = vadd.f32 %v18713_v32, %v7742_v10 }
 0xa60   : > { %9353 = vrot.lane.b32.xlu1 %v9284_v56, %s13746_s9  ;;  %9223 = vrot.lane.b32.xlu2 %v13433_v20, %s13746_s9  ;;  %v13435_v13 = vpop.eup %13434  ;;  %v19087_v11 = vsel %vm8067_vm11, %v8069_v31, %v8065_v61  ;;  %v8084_v31 = vor.u32 1.1754944e-38, %v8083_v46 }
 0xa61   : > { %21678 = vst [vmem:[#allocation22_spill] sm:$0xff] %v19064_v50  ;;  %13438 = vtanh.f32 %v19064_v50  ;;  %v19085_v56 = vadd.f32 1.0, %v13435_v13  ;;  %v19090_v45 = vpop.eup %13436  ;;  %v12649_v13 = vmul.f32 -1.442695, %v7799_v42 }
 0xa62   : > { %v7655_v7 = vpop.f32.mrf.mxu2  ;;  %13440 = vpow2.f32 %v12648_v48  ;;  %v9196_v10 = vpop.permute.xlu0 %9195  ;;  %v8103_v42 = vmul.f32 %v19090_v45, %v19053_v52  ;;  %vm8108_vm4 = vweird.f32 %v19090_v45 }
 0xa63   : > { %v7656_v39 = vadd.f32 %v7655_v7, %v7567_v22  ;;  %v7744_v18 = vpop.f32.mrf.mxu3  ;;  %v7479_v20 = vpop.f32.mrf.mxu0  ;;  %v9285_v48 = vmul.f32 %v9196_v10, %v19087_v11  ;;  %v8076_v22 = vadd.f32 %v19026_v54, %v8075_v58  ;;  %13442 = vrcp.f32 %v19085_v56  ;;  %vm19169_vm6 = vmor %vm8107_vm5, %vm8108_vm4 }
 0xa64   : > { %v7568_v50 = vpop.f32.mrf.mxu1  ;;  %v7480_v21 = vadd.f32 %v7479_v20, %v18639_v17  ;;  %v8081_v17 = vand.u32 2147483647, %v18989_v41  ;;  %v21685_v41 = vld [vmem:[#allocation137_spill] sm:$0xff]  ;;  %v8104_v61 = vsub.f32 1.0, %v8103_v42  ;;  %vm8122_vm9 = vweird.f32 %v19085_v56 }
 0xa65   : > { %v7745_v5 = vadd.f32 %v7744_v18, %v7656_v39  ;;  %v8080_v9 = vsel %vm19105_vm14, %v19026_v54, %v8076_v22  ;;  %v7801_v39 = vadd.f32 %v18787_v63, %v21685_v41 }
 0xa66   : > { %v7569_v7 = vadd.f32 %v7568_v50, %v7480_v21  ;;  %vm8082_vm15 = vcmp.eq.f32.partialorder %v8081_v17, 8.507059e+37  ;;  %v8098_v17 = vand.u32 2147483648, %v19021_v53 }
 0xa67   : > { %v13439_v15 = vpop.eup %13438  ;;  %v19096_v2 = vadd.f32 %v18713_v32, %v7745_v5  ;;  %v8090_v5 = vmul.f32 %v19058_v57, %v8089_v6 }
 0xa68   : > { %9225 = vrot.lane.b32.xlu0 %v13439_v15, %s13746_s9  ;;  %9355 = vrot.lane.b32.xlu2 %v9285_v48, %s13746_s9  ;;  %v13441_v40 = vpop.eup %13440  ;;  %v19119_v15 = vsel %vm8082_vm15, %v8084_v31, %v8080_v9  ;;  %v9200_v31 = vpop.permute.xlu2 %9199 }
 0xa69   : > { %21682 = vst [vmem:[#allocation23_spill] sm:$0xff] %v19096_v2  ;;  %13444 = vtanh.f32 %v19096_v2  ;;  %v19117_v20 = vadd.f32 1.0, %v13441_v40  ;;  %v19122_v22 = vpop.eup %13442  ;;  %v12650_v40 = vmul.f32 -1.442695, %v7801_v39 }
 0xa6a   : > { %v7657_v58 = vpop.f32.mrf.mxu2  ;;  %13446 = vpow2.f32 %v12649_v13  ;;  %v9198_v10 = vpop.permute.xlu1 %9197  ;;  %v8091_v13 = vadd.f32 %v19058_v57, %v8090_v5  ;;  %vm8123_vm8 = vweird.f32 %v19122_v22 }
 0xa6b   : > { %v7658_v18 = vadd.f32 %v7657_v58, %v7569_v7  ;;  %v7746_v50 = vpop.f32.mrf.mxu3  ;;  %v7482_v21 = vpop.f32.mrf.mxu0  ;;  %v9286_v7 = vmul.f32 %v9198_v10, %v19119_v15  ;;  %13448 = vrcp.f32 %v19117_v20  ;;  %vm19199_vm10 = vmor %vm8122_vm9, %vm8123_vm8  ;;  %vm8137_vm13 = vweird.f32 %v19117_v20 }
 0xa6c   : > { %v7571_v6 = vpop.f32.mrf.mxu1  ;;  %v7483_v54 = vadd.f32 %v7482_v21, %v18649_v25  ;;  %v8096_v25 = vand.u32 2147483647, %v19021_v53  ;;  %v8095_v41 = vsel %vm19136_vm2, %v19058_v57, %v8091_v13  ;;  %v8118_v53 = vmul.f32 %v19122_v22, %v19085_v56 }
 0xa6d   : > { %v7747_v48 = vadd.f32 %v7746_v50, %v7658_v18  ;;  %v8105_v18 = vmul.f32 %v19090_v45, %v8104_v61  ;;  %v21689_v50 = vld [vmem:[#allocation141_spill] sm:$0xff]  ;;  %v8099_v21 = vor.u32 1.1754944e-38, %v8098_v17 }
 0xa6e   : > { %v7572_v42 = vadd.f32 %v7571_v6, %v7483_v54  ;;  %v7803_v10 = vadd.f32 %v18787_v63, %v21689_v50  ;;  %vm8097_vm3 = vcmp.eq.f32.partialorder %v8096_v25, 8.507059e+37  ;;  %v8119_v17 = vsub.f32 1.0, %v8118_v53 }
 0xa6f   : > { %v13445_v46 = vpop.eup %13444  ;;  %v19129_v58 = vadd.f32 %v18713_v32, %v7747_v48  ;;  %v19151_v57 = vsel %vm8097_vm3, %v8099_v21, %v8095_v41  ;;  %v8106_v50 = vadd.f32 %v19090_v45, %v8105_v18  ;;  %v8113_v41 = vand.u32 2147483648, %v19053_v52 }
 0xa70   : > { %9227 = vrot.lane.b32.xlu1 %v13445_v46, %s13746_s9  ;;  %9357 = vrot.lane.b32.xlu0 %v9286_v7, %s13746_s9  ;;  %v13447_v5 = vpop.eup %13446 }
 0xa71   : > { %21686 = vst [vmem:[#allocation177_spill] sm:$0xff] %v19129_v58  ;;  %13450 = vtanh.f32 %v19129_v58  ;;  %v19149_v46 = vadd.f32 1.0, %v13447_v5  ;;  %v19154_v9 = vpop.eup %13448  ;;  %v12651_v5 = vmul.f32 -1.442695, %v7803_v10  ;;  %v8110_v21 = vsel %vm19169_vm6, %v19090_v45, %v8106_v50 }
 0xa72   : > { %v7660_v39 = vpop.f32.mrf.mxu2  ;;  %13452 = vpow2.f32 %v12650_v40  ;;  %v9287_v40 = vmul.f32 %v9200_v31, %v19151_v57  ;;  %v8133_v10 = vmul.f32 %v19154_v9, %v19117_v20  ;;  %vm8138_vm12 = vweird.f32 %v19154_v9 }
 0xa73   : > { %v7661_v48 = vadd.f32 %v7660_v39, %v7572_v42  ;;  %v7749_v7 = vpop.f32.mrf.mxu3  ;;  %v7484_v6 = vpop.f32.mrf.mxu0  ;;  %13454 = vrcp.f32 %v19149_v46  ;;  %vm19230_vm14 = vmor %vm8137_vm13, %vm8138_vm12  ;;  %vm8152_vm1 = vweird.f32 %v19149_v46 }
 0xa74   : > { %v7573_v54 = vpop.f32.mrf.mxu1  ;;  %v7485_v61 = vadd.f32 %v7484_v6, %v18655_v38  ;;  %v8111_v38 = vand.u32 2147483647, %v19053_v52  ;;  %v8134_v45 = vsub.f32 1.0, %v8133_v10 }
 0xa75   : > { %v7750_v13 = vadd.f32 %v7749_v7, %v7661_v48  ;;  %v8120_v48 = vmul.f32 %v19122_v22, %v8119_v17 }
 0xa76   : > { %v7574_v18 = vadd.f32 %v7573_v54, %v7485_v61  ;;  %vm8112_vm7 = vcmp.eq.f32.partialorder %v8111_v38, 8.507059e+37  ;;  %v8128_v38 = vand.u32 2147483648, %v19085_v56  ;;  %v8135_v10 = vmul.f32 %v19154_v9, %v8134_v45 }
 0xa77   : > { %v13451_v42 = vpop.eup %13450  ;;  %v19160_v25 = vadd.f32 %v18713_v32, %v7750_v13  ;;  %v8114_v13 = vor.u32 1.1754944e-38, %v8113_v41  ;;  %v8121_v17 = vadd.f32 %v19122_v22, %v8120_v48 }
 0xa78   : > { %9359 = vrot.lane.b32.xlu1 %v9287_v40, %s13746_s9  ;;  %9229 = vrot.lane.b32.xlu2 %v13451_v42, %s13746_s9  ;;  %v13453_v39 = vpop.eup %13452 }
 0xa79   : > { %21690 = vst [vmem:[#allocation24_spill] sm:$0xff] %v19160_v25  ;;  %13456 = vtanh.f32 %v19160_v25  ;;  %v19179_v54 = vadd.f32 1.0, %v13453_v39  ;;  %v19181_v25 = vsel %vm8112_vm7, %v8114_v13, %v8110_v21  ;;  %v19184_v2 = vpop.eup %13454  ;;  %v8125_v21 = vsel %vm19199_vm10, %v19122_v22, %v8121_v17 }
 0xa7a   : > { %v7662_v31 = vpop.f32.mrf.mxu2  ;;  %13458 = vpow2.f32 %v12651_v5  ;;  %v9202_v6 = vpop.permute.xlu0 %9201  ;;  %v8148_v48 = vmul.f32 %v19184_v2, %v19149_v46  ;;  %v8136_v17 = vadd.f32 %v19154_v9, %v8135_v10  ;;  %vm8153_vm0 = vweird.f32 %v19184_v2 }
 0xa7b   : > { %v7663_v52 = vadd.f32 %v7662_v31, %v7574_v18  ;;  %v7751_v7 = vpop.f32.mrf.mxu3  ;;  %v7487_v61 = vpop.f32.mrf.mxu0  ;;  %v9288_v50 = vmul.f32 %v9202_v6, %v19181_v25  ;;  %13460 = vrcp.f32 %v19179_v54  ;;  %v8129_v6 = vor.u32 1.1754944e-38, %v8128_v38  ;;  %vm19260_vm2 = vmor %vm8152_vm1, %vm8153_vm0 }
 0xa7c   : > { %v7576_v40 = vpop.f32.mrf.mxu1  ;;  %v7488_v58 = vadd.f32 %v7487_v61, %v18665_v36  ;;  %v8126_v36 = vand.u32 2147483647, %v19085_v56  ;;  %v7805_v56 = vadd.f32 %v18787_v63, %v18567_v23  ;;  %vm8167_vm5 = vweird.f32 %v19179_v54 }
 0xa7d   : > { %v7752_v42 = vadd.f32 %v7751_v7, %v7663_v52 }
 0xa7e   : > { %v7577_v18 = vadd.f32 %v7576_v40, %v7488_v58  ;;  %vm8127_vm11 = vcmp.eq.f32.partialorder %v8126_v36, 8.507059e+37  ;;  %v8143_v36 = vand.u32 2147483648, %v19117_v20 }
 0xa7f   : > { %v13457_v5 = vpop.eup %13456  ;;  %v19190_v41 = vadd.f32 %v18713_v32, %v7752_v42  ;;  %v19213_v45 = vsel %vm8127_vm11, %v8129_v6, %v8125_v21 }
 0xa80   : > { %9231 = vrot.lane.b32.xlu0 %v13457_v5, %s13746_s9  ;;  %9361 = vrot.lane.b32.xlu2 %v9288_v50, %s13746_s9  ;;  %v13459_v39 = vpop.eup %13458  ;;  %v8149_v5 = vsub.f32 1.0, %v8148_v48 }
 0xa81   : > { %13462 = vtanh.f32 %v19190_v41  ;;  %v19211_v13 = vadd.f32 1.0, %v13459_v39  ;;  %v19216_v50 = vpop.eup %13460  ;;  %v12652_v39 = vmul.f32 -1.442695, %v7805_v56  ;;  %v21697_v56 = vld [vmem:[#allocation145_spill] sm:$0xff] }
 0xa82   : > { %v7665_v31 = vpop.f32.mrf.mxu2  ;;  %v9204_v58 = vpop.permute.xlu1 %9203  ;;  %v8150_v48 = vmul.f32 %v19184_v2, %v8149_v5  ;;  %vm8168_vm4 = vweird.f32 %v19216_v50 }
 0xa83   : > { %v7666_v52 = vadd.f32 %v7665_v31, %v7577_v18  ;;  %v7754_v7 = vpop.f32.mrf.mxu3  ;;  %v7489_v61 = vpop.f32.mrf.mxu0  ;;  %v9289_v23 = vmul.f32 %v9204_v58, %v19213_v45  ;;  %13464 = vrcp.f32 %v19211_v13  ;;  %v8140_v31 = vsel %vm19230_vm14, %v19154_v9, %v8136_v17  ;;  %vm19290_vm6 = vmor %vm8167_vm5, %vm8168_vm4 }
 0xa84   : > { %v7578_v40 = vpop.f32.mrf.mxu1  ;;  %v7490_v22 = vadd.f32 %v7489_v61, %v18671_v35  ;;  %v8141_v35 = vand.u32 2147483647, %v19117_v20  ;;  %v8163_v20 = vmul.f32 %v19216_v50, %v19179_v54  ;;  %v8144_v58 = vor.u32 1.1754944e-38, %v8143_v36 }
 0xa85   : > { %v7755_v42 = vadd.f32 %v7754_v7, %v7666_v52  ;;  %v7807_v52 = vadd.f32 %v18787_v63, %v21697_v56  ;;  %v9206_v7 = vpop.permute.xlu2 %9205  ;;  %vm8182_vm9 = vweird.f32 %v19211_v13 }
 0xa86   : > { %v7579_v10 = vadd.f32 %v7578_v40, %v7490_v22  ;;  %vm8142_vm15 = vcmp.eq.f32.partialorder %v8141_v35, 8.507059e+37 }
 0xa87   : > { %v13463_v38 = vpop.eup %13462  ;;  %v19223_v18 = vadd.f32 %v18713_v32, %v7755_v42  ;;  %v19243_v22 = vsel %vm8142_vm15, %v8144_v58, %v8140_v31  ;;  %v12653_v53 = vmul.f32 -1.442695, %v7807_v52 }
 0xa88   : > { %9233 = vrot.lane.b32.xlu1 %v13463_v38, %s13746_s9  ;;  %9363 = vrot.lane.b32.xlu0 %v9289_v23, %s13746_s9  ;;  %v9290_v5 = vmul.f32 %v9206_v7, %v19243_v22  ;;  %v8151_v38 = vadd.f32 %v19184_v2, %v8150_v48 }
 0xa89   : > { %13466 = vtanh.f32 %v19223_v18  ;;  %v19246_v23 = vpop.eup %13464 }
 0xa8a   : > { %v7667_v21 = vpop.f32.mrf.mxu2  ;;  %13468 = vpow2.f32 %v12652_v39  ;;  %v8164_v39 = vsub.f32 1.0, %v8163_v20  ;;  %v8178_v20 = vmul.f32 %v19246_v23, %v19211_v13  ;;  %v8155_v52 = vsel %vm19260_vm2, %v19184_v2, %v8151_v38 }
 0xa8b   : > { %v7668_v6 = vadd.f32 %v7667_v21, %v7579_v10  ;;  %v7756_v61 = vpop.f32.mrf.mxu3  ;;  %v7492_v40 = vpop.f32.mrf.mxu0  ;;  %v8158_v10 = vand.u32 2147483648, %v19149_v46  ;;  %vm8183_vm8 = vweird.f32 %v19246_v23 }
 0xa8c   : > { %v7581_v42 = vpop.f32.mrf.mxu1  ;;  %v7493_v17 = vadd.f32 %v7492_v40, %v18681_v29  ;;  %v8156_v29 = vand.u32 2147483647, %v19149_v46  ;;  %v8165_v7 = vmul.f32 %v19216_v50, %v8164_v39  ;;  %v7809_v46 = vadd.f32 %v18787_v63, %v18583_v37  ;;  %vm19327_vm10 = vmor %vm8182_vm9, %vm8183_vm8 }
 0xa8d   : > { %v7757_v9 = vadd.f32 %v7756_v61, %v7668_v6  ;;  %v8159_v40 = vor.u32 1.1754944e-38, %v8158_v10  ;;  %v8179_v38 = vsub.f32 1.0, %v8178_v20  ;;  %v9212_v48 = vpop.permute.xlu2 %9211 }
 0xa8e   : > { %v7582_v21 = vadd.f32 %v7581_v42, %v7493_v17  ;;  %vm8157_vm3 = vcmp.eq.f32.partialorder %v8156_v29, 8.507059e+37  ;;  %v8173_v29 = vand.u32 2147483648, %v19179_v54 }
 0xa8f   : > { %v13467_v36 = vpop.eup %13466  ;;  %v19252_v35 = vadd.f32 %v18713_v32, %v7757_v9 }
 0xa90   : > { %9365 = vrot.lane.b32.xlu1 %v9290_v5, %s13746_s9  ;;  %9235 = vrot.lane.b32.xlu2 %v13467_v36, %s13746_s9  ;;  %v13469_v31 = vpop.eup %13468  ;;  %v19274_v36 = vsel %vm8157_vm3, %v8159_v40, %v8155_v52  ;;  %v8180_v52 = vmul.f32 %v19246_v23, %v8179_v38 }
 0xa91   : > { %13470 = vtanh.f32 %v19252_v35  ;;  %v19272_v42 = vadd.f32 1.0, %v13469_v31 }
 0xa92   : > { %v7670_v56 = vpop.f32.mrf.mxu2  ;;  %13472 = vpow2.f32 %v12653_v53  ;;  %v9208_v61 = vpop.permute.xlu0 %9207  ;;  %v8166_v53 = vadd.f32 %v19216_v50, %v8165_v7 }
 0xa93   : > { %v7671_v58 = vadd.f32 %v7670_v56, %v7582_v21  ;;  %v7759_v6 = vpop.f32.mrf.mxu3  ;;  %v7494_v9 = vpop.f32.mrf.mxu0  ;;  %v9291_v39 = vmul.f32 %v9208_v61, %v19274_v36  ;;  %v12654_v21 = vmul.f32 -1.442695, %v7809_v46  ;;  %13474 = vrcp.f32 %v19272_v42 }
 0xa94   : > { %v7583_v17 = vpop.f32.mrf.mxu1  ;;  %v7495_v2 = vadd.f32 %v7494_v9, %v18687_v34  ;;  %v8171_v34 = vand.u32 2147483647, %v19179_v54  ;;  %v8170_v46 = vsel %vm19290_vm6, %v19216_v50, %v8166_v53  ;;  %v8174_v9 = vor.u32 1.1754944e-38, %v8173_v29 }
 0xa95   : > { %v7760_v5 = vadd.f32 %v7759_v6, %v7671_v58  ;;  %v21702_v58 = vld [vmem:[#allocation149_spill] sm:$0xff]  ;;  %v8181_v53 = vadd.f32 %v19246_v23, %v8180_v52  ;;  %vm8197_vm13 = vweird.f32 %v19272_v42 }
 0xa96   : > { %v7584_v20 = vadd.f32 %v7583_v17, %v7495_v2  ;;  %v7811_v54 = vadd.f32 %v18787_v63, %v21702_v58  ;;  %vm8172_vm7 = vcmp.eq.f32.partialorder %v8171_v34, 8.507059e+37 }
 0xa97   : > { %v13471_v37 = vpop.eup %13470  ;;  %v19281_v10 = vadd.f32 %v18713_v32, %v7760_v5  ;;  %v19303_v38 = vsel %vm8172_vm7, %v8174_v9, %v8170_v46  ;;  %v8185_v58 = vsel %vm19327_vm10, %v19246_v23, %v8181_v53 }
 0xa98   : > { %9237 = vrot.lane.b32.xlu0 %v13471_v37, %s13746_s9  ;;  %9367 = vrot.lane.b32.xlu2 %v9291_v39, %s13746_s9  ;;  %v13473_v31 = vpop.eup %13472  ;;  %v12655_v34 = vmul.f32 -1.442695, %v7811_v54 }
 0xa99   : > { %13476 = vtanh.f32 %v19281_v10  ;;  %v19301_v17 = vadd.f32 1.0, %v13473_v31  ;;  %v19306_v50 = vpop.eup %13474 }
 0xa9a   : > { %v7672_v7 = vpop.f32.mrf.mxu2  ;;  %13478 = vpow2.f32 %v12654_v21  ;;  %v9210_v40 = vpop.permute.xlu1 %9209  ;;  %vm8198_vm12 = vweird.f32 %v19306_v50 }
 0xa9b   : > { %v7673_v6 = vadd.f32 %v7672_v7, %v7584_v20  ;;  %v7761_v61 = vpop.f32.mrf.mxu3  ;;  %v7497_v5 = vpop.f32.mrf.mxu0  ;;  %v9292_v37 = vmul.f32 %v9210_v40, %v19303_v38  ;;  %13480 = vrcp.f32 %v19301_v17  ;;  %v8186_v20 = vand.u32 2147483647, %v19211_v13  ;;  %v9087_v7 = vld [vmem:[%s19315_s13] sm:$0xff]  ;;  %vm8199_vm14 = vmor %vm8197_vm13, %vm8198_vm12 }
 0xa9c   : > { %v7498_v39 = vadd.f32 %v7497_v5, %v18697_v55  ;;  %v7586_v21 = vpop.f32.mrf.mxu1  ;;  %v8188_v55 = vand.u32 2147483648, %v19211_v13  ;;  %v8193_v13 = vmul.f32 %v19306_v50, %v19272_v42  ;;  %v9344_v40 = vpop.permute.xlu2 %9343  ;;  %vm8212_vm1 = vweird.f32 %v19301_v17 }
 0xa9d   : > { %v7762_v2 = vadd.f32 %v7761_v61, %v7673_v6  ;;  %v7813_v6 = vadd.f32 %v18787_v63, %v18599_v28  ;;  %vm8187_vm11 = vcmp.eq.f32.partialorder %v8186_v20, 8.507059e+37 }
 0xa9e   : > { %v7587_v46 = vadd.f32 %v7586_v21, %v7498_v39  ;;  %v8189_v61 = vor.u32 1.1754944e-38, %v8188_v55  ;;  %v9119_v39 = vmul.f32 %v9087_v7, %v18895_v4  ;;  %v8194_v55 = vsub.f32 1.0, %v8193_v13 }
 0xa9f   : > { %v13477_v29 = vpop.eup %13476  ;;  %v19320_v31 = vadd.f32 %v18713_v32, %v7762_v2 }
 0xaa0   : > { %9239 = vrot.lane.b32.xlu1 %v13477_v29, %s13746_s9  ;;  %9369 = vrot.lane.b32.xlu0 %v9292_v37, %s13746_s9  ;;  %v13479_v56 = vpop.eup %13478  ;;  %v19343_v21 = vsel %vm8187_vm11, %v8189_v61, %v8185_v58  ;;  %v9439_v28 = vadd.f32 %v9344_v40, %v9119_v39  ;;  %v8195_v58 = vmul.f32 %v19306_v50, %v8194_v55  ;;  %v21705_v40 = vld [vmem:[#allocation153_spill] sm:$0xff]  ;;  %v8203_v55 = vand.u32 2147483648, %v19272_v42 }
 0xaa1   : > { %13482 = vtanh.f32 %v19320_v31  ;;  %v19340_v2 = vadd.f32 1.0, %v13479_v56  ;;  %v19346_v29 = vpop.eup %13480 }
 0xaa2   : > { %v7675_v54 = vpop.f32.mrf.mxu2  ;;  %13484 = vpow2.f32 %v12655_v34  ;;  %v9293_v34 = vmul.f32 %v9212_v48, %v19343_v21  ;;  %vm8213_vm0 = vweird.f32 %v19346_v29 }
 0xaa3   : > { %v7676_v9 = vadd.f32 %v7675_v54, %v7587_v46  ;;  %v7764_v5 = vpop.f32.mrf.mxu3  ;;  %v7499_v37 = vpop.f32.mrf.mxu0  ;;  %v12656_v46 = vmul.f32 -1.442695, %v7813_v6  ;;  %13486 = vrcp.f32 %v19340_v2  ;;  %v8208_v54 = vmul.f32 %v19346_v29, %v19301_v17  ;;  %vm8214_vm2 = vmor %vm8212_vm1, %vm8213_vm0 }
 0xaa4   : > { %v7500_v53 = vadd.f32 %v7499_v37, %v18700_v30  ;;  %v7588_v4 = vpop.f32.mrf.mxu1  ;;  %v8196_v37 = vadd.f32 %v19306_v50, %v8195_v58  ;;  %vm8227_vm5 = vweird.f32 %v19340_v2 }
 0xaa5   : > { %v7765_v23 = vadd.f32 %v7764_v5, %v7676_v9  ;;  %v7815_v9 = vadd.f32 %v18787_v63, %v21705_v40  ;;  %v7817_v40 = vadd.f32 %v18787_v63, %v18615_v16 }
 0xaa6   : > { %v7589_v30 = vadd.f32 %v7588_v4, %v7500_v53  ;;  %v9088_v4 = vld [vmem:[%s19315_s13 + $0x8] sm:$0xff] }
 0xaa7   : > { %v13483_v52 = vpop.eup %13482  ;;  %v19350_v56 = vadd.f32 %v18713_v32, %v7765_v23  ;;  %v8209_v23 = vsub.f32 1.0, %v8208_v54  ;;  %v12658_v16 = vmul.f32 -1.442695, %v7817_v40 }
 0xaa8   : > { %9371 = vrot.lane.b32.xlu1 %v9293_v34, %s13746_s9  ;;  %9241 = vrot.lane.b32.xlu2 %v13483_v52, %s13746_s9  ;;  %v13485_v20 = vpop.eup %13484 }
 0xaa9   : > { %13488 = vtanh.f32 %v19350_v56  ;;  %v19359_v6 = vadd.f32 1.0, %v13485_v20  ;;  %v19363_v39 = vpop.eup %13486  ;;  %v8210_v58 = vmul.f32 %v19346_v29, %v8209_v23 }
 0xaaa   : > { %13490 = vtanh.f32 %v9439_v28  ;;  %v7677_v48 = vpop.f32.mrf.mxu2  ;;  %v9214_v7 = vpop.permute.xlu0 %9213  ;;  %v8223_v54 = vmul.f32 %v19363_v39, %v19340_v2  ;;  %vm8228_vm4 = vweird.f32 %v19363_v39 }
 0xaab   : > { %13492 = vpow2.f32 %v12656_v46  ;;  %v7678_v13 = vadd.f32 %v7677_v48, %v7589_v30  ;;  %v7766_v61 = vpop.f32.mrf.mxu3  ;;  %v8201_v46 = vand.u32 2147483647, %v19272_v42  ;;  %v12657_v30 = vmul.f32 -1.442695, %v7815_v9  ;;  %vm8229_vm6 = vmor %vm8227_vm5, %vm8228_vm4 }
 0xaac   : > { %13494 = vrcp.f32 %v19359_v6  ;;  %v8211_v23 = vadd.f32 %v19346_v29, %v8210_v58  ;;  %v21706_v58 = vld [vmem:[#allocation157_spill] sm:$0xff]  ;;  %vm8242_vm9 = vweird.f32 %v19359_v6 }
 0xaad   : > { %v7767_v5 = vadd.f32 %v7766_v61, %v7678_v13  ;;  %v9120_v13 = vmul.f32 %v9088_v4, %v18927_v27  ;;  %vm8202_vm15 = vcmp.eq.f32.partialorder %v8201_v46, 8.507059e+37  ;;  %v9218_v46 = vpop.permute.xlu2 %9217 }
 0xaae   : > { %v8215_v4 = vsel %vm8214_vm2, %v19346_v29, %v8211_v23 }
 0xaaf   : > { %v13489_v53 = vpop.eup %13488  ;;  %v19368_v34 = vadd.f32 %v18713_v32, %v7767_v5  ;;  %v8200_v32 = vsel %vm8199_vm14, %v19306_v50, %v8196_v37 }
 0xab0   : > { %v13491_v52 = vpop.eup %13490  ;;  %9243 = vrot.lane.b32.xlu0 %v13489_v53, %s13746_s9  ;;  %9823 = vrot.lane.b32.xlu2 %v9439_v28, %s13746_s9  ;;  %v8204_v28 = vor.u32 1.1754944e-38, %v8203_v55  ;;  %v8224_v53 = vsub.f32 1.0, %v8223_v54  ;;  %v8218_v55 = vand.u32 2147483648, %v19301_v17 }
 0xab1   : > { %v13493_v20 = vpop.eup %13492  ;;  %13496 = vtanh.f32 %v19368_v34  ;;  %9535 = vrot.lane.b32.xlu1 %v13491_v52, %s13746_s9  ;;  %v8216_v52 = vand.u32 2147483647, %v19301_v17  ;;  %v7819_v17 = vadd.f32 %v18787_v63, %v21706_v58 }
 0xab2   : > { %v9216_v48 = vpop.permute.xlu1 %9215  ;;  %v9346_v42 = vpop.permute.xlu0 %9345  ;;  %v19386_v61 = vadd.f32 1.0, %v13493_v20  ;;  %13498 = vpow2.f32 %v12657_v30  ;;  %v19390_v9 = vsel %vm8202_vm15, %v8204_v28, %v8200_v32  ;;  %v8219_v54 = vor.u32 1.1754944e-38, %v8218_v55 }
 0xab3   : > { %v9440_v50 = vadd.f32 %v9346_v42, %v9120_v13  ;;  %v19392_v5 = vpop.eup %13494  ;;  %v9294_v37 = vmul.f32 %v9214_v7, %v19390_v9  ;;  %v9089_v7 = vld [vmem:[%s19315_s13 + $0x10] sm:$0xff]  ;;  %v8225_v42 = vmul.f32 %v19363_v39, %v8224_v53  ;;  %vm8217_vm3 = vcmp.eq.f32.partialorder %v8216_v52, 8.507059e+37 }
 0xab4   : > { %13500 = vrcp.f32 %v19386_v61  ;;  %v8238_v30 = vmul.f32 %v19392_v5, %v19359_v6  ;;  %v9121_v28 = vmul.f32 %v9089_v7, %v18959_v59  ;;  %v19412_v13 = vsel %vm8217_vm3, %v8219_v54, %v8215_v4 }
 0xab5   : > { %13502 = vtanh.f32 %v9440_v50  ;;  %v12659_v58 = vmul.f32 -1.442695, %v7819_v17  ;;  %v8226_v53 = vadd.f32 %v19363_v39, %v8225_v42  ;;  %v8233_v59 = vand.u32 2147483648, %v19340_v2 }
 0xab6   : > { %13504 = vpow2.f32 %v12658_v16  ;;  %v8239_v23 = vsub.f32 1.0, %v8238_v30  ;;  %v8231_v55 = vand.u32 2147483647, %v19340_v2  ;;  %v9090_v16 = vld [vmem:[%s19315_s13 + $0x18] sm:$0xff]  ;;  %v9350_v30 = vpop.permute.xlu2 %9349  ;;  %v7821_v42 = vadd.f32 %v18787_v63, %v18631_v8 }
 0xab7   : > { %v13497_v27 = vpop.eup %13496  ;;  %v9122_v2 = vmul.f32 %v9090_v16, %v18991_v1  ;;  %vm8243_vm8 = vweird.f32 %v19392_v5  ;;  %v8248_v1 = vand.u32 2147483648, %v19359_v6  ;;  %v8246_v8 = vand.u32 2147483647, %v19359_v6 }
 0xab8   : > { %9825 = vrot.lane.b32.xlu0 %v9440_v50, %s13746_s9  ;;  %9373 = vrot.lane.b32.xlu2 %v9294_v37, %s13746_s9  ;;  %v13499_v32 = vpop.eup %13498  ;;  %v9295_v37 = vmul.f32 %v9216_v48, %v19412_v13  ;;  %v8240_v52 = vmul.f32 %v19392_v5, %v8239_v23  ;;  %vm8232_vm7 = vcmp.eq.f32.partialorder %v8231_v55, 8.507059e+37  ;;  %vm19454_vm10 = vmor %vm8242_vm9, %vm8243_vm8  ;;  %vm8257_vm13 = vweird.f32 %v19386_v61 }
 0xab9   : > { %9245 = vrot.lane.b32.xlu1 %v13497_v27, %s13746_s9  ;;  %v19416_v50 = vadd.f32 1.0, %v13499_v32  ;;  %v8234_v32 = vor.u32 1.1754944e-38, %v8233_v59  ;;  %v12660_v59 = vmul.f32 -1.442695, %v7821_v42  ;;  %vm8247_vm11 = vcmp.eq.f32.partialorder %v8246_v8, 8.507059e+37 }
 0xaba   : > { %v9348_v20 = vpop.permute.xlu1 %9347  ;;  %v19414_v29 = vpop.eup %13500 }
 0xabb   : > { %v9441_v40 = vadd.f32 %v9348_v20, %v9121_v28  ;;  %v13503_v27 = vpop.eup %13502  ;;  %v8253_v4 = vmul.f32 %v19414_v29, %v19386_v61  ;;  %v8230_v20 = vsel %vm8229_vm6, %v19363_v39, %v8226_v53  ;;  %v9442_v28 = vadd.f32 %v9350_v30, %v9122_v2  ;;  %v21709_v2 = vld [vmem:[#allocation6_spill] sm:$0xff] }
 0xabc   : > { %v13505_v48 = vpop.eup %13504  ;;  %v19439_v54 = vsel %vm8232_vm7, %v8234_v32, %v8230_v20  ;;  %v8249_v20 = vor.u32 1.1754944e-38, %v8248_v1  ;;  %v7823_v42 = vadd.f32 %v18787_v63, %v21709_v2  ;;  %vm8258_vm12 = vweird.f32 %v19414_v29 }
 0xabd   : > { %13506 = vtanh.f32 %v9441_v40  ;;  %v19434_v17 = vadd.f32 1.0, %v13505_v48  ;;  %v9296_v23 = vmul.f32 %v9218_v46, %v19439_v54  ;;  %vm8259_vm14 = vmor %vm8257_vm13, %vm8258_vm12  ;;  %vm8272_vm1 = vweird.f32 %v19416_v50 }
 0xabe   : > { %13508 = vrcp.f32 %v19416_v50  ;;  %v12661_v8 = vmul.f32 -1.442695, %v7823_v42 }
 0xabf   : > { %13510 = vpow2.f32 %v12659_v58  ;;  %v9091_v58 = vld [vmem:[%s19315_s13 + $0x20] sm:$0xff]  ;;  %vm8287_vm5 = vweird.f32 %v19434_v17 }
 0xac0   : > { %9375 = vrot.lane.b32.xlu0 %v9295_v37, %s13746_s9  ;;  %9537 = vrot.lane.b32.xlu2 %v13503_v27, %s13746_s9  ;;  %v8254_v37 = vsub.f32 1.0, %v8253_v4  ;;  %13512 = vrcp.f32 %v19434_v17  ;;  %v19465_v4 = vpop.permute.xlu2 %9223  ;;  %v9123_v30 = vmul.f32 %v9091_v58, %v19023_v12  ;;  %v8261_v58 = vand.u32 2147483647, %v19386_v61 }
 0xac1   : > { %9827 = vrot.lane.b32.xlu1 %v9441_v40, %s13746_s9  ;;  %v8241_v40 = vadd.f32 %v19392_v5, %v8240_v52  ;;  %13514 = vtanh.f32 %v9442_v28 }
 0xac2   : > { %v9220_v7 = vpop.permute.xlu0 %9219  ;;  %v8255_v55 = vmul.f32 %v19414_v29, %v8254_v37  ;;  %13516 = vpow2.f32 %v12660_v59  ;;  %vm8262_vm15 = vcmp.eq.f32.partialorder %v8261_v58, 8.507059e+37 }
 0xac3   : > { %v13507_v39 = vpop.eup %13506  ;;  %v8245_v6 = vsel %vm19454_vm10, %v19392_v5, %v8241_v40 }
 0xac4   : > { %v19444_v27 = vpop.eup %13508  ;;  %v19472_v5 = vsel %vm8247_vm11, %v8249_v20, %v8245_v6  ;;  %v8256_v37 = vadd.f32 %v19414_v29, %v8255_v55  ;;  %v7825_v55 = vadd.f32 %v18787_v63, %v18647_v44 }
 0xac5   : > { %v13511_v53 = vpop.eup %13510  ;;  %v8268_v52 = vmul.f32 %v19444_v27, %v19416_v50  ;;  %v9297_v40 = vmul.f32 %v9220_v7, %v19472_v5  ;;  %v9092_v7 = vld [vmem:[%s19315_s13 + $0x28] sm:$0xff]  ;;  %vm8273_vm0 = vweird.f32 %v19444_v27 }
 0xac6   : > { %v19468_v32 = vadd.f32 1.0, %v13511_v53  ;;  %v8260_v53 = vsel %vm8259_vm14, %v19414_v29, %v8256_v37  ;;  %v12662_v37 = vmul.f32 -1.442695, %v7825_v55  ;;  %vm8274_vm2 = vmor %vm8272_vm1, %vm8273_vm0 }
 0xac7   : > { %v8269_v12 = vsub.f32 1.0, %v8268_v52  ;;  %v9124_v52 = vmul.f32 %v9092_v7, %v19055_v60  ;;  %v8278_v60 = vand.u32 2147483648, %v19416_v50 }
 0xac8   : > { %9539 = vrot.lane.b32.xlu0 %v13507_v39, %s13746_s9  ;;  %9829 = vrot.lane.b32.xlu2 %v9442_v28, %s13746_s9  ;;  %v19477_v39 = vpop.eup %13512  ;;  %13518 = vrcp.f32 %v19468_v32  ;;  %v9356_v20 = vpop.permute.xlu2 %9355  ;;  %vm8302_vm9 = vweird.f32 %v19468_v32 }
 0xac9   : > { %9377 = vrot.lane.b32.xlu1 %v9296_v23, %s13746_s9  ;;  %v8263_v23 = vand.u32 2147483648, %v19386_v61  ;;  %v13515_v1 = vpop.eup %13514  ;;  %v8283_v46 = vmul.f32 %v19477_v39, %v19434_v17  ;;  %v8270_v61 = vmul.f32 %v19444_v27, %v8269_v12  ;;  %vm8288_vm4 = vweird.f32 %v19477_v39 }
 0xaca   : > { %v9222_v16 = vpop.permute.xlu1 %9221  ;;  %v9352_v48 = vpop.permute.xlu0 %9351  ;;  %vm8289_vm6 = vmor %vm8287_vm5, %vm8288_vm4 }
 0xacb   : > { %v9443_v28 = vadd.f32 %v9352_v48, %v9123_v30  ;;  %v13517_v6 = vpop.eup %13516  ;;  %v8264_v48 = vor.u32 1.1754944e-38, %v8263_v23  ;;  %v8271_v12 = vadd.f32 %v19444_v27, %v8270_v61  ;;  %v8276_v23 = vand.u32 2147483647, %v19416_v50 }
 0xacc   : > { %v19498_v42 = vadd.f32 1.0, %v13517_v6  ;;  %v21710_v6 = vld [vmem:[#allocation7_spill] sm:$0xff] }
 0xacd   : > { %13520 = vtanh.f32 %v9443_v28  ;;  %v19494_v30 = vsel %vm8262_vm15, %v8264_v48, %v8260_v53  ;;  %v8275_v53 = vsel %vm8274_vm2, %v19444_v27, %v8271_v12  ;;  %v7827_v55 = vadd.f32 %v18787_v63, %v21710_v6 }
 0xace   : > { %13522 = vpow2.f32 %v12661_v8  ;;  %v19496_v2 = vpop.eup %13518  ;;  %vm8277_vm3 = vcmp.eq.f32.partialorder %v8276_v23, 8.507059e+37  ;;  %vm8317_vm13 = vweird.f32 %v19498_v42 }
 0xacf   : > { %v8298_v7 = vmul.f32 %v19496_v2, %v19468_v32  ;;  %vm8303_vm8 = vweird.f32 %v19496_v2 }
 0xad0   : > { %9831 = vrot.lane.b32.xlu0 %v9443_v28, %s13746_s9  ;;  %9379 = vrot.lane.b32.xlu2 %v9297_v40, %s13746_s9  ;;  %v9298_v28 = vmul.f32 %v9222_v16, %v19494_v30  ;;  %v8284_v40 = vsub.f32 1.0, %v8283_v46  ;;  %vm8304_vm10 = vmor %vm8302_vm9, %vm8303_vm8 }
 0xad1   : > { %9541 = vrot.lane.b32.xlu1 %v13515_v1, %s13746_s9  ;;  %v9093_v1 = vld [vmem:[%s19315_s13 + $0x30] sm:$0xff]  ;;  %v8299_v27 = vsub.f32 1.0, %v8298_v7 }
 0xad2   : > { %v9354_v59 = vpop.permute.xlu1 %9353  ;;  %v8285_v8 = vmul.f32 %v19477_v39, %v8284_v40  ;;  %v9125_v50 = vmul.f32 %v9093_v1, %v19087_v11  ;;  %v19520_v61 = vpop.permute.xlu2 %9229  ;;  %v8293_v40 = vand.u32 2147483648, %v19434_v17 }
 0xad3   : > { %v9444_v29 = vadd.f32 %v9354_v59, %v9124_v52  ;;  %v13521_v44 = vpop.eup %13520  ;;  %v8279_v59 = vor.u32 1.1754944e-38, %v8278_v60  ;;  %v12663_v60 = vmul.f32 -1.442695, %v7827_v55  ;;  %v8300_v23 = vmul.f32 %v19496_v2, %v8299_v27 }
 0xad4   : > { %v13523_v16 = vpop.eup %13522  ;;  %v9445_v52 = vadd.f32 %v9356_v20, %v9125_v50  ;;  %v9094_v20 = vld [vmem:[%s19315_s13 + $0x38] sm:$0xff]  ;;  %v8308_v27 = vand.u32 2147483648, %v19468_v32 }
 0xad5   : > { %13524 = vtanh.f32 %v9444_v29  ;;  %v19516_v46 = vadd.f32 1.0, %v13523_v16  ;;  %v19523_v48 = vsel %vm8277_vm3, %v8279_v59, %v8275_v53  ;;  %v9126_v7 = vmul.f32 %v9094_v20, %v19119_v15 }
 0xad6   : > { %13526 = vrcp.f32 %v19498_v42  ;;  %v9299_v11 = vmul.f32 %v19465_v4, %v19523_v48  ;;  %v7829_v59 = vadd.f32 %v18787_v63, %v18663_v62  ;;  %v8301_v55 = vadd.f32 %v19496_v2, %v8300_v23 }
 0xad7   : > { %13528 = vpow2.f32 %v12662_v37  ;;  %v8291_v37 = vand.u32 2147483647, %v19434_v17  ;;  %v8309_v23 = vor.u32 1.1754944e-38, %v8308_v27  ;;  %v8323_v27 = vand.u32 2147483648, %v19498_v42 }
 0xad8   : > { %9381 = vrot.lane.b32.xlu0 %v9298_v28, %s13746_s9  ;;  %9543 = vrot.lane.b32.xlu2 %v13521_v44, %s13746_s9  ;;  %13530 = vrcp.f32 %v19516_v46  ;;  %v12664_v62 = vmul.f32 -1.442695, %v7829_v59  ;;  %vm8332_vm1 = vweird.f32 %v19516_v46 }
 0xad9   : > { %9833 = vrot.lane.b32.xlu1 %v9444_v29, %s13746_s9  ;;  %v8286_v29 = vadd.f32 %v19477_v39, %v8285_v8  ;;  %13532 = vtanh.f32 %v9445_v52  ;;  %v8294_v8 = vor.u32 1.1754944e-38, %v8293_v40  ;;  %vm8292_vm7 = vcmp.eq.f32.partialorder %v8291_v37, 8.507059e+37 }
 0xada   : > { %v9226_v58 = vpop.permute.xlu0 %9225  ;;  %13534 = vpow2.f32 %v12663_v60  ;;  %v8305_v40 = vsel %vm8304_vm10, %v19496_v2, %v8301_v55  ;;  %v21711_v60 = vld [vmem:[#allocation161_spill] sm:$0xff] }
 0xadb   : > { %v13525_v28 = vpop.eup %13524  ;;  %v8290_v4 = vsel %vm8289_vm6, %v19477_v39, %v8286_v29  ;;  %v9362_v29 = vpop.permute.xlu2 %9361 }
 0xadc   : > { %v19529_v44 = vpop.eup %13526  ;;  %v19549_v50 = vsel %vm8292_vm7, %v8294_v8, %v8290_v4  ;;  %v7831_v4 = vadd.f32 %v18787_v63, %v21711_v60 }
 0xadd   : > { %v13529_v12 = vpop.eup %13528  ;;  %v8313_v16 = vmul.f32 %v19529_v44, %v19498_v42  ;;  %v9300_v6 = vmul.f32 %v9226_v58, %v19549_v50  ;;  %v9095_v58 = vld [vmem:[%s19315_s13 + $0x40] sm:$0xff]  ;;  %vm8318_vm12 = vweird.f32 %v19529_v44 }
 0xade   : > { %v19545_v53 = vadd.f32 1.0, %v13529_v12  ;;  %v12665_v55 = vmul.f32 -1.442695, %v7831_v4  ;;  %vm8319_vm14 = vmor %vm8317_vm13, %vm8318_vm12 }
 0xadf   : > { %v8314_v15 = vsub.f32 1.0, %v8313_v16 }
 0xae0   : > { %9545 = vrot.lane.b32.xlu0 %v13525_v28, %s13746_s9  ;;  %9835 = vrot.lane.b32.xlu2 %v9445_v52, %s13746_s9  ;;  %v19554_v52 = vpop.eup %13530  ;;  %13536 = vrcp.f32 %v19545_v53  ;;  %vm8347_vm5 = vweird.f32 %v19545_v53 }
 0xae1   : > { %9383 = vrot.lane.b32.xlu1 %v9299_v11, %s13746_s9  ;;  %v13533_v28 = vpop.eup %13532  ;;  %v8306_v11 = vand.u32 2147483647, %v19468_v32  ;;  %v8328_v20 = vmul.f32 %v19554_v52, %v19516_v46  ;;  %v8315_v32 = vmul.f32 %v19529_v44, %v8314_v15  ;;  %vm8333_vm0 = vweird.f32 %v19554_v52 }
 0xae2   : > { %v9228_v17 = vpop.permute.xlu1 %9227  ;;  %v9358_v1 = vpop.permute.xlu0 %9357  ;;  %vm19616_vm2 = vmor %vm8332_vm1, %vm8333_vm0 }
 0xae3   : > { %v9446_v39 = vadd.f32 %v9358_v1, %v9126_v7  ;;  %v13535_v12 = vpop.eup %13534  ;;  %v9127_v1 = vmul.f32 %v9095_v58, %v19151_v57  ;;  %vm8307_vm11 = vcmp.eq.f32.partialorder %v8306_v11, 8.507059e+37  ;;  %v8316_v15 = vadd.f32 %v19529_v44, %v8315_v32 }
 0xae4   : > { %v19571_v16 = vsel %vm8307_vm11, %v8309_v23, %v8305_v40  ;;  %v19575_v7 = vadd.f32 1.0, %v13535_v12 }
 0xae5   : > { %13538 = vtanh.f32 %v9446_v39  ;;  %v9301_v59 = vmul.f32 %v9228_v17, %v19571_v16  ;;  %v9096_v17 = vld [vmem:[%s19315_s13 + $0x48] sm:$0xff] }
 0xae6   : > { %13540 = vpow2.f32 %v12664_v62  ;;  %v19573_v2 = vpop.eup %13536  ;;  %v9128_v12 = vmul.f32 %v9096_v17, %v19181_v25  ;;  %vm8362_vm9 = vweird.f32 %v19575_v7 }
 0xae7   : > { %v8343_v40 = vmul.f32 %v19573_v2, %v19545_v53  ;;  %vm8348_vm4 = vweird.f32 %v19573_v2 }
 0xae8   : > { %9837 = vrot.lane.b32.xlu0 %v9446_v39, %s13746_s9  ;;  %9385 = vrot.lane.b32.xlu2 %v9300_v6, %s13746_s9  ;;  %v8329_v39 = vsub.f32 1.0, %v8328_v20  ;;  %v8324_v20 = vor.u32 1.1754944e-38, %v8323_v27  ;;  %v9448_v32 = vadd.f32 %v9362_v29, %v9128_v12  ;;  %vm8349_vm6 = vmor %vm8347_vm5, %vm8348_vm4 }
 0xae9   : > { %9547 = vrot.lane.b32.xlu1 %v13533_v28, %s13746_s9  ;;  %v8321_v28 = vand.u32 2147483647, %v19498_v42  ;;  %v8320_v42 = vsel %vm8319_vm14, %v19529_v44, %v8316_v15  ;;  %v8338_v44 = vand.u32 2147483648, %v19516_v46 }
 0xaea   : > { %v9360_v37 = vpop.permute.xlu1 %9359  ;;  %v19580_v57 = vpop.permute.xlu2 %9235  ;;  %v8330_v11 = vmul.f32 %v19554_v52, %v8329_v39  ;;  %v9097_v39 = vld [vmem:[%s19315_s13 + $0x50] sm:$0xff] }
 0xaeb   : > { %v9447_v8 = vadd.f32 %v9360_v37, %v9127_v1  ;;  %v13539_v6 = vpop.eup %13538  ;;  %v7833_v37 = vadd.f32 %v18787_v63, %v18679_v49  ;;  %vm8322_vm15 = vcmp.eq.f32.partialorder %v8321_v28, 8.507059e+37  ;;  %v8344_v1 = vsub.f32 1.0, %v8343_v40 }
 0xaec   : > { %v13541_v62 = vpop.eup %13540  ;;  %v19600_v4 = vsel %vm8322_vm15, %v8324_v20, %v8320_v42  ;;  %v8331_v23 = vadd.f32 %v19554_v52, %v8330_v11  ;;  %v9129_v28 = vmul.f32 %v9097_v39, %v19213_v45 }
 0xaed   : > { %13542 = vtanh.f32 %v9447_v8  ;;  %v19597_v60 = vadd.f32 1.0, %v13541_v62  ;;  %v9302_v49 = vmul.f32 %v19520_v61, %v19600_v4  ;;  %v8345_v15 = vmul.f32 %v19573_v2, %v8344_v1  ;;  %v21714_v62 = vld [vmem:[#allocation8_spill] sm:$0xff] }
 0xaee   : > { %13544 = vrcp.f32 %v19575_v7  ;;  %v7835_v11 = vadd.f32 %v18787_v63, %v21714_v62 }
 0xaef   : > { %13546 = vpow2.f32 %v12665_v55  ;;  %v8346_v45 = vadd.f32 %v19573_v2, %v8345_v15  ;;  %vm8377_vm13 = vweird.f32 %v19597_v60 }
 0xaf0   : > { %9387 = vrot.lane.b32.xlu0 %v9301_v59, %s13746_s9  ;;  %9549 = vrot.lane.b32.xlu2 %v13539_v6, %s13746_s9  ;;  %v12666_v59 = vmul.f32 -1.442695, %v7833_v37  ;;  %v8336_v6 = vand.u32 2147483647, %v19516_v46  ;;  %13548 = vrcp.f32 %v19597_v60  ;;  %v8335_v46 = vsel %vm19616_vm2, %v19554_v52, %v8331_v23 }
 0xaf1   : > { %9839 = vrot.lane.b32.xlu1 %v9447_v8, %s13746_s9  ;;  %13550 = vtanh.f32 %v9448_v32  ;;  %v8339_v37 = vor.u32 1.1754944e-38, %v8338_v44  ;;  %v12667_v23 = vmul.f32 -1.442695, %v7835_v11  ;;  %v8351_v44 = vand.u32 2147483647, %v19545_v53 }
 0xaf2   : > { %v9232_v58 = vpop.permute.xlu0 %9231  ;;  %v19620_v55 = vpop.permute.xlu2 %9367  ;;  %13552 = vpow2.f32 %v12666_v59  ;;  %vm8337_vm3 = vcmp.eq.f32.partialorder %v8336_v6, 8.507059e+37  ;;  %v8350_v6 = vsel %vm8349_vm6, %v19573_v2, %v8346_v45  ;;  %v12670_v45 = vmul.f32 -1.442695, %v18723_v51 }
 0xaf3   : > { %v13543_v8 = vpop.eup %13542  ;;  %v19634_v20 = vsel %vm8337_vm3, %v8339_v37, %v8335_v46  ;;  %vm8352_vm7 = vcmp.eq.f32.partialorder %v8351_v44, 8.507059e+37 }
 0xaf4   : > { %v19607_v25 = vpop.eup %13544  ;;  %v9303_v12 = vmul.f32 %v9232_v58, %v19634_v20  ;;  %v9098_v58 = vld [vmem:[%s19315_s13 + $0x58] sm:$0xff] }
 0xaf5   : > { %v13547_v29 = vpop.eup %13546  ;;  %v8358_v40 = vmul.f32 %v19607_v25, %v19575_v7  ;;  %v9130_v15 = vmul.f32 %v9098_v58, %v19243_v22  ;;  %vm8363_vm8 = vweird.f32 %v19607_v25  ;;  %v8368_v22 = vand.u32 2147483648, %v19575_v7  ;;  %v21715_v58 = vld [vmem:[#allocation10_spill] sm:$0xff] }
 0xaf6   : > { %v19632_v42 = vadd.f32 1.0, %v13547_v29  ;;  %vm8364_vm10 = vmor %vm8362_vm9, %vm8363_vm8 }
 0xaf7   : > { %v8359_v1 = vsub.f32 1.0, %v8358_v40 }
 0xaf8   : > { %9551 = vrot.lane.b32.xlu0 %v13543_v8, %s13746_s9  ;;  %9841 = vrot.lane.b32.xlu2 %v9448_v32, %s13746_s9  ;;  %v19639_v32 = vpop.eup %13548  ;;  %v8353_v8 = vand.u32 2147483648, %v19545_v53  ;;  %13554 = vrcp.f32 %v19632_v42  ;;  %vm8392_vm1 = vweird.f32 %v19632_v42 }
 0xaf9   : > { %9389 = vrot.lane.b32.xlu1 %v9302_v49, %s13746_s9  ;;  %v13551_v59 = vpop.eup %13550  ;;  %v12669_v49 = vmul.f32 -1.442695, %v18717_v0  ;;  %v8373_v0 = vmul.f32 %v19639_v32, %v19597_v60  ;;  %v8360_v53 = vmul.f32 %v19607_v25, %v8359_v1  ;;  %vm8378_vm12 = vweird.f32 %v19639_v32 }
 0xafa   : > { %v9234_v27 = vpop.permute.xlu1 %9233  ;;  %v9364_v17 = vpop.permute.xlu0 %9363  ;;  %v8354_v46 = vor.u32 1.1754944e-38, %v8353_v8  ;;  %vm19705_vm14 = vmor %vm8377_vm13, %vm8378_vm12 }
 0xafb   : > { %v9449_v52 = vadd.f32 %v9364_v17, %v9129_v28  ;;  %v13553_v39 = vpop.eup %13552  ;;  %v8374_v40 = vsub.f32 1.0, %v8373_v0 }
 0xafc   : > { %v19657_v28 = vadd.f32 1.0, %v13553_v39  ;;  %v19659_v17 = vsel %vm8352_vm7, %v8354_v46, %v8350_v6  ;;  %v7837_v39 = vadd.f32 %v18787_v63, %v21715_v58  ;;  %v8369_v6 = vor.u32 1.1754944e-38, %v8368_v22 }
 0xafd   : > { %13556 = vtanh.f32 %v9449_v52  ;;  %v9304_v11 = vmul.f32 %v9234_v27, %v19659_v17  ;;  %v8366_v27 = vand.u32 2147483647, %v19575_v7 }
 0xafe   : > { %13558 = vpow2.f32 %v12667_v23  ;;  %v19661_v62 = vpop.eup %13554  ;;  %v9099_v23 = vld [vmem:[%s19315_s13 + $0x60] sm:$0xff]  ;;  %vm8407_vm5 = vweird.f32 %v19657_v28 }
 0xaff   : > { %13560 = vpow2.f32 %v12669_v49  ;;  %v8388_v1 = vmul.f32 %v19661_v62, %v19632_v42  ;;  %vm8367_vm11 = vcmp.eq.f32.partialorder %v8366_v27, 8.507059e+37  ;;  %vm8393_vm0 = vweird.f32 %v19661_v62 }
 0xb00   : > { %9843 = vrot.lane.b32.xlu0 %v9449_v52, %s13746_s9  ;;  %9391 = vrot.lane.b32.xlu2 %v9303_v12, %s13746_s9  ;;  %v8361_v52 = vadd.f32 %v19607_v25, %v8360_v53  ;;  %13562 = vrcp.f32 %v19657_v28  ;;  %vm19733_vm2 = vmor %vm8392_vm1, %vm8393_vm0 }
 0xb01   : > { %9553 = vrot.lane.b32.xlu1 %v13551_v59, %s13746_s9  ;;  %v8375_v59 = vmul.f32 %v19639_v32, %v8374_v40  ;;  %v8389_v53 = vsub.f32 1.0, %v8388_v1  ;;  %v8383_v40 = vand.u32 2147483648, %v19597_v60 }
 0xb02   : > { %v9366_v29 = vpop.permute.xlu1 %9365  ;;  %v19651_v61 = vpop.permute.xlu2 %9241  ;;  %v8365_v51 = vsel %vm8364_vm10, %v19607_v25, %v8361_v52 }
 0xb03   : > { %v9450_v2 = vadd.f32 %v9366_v29, %v9130_v15  ;;  %v13557_v37 = vpop.eup %13556  ;;  %v9131_v29 = vmul.f32 %v9099_v23, %v19274_v36  ;;  %v19690_v15 = vsel %vm8367_vm11, %v8369_v6, %v8365_v51  ;;  %v8376_v63 = vadd.f32 %v19639_v32, %v8375_v59 }
 0xb04   : > { %v13559_v12 = vpop.eup %13558  ;;  %v9305_v36 = vmul.f32 %v19580_v57, %v19690_v15  ;;  %v8390_v57 = vmul.f32 %v19661_v62, %v8389_v53  ;;  %v12671_v23 = vmul.f32 -1.442695, %v18732_v14  ;;  %v8384_v1 = vor.u32 1.1754944e-38, %v8383_v40 }
 0xb05   : > { %13564 = vtanh.f32 %v9450_v2  ;;  %v13561_v8 = vpop.eup %13560  ;;  %v19683_v7 = vadd.f32 1.0, %v13559_v12 }
 0xb06   : > { %v19686_v0 = vadd.f32 1.0, %v13561_v8  ;;  %13566 = vpow2.f32 %v12670_v45  ;;  %v19688_v46 = vpop.eup %13562 }
 0xb07   : > { %13568 = vrcp.f32 %v19683_v7  ;;  %v8403_v22 = vmul.f32 %v19688_v46, %v19657_v28  ;;  %vm8408_vm4 = vweird.f32 %v19688_v46  ;;  %vm8422_vm8 = vweird.f32 %v19683_v7 }
 0xb08   : > { %9393 = vrot.lane.b32.xlu0 %v9304_v11, %s13746_s9  ;;  %9555 = vrot.lane.b32.xlu2 %v13557_v37, %s13746_s9  ;;  %v12668_v11 = vmul.f32 -1.442695, %v7837_v39  ;;  %v8381_v37 = vand.u32 2147483647, %v19597_v60  ;;  %13570 = vrcp.f32 %v19686_v0  ;;  %v8380_v60 = vsel %vm19705_vm14, %v19639_v32, %v8376_v63  ;;  %vm19775_vm6 = vmor %vm8407_vm5, %vm8408_vm4  ;;  %v9102_v63 = vld [vmem:[%s19315_s13 + $0x78] sm:$0xff] }
 0xb09   : > { %9845 = vrot.lane.b32.xlu1 %v9450_v2, %s13746_s9  ;;  %v9451_v2 = vadd.f32 %v19620_v55, %v9131_v29  ;;  %v9100_v55 = vld [vmem:[%s19315_s13 + $0x68] sm:$0xff]  ;;  %v8391_v39 = vadd.f32 %v19661_v62, %v8390_v57  ;;  %v8404_v29 = vsub.f32 1.0, %v8403_v22  ;;  %vm8612_vm12 = vweird.f32 %v19686_v0 }
 0xb0a   : > { %v9238_v49 = vpop.permute.xlu0 %9237  ;;  %v19678_v44 = vpop.permute.xlu2 %9823  ;;  %v9132_v8 = vmul.f32 %v9100_v55, %v19303_v38  ;;  %vm8382_vm15 = vcmp.eq.f32.partialorder %v8381_v37, 8.507059e+37  ;;  %v8398_v38 = vand.u32 2147483648, %v19632_v42 }
 0xb0b   : > { %v13565_v25 = vpop.eup %13564  ;;  %13572 = vtanh.f32 %v9451_v2  ;;  %v19720_v58 = vsel %vm8382_vm15, %v8384_v1, %v8380_v60  ;;  %v8405_v40 = vmul.f32 %v19688_v46, %v8404_v29  ;;  %v8413_v29 = vand.u32 2147483648, %v19657_v28 }
 0xb0c   : > { %v13567_v27 = vpop.eup %13566  ;;  %13574 = vpow2.f32 %v12668_v11  ;;  %v9306_v14 = vmul.f32 %v9238_v49, %v19720_v58  ;;  %v9101_v11 = vld [vmem:[%s19315_s13 + $0x70] sm:$0xff]  ;;  %v8399_v52 = vor.u32 1.1754944e-38, %v8398_v38 }
 0xb0d   : > { %v19724_v51 = vpop.eup %13568  ;;  %v19726_v6 = vadd.f32 1.0, %v13567_v27  ;;  %13576 = vpow2.f32 %v12671_v23  ;;  %v9133_v57 = vmul.f32 %v9101_v11, %v19343_v21  ;;  %v8406_v23 = vadd.f32 %v19688_v46, %v8405_v40 }
 0xb0e   : > { %v19729_v53 = vpop.eup %13570  ;;  %v12672_v21 = vmul.f32 -1.442695, %v18739_v26  ;;  %vm8423_vm9 = vweird.f32 %v19724_v51 }
 0xb0f   : > { %v8608_v55 = vmul.f32 %v19729_v53, %v19686_v0  ;;  %vm8613_vm10 = vweird.f32 %v19729_v53  ;;  %vm19806_vm11 = vmor %vm8422_vm8, %vm8423_vm9  ;;  %vm8627_vm1 = vweird.f32 %v19726_v6 }
 0xb10   : > { %9557 = vrot.lane.b32.xlu0 %v13565_v25, %s13746_s9  ;;  %9847 = vrot.lane.b32.xlu2 %v9451_v2, %s13746_s9  ;;  %v8396_v25 = vand.u32 2147483647, %v19632_v42  ;;  %v8418_v42 = vmul.f32 %v19724_v51, %v19683_v7  ;;  %vm19815_vm13 = vmor %vm8612_vm12, %vm8613_vm10 }
 0xb11   : > { %9395 = vrot.lane.b32.xlu1 %v9305_v36, %s13746_s9  ;;  %v13573_v2 = vpop.eup %13572  ;;  %v8395_v36 = vsel %vm19733_vm2, %v19661_v62, %v8391_v39  ;;  %v8609_v39 = vsub.f32 1.0, %v8608_v55 }
 0xb12   : > { %v9240_v12 = vpop.permute.xlu1 %9239  ;;  %v9370_v45 = vpop.permute.xlu0 %9369  ;;  %vm8397_vm3 = vcmp.eq.f32.partialorder %v8396_v25, 8.507059e+37 }
 0xb13   : > { %v19718_v59 = vpop.permute.xlu2 %9373  ;;  %v9452_v32 = vadd.f32 %v9370_v45, %v9132_v8  ;;  %v13575_v49 = vpop.eup %13574  ;;  %v19757_v45 = vsel %vm8397_vm3, %v8399_v52, %v8395_v36  ;;  %v8419_v8 = vsub.f32 1.0, %v8418_v42  ;;  %v9134_v42 = vmul.f32 %v9102_v63, %v19390_v9 }
 0xb14   : > { %v19754_v62 = vadd.f32 1.0, %v13575_v49  ;;  %v13577_v60 = vpop.eup %13576  ;;  %v9307_v1 = vmul.f32 %v9240_v12, %v19757_v45  ;;  %v12673_v12 = vmul.f32 -1.442695, %v18748_v19  ;;  %v8610_v49 = vmul.f32 %v19729_v53, %v8609_v39 }
 0xb15   : > { %13578 = vtanh.f32 %v9452_v32  ;;  %v19766_v38 = vadd.f32 1.0, %v13577_v60  ;;  %v8420_v25 = vmul.f32 %v19724_v51, %v8419_v8  ;;  %v8414_v19 = vor.u32 1.1754944e-38, %v8413_v29 }
 0xb16   : > { %13580 = vrcp.f32 %v19726_v6  ;;  %v9454_v52 = vadd.f32 %v19718_v59, %v9134_v42  ;;  %v8611_v60 = vadd.f32 %v19729_v53, %v8610_v49  ;;  %v8618_v8 = vand.u32 2147483648, %v19686_v0 }
 0xb17   : > { %13582 = vrcp.f32 %v19754_v62  ;;  %v8426_v59 = vand.u32 2147483647, %v19683_v7  ;;  %v12674_v63 = vmul.f32 -1.442695, %v18755_v3  ;;  %vm8437_vm5 = vweird.f32 %v19754_v62 }
 0xb18   : > { %9849 = vrot.lane.b32.xlu0 %v9452_v32, %s13746_s9  ;;  %9397 = vrot.lane.b32.xlu2 %v9306_v14, %s13746_s9  ;;  %v8619_v49 = vor.u32 1.1754944e-38, %v8618_v8  ;;  %v8633_v8 = vand.u32 2147483648, %v19726_v6  ;;  %vm8642_vm9 = vweird.f32 %v19766_v38 }
 0xb19   : > { %9559 = vrot.lane.b32.xlu1 %v13573_v2, %s13746_s9  ;;  %v8411_v2 = vand.u32 2147483647, %v19657_v28  ;;  %v8410_v28 = vsel %vm19775_vm6, %v19688_v46, %v8406_v23  ;;  %vm8427_vm14 = vcmp.eq.f32.partialorder %v8426_v59, 8.507059e+37 }
 0xb1a   : > { %v9372_v37 = vpop.permute.xlu1 %9371 }
 0xb1b   : > { %v19752_v22 = vpop.permute.xlu2 %9537  ;;  %v9453_v27 = vadd.f32 %v9372_v37, %v9133_v57  ;;  %v13579_v32 = vpop.eup %13578  ;;  %vm8412_vm7 = vcmp.eq.f32.partialorder %v8411_v2, 8.507059e+37  ;;  %v8421_v57 = vadd.f32 %v19724_v51, %v8420_v25 }
 0xb1c   : > { %v19763_v14 = vpop.eup %13580  ;;  %v19792_v46 = vsel %vm8412_vm7, %v8414_v19, %v8410_v28 }
 0xb1d   : > { %13584 = vtanh.f32 %v9453_v27  ;;  %v8623_v36 = vmul.f32 %v19763_v14, %v19726_v6  ;;  %v19796_v55 = vpop.eup %13582  ;;  %v9308_v9 = vmul.f32 %v19651_v61, %v19792_v46  ;;  %vm8628_vm0 = vweird.f32 %v19763_v14 }
 0xb1e   : > { %13586 = vpow2.f32 %v12672_v21  ;;  %v8433_v29 = vmul.f32 %v19796_v55, %v19754_v62  ;;  %vm8629_vm2 = vmor %vm8627_vm1, %vm8628_vm0  ;;  %vm8438_vm4 = vweird.f32 %v19796_v55 }
 0xb1f   : > { %13588 = vrcp.f32 %v19766_v38  ;;  %v8624_v23 = vsub.f32 1.0, %v8623_v36  ;;  %vm19884_vm6 = vmor %vm8437_vm5, %vm8438_vm4 }
 0xb20   : > { %9399 = vrot.lane.b32.xlu0 %v9307_v1, %s13746_s9  ;;  %9561 = vrot.lane.b32.xlu2 %v13579_v32, %s13746_s9  ;;  %13590 = vpow2.f32 %v12673_v12  ;;  %v8428_v1 = vand.u32 2147483648, %v19683_v7  ;;  %v8616_v32 = vand.u32 2147483647, %v19686_v0  ;;  %v8425_v7 = vsel %vm19806_vm11, %v19724_v51, %v8421_v57 }
 0xb21   : > { %9851 = vrot.lane.b32.xlu1 %v9453_v27, %s13746_s9  ;;  %13592 = vtanh.f32 %v9454_v52  ;;  %v8615_v0 = vsel %vm19815_vm13, %v19729_v53, %v8611_v60  ;;  %v8625_v28 = vmul.f32 %v19763_v14, %v8624_v23 }
 0xb22   : > { %v9244_v11 = vpop.permute.xlu0 %9243  ;;  %v8429_v25 = vor.u32 1.1754944e-38, %v8428_v1  ;;  %vm8617_vm15 = vcmp.eq.f32.partialorder %v8616_v32, 8.507059e+37  ;;  %13594 = vpow2.f32 %v12674_v63 }
 0xb23   : > { %v19788_v40 = vpop.permute.xlu2 %9829  ;;  %v9536_v37 = vpop.permute.xlu1 %9535  ;;  %v8620_v53 = vsel %vm8617_vm15, %v8619_v49, %v8615_v0  ;;  %v8626_v23 = vadd.f32 %v19763_v14, %v8625_v28 }
 0xb24   : > { %v13585_v27 = vpop.eup %13584  ;;  %v19840_v42 = vsel %vm8427_vm14, %v8429_v25, %v8425_v7  ;;  %v9631_v60 = vmul.f32 %v9536_v37, %v8620_v53  ;;  %v9104_v25 = vld [vmem:[%s19315_s13 + $0x88] sm:$0xff] }
 0xb25   : > { %v13587_v61 = vpop.eup %13586  ;;  %v9309_v3 = vmul.f32 %v9244_v11, %v19840_v42  ;;  %v8631_v11 = vand.u32 2147483647, %v19726_v6  ;;  %v8634_v6 = vor.u32 1.1754944e-38, %v8633_v8 }
 0xb26   : > { %v19822_v2 = vpop.eup %13588  ;;  %v19838_v51 = vadd.f32 1.0, %v13587_v61  ;;  %v8630_v61 = vsel %vm8629_vm2, %v19763_v14, %v8626_v23  ;;  %v12675_v14 = vmul.f32 -1.442695, %v18764_v47 }
 0xb27   : > { %v13591_v26 = vpop.eup %13590  ;;  %vm8632_vm3 = vcmp.eq.f32.partialorder %v8631_v11, 8.507059e+37  ;;  %vm8643_vm7 = vweird.f32 %v19822_v2 }
 0xb28   : > { %9563 = vrot.lane.b32.xlu0 %v13585_v27, %s13746_s9  ;;  %9853 = vrot.lane.b32.xlu2 %v9454_v52, %s13746_s9  ;;  %v8434_v52 = vsub.f32 1.0, %v8433_v29  ;;  %v19842_v57 = vadd.f32 1.0, %v13591_v26  ;;  %v9103_v27 = vld [vmem:[%s19315_s13 + $0x80] sm:$0xff]  ;;  %v13593_v1 = vpop.eup %13592  ;;  %13596 = vrcp.f32 %v19838_v51  ;;  %v9105_v26 = vld [vmem:[%s19315_s13 + $0x90] sm:$0xff]  ;;  %vm8644_vm10 = vmor %vm8642_vm9, %vm8643_vm7  ;;  %vm8657_vm14 = vweird.f32 %v19838_v51 }
 0xb29   : > { %9401 = vrot.lane.b32.xlu1 %v9308_v9, %s13746_s9  ;;  %v8638_v9 = vmul.f32 %v19822_v2, %v19766_v38  ;;  %v9135_v37 = vmul.f32 %v9103_v27, %v19412_v13  ;;  %v13595_v0 = vpop.eup %13594  ;;  %v8635_v13 = vsel %vm8632_vm3, %v8634_v6, %v8630_v61  ;;  %v8441_v27 = vand.u32 2147483647, %v19754_v62 }
 0xb2a   : > { %v19830_v12 = vpop.permute.xlu0 %9825  ;;  %13598 = vrcp.f32 %v19842_v57  ;;  %v8435_v39 = vmul.f32 %v19796_v55, %v8434_v52  ;;  %v9632_v53 = vmul.f32 %v19752_v22, %v8635_v13  ;;  %v8443_v52 = vand.u32 2147483648, %v19754_v62 }
 0xb2b   : > { %v19834_v19 = vpop.permute.xlu2 %9379  ;;  %v19836_v36 = vpop.permute.xlu1 %9245  ;;  %v8639_v32 = vsub.f32 1.0, %v8638_v9  ;;  %v12676_v9 = vmul.f32 -1.442695, %v18771_v24  ;;  %v9137_v23 = vmul.f32 %v9105_v26, %v19472_v5  ;;  %v9136_v22 = vmul.f32 %v9104_v25, %v19439_v54 }
 0xb2c   : > { %v8436_v63 = vadd.f32 %v19796_v55, %v8435_v39  ;;  %v8444_v11 = vor.u32 1.1754944e-38, %v8443_v52  ;;  %v8648_v54 = vand.u32 2147483648, %v19766_v38  ;;  %vm8442_vm8 = vcmp.eq.f32.partialorder %v8441_v27, 8.507059e+37 }
 0xb2d   : > { %v8640_v28 = vmul.f32 %v19822_v2, %v8639_v32  ;;  %vm8672_vm15 = vweird.f32 %v19842_v57 }
 0xb2e   : > { %v19870_v49 = vpop.eup %13596 }
 0xb2f   : > { %v8641_v62 = vadd.f32 %v19822_v2, %v8640_v28  ;;  %v8653_v24 = vmul.f32 %v19870_v49, %v19838_v51  ;;  %vm8658_vm12 = vweird.f32 %v19870_v49 }
 0xb30   : > { %9403 = vrot.lane.b32.xlu2 %v9309_v3, %s13746_s9  ;;  %9695 = vrot.lane.b32.xlu0 %v9631_v60, %s13746_s9  ;;  %v19875_v3 = vpop.eup %13598  ;;  %v19877_v60 = vadd.f32 1.0, %v13595_v0  ;;  %vm19947_vm0 = vmor %vm8657_vm14, %vm8658_vm12 }
 0xb31   : > { %9565 = vrot.lane.b32.xlu1 %v13593_v1, %s13746_s9  ;;  %v8440_v1 = vsel %vm19884_vm6, %v19796_v55, %v8436_v63  ;;  %v8646_v55 = vand.u32 2147483647, %v19766_v38  ;;  %v8645_v0 = vsel %vm8644_vm10, %v19822_v2, %v8641_v62  ;;  %v8654_v13 = vsub.f32 1.0, %v8653_v24 }
 0xb32   : > { %v9376_v59 = vpop.permute.xlu0 %9375  ;;  %v19906_v32 = vsel %vm8442_vm8, %v8444_v11, %v8440_v1  ;;  %v8649_v63 = vor.u32 1.1754944e-38, %v8648_v54  ;;  %v9106_v1 = vld [vmem:[%s19315_s13 + $0x98] sm:$0xff]  ;;  %vm8673_vm13 = vweird.f32 %v19875_v3  ;;  %v8663_v24 = vand.u32 2147483648, %v19838_v51 }
 0xb33   : > { %v9455_v21 = vadd.f32 %v9376_v59, %v9135_v37  ;;  %v19861_v29 = vpop.permute.xlu2 %9543  ;;  %v19863_v7 = vpop.permute.xlu1 %9827  ;;  %v8668_v37 = vmul.f32 %v19875_v3, %v19842_v57  ;;  %v9310_v6 = vmul.f32 %v19836_v36, %v19906_v32  ;;  %vm8647_vm11 = vcmp.eq.f32.partialorder %v8646_v55, 8.507059e+37  ;;  %vm19954_vm1 = vmor %vm8672_vm15, %vm8673_vm13 }
 0xb34   : > { %v8650_v28 = vsel %vm8647_vm11, %v8649_v63, %v8645_v0  ;;  %v8655_v2 = vmul.f32 %v19870_v49, %v8654_v13  ;;  %v8678_v11 = vand.u32 2147483648, %v19842_v57  ;;  %v8676_v54 = vand.u32 2147483647, %v19842_v57 }
 0xb35   : > { %13600 = vtanh.f32 %v9455_v21  ;;  %v8669_v26 = vsub.f32 1.0, %v8668_v37  ;;  %v8661_v37 = vand.u32 2147483647, %v19838_v51  ;;  %v9138_v55 = vmul.f32 %v9106_v1, %v19494_v30 }
 0xb36   : > { %13602 = vpow2.f32 %v12675_v14  ;;  %v8664_v13 = vor.u32 1.1754944e-38, %v8663_v24  ;;  %vm8677_vm3 = vcmp.eq.f32.partialorder %v8676_v54, 8.507059e+37  ;;  %vm8687_vm5 = vweird.f32 %v19877_v60 }
 0xb37   : > { %13604 = vrcp.f32 %v19877_v60  ;;  %v8670_v52 = vmul.f32 %v19875_v3, %v8669_v26  ;;  %vm8662_vm2 = vcmp.eq.f32.partialorder %v8661_v37, 8.507059e+37  ;;  %v8691_v51 = vand.u32 2147483647, %v19877_v60 }
 0xb38   : > { %9855 = vrot.lane.b32.xlu0 %v9455_v21, %s13746_s9  ;;  %13606 = vpow2.f32 %v12676_v9  ;;  %v9457_v21 = vadd.f32 %v19834_v19, %v9137_v23 }
 0xb39   : > { %9697 = vrot.lane.b32.xlu1 %v9632_v53, %s13746_s9  ;;  %v12677_v53 = vmul.f32 -1.442695, %v18780_v43  ;;  %vm8692_vm7 = vcmp.eq.f32.partialorder %v8691_v51, 8.507059e+37 }
 0xb3a   : > { %v9540_v8 = vpop.permute.xlu0 %9539 }
 0xb3b   : > { %v13601_v5 = vpop.eup %13600  ;;  %v19900_v39 = vpop.permute.xlu2 %9835  ;;  %v9633_v19 = vmul.f32 %v9540_v8, %v8650_v28  ;;  %v8671_v8 = vadd.f32 %v19875_v3, %v8670_v52 }
 0xb3c   : > { %v9378_v59 = vpop.permute.xlu1 %9377  ;;  %9567 = vrot.lane.b32.xlu2 %v13601_v5, %s13746_s9  ;;  %v13603_v38 = vpop.eup %13602 }
 0xb3d   : > { %v9456_v61 = vadd.f32 %v9378_v59, %v9136_v22  ;;  %v19916_v25 = vpop.eup %13604  ;;  %v19926_v23 = vadd.f32 1.0, %v13603_v38  ;;  %v8656_v22 = vadd.f32 %v19870_v49, %v8655_v2  ;;  %v8675_v0 = vsel %vm19954_vm1, %v19875_v3, %v8671_v8  ;;  %v9108_v8 = vld [vmem:[%s19315_s13 + $0xa8] sm:$0xff] }
 0xb3e   : > { %v13607_v36 = vpop.eup %13606  ;;  %v8683_v62 = vmul.f32 %v19916_v25, %v19877_v60  ;;  %v8679_v38 = vor.u32 1.1754944e-38, %v8678_v11  ;;  %vm8688_vm4 = vweird.f32 %v19916_v25  ;;  %v8693_v11 = vand.u32 2147483648, %v19877_v60 }
 0xb3f   : > { %13608 = vtanh.f32 %v9456_v61  ;;  %v19928_v47 = vadd.f32 1.0, %v13607_v36  ;;  %v8660_v57 = vsel %vm19947_vm0, %v19870_v49, %v8656_v22  ;;  %vm8689_vm6 = vmor %vm8687_vm5, %vm8688_vm4  ;;  %vm8702_vm10 = vweird.f32 %v19926_v23 }
 0xb40   : > { %9405 = vrot.lane.b32.xlu0 %v9310_v6, %s13746_s9  ;;  %13610 = vtanh.f32 %v9457_v21  ;;  %v8684_v6 = vsub.f32 1.0, %v8683_v62  ;;  %v8665_v49 = vsel %vm8662_vm2, %v8664_v13, %v8660_v57  ;;  %v21732_v62 = vld [vmem:[#allocation11_spill] sm:$0xff]  ;;  %v8694_v13 = vor.u32 1.1754944e-38, %v8693_v11 }
 0xb41   : > { %9857 = vrot.lane.b32.xlu1 %v9456_v61, %s13746_s9  ;;  %13612 = vpow2.f32 %v12677_v53  ;;  %v12678_v53 = vmul.f32 -1.442695, %v18790_v33  ;;  %v8706_v11 = vand.u32 2147483647, %v19926_v23  ;;  %vm8717_vm11 = vweird.f32 %v19928_v47 }
 0xb42   : > { %v19918_v14 = vpop.permute.xlu0 %9831  ;;  %13614 = vrcp.f32 %v19926_v23  ;;  %v8685_v3 = vmul.f32 %v19916_v25, %v8684_v6 }
 0xb43   : > { %v19923_v27 = vpop.permute.xlu2 %9385  ;;  %13616 = vrcp.f32 %v19928_v47  ;;  %vm8707_vm14 = vcmp.eq.f32.partialorder %v8706_v11, 8.507059e+37 }
 0xb44   : > { %v9542_v9 = vpop.permute.xlu1 %9541  ;;  %9699 = vrot.lane.b32.xlu2 %v9633_v19, %s13746_s9  ;;  %v8680_v19 = vsel %vm8677_vm3, %v8679_v38, %v8675_v0 }
 0xb45   : > { %v13609_v43 = vpop.eup %13608  ;;  %v9634_v2 = vmul.f32 %v9542_v9, %v8665_v49  ;;  %v9635_v52 = vmul.f32 %v19861_v29, %v8680_v19  ;;  %v8686_v9 = vadd.f32 %v19916_v25, %v8685_v3  ;;  %v21733_v19 = vld [vmem:[#allocation165_spill] sm:$0xff] }
 0xb46   : > { %v13611_v5 = vpop.eup %13610 }
 0xb47   : > { %v13613_v28 = vpop.eup %13612 }
 0xb48   : > { %9569 = vrot.lane.b32.xlu0 %v13609_v43, %s13746_s9  ;;  %v19970_v36 = vpop.eup %13614  ;;  %v19976_v1 = vadd.f32 1.0, %v13613_v28  ;;  %v12679_v43 = vmul.f32 -1.442695, %v21732_v62 }
 0xb49   : > { %9571 = vrot.lane.b32.xlu1 %v13611_v5, %s13746_s9  ;;  %v19974_v22 = vpop.eup %13616  ;;  %v8698_v33 = vmul.f32 %v19970_v36, %v19926_v23  ;;  %vm8703_vm8 = vweird.f32 %v19970_v36 }
 0xb4a   : > { %v9382_v61 = vpop.permute.xlu0 %9381  ;;  %v8713_v5 = vmul.f32 %v19974_v22, %v19928_v47  ;;  %vm8718_vm9 = vweird.f32 %v19974_v22  ;;  %vm20035_vm12 = vmor %vm8702_vm10, %vm8703_vm8  ;;  %v8738_v11 = vand.u32 2147483648, %v19976_v1  ;;  %vm8732_vm1 = vweird.f32 %v19976_v1 }
 0xb4b   : > { %v9458_v26 = vadd.f32 %v9382_v61, %v9138_v55  ;;  %v19964_v63 = vpop.permute.xlu2 %9549  ;;  %v9140_v55 = vmul.f32 %v9108_v8, %v19549_v50  ;;  %v8699_v6 = vsub.f32 1.0, %v8698_v33  ;;  %v8708_v33 = vand.u32 2147483648, %v19926_v23  ;;  %vm20042_vm13 = vmor %vm8717_vm11, %vm8718_vm9 }
 0xb4c   : > { %v19966_v30 = vpop.permute.xlu1 %9833  ;;  %9859 = vrot.lane.b32.xlu2 %v9457_v21, %s13746_s9  ;;  %v9107_v21 = vld [vmem:[%s19315_s13 + $0xa0] sm:$0xff]  ;;  %v8714_v0 = vsub.f32 1.0, %v8713_v5  ;;  %v8723_v5 = vand.u32 2147483648, %v19928_v47 }
 0xb4d   : > { %13618 = vtanh.f32 %v9458_v26  ;;  %v9139_v54 = vmul.f32 %v9107_v21, %v19523_v48  ;;  %v9460_v61 = vadd.f32 %v19923_v27, %v9140_v55  ;;  %v8690_v48 = vsel %vm8689_vm6, %v19916_v25, %v8686_v9 }
 0xb4e   : > { %13620 = vpow2.f32 %v12678_v53  ;;  %v8695_v38 = vsel %vm8692_vm7, %v8694_v13, %v8690_v48  ;;  %v8700_v25 = vmul.f32 %v19970_v36, %v8699_v6  ;;  %v8715_v3 = vmul.f32 %v19974_v22, %v8714_v0 }
 0xb4f   : > { %13622 = vrcp.f32 %v19976_v1  ;;  %v8709_v6 = vor.u32 1.1754944e-38, %v8708_v33 }
 0xb50   : > { %9701 = vrot.lane.b32.xlu0 %v9634_v2, %s13746_s9  ;;  %13624 = vpow2.f32 %v12679_v43  ;;  %v12680_v2 = vmul.f32 -1.442695, %v21733_v19  ;;  %v8701_v62 = vadd.f32 %v19970_v36, %v8700_v25  ;;  %v9109_v43 = vld [vmem:[%s19315_s13 + $0xb0] sm:$0xff] }
 0xb51   : > { %9703 = vrot.lane.b32.xlu1 %v9635_v52, %s13746_s9  ;;  %v9141_v55 = vmul.f32 %v9109_v43, %v19571_v16  ;;  %v21738_v19 = vld [vmem:[#allocation12_spill] sm:$0xff] }
 0xb52   : > { %v9546_v24 = vpop.permute.xlu0 %9545 }
 0xb53   : > { %v13619_v29 = vpop.eup %13618  ;;  %v19990_v37 = vpop.permute.xlu2 %9841  ;;  %v9636_v28 = vmul.f32 %v9546_v24, %v8695_v38  ;;  %v8716_v24 = vadd.f32 %v19974_v22, %v8715_v3 }
 0xb54   : > { %v9384_v59 = vpop.permute.xlu1 %9383  ;;  %9573 = vrot.lane.b32.xlu2 %v13619_v29, %s13746_s9  ;;  %v13621_v50 = vpop.eup %13620 }
 0xb55   : > { %v9459_v57 = vadd.f32 %v9384_v59, %v9139_v54  ;;  %v20004_v60 = vpop.eup %13622  ;;  %v20014_v52 = vadd.f32 1.0, %v13621_v50  ;;  %v8721_v54 = vand.u32 2147483647, %v19928_v47  ;;  %v8705_v47 = vsel %vm20035_vm12, %v19970_v36, %v8701_v62 }
 0xb56   : > { %v13625_v27 = vpop.eup %13624  ;;  %v8728_v8 = vmul.f32 %v20004_v60, %v19976_v1  ;;  %v8720_v48 = vsel %vm20042_vm13, %v19974_v22, %v8716_v24  ;;  %v8724_v50 = vor.u32 1.1754944e-38, %v8723_v5  ;;  %v8710_v36 = vsel %vm8707_vm14, %v8709_v6, %v8705_v47  ;;  %v9111_v24 = vld [vmem:[%s19315_s13 + $0xc0] sm:$0xff] }
 0xb57   : > { %13626 = vtanh.f32 %v9459_v57  ;;  %v20016_v21 = vadd.f32 1.0, %v13625_v27  ;;  %vm8722_vm15 = vcmp.eq.f32.partialorder %v8721_v54, 8.507059e+37  ;;  %vm8733_vm0 = vweird.f32 %v20004_v60 }
 0xb58   : > { %9861 = vrot.lane.b32.xlu0 %v9458_v26, %s13746_s9  ;;  %13628 = vtanh.f32 %v9460_v61  ;;  %v9143_v23 = vmul.f32 %v9111_v24, %v19634_v20  ;;  %v8736_v47 = vand.u32 2147483647, %v19976_v1  ;;  %vm8734_vm2 = vmor %vm8732_vm1, %vm8733_vm0  ;;  %v9112_v24 = vld [vmem:[%s19315_s13 + $0xc8] sm:$0xff]  ;;  %vm8747_vm6 = vweird.f32 %v20014_v52 }
 0xb59   : > { %9863 = vrot.lane.b32.xlu1 %v9459_v57, %s13746_s9  ;;  %13630 = vpow2.f32 %v12680_v2  ;;  %v8729_v57 = vsub.f32 1.0, %v8728_v8  ;;  %v12681_v2 = vmul.f32 -1.442695, %v21738_v19  ;;  %v21739_v8 = vld [vmem:[#allocation14_spill] sm:$0xff]  ;;  %vm8762_vm7 = vweird.f32 %v20016_v21 }
 0xb5a   : > { %v20006_v49 = vpop.permute.xlu0 %9837  ;;  %13632 = vrcp.f32 %v20014_v52  ;;  %vm8737_vm3 = vcmp.eq.f32.partialorder %v8736_v47, 8.507059e+37 }
 0xb5b   : > { %v20011_v26 = vpop.permute.xlu2 %9391  ;;  %13634 = vrcp.f32 %v20016_v21  ;;  %v8730_v22 = vmul.f32 %v20004_v60, %v8729_v57 }
 0xb5c   : > { %v9548_v53 = vpop.permute.xlu1 %9547  ;;  %9705 = vrot.lane.b32.xlu2 %v9636_v28, %s13746_s9  ;;  %v8725_v28 = vsel %vm8722_vm15, %v8724_v50, %v8720_v48  ;;  %v9463_v57 = vadd.f32 %v20011_v26, %v9143_v23  ;;  %v8739_v50 = vor.u32 1.1754944e-38, %v8738_v11  ;;  %v8766_v23 = vand.u32 2147483647, %v20016_v21 }
 0xb5d   : > { %v13627_v9 = vpop.eup %13626  ;;  %v9637_v25 = vmul.f32 %v9548_v53, %v8710_v36  ;;  %v9638_v3 = vmul.f32 %v19964_v63, %v8725_v28  ;;  %v8731_v53 = vadd.f32 %v20004_v60, %v8730_v22 }
 0xb5e   : > { %v13629_v29 = vpop.eup %13628  ;;  %vm8767_vm11 = vcmp.eq.f32.partialorder %v8766_v23, 8.507059e+37 }
 0xb5f   : > { %v13631_v38 = vpop.eup %13630 }
 0xb60   : > { %9575 = vrot.lane.b32.xlu0 %v13627_v9, %s13746_s9  ;;  %v20058_v27 = vpop.eup %13632  ;;  %v20064_v43 = vadd.f32 1.0, %v13631_v38  ;;  %v12682_v9 = vmul.f32 -1.442695, %v21739_v8 }
 0xb61   : > { %9577 = vrot.lane.b32.xlu1 %v13629_v29, %s13746_s9  ;;  %v20062_v62 = vpop.eup %13634  ;;  %v8743_v63 = vmul.f32 %v20058_v27, %v20014_v52  ;;  %vm8748_vm4 = vweird.f32 %v20058_v27 }
 0xb62   : > { %v9388_v51 = vpop.permute.xlu0 %9387  ;;  %v8758_v5 = vmul.f32 %v20062_v62, %v20016_v21  ;;  %vm8763_vm5 = vweird.f32 %v20062_v62  ;;  %vm20124_vm8 = vmor %vm8747_vm6, %vm8748_vm4  ;;  %vm8777_vm13 = vweird.f32 %v20064_v43 }
 0xb63   : > { %v9461_v0 = vadd.f32 %v9388_v51, %v9141_v55  ;;  %v20052_v13 = vpop.permute.xlu2 %9555  ;;  %v8744_v48 = vsub.f32 1.0, %v8743_v63  ;;  %v21741_v63 = vld [vmem:[#allocation16_spill] sm:$0xff]  ;;  %vm20131_vm9 = vmor %vm8762_vm7, %vm8763_vm5 }
 0xb64   : > { %v20054_v16 = vpop.permute.xlu1 %9839  ;;  %9865 = vrot.lane.b32.xlu2 %v9460_v61, %s13746_s9  ;;  %v9110_v61 = vld [vmem:[%s19315_s13 + $0xb8] sm:$0xff]  ;;  %v8759_v6 = vsub.f32 1.0, %v8758_v5 }
 0xb65   : > { %13636 = vtanh.f32 %v9461_v0  ;;  %v9142_v59 = vmul.f32 %v9110_v61, %v19600_v4  ;;  %v8735_v4 = vsel %vm8734_vm2, %v20004_v60, %v8731_v53  ;;  %v8745_v60 = vmul.f32 %v20058_v27, %v8744_v48 }
 0xb66   : > { %13638 = vpow2.f32 %v12681_v2  ;;  %v8740_v38 = vsel %vm8737_vm3, %v8739_v50, %v8735_v4  ;;  %v8760_v19 = vmul.f32 %v20062_v62, %v8759_v6  ;;  %v8753_v61 = vand.u32 2147483648, %v20014_v52 }
 0xb67   : > { %13640 = vrcp.f32 %v20064_v43 }
 0xb68   : > { %9707 = vrot.lane.b32.xlu0 %v9637_v25, %s13746_s9  ;;  %13642 = vpow2.f32 %v12682_v9  ;;  %v21740_v25 = vld [vmem:[#allocation15_spill] sm:$0xff]  ;;  %v8746_v9 = vadd.f32 %v20058_v27, %v8745_v60  ;;  %v8761_v5 = vadd.f32 %v20062_v62, %v8760_v19  ;;  %v8754_v50 = vor.u32 1.1754944e-38, %v8753_v61  ;;  %v21746_v19 = vld [vmem:[#allocation169_spill] sm:$0xff] }
 0xb69   : > { %9709 = vrot.lane.b32.xlu1 %v9638_v3, %s13746_s9  ;;  %v12683_v22 = vmul.f32 -1.442695, %v21740_v25  ;;  %v12684_v61 = vmul.f32 -1.442695, %v21746_v19 }
 0xb6a   : > { %v9552_v33 = vpop.permute.xlu0 %9551  ;;  %v8765_v6 = vsel %vm20131_vm9, %v20062_v62, %v8761_v5 }
 0xb6b   : > { %v13637_v29 = vpop.eup %13636  ;;  %v20078_v54 = vpop.permute.xlu2 %9847  ;;  %v9639_v36 = vmul.f32 %v9552_v33, %v8740_v38 }
 0xb6c   : > { %v9390_v55 = vpop.permute.xlu1 %9389  ;;  %9579 = vrot.lane.b32.xlu2 %v13637_v29, %s13746_s9  ;;  %v13639_v20 = vpop.eup %13638  ;;  %v12685_v29 = vmul.f32 -1.442695, %v21741_v63 }
 0xb6d   : > { %v9462_v51 = vadd.f32 %v9390_v55, %v9142_v59  ;;  %v20092_v1 = vpop.eup %13640  ;;  %v20102_v3 = vadd.f32 1.0, %v13639_v20  ;;  %v8768_v59 = vand.u32 2147483648, %v20016_v21  ;;  %v8751_v55 = vand.u32 2147483647, %v20014_v52 }
 0xb6e   : > { %v13643_v26 = vpop.eup %13642  ;;  %v8773_v53 = vmul.f32 %v20092_v1, %v20064_v43  ;;  %v8750_v21 = vsel %vm20124_vm8, %v20058_v27, %v8746_v9  ;;  %vm8778_vm12 = vweird.f32 %v20092_v1 }
 0xb6f   : > { %13644 = vtanh.f32 %v9462_v51  ;;  %v20105_v8 = vadd.f32 1.0, %v13643_v26  ;;  %vm8752_vm10 = vcmp.eq.f32.partialorder %v8751_v55, 8.507059e+37  ;;  %vm8779_vm14 = vmor %vm8777_vm13, %vm8778_vm12  ;;  %vm8792_vm2 = vweird.f32 %v20102_v3 }
 0xb70   : > { %9867 = vrot.lane.b32.xlu0 %v9461_v0, %s13746_s9  ;;  %13646 = vtanh.f32 %v9463_v57  ;;  %v8774_v48 = vsub.f32 1.0, %v8773_v53  ;;  %v8755_v60 = vsel %vm8752_vm10, %v8754_v50, %v8750_v21  ;;  %vm9919_vm10 = vcmask 523264  }
 0xb71   : > { %9869 = vrot.lane.b32.xlu1 %v9462_v51, %s13746_s9  ;;  %13648 = vpow2.f32 %v12683_v22  ;;  %v9144_v51 = vmul.f32 %v9112_v24, %v19659_v17  ;;  %v9113_v24 = vld [vmem:[%s19315_s13 + $0xd0] sm:$0xff]  ;;  %vm8807_vm3 = vweird.f32 %v20105_v8 }
 0xb72   : > { %v20094_v28 = vpop.permute.xlu0 %9843  ;;  %13650 = vrcp.f32 %v20102_v3  ;;  %v8775_v62 = vmul.f32 %v20092_v1, %v8774_v48 }
 0xb73   : > { %v20099_v0 = vpop.permute.xlu2 %9397  ;;  %13652 = vrcp.f32 %v20105_v8 }
 0xb74   : > { %v9554_v2 = vpop.permute.xlu1 %9553  ;;  %9711 = vrot.lane.b32.xlu2 %v9639_v36, %s13746_s9  ;;  %13654 = vpow2.f32 %v12685_v29  ;;  %v8769_v36 = vor.u32 1.1754944e-38, %v8768_v59  ;;  %v21747_v29 = vld [vmem:[#allocation173_spill] sm:$0xff] }
 0xb75   : > { %v13645_v33 = vpop.eup %13644  ;;  %v9640_v25 = vmul.f32 %v9554_v2, %v8755_v60  ;;  %v12688_v5 = vmul.f32 -1.442695, %v21747_v29  ;;  %v8776_v2 = vadd.f32 %v20092_v1, %v8775_v62 }
 0xb76   : > { %v13647_v11 = vpop.eup %13646  ;;  %v8770_v26 = vsel %vm8767_vm11, %v8769_v36, %v8765_v6 }
 0xb77   : > { %v13649_v27 = vpop.eup %13648  ;;  %v9641_v9 = vmul.f32 %v20052_v13, %v8770_v26  ;;  %v9145_v13 = vmul.f32 %v9113_v24, %v19690_v15  ;;  %v8781_v15 = vand.u32 2147483647, %v20064_v43  ;;  %v8780_v6 = vsel %vm8779_vm14, %v20092_v1, %v8776_v2  ;;  %v9115_v2 = vld [vmem:[%s19315_s13 + $0xe0] sm:$0xff] }
 0xb78   : > { %9581 = vrot.lane.b32.xlu0 %v13645_v33, %s13746_s9  ;;  %v20147_v22 = vpop.eup %13650  ;;  %v20154_v33 = vadd.f32 1.0, %v13649_v27 }
 0xb79   : > { %9583 = vrot.lane.b32.xlu1 %v13647_v11, %s13746_s9  ;;  %v20152_v53 = vpop.eup %13652  ;;  %v8788_v59 = vmul.f32 %v20147_v22, %v20102_v3  ;;  %vm8782_vm15 = vcmp.eq.f32.partialorder %v8781_v15, 8.507059e+37  ;;  %vm8793_vm0 = vweird.f32 %v20147_v22  ;;  %v9117_v15 = vld [vmem:[%s19315_s13 + $0xf0] sm:$0xff] }
 0xb7a   : > { %v9394_v4 = vpop.permute.xlu0 %9393  ;;  %v13655_v63 = vpop.eup %13654  ;;  %v8803_v47 = vmul.f32 %v20152_v53, %v20105_v8  ;;  %vm8808_vm1 = vweird.f32 %v20152_v53  ;;  %vm20216_vm4 = vmor %vm8792_vm2, %vm8793_vm0  ;;  %vm8822_vm9 = vweird.f32 %v20154_v33 }
 0xb7b   : > { %v9464_v20 = vadd.f32 %v9394_v4, %v9144_v51  ;;  %v20141_v17 = vpop.permute.xlu2 %9561  ;;  %v8783_v51 = vand.u32 2147483648, %v20064_v43  ;;  %v20170_v21 = vadd.f32 1.0, %v13655_v63  ;;  %v8789_v50 = vsub.f32 1.0, %v8788_v59  ;;  %vm20225_vm5 = vmor %vm8807_vm3, %vm8808_vm1 }
 0xb7c   : > { %v20143_v38 = vpop.permute.xlu1 %9845  ;;  %9871 = vrot.lane.b32.xlu2 %v9463_v57, %s13746_s9  ;;  %v9114_v57 = vld [vmem:[%s19315_s13 + $0xd8] sm:$0xff]  ;;  %v8804_v36 = vsub.f32 1.0, %v8803_v47  ;;  %v8813_v47 = vand.u32 2147483648, %v20105_v8 }
 0xb7d   : > { %13656 = vtanh.f32 %v9464_v20  ;;  %v9146_v23 = vmul.f32 %v9114_v57, %v19720_v58  ;;  %v8784_v27 = vor.u32 1.1754944e-38, %v8783_v51  ;;  %v8790_v1 = vmul.f32 %v20147_v22, %v8789_v50 }
 0xb7e   : > { %13658 = vpow2.f32 %v12684_v61  ;;  %v8805_v19 = vmul.f32 %v20152_v53, %v8804_v36  ;;  %v8796_v51 = vand.u32 2147483647, %v20102_v3  ;;  %vm8852_vm13 = vweird.f32 %v20170_v21 }
 0xb7f   : > { %13660 = vrcp.f32 %v20154_v33  ;;  %v9466_v48 = vadd.f32 %v20099_v0, %v9146_v23  ;;  %v8785_v60 = vsel %vm8782_vm15, %v8784_v27, %v8780_v6  ;;  %v9147_v6 = vmul.f32 %v9115_v2, %v19757_v45 }
 0xb80   : > { %9713 = vrot.lane.b32.xlu0 %v9640_v25, %s13746_s9  ;;  %13662 = vpow2.f32 %v12688_v5  ;;  %v8791_v5 = vadd.f32 %v20147_v22, %v8790_v1  ;;  %v8806_v59 = vadd.f32 %v20152_v53, %v8805_v19  ;;  %v21753_v1 = vld [vmem:[#allocation18_spill] sm:$0xff]  ;;  %v8814_v19 = vor.u32 1.1754944e-38, %v8813_v47  ;;  %v21754_v47 = vld [vmem:[#allocation23_spill] sm:$0xff] }
 0xb81   : > { %9715 = vrot.lane.b32.xlu1 %v9641_v9, %s13746_s9  ;;  %13664 = vrcp.f32 %v20170_v21  ;;  %vm8797_vm6 = vcmp.eq.f32.partialorder %v8796_v51, 8.507059e+37  ;;  %v12691_v51 = vmul.f32 -1.442695, %v21754_v47 }
 0xb82   : > { %v9558_v11 = vpop.permute.xlu0 %9557  ;;  %v8810_v27 = vsel %vm20225_vm5, %v20152_v53, %v8806_v59 }
 0xb83   : > { %v13657_v55 = vpop.eup %13656  ;;  %v20174_v4 = vpop.permute.xlu2 %9853  ;;  %v9642_v0 = vmul.f32 %v9558_v11, %v8785_v60 }
 0xb84   : > { %v9396_v52 = vpop.permute.xlu1 %9395  ;;  %9585 = vrot.lane.b32.xlu2 %v13657_v55, %s13746_s9  ;;  %v13659_v43 = vpop.eup %13658  ;;  %v8798_v55 = vand.u32 2147483648, %v20102_v3 }
 0xb85   : > { %v9465_v58 = vadd.f32 %v9396_v52, %v9145_v13  ;;  %v20184_v26 = vpop.eup %13660  ;;  %v20190_v9 = vadd.f32 1.0, %v13659_v43  ;;  %v8811_v52 = vand.u32 2147483647, %v20105_v8  ;;  %v8795_v8 = vsel %vm20216_vm4, %v20147_v22, %v8791_v5 }
 0xb86   : > { %v13663_v62 = vpop.eup %13662  ;;  %v8818_v11 = vmul.f32 %v20184_v26, %v20154_v33  ;;  %v8799_v43 = vor.u32 1.1754944e-38, %v8798_v55  ;;  %vm8823_vm8 = vweird.f32 %v20184_v26 }
 0xb87   : > { %13666 = vtanh.f32 %v9465_v58  ;;  %v20194_v57 = vpop.eup %13664  ;;  %v20196_v63 = vadd.f32 1.0, %v13663_v62  ;;  %v12686_v62 = vmul.f32 -1.442695, %v21753_v1  ;;  %vm8812_vm7 = vcmp.eq.f32.partialorder %v8811_v52, 8.507059e+37  ;;  %vm20271_vm11 = vmor %vm8822_vm9, %vm8823_vm8 }
 0xb88   : > { %9873 = vrot.lane.b32.xlu0 %v9464_v20, %s13746_s9  ;;  %13668 = vtanh.f32 %v9466_v48  ;;  %v21748_v20 = vld [vmem:[#allocation19_spill] sm:$0xff]  ;;  %v8819_v36 = vsub.f32 1.0, %v8818_v11  ;;  %v8800_v22 = vsel %vm8797_vm6, %v8799_v43, %v8795_v8  ;;  %vm8853_vm12 = vweird.f32 %v20194_v57 }
 0xb89   : > { %9875 = vrot.lane.b32.xlu1 %v9465_v58, %s13746_s9  ;;  %v12687_v24 = vmul.f32 -1.442695, %v21748_v20  ;;  %13670 = vrcp.f32 %v20190_v9  ;;  %v9149_v20 = vmul.f32 %v9117_v15, %v19840_v42  ;;  %vm20303_vm15 = vmor %vm8852_vm13, %vm8853_vm12  ;;  %vm8837_vm1 = vweird.f32 %v20190_v9 }
 0xb8a   : > { %v20186_v25 = vpop.permute.xlu0 %9849  ;;  %vm8897_vm5 = vweird.f32 %v20196_v63 }
 0xb8b   : > { %v9404_v29 = vpop.permute.xlu2 %9403  ;;  %13672 = vpow2.f32 %v12687_v24  ;;  %v8815_v24 = vsel %vm8812_vm7, %v8814_v19, %v8810_v27 }
 0xb8c   : > { %v9560_v61 = vpop.permute.xlu1 %9559  ;;  %9717 = vrot.lane.b32.xlu2 %v9642_v0, %s13746_s9  ;;  %13674 = vrcp.f32 %v20196_v63  ;;  %v8848_v0 = vmul.f32 %v20194_v57, %v20170_v21  ;;  %v20244_v5 = vadd.f32 %v9404_v29, %v9149_v20  ;;  %v9644_v42 = vmul.f32 %v20141_v17, %v8815_v24 }
 0xb8d   : > { %v13667_v13 = vpop.eup %13666  ;;  %v9643_v2 = vmul.f32 %v9560_v61, %v8800_v22  ;;  %v8828_v61 = vand.u32 2147483648, %v20154_v33 }
 0xb8e   : > { %v13669_v23 = vpop.eup %13668  ;;  %v8849_v55 = vsub.f32 1.0, %v8848_v0 }
 0xb8f   : > { %v20242_v53 = vpop.eup %13670  ;;  %v8829_v0 = vor.u32 1.1754944e-38, %v8828_v61 }
 0xb90   : > { %9587 = vrot.lane.b32.xlu0 %v13667_v13, %s13746_s9  ;;  %v8820_v13 = vmul.f32 %v20184_v26, %v8819_v36  ;;  %v8833_v52 = vmul.f32 %v20242_v53, %v20190_v9  ;;  %v8826_v36 = vand.u32 2147483647, %v20154_v33  ;;  %vm8838_vm2 = vweird.f32 %v20242_v53 }
 0xb91   : > { %9589 = vrot.lane.b32.xlu1 %v13669_v23, %s13746_s9  ;;  %v13673_v59 = vpop.eup %13672  ;;  %vm20339_vm4 = vmor %vm8837_vm1, %vm8838_vm2 }
 0xb92   : > { %v9400_v50 = vpop.permute.xlu0 %9399  ;;  %v20250_v23 = vpop.eup %13674  ;;  %v8821_v29 = vadd.f32 %v20184_v26, %v8820_v13  ;;  %v20262_v58 = vadd.f32 1.0, %v13673_v59  ;;  %vm8827_vm14 = vcmp.eq.f32.partialorder %v8826_v36, 8.507059e+37  ;;  %v8856_v13 = vand.u32 2147483647, %v20170_v21 }
 0xb93   : > { %v9467_v45 = vadd.f32 %v9400_v50, %v9147_v6  ;;  %v8850_v6 = vmul.f32 %v20194_v57, %v8849_v55  ;;  %v8893_v50 = vmul.f32 %v20250_v23, %v20196_v63  ;;  %vm8898_vm3 = vweird.f32 %v20250_v23 }
 0xb94   : > { %v20235_v60 = vpop.permute.xlu1 %9851  ;;  %9877 = vrot.lane.b32.xlu2 %v9466_v48, %s13746_s9  ;;  %v9116_v48 = vld [vmem:[%s19315_s13 + $0xe8] sm:$0xff]  ;;  %v8825_v33 = vsel %vm20271_vm11, %v20184_v26, %v8821_v29  ;;  %v21759_v29 = vld [vmem:[#allocation20_spill] sm:$0xff]  ;;  %vm8857_vm0 = vcmp.eq.f32.partialorder %v8856_v13, 8.507059e+37  ;;  %vm8899_vm6 = vmor %vm8897_vm5, %vm8898_vm3  ;;  %vm8882_vm11 = vweird.f32 %v20262_v58 }
 0xb95   : > { %13676 = vtanh.f32 %v9467_v45  ;;  %v9148_v3 = vmul.f32 %v9116_v48, %v19792_v46  ;;  %v8851_v19 = vadd.f32 %v20194_v57, %v8850_v6  ;;  %v8894_v22 = vsub.f32 1.0, %v8893_v50  ;;  %v21760_v6 = vld [vmem:[#allocation22_spill] sm:$0xff] }
 0xb96   : > { %v20246_v11 = vpop.permute.xlu2 %9567  ;;  %13678 = vpow2.f32 %v12686_v62  ;;  %v8834_v62 = vsub.f32 1.0, %v8833_v52  ;;  %v8830_v59 = vsel %vm8827_vm14, %v8829_v0, %v8825_v33  ;;  %v12689_v52 = vmul.f32 -1.442695, %v21759_v29 }
 0xb97   : > { %13680 = vtanh.f32 %v20244_v5  ;;  %v8895_v61 = vmul.f32 %v20250_v23, %v8894_v22  ;;  %v8841_v0 = vand.u32 2147483647, %v20190_v9 }
 0xb98   : > { %9719 = vrot.lane.b32.xlu0 %v9643_v2, %s13746_s9  ;;  %13682 = vpow2.f32 %v12691_v51  ;;  %v8858_v2 = vand.u32 2147483648, %v20170_v21  ;;  %v8855_v21 = vsel %vm20303_vm15, %v20194_v57, %v8851_v19  ;;  %v8901_v19 = vand.u32 2147483647, %v20196_v63 }
 0xb99   : > { %9721 = vrot.lane.b32.xlu1 %v9644_v42, %s13746_s9  ;;  %13684 = vrcp.f32 %v20262_v58  ;;  %v8896_v33 = vadd.f32 %v20250_v23, %v8895_v61  ;;  %vm8842_vm7 = vcmp.eq.f32.partialorder %v8841_v0, 8.507059e+37  ;;  %v8886_v0 = vand.u32 2147483647, %v20262_v58 }
 0xb9a   : > { %v9564_v17 = vpop.permute.xlu0 %9563  ;;  %vm8902_vm8 = vcmp.eq.f32.partialorder %v8901_v19, 8.507059e+37 }
 0xb9b   : > { %v13677_v15 = vpop.eup %13676  ;;  %v9645_v42 = vmul.f32 %v9564_v17, %v8830_v59  ;;  %v8900_v13 = vsel %vm8899_vm6, %v20250_v23, %v8896_v33  ;;  %vm8887_vm14 = vcmp.eq.f32.partialorder %v8886_v0, 8.507059e+37 }
 0xb9c   : > { %v9402_v8 = vpop.permute.xlu1 %9401  ;;  %9591 = vrot.lane.b32.xlu2 %v13677_v15, %s13746_s9  ;;  %v13679_v46 = vpop.eup %13678  ;;  %v8859_v15 = vor.u32 1.1754944e-38, %v8858_v2 }
 0xb9d   : > { %v20275_v43 = vadd.f32 %v9402_v8, %v9148_v3  ;;  %v13681_v24 = vpop.eup %13680  ;;  %v20296_v26 = vadd.f32 1.0, %v13679_v46  ;;  %v12690_v3 = vmul.f32 -1.442695, %v21760_v6  ;;  %v8843_v46 = vand.u32 2147483648, %v20190_v9 }
 0xb9e   : > { %v9700_v1 = vpop.permute.xlu2 %9699  ;;  %v13683_v48 = vpop.eup %13682 }
 0xb9f   : > { %v9922_v20 = vsel %vm9919_vm10, %v9700_v1, %v19863_v7  ;;  %13686 = vtanh.f32 %v20275_v43  ;;  %v20317_v17 = vpop.eup %13684  ;;  %v20322_v57 = vadd.f32 1.0, %v13683_v48  ;;  %v8903_v1 = vand.u32 2147483648, %v20196_v63 }
 0xba0   : > { %9954 = vst [vmem:[%s20282_s16 + $0x10] sm:$0xff] %v9922_v20  ;;  %9879 = vrot.lane.b32.xlu0 %v9467_v45, %s13746_s9  ;;  %v8835_v45 = vmul.f32 %v20242_v53, %v8834_v62  ;;  %13688 = vrcp.f32 %v20296_v26  ;;  %v8878_v62 = vmul.f32 %v20317_v17, %v20262_v58  ;;  %vm8883_vm9 = vweird.f32 %v20317_v17 }
 0xba1   : > { %9595 = vrot.lane.b32.xlu1 %v13681_v24, %s13746_s9  ;;  %13690 = vpow2.f32 %v12689_v52  ;;  %v8844_v24 = vor.u32 1.1754944e-38, %v8843_v46  ;;  %v8904_v59 = vor.u32 1.1754944e-38, %v8903_v1  ;;  %v12694_v52 = vmul.f32 -1.442695, %v19190_v41  ;;  %vm8884_vm12 = vmor %vm8882_vm11, %vm8883_vm9 }
 0xba2   : > { %v9696_v55 = vpop.permute.xlu0 %9695  ;;  %v8836_v8 = vadd.f32 %v20242_v53, %v8835_v45  ;;  %13692 = vpow2.f32 %v12690_v3  ;;  %v8879_v7 = vsub.f32 1.0, %v8878_v62  ;;  %vm8867_vm15 = vweird.f32 %v20296_v26 }
 0xba3   : > { %v9920_v47 = vsel %vm9919_vm10, %v9696_v55, %v19678_v44  ;;  %v8860_v44 = vsel %vm8857_vm0, %v8859_v15, %v8855_v21  ;;  %13694 = vrcp.f32 %v20322_v57  ;;  %v8905_v45 = vsel %vm8902_vm8, %v8904_v59, %v8900_v13  ;;  %v9118_v21 = vld [vmem:[%s19315_s13 + $0xf8] sm:$0xff] }
 0xba4   : > { %v9566_v51 = vpop.permute.xlu1 %9565  ;;  %9952 = vst [vmem:[%s20282_s16] sm:$0xff] %v9920_v47  ;;  %9723 = vrot.lane.b32.xlu2 %v9645_v42, %s13746_s9  ;;  %v9647_v27 = vmul.f32 %v20246_v11, %v8860_v44  ;;  %v8840_v20 = vsel %vm20339_vm4, %v20242_v53, %v8836_v8  ;;  %13696 = vpow2.f32 %v12694_v52  ;;  %vm8942_vm3 = vweird.f32 %v20322_v57 }
 0xba5   : > { %v13687_v36 = vpop.eup %13686  ;;  %v8845_v42 = vsel %vm8842_vm7, %v8844_v24, %v8840_v20 }
 0xba6   : > { %v20326_v50 = vpop.permute.xlu2 %9859  ;;  %v20352_v9 = vpop.eup %13688  ;;  %v9646_v55 = vmul.f32 %v9566_v51, %v8845_v42  ;;  %v9150_v51 = vmul.f32 %v9118_v21, %v19906_v32  ;;  %v8888_v32 = vand.u32 2147483648, %v20262_v58  ;;  %v8873_v58 = vand.u32 2147483648, %v20296_v26  ;;  %v21763_v42 = vld [vmem:[#allocation177_spill] sm:$0xff] }
 0xba7   : > { %v13691_v53 = vpop.eup %13690  ;;  %v8863_v47 = vmul.f32 %v20352_v9, %v20296_v26  ;;  %vm8868_vm13 = vweird.f32 %v20352_v9 }
 0xba8   : > { %9593 = vrot.lane.b32.xlu0 %v13687_v36, %s13746_s9  ;;  %v13693_v61 = vpop.eup %13692  ;;  %v20368_v15 = vadd.f32 1.0, %v13691_v53  ;;  %v8889_v19 = vor.u32 1.1754944e-38, %v8888_v32  ;;  %v12692_v53 = vmul.f32 -1.442695, %v21763_v42  ;;  %vm8869_vm0 = vmor %vm8867_vm15, %vm8868_vm13  ;;  %v8874_v52 = vor.u32 1.1754944e-38, %v8873_v58 }
 0xba9   : > { %9727 = vrot.lane.b32.xlu1 %v9647_v27, %s13746_s9  ;;  %v20361_v23 = vpop.eup %13694  ;;  %v8864_v3 = vsub.f32 1.0, %v8863_v47  ;;  %v20370_v44 = vadd.f32 1.0, %v13693_v61  ;;  %v12697_v58 = vmul.f32 -1.442695, %v19281_v10 }
 0xbaa   : > { %v20350_v22 = vpop.permute.xlu0 %9855  ;;  %v8938_v41 = vmul.f32 %v20361_v23, %v20322_v57  ;;  %v13697_v20 = vpop.eup %13696  ;;  %vm8943_vm1 = vweird.f32 %v20361_v23  ;;  %vm8912_vm8 = vweird.f32 %v20368_v15 }
 0xbab   : > { %v8865_v33 = vmul.f32 %v20352_v9, %v8864_v3  ;;  %v20406_v47 = vadd.f32 1.0, %v13697_v20  ;;  %v8946_v3 = vand.u32 2147483647, %v20322_v57  ;;  %vm8944_vm4 = vmor %vm8942_vm3, %vm8943_vm1  ;;  %vm8927_vm11 = vweird.f32 %v20370_v44 }
 0xbac   : > { %v9698_v2 = vpop.permute.xlu1 %9697  ;;  %v8939_v62 = vsub.f32 1.0, %v8938_v41 }
 0xbad   : > { %v9921_v63 = vsel %vm9919_vm10, %v9698_v2, %v19830_v12  ;;  %v8880_v12 = vmul.f32 %v20317_v17, %v8879_v7  ;;  %v8866_v24 = vadd.f32 %v20352_v9, %v8865_v33  ;;  %vm8947_vm5 = vcmp.eq.f32.partialorder %v8946_v3, 8.507059e+37 }
 0xbae   : > { %9953 = vst [vmem:[%s20282_s16 + $0x8] sm:$0xff] %v9921_v63  ;;  %v9574_v48 = vpop.permute.xlu2 %9573 }
 0xbaf   : > { %v9650_v29 = vmul.f32 %v9574_v48, %v8905_v45  ;;  %v8881_v27 = vadd.f32 %v20317_v17, %v8880_v12  ;;  %v21764_v48 = vld [vmem:[#allocation24_spill] sm:$0xff]  ;;  %v8870_v61 = vsel %vm8869_vm0, %v20352_v9, %v8866_v24  ;;  %vm8987_vm0 = vweird.f32 %v20406_v47 }
 0xbb0   : > { %9725 = vrot.lane.b32.xlu0 %v9646_v55, %s13746_s9  ;;  %v12693_v21 = vmul.f32 -1.442695, %v21764_v48  ;;  %v8933_v48 = vand.u32 2147483648, %v20370_v44 }
 0xbb1   : > { %9733 = vrot.lane.b32.xlu1 %v9650_v29, %s13746_s9  ;;  %v8885_v11 = vsel %vm8884_vm12, %v20317_v17, %v8881_v27  ;;  %v8871_v17 = vand.u32 2147483647, %v20296_v26 }
 0xbb2   : > { %v9406_v6 = vpop.permute.xlu0 %9405  ;;  %v8890_v63 = vsel %vm8887_vm14, %v8889_v19, %v8885_v11 }
 0xbb3   : > { %v20372_v8 = vadd.f32 %v9406_v6, %v9150_v51  ;;  %vm8872_vm2 = vcmp.eq.f32.partialorder %v8871_v17, 8.507059e+37  ;;  %v8948_v51 = vand.u32 2147483648, %v20322_v57  ;;  %v8918_v17 = vand.u32 2147483648, %v20368_v15 }
 0xbb4   : > { %v20374_v36 = vpop.permute.xlu1 %9857  ;;  %v8875_v6 = vsel %vm8872_vm2, %v8874_v52, %v8870_v61  ;;  %v8931_v61 = vand.u32 2147483647, %v20370_v44 }
 0xbb5   : > { %13698 = vtanh.f32 %v20372_v8 }
 0xbb6   : > { %13700 = vrcp.f32 %v20368_v15  ;;  %v9706_v46 = vpop.permute.xlu2 %9705  ;;  %vm8932_vm14 = vcmp.eq.f32.partialorder %v8931_v61, 8.507059e+37 }
 0xbb7   : > { %13702 = vrcp.f32 %v20370_v44  ;;  %v9925_v1 = vsel %vm9919_vm10, %v9706_v46, %v19966_v30  ;;  %v8940_v30 = vmul.f32 %v20361_v23, %v8939_v62  ;;  %v8949_v62 = vor.u32 1.1754944e-38, %v8948_v51 }
 0xbb8   : > { %9957 = vst [vmem:[%s20282_s16 + $0x28] sm:$0xff] %v9925_v1  ;;  %13704 = vpow2.f32 %v12692_v53 }
 0xbb9   : > { %v8941_v26 = vadd.f32 %v20361_v23, %v8940_v30  ;;  %13706 = vpow2.f32 %v12693_v21 }
 0xbba   : > { %v9570_v2 = vpop.permute.xlu0 %9569  ;;  %13708 = vrcp.f32 %v20406_v47 }
 0xbbb   : > { %v13699_v13 = vpop.eup %13698  ;;  %v9648_v41 = vmul.f32 %v9570_v2, %v8875_v6  ;;  %v8945_v33 = vsel %vm8944_vm4, %v20361_v23, %v8941_v26  ;;  %13710 = vpow2.f32 %v12697_v58 }
 0xbbc   : > { %v9572_v59 = vpop.permute.xlu1 %9571  ;;  %v20395_v7 = vpop.eup %13700  ;;  %9597 = vrot.lane.b32.xlu2 %v13699_v13, %s13746_s9  ;;  %v8950_v19 = vsel %vm8947_vm5, %v8949_v62, %v8945_v33 }
 0xbbd   : > { %v9649_v55 = vmul.f32 %v9572_v59, %v8890_v63  ;;  %v20401_v45 = vpop.eup %13702  ;;  %v8908_v12 = vmul.f32 %v20395_v7, %v20368_v15  ;;  %vm8913_vm6 = vweird.f32 %v20395_v7 }
 0xbbe   : > { %v20410_v29 = vpop.permute.xlu2 %9865  ;;  %v8923_v9 = vmul.f32 %v20401_v45, %v20370_v44  ;;  %v13705_v11 = vpop.eup %13704  ;;  %vm8928_vm7 = vweird.f32 %v20401_v45  ;;  %vm8914_vm9 = vmor %vm8912_vm8, %vm8913_vm6 }
 0xbbf   : > { %9731 = vrot.lane.b32.xlu0 %v9649_v55, %s13746_s9  ;;  %v8909_v0 = vsub.f32 1.0, %v8908_v12  ;;  %v13707_v24 = vpop.eup %13706  ;;  %v8916_v55 = vand.u32 2147483647, %v20368_v15  ;;  %vm8929_vm12 = vmor %vm8927_vm11, %vm8928_vm7  ;;  %v8919_v15 = vor.u32 1.1754944e-38, %v8918_v17 }
 0xbc0   : > { %v8924_v57 = vsub.f32 1.0, %v8923_v9  ;;  %v20431_v13 = vpop.eup %13708  ;;  %v20440_v59 = vadd.f32 1.0, %v13707_v24  ;;  %v8934_v9 = vor.u32 1.1754944e-38, %v8933_v48 }
 0xbc1   : > { %v8983_v53 = vmul.f32 %v20431_v13, %v20406_v47  ;;  %vm8917_vm13 = vcmp.eq.f32.partialorder %v8916_v55, 8.507059e+37  ;;  %vm8988_vm15 = vweird.f32 %v20431_v13 }
 0xbc2   : > { %v9702_v27 = vpop.permute.xlu0 %9701  ;;  %v8925_v23 = vmul.f32 %v20401_v45, %v8924_v57  ;;  %vm8989_vm1 = vmor %vm8987_vm0, %vm8988_vm15  ;;  %vm8972_vm7 = vweird.f32 %v20440_v59 }
 0xbc3   : > { %v9923_v32 = vsel %vm9919_vm10, %v9702_v27, %v19788_v40  ;;  %v8910_v40 = vmul.f32 %v20395_v7, %v8909_v0  ;;  %v8984_v12 = vsub.f32 1.0, %v8983_v53 }
 0xbc4   : > { %v9704_v46 = vpop.permute.xlu1 %9703  ;;  %9955 = vst [vmem:[%s20282_s16 + $0x18] sm:$0xff] %v9923_v32  ;;  %9729 = vrot.lane.b32.xlu2 %v9648_v41, %s13746_s9  ;;  %v8926_v10 = vadd.f32 %v20401_v45, %v8925_v23  ;;  %v13711_v41 = vpop.eup %13710 }
 0xbc5   : > { %v9924_v1 = vsel %vm9919_vm10, %v9704_v46, %v19918_v14  ;;  %v20436_v14 = vadd.f32 1.0, %v13705_v11  ;;  %v8911_v42 = vadd.f32 %v20395_v7, %v8910_v40  ;;  %v8985_v46 = vmul.f32 %v20431_v13, %v8984_v12 }
 0xbc6   : > { %9956 = vst [vmem:[%s20282_s16 + $0x20] sm:$0xff] %v9924_v1  ;;  %v9580_v20 = vpop.permute.xlu2 %9579  ;;  %v8930_v51 = vsel %vm8929_vm12, %v20401_v45, %v8926_v10  ;;  %v12696_v45 = vmul.f32 -1.442695, %v19252_v35  ;;  %v20471_v1 = vadd.f32 1.0, %v13711_v41  ;;  %v8993_v11 = vand.u32 2147483648, %v20406_v47 }
 0xbc7   : > { %v9653_v2 = vmul.f32 %v9580_v20, %v8950_v19  ;;  %13712 = vrcp.f32 %v20436_v14  ;;  %v8915_v26 = vsel %vm8914_vm9, %v20395_v7, %v8911_v42  ;;  %v8935_v27 = vsel %vm8932_vm14, %v8934_v9, %v8930_v51 }
 0xbc8   : > { %13714 = vrcp.f32 %v20440_v59  ;;  %v8920_v6 = vsel %vm8917_vm13, %v8919_v15, %v8915_v26  ;;  %v12695_v7 = vmul.f32 -1.442695, %v19223_v18  ;;  %v8986_v57 = vadd.f32 %v20431_v13, %v8985_v46 }
 0xbc9   : > { %9739 = vrot.lane.b32.xlu1 %v9653_v2, %s13746_s9  ;;  %v8991_v19 = vand.u32 2147483647, %v20406_v47  ;;  %v8994_v42 = vor.u32 1.1754944e-38, %v8993_v11  ;;  %v8963_v51 = vand.u32 2147483648, %v20436_v14  ;;  %vm8957_vm5 = vweird.f32 %v20436_v14 }
 0xbca   : > { %v20438_v63 = vpop.permute.xlu0 %9861  ;;  %13716 = vpow2.f32 %v12695_v7  ;;  %v8990_v40 = vsel %vm8989_vm1, %v20431_v13, %v8986_v57  ;;  %v12699_v41 = vmul.f32 -1.442695, %v19350_v56  ;;  %vm9032_vm13 = vweird.f32 %v20471_v1 }
 0xbcb   : > { %13718 = vpow2.f32 %v12696_v45  ;;  %vm8992_vm2 = vcmp.eq.f32.partialorder %v8991_v19, 8.507059e+37  ;;  %v8964_v7 = vor.u32 1.1754944e-38, %v8963_v51  ;;  %v12700_v45 = vmul.f32 -1.442695, %v19368_v34 }
 0xbcc   : > { %v20442_v30 = vpop.permute.xlu1 %9863  ;;  %13720 = vrcp.f32 %v20471_v1  ;;  %v8995_v17 = vsel %vm8992_vm2, %v8994_v42, %v8990_v40  ;;  %v9036_v42 = vand.u32 2147483647, %v20471_v1 }
 0xbce   : > { %v9712_v21 = vpop.permute.xlu2 %9711  ;;  %vm9037_vm15 = vcmp.eq.f32.partialorder %v9036_v42, 8.507059e+37 }
 0xbcf   : > { %v9928_v52 = vsel %vm9919_vm10, %v9712_v21, %v20054_v16  ;;  %v20464_v16 = vpop.eup %13712 }
 0xbd0   : > { %9960 = vst [vmem:[%s20282_s16 + $0x40] sm:$0xff] %v9928_v52  ;;  %v20467_v0 = vpop.eup %13714  ;;  %v8953_v18 = vmul.f32 %v20464_v16, %v20436_v14  ;;  %vm8958_vm3 = vweird.f32 %v20464_v16 }
 0xbd1   : > { %v8968_v35 = vmul.f32 %v20467_v0, %v20440_v59  ;;  %v13717_v47 = vpop.eup %13716  ;;  %vm8973_vm4 = vweird.f32 %v20467_v0  ;;  %vm20518_vm6 = vmor %vm8957_vm5, %vm8958_vm3 }
 0xbd2   : > { %v9576_v3 = vpop.permute.xlu0 %9575  ;;  %v8954_v23 = vsub.f32 1.0, %v8953_v18  ;;  %v13719_v55 = vpop.eup %13718  ;;  %v20498_v61 = vadd.f32 1.0, %v13717_v47  ;;  %vm8974_vm8 = vmor %vm8972_vm7, %vm8973_vm4 }
 0xbd3   : > { %v9651_v44 = vmul.f32 %v9576_v3, %v8920_v6  ;;  %v8969_v53 = vsub.f32 1.0, %v8968_v35  ;;  %v20502_v52 = vadd.f32 1.0, %v13719_v55  ;;  %v8961_v6 = vand.u32 2147483647, %v20436_v14 }
 0xbd4   : > { %v9578_v32 = vpop.permute.xlu1 %9577  ;;  %v8955_v21 = vmul.f32 %v20464_v16, %v8954_v23  ;;  %v8978_v3 = vand.u32 2147483648, %v20440_v59  ;;  %13722 = vrcp.f32 %v20498_v61  ;;  %vm9002_vm2 = vweird.f32 %v20498_v61 }
 0xbd5   : > { %v9652_v33 = vmul.f32 %v9578_v32, %v8935_v27  ;;  %9735 = vrot.lane.b32.xlu2 %v9651_v44, %s13746_s9  ;;  %v8970_v13 = vmul.f32 %v20467_v0, %v8969_v53  ;;  %v8976_v32 = vand.u32 2147483647, %v20440_v59  ;;  %13724 = vrcp.f32 %v20502_v52 }
 0xbd6   : > { %v20474_v62 = vpop.permute.xlu2 %9871  ;;  %v8956_v12 = vadd.f32 %v20464_v16, %v8955_v21  ;;  %vm8962_vm9 = vcmp.eq.f32.partialorder %v8961_v6, 8.507059e+37  ;;  %v8979_v57 = vor.u32 1.1754944e-38, %v8978_v3  ;;  %13726 = vpow2.f32 %v12699_v41 }
 0xbd7   : > { %9737 = vrot.lane.b32.xlu0 %v9652_v33, %s13746_s9  ;;  %v8971_v9 = vadd.f32 %v20467_v0, %v8970_v13  ;;  %vm8977_vm11 = vcmp.eq.f32.partialorder %v8976_v32, 8.507059e+37  ;;  %13728 = vpow2.f32 %v12700_v45  ;;  %v9008_v32 = vand.u32 2147483648, %v20498_v61 }
 0xbd8   : > { %v8960_v46 = vsel %vm20518_vm6, %v20464_v16, %v8956_v12  ;;  %vm9017_vm4 = vweird.f32 %v20502_v52  ;;  %v9021_v45 = vand.u32 2147483647, %v20502_v52 }
 0xbd9   : > { %v8975_v33 = vsel %vm8974_vm8, %v20467_v0, %v8971_v9  ;;  %v8965_v59 = vsel %vm8962_vm9, %v8964_v7, %v8960_v46  ;;  %v12698_v0 = vmul.f32 -1.442695, %v19320_v31  ;;  %v9023_v7 = vand.u32 2147483648, %v20502_v52 }
 0xbda   : > { %v9708_v20 = vpop.permute.xlu0 %9707  ;;  %vm9022_vm7 = vcmp.eq.f32.partialorder %v9021_v45, 8.507059e+37 }
 0xbdb   : > { %v9926_v24 = vsel %vm9919_vm10, %v9708_v20, %v19900_v39  ;;  %v20494_v39 = vpop.eup %13720  ;;  %13730 = vpow2.f32 %v12698_v0 }
 0xbdc   : > { %v9710_v2 = vpop.permute.xlu1 %9709  ;;  %9958 = vst [vmem:[%s20282_s16 + $0x30] sm:$0xff] %v9926_v24  ;;  %v9028_v15 = vmul.f32 %v20494_v39, %v20471_v1  ;;  %v20534_v16 = vpop.eup %13722  ;;  %vm9033_vm12 = vweird.f32 %v20494_v39 }
 0xbdd   : > { %v9927_v58 = vsel %vm9919_vm10, %v9710_v2, %v20006_v49  ;;  %v20536_v24 = vpop.eup %13724  ;;  %v8998_v40 = vmul.f32 %v20534_v16, %v20498_v61  ;;  %vm9034_vm14 = vmor %vm9032_vm13, %vm9033_vm12  ;;  %vm9003_vm0 = vweird.f32 %v20534_v16 }
 0xbde   : > { %9959 = vst [vmem:[%s20282_s16 + $0x38] sm:$0xff] %v9927_v58  ;;  %v9586_v10 = vpop.permute.xlu2 %9585  ;;  %v9029_v56 = vsub.f32 1.0, %v9028_v15  ;;  %v13727_v23 = vpop.eup %13726  ;;  %v9038_v58 = vand.u32 2147483648, %v20471_v1  ;;  %v9013_v31 = vmul.f32 %v20536_v24, %v20502_v52  ;;  %vm9018_vm1 = vweird.f32 %v20536_v24  ;;  %vm9004_vm3 = vmor %vm9002_vm2, %vm9003_vm0 }
 0xbdf   : > { %v9656_v48 = vmul.f32 %v9586_v10, %v8995_v17  ;;  %v13729_v47 = vpop.eup %13728  ;;  %v20552_v17 = vadd.f32 1.0, %v13727_v23  ;;  %v8999_v21 = vsub.f32 1.0, %v8998_v40  ;;  %vm9019_vm5 = vmor %vm9017_vm4, %vm9018_vm1 }
 0xbe0   : > { %v9030_v19 = vmul.f32 %v20494_v39, %v9029_v56  ;;  %v9039_v12 = vor.u32 1.1754944e-38, %v9038_v58  ;;  %v9014_v15 = vsub.f32 1.0, %v9013_v31  ;;  %v20561_v1 = vadd.f32 1.0, %v13729_v47 }
 0xbe1   : > { %9745 = vrot.lane.b32.xlu1 %v9656_v48, %s13746_s9  ;;  %v13731_v6 = vpop.eup %13730  ;;  %13732 = vrcp.f32 %v20552_v17  ;;  %v9000_v3 = vmul.f32 %v20534_v16, %v8999_v21  ;;  %v9006_v56 = vand.u32 2147483647, %v20498_v61  ;;  %vm9062_vm9 = vweird.f32 %v20552_v17 }
 0xbe2   : > { %v20500_v49 = vpop.permute.xlu0 %9867  ;;  %v9031_v2 = vadd.f32 %v20494_v39, %v9030_v19  ;;  %v20567_v41 = vadd.f32 1.0, %v13731_v6  ;;  %13734 = vrcp.f32 %v20561_v1  ;;  %vm9077_vm13 = vweird.f32 %v20561_v1 }
 0xbe3   : > { %v9001_v27 = vadd.f32 %v20534_v16, %v9000_v3  ;;  %vm9007_vm6 = vcmp.eq.f32.partialorder %v9006_v56, 8.507059e+37 }
 0xbe4   : > { %v20504_v26 = vpop.permute.xlu1 %9869  ;;  %v9035_v48 = vsel %vm9034_vm14, %v20494_v39, %v9031_v2  ;;  %v9015_v39 = vmul.f32 %v20536_v24, %v9014_v15  ;;  %13736 = vrcp.f32 %v20567_v41  ;;  %vm9047_vm2 = vweird.f32 %v20567_v41 }
 0xbe5   : > { %v9040_v51 = vsel %vm9037_vm15, %v9039_v12, %v9035_v48  ;;  %v9066_v12 = vand.u32 2147483647, %v20552_v17  ;;  %v9051_v56 = vand.u32 2147483647, %v20567_v41 }
 0xbe6   : > { %v9718_v44 = vpop.permute.xlu2 %9717 }
 0xbe7   : > { %v9931_v14 = vsel %vm9919_vm10, %v9718_v44, %v20143_v38  ;;  %v8980_v38 = vsel %vm8977_vm11, %v8979_v57, %v8975_v33  ;;  %v13733_v46 = vpop.eup %13732  ;;  %vm9067_vm14 = vcmp.eq.f32.partialorder %v9066_v12, 8.507059e+37  ;;  %vm9052_vm4 = vcmp.eq.f32.partialorder %v9051_v56, 8.507059e+37 }
 0xbe8   : > { %9963 = vst [vmem:[%s20282_s16 + $0x58] sm:$0xff] %v9931_v14  ;;  %v9016_v14 = vadd.f32 %v20536_v24, %v9015_v39  ;;  %vm9063_vm8 = vweird.f32 %v13733_v46 }
 0xbe9   : > { %vm9064_vm11 = vmor %vm9062_vm9, %vm9063_vm8 }
 0xbea   : > { %v9582_v18 = vpop.permute.xlu0 %9581  ;;  %v9020_v61 = vsel %vm9019_vm5, %v20536_v24, %v9016_v14 }
 0xbeb   : > { %v9654_v11 = vmul.f32 %v9582_v18, %v8965_v59  ;;  %v9005_v59 = vsel %vm9004_vm3, %v20534_v16, %v9001_v27  ;;  %v13735_v18 = vpop.eup %13734 }
 0xbec   : > { %v9584_v35 = vpop.permute.xlu1 %9583  ;;  %v13737_v16 = vpop.eup %13736  ;;  %vm9078_vm12 = vweird.f32 %v13735_v18 }
 0xbed   : > { %v9655_v20 = vmul.f32 %v9584_v35, %v8980_v38  ;;  %9741 = vrot.lane.b32.xlu2 %v9654_v11, %s13746_s9  ;;  %v9009_v11 = vor.u32 1.1754944e-38, %v9008_v32  ;;  %v9058_v38 = vmul.f32 %v13733_v46, %v20552_v17  ;;  %v9024_v35 = vor.u32 1.1754944e-38, %v9023_v7  ;;  %vm9079_vm15 = vmor %vm9077_vm13, %vm9078_vm12 }
 0xbee   : > { %v20541_v34 = vpop.permute.xlu2 %9877  ;;  %v9043_v58 = vmul.f32 %v13737_v16, %v20567_v41  ;;  %vm9048_vm0 = vweird.f32 %v13737_v16 }
 0xbef   : > { %9743 = vrot.lane.b32.xlu0 %v9655_v20, %s13746_s9  ;;  %v9010_v19 = vsel %vm9007_vm6, %v9009_v11, %v9005_v59  ;;  %v9025_v52 = vsel %vm9022_vm7, %v9024_v35, %v9020_v61  ;;  %v9059_v23 = vsub.f32 1.0, %v9058_v38  ;;  %vm9049_vm3 = vmor %vm9047_vm2, %vm9048_vm0 }
 0xbf1   : > { %v9060_v31 = vmul.f32 %v13733_v46, %v9059_v23 }
 0xbf2   : > { %v9714_v53 = vpop.permute.xlu0 %9713 }
 0xbf3   : > { %v9929_v10 = vsel %vm9919_vm10, %v9714_v53, %v19990_v37  ;;  %v9061_v21 = vadd.f32 %v13733_v46, %v9060_v31 }
 0xbf4   : > { %v9716_v55 = vpop.permute.xlu1 %9715  ;;  %9961 = vst [vmem:[%s20282_s16 + $0x48] sm:$0xff] %v9929_v10 }
 0xbf5   : > { %v9930_v13 = vsel %vm9919_vm10, %v9716_v55, %v20094_v28  ;;  %v9044_v55 = vsub.f32 1.0, %v9043_v58 }
 0xbf6   : > { %9962 = vst [vmem:[%s20282_s16 + $0x50] sm:$0xff] %v9930_v13  ;;  %v9592_v9 = vpop.permute.xlu2 %9591  ;;  %v9068_v13 = vand.u32 2147483648, %v20552_v17 }
 0xbf7   : > { %v9659_v37 = vmul.f32 %v9592_v9, %v9040_v51  ;;  %v9065_v51 = vsel %vm9064_vm11, %v13733_v46, %v9061_v21  ;;  %v9083_v9 = vand.u32 2147483648, %v20561_v1  ;;  %v9053_v46 = vand.u32 2147483648, %v20567_v41 }
 0xbf8   : > { %v9069_v6 = vor.u32 1.1754944e-38, %v9068_v13 }
 0xbf9   : > { %9751 = vrot.lane.b32.xlu1 %v9659_v37, %s13746_s9  ;;  %v9084_v14 = vor.u32 1.1754944e-38, %v9083_v9 }
 0xbfa   : > { %v20570_v28 = vpop.permute.xlu0 %9873  ;;  %v9070_v3 = vsel %vm9067_vm14, %v9069_v6, %v9065_v51 }
 0xbfc   : > { %v20572_v44 = vpop.permute.xlu1 %9875 }
 0xbfe   : > { %v9724_v33 = vpop.permute.xlu2 %9723 }
 0xbff   : > { %v9934_v57 = vsel %vm9919_vm10, %v9724_v33, %v20235_v60  ;;  %v9073_v60 = vmul.f32 %v13735_v18, %v20561_v1 }
 0xc00   : > { %9966 = vst [vmem:[%s20282_s16 + $0x70] sm:$0xff] %v9934_v57  ;;  %v9054_v57 = vor.u32 1.1754944e-38, %v9053_v46 }
 0xc01   : > { %v9074_v24 = vsub.f32 1.0, %v9073_v60 }
 0xc02   : > { %v9588_v20 = vpop.permute.xlu0 %9587 }
 0xc03   : > { %v9657_v0 = vmul.f32 %v9588_v20, %v9010_v19  ;;  %v9075_v10 = vmul.f32 %v13735_v18, %v9074_v24 }
 0xc04   : > { %v9590_v2 = vpop.permute.xlu1 %9589 }
 0xc05   : > { %v9658_v40 = vmul.f32 %v9590_v2, %v9025_v52  ;;  %9747 = vrot.lane.b32.xlu2 %v9657_v0, %s13746_s9  ;;  %v9076_v15 = vadd.f32 %v13735_v18, %v9075_v10 }
 0xc07   : > { %9749 = vrot.lane.b32.xlu0 %v9658_v40, %s13746_s9  ;;  %v9080_v27 = vsel %vm9079_vm15, %v13735_v18, %v9076_v15 }
 0xc0a   : > { %v9720_v42 = vpop.permute.xlu0 %9719 }
 0xc0b   : > { %v9932_v53 = vsel %vm9919_vm10, %v9720_v42, %v20078_v54  ;;  %v9045_v54 = vmul.f32 %v13737_v16, %v9044_v55 }
 0xc0c   : > { %v9722_v47 = vpop.permute.xlu1 %9721  ;;  %9964 = vst [vmem:[%s20282_s16 + $0x60] sm:$0xff] %v9932_v53 }
 0xc0d   : > { %v9933_v48 = vsel %vm9919_vm10, %v9722_v47, %v20186_v25  ;;  %v9081_v25 = vand.u32 2147483647, %v20561_v1  ;;  %v9046_v17 = vadd.f32 %v13737_v16, %v9045_v54 }
 0xc0e   : > { %9965 = vst [vmem:[%s20282_s16 + $0x68] sm:$0xff] %v9933_v48 }
 0xc0f   : > { %vm9082_vm1 = vcmp.eq.f32.partialorder %v9081_v25, 8.507059e+37  ;;  %v9050_v45 = vsel %vm9049_vm3, %v13737_v16, %v9046_v17 }
 0xc10   : > { %v9085_v1 = vsel %vm9082_vm1, %v9084_v14, %v9080_v27  ;;  %v9055_v59 = vsel %vm9052_vm4, %v9054_v57, %v9050_v45 }
 0xc12   : > { %v20607_v37 = vpop.permute.xlu0 %9879 }
 0xc14   : > { %v9596_v39 = vpop.permute.xlu1 %9595 }
 0xc15   : > { %v9661_v32 = vmul.f32 %v9596_v39, %v9070_v3 }
 0xc16   : > { %v9598_v7 = vpop.permute.xlu2 %9597 }
 0xc17   : > { %9755 = vrot.lane.b32.xlu0 %v9661_v32, %s13746_s9  ;;  %v9662_v33 = vmul.f32 %v9598_v7, %v9085_v1 }
 0xc19   : > { %9757 = vrot.lane.b32.xlu1 %v9662_v33, %s13746_s9 }
 0xc1a   : > { %v9594_v18 = vpop.permute.xlu0 %9593 }
 0xc1b   : > { %v9660_v11 = vmul.f32 %v9594_v18, %v9055_v59 }
 0xc1c   : > { %v9728_v61 = vpop.permute.xlu1 %9727 }
 0xc1d   : > { %v9936_v41 = vsel %vm9919_vm10, %v9728_v61, %v20350_v22  ;;  %9753 = vrot.lane.b32.xlu2 %v9660_v11, %s13746_s9 }
 0xc1e   : > { %9968 = vst [vmem:[%s20282_s16 + $0x80] sm:$0xff] %v9936_v41  ;;  %v9730_v38 = vpop.permute.xlu2 %9729 }
 0xc1f   : > { %9885 = vrot.lane.b32.xlu0 %v20372_v8, %s13746_s9  ;;  %v9937_v35 = vsel %vm9919_vm10, %v9730_v38, %v20374_v36 }
 0xc20   : > { %9969 = vst [vmem:[%s20282_s16 + $0x88] sm:$0xff] %v9937_v35 }
 0xc21   : > { %9881 = vrot.lane.b32.xlu1 %v20275_v43, %s13746_s9 }
 0xc22   : > { %v9726_v19 = vpop.permute.xlu0 %9725 }
 0xc23   : > { %v9935_v22 = vsel %vm9919_vm10, %v9726_v19, %v20174_v4 }
 0xc24   : > { %v9734_v20 = vpop.permute.xlu1 %9733  ;;  %9967 = vst [vmem:[%s20282_s16 + $0x78] sm:$0xff] %v9935_v22 }
 0xc25   : > { %v9939_v8 = vsel %vm9919_vm10, %v9734_v20, %v20438_v63  ;;  %9883 = vrot.lane.b32.xlu2 %v20244_v5, %s13746_s9 }
 0xc26   : > { %9971 = vst [vmem:[%s20282_s16 + $0x98] sm:$0xff] %v9939_v8 }
 0xc2f   : > { %v9736_v36 = vpop.permute.xlu2 %9735 }
 0xc30   : > { %v9940_v43 = vsel %vm9919_vm10, %v9736_v36, %v20442_v30 }
 0xc31   : > { %v9732_v0 = vpop.permute.xlu0 %9731  ;;  %9972 = vst [vmem:[%s20282_s16 + $0xa0] sm:$0xff] %v9940_v43 }
 0xc32   : > { %v9938_v4 = vsel %vm9919_vm10, %v9732_v0, %v20326_v50 }
 0xc33   : > { %9970 = vst [vmem:[%s20282_s16 + $0x90] sm:$0xff] %v9938_v4 }
 0xc3b   : > { %v9740_v52 = vpop.permute.xlu1 %9739 }
 0xc3c   : > { %v9942_v63 = vsel %vm9919_vm10, %v9740_v52, %v20500_v49 }
 0xc3d   : > { %9974 = vst [vmem:[%s20282_s16 + $0xb0] sm:$0xff] %v9942_v63 }
 0xc47   : > { %v9742_v2 = vpop.permute.xlu2 %9741 }
 0xc48   : > { %v9943_v5 = vsel %vm9919_vm10, %v9742_v2, %v20504_v26 }
 0xc49   : > { %v9738_v30 = vpop.permute.xlu0 %9737  ;;  %9975 = vst [vmem:[%s20282_s16 + $0xb8] sm:$0xff] %v9943_v5 }
 0xc4a   : > { %v9941_v60 = vsel %vm9919_vm10, %v9738_v30, %v20410_v29 }
 0xc4b   : > { %9973 = vst [vmem:[%s20282_s16 + $0xa8] sm:$0xff] %v9941_v60 }
 0xc53   : > { %v9746_v50 = vpop.permute.xlu1 %9745 }
 0xc54   : > { %v9945_v16 = vsel %vm9919_vm10, %v9746_v50, %v20570_v28 }
 0xc55   : > { %9977 = vst [vmem:[%s20282_s16 + $0xc8] sm:$0xff] %v9945_v16 }
 0xc5f   : > { %v9748_v49 = vpop.permute.xlu2 %9747 }
 0xc60   : > { %v9946_v40 = vsel %vm9919_vm10, %v9748_v49, %v20572_v44 }
 0xc61   : > { %v9744_v23 = vpop.permute.xlu0 %9743  ;;  %9978 = vst [vmem:[%s20282_s16 + $0xd0] sm:$0xff] %v9946_v40 }
 0xc62   : > { %v9944_v26 = vsel %vm9919_vm10, %v9744_v23, %v20474_v62 }
 0xc63   : > { %9976 = vst [vmem:[%s20282_s16 + $0xc0] sm:$0xff] %v9944_v26 }
 0xc6b   : > { %v9752_v29 = vpop.permute.xlu1 %9751 }
 0xc6c   : > { %v9948_v24 = vsel %vm9919_vm10, %v9752_v29, %v20607_v37 }
 0xc6d   : > { %9980 = vst [vmem:[%s20282_s16 + $0xe0] sm:$0xff] %v9948_v24 }
 0xc77   : > { %v9754_v31 = vpop.permute.xlu2 %9753 }
 0xc79   : > { %v9750_v28 = vpop.permute.xlu0 %9749 }
 0xc7a   : > { %v9947_v58 = vsel %vm9919_vm10, %v9750_v28, %v20541_v34 }
 0xc7b   : > { %9979 = vst [vmem:[%s20282_s16 + $0xd8] sm:$0xff] %v9947_v58 }
 0xc7f   : > { %v9884_v44 = vpop.permute.xlu2 %9883 }
 0xc89   : > { %v9756_v42 = vpop.permute.xlu0 %9755 }
 0xc8a   : > { %v9950_v53 = vsel %vm9919_vm10, %v9756_v42, %v9884_v44 }
 0xc8b   : > { %9982 = vst [vmem:[%s20282_s16 + $0xf0] sm:$0xff] %v9950_v53  ;;  %v9758_v62 = vpop.permute.xlu1 %9757 }
 0xc91   : > { %v9886_v47 = vpop.permute.xlu0 %9885 }
 0xc92   : > { %v9951_v10 = vsel %vm9919_vm10, %v9758_v62, %v9886_v47 }
 0xc93   : > { %9983 = vst [vmem:[%s20282_s16 + $0xf8] sm:$0xff] %v9951_v10  ;;  %v9882_v55 = vpop.permute.xlu1 %9881 }
 0xc94   : > { %v9949_v48 = vsel %vm9919_vm10, %v9754_v31, %v9882_v55 }
 0xc95   : > { %9981 = vst [vmem:[%s20282_s16 + $0xe8] sm:$0xff] %v9949_v48 }
 0xc96 PF: > { %s16_s21 = sadd.s32 1, %s13744_s21  }
 0xc97   : > { %p13_p4 = scmp.ge.s32.totalorder %s16_s21, 4  }
 0xc99   :  { %15 = sbr.rel (!%p13_p4) target bundleno = 1 (0x1), region = 80 }

</bundles_post_ra>
